<compile_context>
chip_gen: v6e
topology: v6e:2x2x1
jax: 0.10.0
libtpu: 0.0.40
codegen_flags: <defaults>
</compile_context>

<pallas_src>
import math

import jax
import jax.numpy as jnp
from jax.experimental import pallas as pl
from jax.experimental.pallas import tpu as pltpu

_BN_EPS = 1e-5
_VMEM = pl.BlockSpec(memory_space=pltpu.MemorySpace.VMEM)
_ANY = pl.BlockSpec(memory_space=pl.ANY)
_POOL_TAPS = 9          # 3x3 maxpool window

_MAT_ORDER = ('conv1', 'pool', 'l1c1', 'l1c2', 'l2c1', 'l2c2', 'l2dn',
              'head', 'deconv', 'clsup')
_BIAS_ORDER = ('conv1', 'l1c1', 'l1c2', 'l2c1', 'l2c2', 'l2dn',
               'head', 'deconv', 'clsup')
_N_VMEM_MATS = 2        # conv1 + pool stay auto-DMA'd into VMEM; rest are hidden


def _round_up(n, mult=128):
    return -(-n // mult) * mult


# ---------------------------------------------------------------------------
# The fused Pallas kernel: the whole network in one launch.
# ---------------------------------------------------------------------------
def _fused_forward_kernel(
        x_ref,
        m_conv1, m_pool,
        h_l1c1, h_l1c2, h_l2c1, h_l2c2, h_l2dn, h_head, h_dec, h_clsup,
        b_conv1, b_l1c1, b_l1c2, b_l2c1, b_l2c2, b_l2dn,
        b_head, b_dec, b_clsup,
        o_ref,
        v_l1c1, v_l1c2, v_l2c1, v_l2c2, v_l2dn, v_head, v_dec, v_clsup,
        dma_sem):
    """Whole-network forward: X (N, H*W*Cin) bf16 -> logits (N, H*W*nc) f32."""

    # Kick off the weight DMAs for all later layers right away so they overlap
    # the conv1 + pool matmul chain; wait just before each first use.
    hbm_srcs = (h_l1c1, h_l1c2, h_l2c1, h_l2c2, h_l2dn, h_head, h_dec, h_clsup)
    vmem_dsts = (v_l1c1, v_l1c2, v_l2c1, v_l2c2, v_l2dn, v_head, v_dec, v_clsup)
    copies = []
    for i, (src, dst) in enumerate(zip(hbm_srcs, vmem_dsts)):
        cp = pltpu.make_async_copy(src, dst, dma_sem.at[i])
        cp.start()
        copies.append(cp)

    def mm(a, m):
        # bf16 operands on the MXU, f32 accumulation.
        return jnp.dot(a.astype(jnp.bfloat16), m,
                       preferred_element_type=jnp.float32)

    x = x_ref[...]                                     # already bf16
    # conv1 (7x7 s2 p3) + bn1 + relu
    a = jnp.maximum(mm(x, m_conv1[...]) + b_conv1[...], 0.0)
    # maxpool(3, s2, p1, ceil_mode=True): the 9 window taps are concatenated
    # into ONE lane-padded operator -> a single matmul, then 8 lane-aligned
    # 256-wide VPU maxima.  Missing / padded taps contribute 0, which is exact
    # because `a` is post-ReLU (>= 0).  Pool indices (return_indices=True) are
    # unused by this forward path and not built.
    p = mm(a, m_pool[...])                             # (N, taps * tap_w)
    tap_w = m_pool.shape[1] // _POOL_TAPS
    pooled = p[:, 0:tap_w]
    for t in range(1, _POOL_TAPS):
        pooled = jnp.maximum(pooled, p[:, t * tap_w:(t + 1) * tap_w])

    # layer1: BasicBlock(8 -> 8, stride 1, identity shortcut)
    copies[0].wait()
    copies[1].wait()
    y = jnp.maximum(mm(pooled, v_l1c1[...]) + b_l1c1[...], 0.0)
    y = mm(y, v_l1c2[...]) + b_l1c2[...]
    r1 = jnp.maximum(y + pooled, 0.0)                  # fused residual + relu

    # layer2: BasicBlock(8 -> 16, stride 2, 1x1-conv shortcut)
    copies[2].wait()
    copies[3].wait()
    copies[4].wait()
    y = jnp.maximum(mm(r1, v_l2c1[...]) + b_l2c1[...], 0.0)
    y = mm(y, v_l2c2[...]) + b_l2c2[...]
    sc = mm(r1, v_l2dn[...]) + b_l2dn[...]
    r2 = jnp.maximum(y + sc, 0.0)                      # fused residual + relu

    # head: 1x1 conv (+bias) + BN + ReLU
    copies[5].wait()
    y = jnp.maximum(mm(r2, v_head[...]) + b_head[...], 0.0)
    # deconv1: ConvTranspose2d(3x3, s2, p1, op1) (+bias) + BN + ReLU
    copies[6].wait()
    y = jnp.maximum(mm(y, v_dec[...]) + b_dec[...], 0.0)
    # classifier ConvTranspose2d + bilinear upsample (pre-folded linear map);
    # lane-dense (N, 256) store.
    copies[7].wait()
    o_ref[...] = (mm(y, v_clsup[...]) + b_clsup[...]).astype(o_ref.dtype)


def resnet_deconv_shallow_forward(packed, x_nchw):
    """packed: output of pack_params().  x_nchw: (N, C, H, W) float32."""
    n, c, h, w = x_nchw.shape
    x_flat = jnp.transpose(x_nchw, (0, 2, 3, 1)).reshape(n, h * w * c)
    x_flat = x_flat.astype(jnp.bfloat16)               # cast once, half the DMA
    mats = [packed['mats'][k] for k in _MAT_ORDER]
    biases = [packed['bias'][k] for k in _BIAS_ORDER]
    hbm_mats = mats[_N_VMEM_MATS:]
    d_out = mats[-1].shape[1]
    num_classes = d_out // (h * w)

    in_specs = ([_VMEM] * (1 + _N_VMEM_MATS)
                + [_ANY] * len(hbm_mats)
                + [_VMEM] * len(biases))
    scratch_shapes = ([pltpu.VMEM(m.shape, m.dtype) for m in hbm_mats]
                      + [pltpu.SemaphoreType.DMA((len(hbm_mats),))])

    out_flat = pl.pallas_call(
        _fused_forward_kernel,
        out_shape=jax.ShapeDtypeStruct((n, d_out), jnp.float32),
        in_specs=in_specs,
        out_specs=_VMEM,
        scratch_shapes=scratch_shapes,
    )(x_flat, *mats, *biases)
    out = out_flat.reshape(n, h, w, num_classes)
    return jnp.transpose(out, (0, 3, 1, 2))            # -> NCHW


# ---------------------------------------------------------------------------
# Host-side (one-time) lowering of each layer to a dense linear operator over
# flattened (h, w, c) activations.  These run eagerly at parameter-packing
# time, never per forward call and never inside the kernel.
# ---------------------------------------------------------------------------
def _spatial_sel(k, n_in, n_out, stride, pad, transpose):
    """(k, n_in, n_out) 0/1 tap-selection tensor for one spatial axis."""
    ki = jnp.arange(k)[:, None, None]
    ii = jnp.arange(n_in)[None, :, None]
    oo = jnp.arange(n_out)[None, None, :]
    if transpose:            # ConvTranspose: out = in*stride + tap - pad
        hit = oo == ii * stride + ki - pad
    else:                    # Conv: in = out*stride + tap - pad
        hit = ii == oo * stride + ki - pad
    return hit.astype(jnp.float32)


def conv_as_matrix(w_hwio, h, w, stride, pad, *, transpose=False,
                   output_padding=0):
    """Lower Conv2d / ConvTranspose2d to a dense (h*w*cin, oh*ow*cout) map.

    w_hwio is (kh, kw, cin, cout); for ConvTranspose this is the PyTorch
    (cin, cout, kh, kw) weight permuted to (2, 3, 0, 1) -- no spatial flip.
    Flattening order is (h, w, c) on both sides; out-of-range taps select
    nothing, which reproduces zero padding (and output_padding rows/cols).
    """
    kh, kw, cin, cout = w_hwio.shape
    if transpose:
        oh = (h - 1) * stride - 2 * pad + kh + output_padding
        ow = (w - 1) * stride - 2 * pad + kw + output_padding
    else:
        oh = (h + 2 * pad - kh) // stride + 1
        ow = (w + 2 * pad - kw) // stride + 1
    sh = _spatial_sel(kh, h, oh, stride, pad, transpose)
    sw = _spatial_sel(kw, w, ow, stride, pad, transpose)
    m = jnp.einsum('aio,bjp,abcd->ijcopd', sh, sw, w_hwio.astype(jnp.float32))
    return m.reshape(h * w * cin, oh * ow * cout), (oh, ow)


def maxpool_as_matrices(h, w, c, k, stride, pad):
    """nn.MaxPool2d(k, stride, pad, ceil_mode=True) as k*k 0/1 tap selectors."""
    def out_size(sz):
        o = -(-(sz + 2 * pad - k) // stride) + 1       # ceil division
        if (o - 1) * stride >= sz + pad:               # PyTorch ceil_mode rule
            o -= 1
        return o

    oh, ow = out_size(h), out_size(w)
    sh = _spatial_sel(k, h, oh, stride, pad, False)
    sw = _spatial_sel(k, w, ow, stride, pad, False)
    eye = jnp.eye(c, dtype=jnp.float32)
    m = jnp.einsum('aio,bjp,ce->abijcope', sh, sw, eye)
    return m.reshape(k * k, h * w * c, oh * ow * c), (oh, ow)


def _bilinear_matrix(in_size, out_size):
    # align_corners=False semantics (the modern F.upsample/F.interpolate
    # default).  Very old PyTorch (<0.4) F.upsample behaved like
    # align_corners=True; flip the source-coordinate formula if that exact
    # reference is required.
    o = jnp.arange(out_size, dtype=jnp.float32)
    src = jnp.clip((o + 0.5) * (in_size / out_size) - 0.5, 0.0, in_size - 1.0)
    i0 = jnp.floor(src).astype(jnp.int32)
    i1 = jnp.minimum(i0 + 1, in_size - 1)
    w1 = src - i0.astype(jnp.float32)
    m = jnp.zeros((out_size, in_size), jnp.float32)
    m = m.at[jnp.arange(out_size), i0].add(1.0 - w1)
    m = m.at[jnp.arange(out_size), i1].add(w1)
    return m


def bilinear_as_matrix(h, w, c, out_h, out_w):
    mh = _bilinear_matrix(h, out_h)                    # (out_h, h)
    mw = _bilinear_matrix(w, out_w)                    # (out_w, w)
    eye = jnp.eye(c, dtype=jnp.float32)
    m = jnp.einsum('oi,pj,ce->ijcope', mh, mw, eye)
    return m.reshape(h * w * c, out_h * out_w * c)


def pack_params(params, in_shape):
    """One-time weight preprocessing: build the fused kernel's operands.

    Every operator is zero-padded so its output width (and the next layer's
    contraction dim) is a multiple of 128 lanes; padded bias entries and
    padded K rows are zero, so the padded lanes stay exactly zero through the
    ReLU / max / residual epilogues.
    """
    c_in, hh, ww = in_shape
    p = params
    bf16 = jnp.bfloat16
    mats, bias = {}, {}

    def bn_fold_pad(m, scale_c, bias_c, hw, k_pad, n_pad):
        rep = hw[0] * hw[1]
        m = m * jnp.tile(scale_c, rep)[None, :]
        b = jnp.tile(bias_c, rep)
        m = jnp.pad(m, ((0, k_pad - m.shape[0]), (0, n_pad - m.shape[1])))
        b = jnp.pad(b, (0, n_pad - b.shape[0]))
        return m.astype(bf16), b.reshape(1, -1).astype(jnp.float32)

    # --- base ResNet ---
    k_in = hh * ww * c_in
    m, hw = conv_as_matrix(p['conv1_w'], hh, ww, 2, 3)
    c1_pad = _round_up(m.shape[1])
    mats['conv1'], bias['conv1'] = bn_fold_pad(m, p['bn1_s'], p['bn1_b'],
                                               hw, k_in, c1_pad)
    c = p['conv1_w'].shape[-1]

    # maxpool: lane-pad every tap to 128-multiple and concatenate along N so
    # the kernel does a single matmul followed by lane-aligned VPU maxima.
    mp, hw = maxpool_as_matrices(hw[0], hw[1], c, 3, 2, 1)
    assert mp.shape[0] == _POOL_TAPS
    tap_pad = _round_up(mp.shape[2])
    mp = jnp.pad(mp, ((0, 0), (0, c1_pad - mp.shape[1]), (0, tap_pad - mp.shape[2])))
    mats['pool'] = jnp.transpose(mp, (1, 0, 2)).reshape(c1_pad, -1).astype(bf16)
    pool_pad = tap_pad

    l1 = p['layer1_0']
    m, hw = conv_as_matrix(l1['conv1_w'], hw[0], hw[1], 1, 1)
    n_pad = _round_up(m.shape[1])
    mats['l1c1'], bias['l1c1'] = bn_fold_pad(m, l1['bn1_s'], l1['bn1_b'],
                                             hw, pool_pad, n_pad)
    prev_pad = n_pad
    m, hw = conv_as_matrix(l1['conv2_w'], hw[0], hw[1], 1, 1)
    n_pad = _round_up(m.shape[1])
    mats['l1c2'], bias['l1c2'] = bn_fold_pad(m, l1['bn2_s'], l1['bn2_b'],
                                             hw, prev_pad, n_pad)
    assert n_pad == pool_pad            # identity residual add stays aligned
    r1_pad = n_pad

    l2 = p['layer2_0']
    m, hw1 = conv_as_matrix(l2['conv1_w'], hw[0], hw[1], 2, 1)
    n_pad1 = _round_up(m.shape[1])
    mats['l2c1'], bias['l2c1'] = bn_fold_pad(m, l2['bn1_s'], l2['bn1_b'],
                                             hw1, r1_pad, n_pad1)
    m, hw2 = conv_as_matrix(l2['conv2_w'], hw1[0], hw1[1], 1, 1)
    n_pad2 = _round_up(m.shape[1])
    mats['l2c2'], bias['l2c2'] = bn_fold_pad(m, l2['bn2_s'], l2['bn2_b'],
                                             hw2, n_pad1, n_pad2)
    m, hwd = conv_as_matrix(l2['down_w'], hw[0], hw[1], 2, 0)
    assert hwd == hw2
    mats['l2dn'], bias['l2dn'] = bn_fold_pad(m, l2['down_s'], l2['down_b'],
                                             hwd, r1_pad, n_pad2)
    hw = hw2
    prev_pad = n_pad2

    # --- deconv-shallow head ---
    m, hw = conv_as_matrix(p['head_w'], hw[0], hw[1], 1, 0)
    n_pad = _round_up(m.shape[1])
    mats['head'], bias['head'] = bn_fold_pad(m, p['head_s'], p['head_b'],
                                             hw, prev_pad, n_pad)
    prev_pad = n_pad

    m, hw = conv_as_matrix(p['deconv_w'], hw[0], hw[1], 2, 1,
                           transpose=True, output_padding=1)
    n_pad = _round_up(m.shape[1])
    mats['deconv'], bias['deconv'] = bn_fold_pad(m, p['deconv_s'], p['deconv_b'],
                                                 hw, prev_pad, n_pad)
    prev_pad = n_pad

    mc, hwc = conv_as_matrix(p['cls_w'], hw[0], hw[1], 2, 1,
                             transpose=True, output_padding=1)
    bc = jnp.tile(p['cls_b'], hwc[0] * hwc[1])
    mu = bilinear_as_matrix(hwc[0], hwc[1], p['cls_w'].shape[-1], hh, ww)
    m_cls = jnp.dot(mc, mu)                            # classifier + upsample
    b_cls = jnp.dot(bc[None, :], mu)
    m_cls = jnp.pad(m_cls, ((0, prev_pad - m_cls.shape[0]), (0, 0)))
    mats['clsup'] = m_cls.astype(bf16)                 # (*, H*W*nc) lane-dense
    bias['clsup'] = b_cls.astype(jnp.float32)
    return {'mats': mats, 'bias': bias}


# ---------------------------------------------------------------------------
# Deterministic parameter construction (synthetic weights, no checkpoint)
# ---------------------------------------------------------------------------
def init_params(key, c_in=4, inplanes=8, planes1=8, planes2=16, num_classes=1):
    keys = iter(jax.random.split(key, 20))
    bn_scale = 1.0 / math.sqrt(1.0 + _BN_EPS)   # gamma=1, var=1, mean=0, beta=0

    def resnet_conv(kh, kw, cin, cout):
        # matches the ResNet __init__ conv init: N(0, sqrt(2/(kh*kw*cout))), HWIO
        std = math.sqrt(2.0 / (kh * kw * cout))
        return std * jax.random.normal(next(keys), (kh, kw, cin, cout), jnp.float32)

    def head_conv(kh, kw, cin, cout):
        # deterministic stand-in for PyTorch's default Conv/ConvTranspose init
        std = 1.0 / math.sqrt(kh * kw * cin)
        w_ = std * jax.random.normal(next(keys), (kh, kw, cin, cout), jnp.float32)
        b_ = std * jax.random.normal(next(keys), (cout,), jnp.float32)
        return w_, b_

    def bn(cout, conv_bias=None):
        s = jnp.full((cout,), bn_scale, jnp.float32)
        b = jnp.zeros((cout,), jnp.float32) if conv_bias is None else conv_bias * bn_scale
        return s, b

    params = {'conv1_w': resnet_conv(7, 7, c_in, inplanes)}
    params['bn1_s'], params['bn1_b'] = bn(inplanes)

    l1 = {'conv1_w': resnet_conv(3, 3, inplanes, planes1),
          'conv2_w': resnet_conv(3, 3, planes1, planes1)}
    l1['bn1_s'], l1['bn1_b'] = bn(planes1)
    l1['bn2_s'], l1['bn2_b'] = bn(planes1)
    params['layer1_0'] = l1

    l2 = {'conv1_w': resnet_conv(3, 3, planes1, planes2),
          'conv2_w': resnet_conv(3, 3, planes2, planes2),
          'down_w': resnet_conv(1, 1, planes1, planes2)}
    l2['bn1_s'], l2['bn1_b'] = bn(planes2)
    l2['bn2_s'], l2['bn2_b'] = bn(planes2)
    l2['down_s'], l2['down_b'] = bn(planes2)
    params['layer2_0'] = l2

    nb = planes2                                # out_channels of last base conv
    hw_, hb_ = head_conv(1, 1, nb, 2 * nb)
    params['head_w'] = hw_
    params['head_s'], params['head_b'] = bn(2 * nb, conv_bias=hb_)

    # ConvTranspose weights kept in (kh, kw, cin, cout) layout, i.e. the torch
    # (cin, cout, kh, kw) weight permuted to (2, 3, 0, 1) -- no spatial flip.
    dw_, db_ = head_conv(3, 3, 2 * nb, nb)
    params['deconv_w'] = dw_
    params['deconv_s'], params['deconv_b'] = bn(nb, conv_bias=db_)

    cw_, cb_ = head_conv(3, 3, nb, num_classes)
    params['cls_w'] = cw_
    params['cls_b'] = cb_                       # classifier has a bias, no BN
    return params


# ---------------------------------------------------------------------------
# Plain-XLA reference of the same math (validation of the Pallas lowering).
# TODO(synk): also validate the packed-operator formulation once against a
# true f32 / PyTorch ResNetDeconvShallow reference (bf16 rounding of the
# dense operators differs slightly from the direct convolutions).
# ---------------------------------------------------------------------------
def _reference_forward(packed, x_nchw):
    n, c, h, w = x_nchw.shape
    x = jnp.transpose(x_nchw, (0, 2, 3, 1)).reshape(n, h * w * c).astype(jnp.bfloat16)
    m, b = packed['mats'], packed['bias']

    def mm(a, w_):
        return jnp.dot(a.astype(jnp.bfloat16), w_, preferred_element_type=jnp.float32)

    a = jnp.maximum(mm(x, m['conv1']) + b['conv1'], 0.0)
    pp = mm(a, m['pool'])
    tap_w = m['pool'].shape[1] // _POOL_TAPS
    pooled = pp[:, :tap_w]
    for t in range(1, _POOL_TAPS):
        pooled = jnp.maximum(pooled, pp[:, t * tap_w:(t + 1) * tap_w])
    y = jnp.maximum(mm(pooled, m['l1c1']) + b['l1c1'], 0.0)
    y = mm(y, m['l1c2']) + b['l1c2']
    r1 = jnp.maximum(y + pooled, 0.0)
    y = jnp.maximum(mm(r1, m['l2c1']) + b['l2c1'], 0.0)
    y = mm(y, m['l2c2']) + b['l2c2']
    r2 = jnp.maximum(y + mm(r1, m['l2dn']) + b['l2dn'], 0.0)
    y = jnp.maximum(mm(r2, m['head']) + b['head'], 0.0)
    y = jnp.maximum(mm(y, m['deconv']) + b['deconv'], 0.0)
    out = mm(y, m['clsup']) + b['clsup']
    nc = m['clsup'].shape[1] // (h * w)
    return jnp.transpose(out.reshape(n, h, w, nc), (0, 3, 1, 2))


if __name__ == "__main__":
    key = jax.random.PRNGKey(0)
    pkey, xkey = jax.random.split(key)
    params = init_params(pkey)
    packed = pack_params(params, in_shape=(4, 16, 16))   # one-time weight prep
    x = jax.random.normal(xkey, (2, 4, 16, 16), jnp.float32)   # NCHW input

    fwd = jax.jit(resnet_deconv_shallow_forward)
    out = jax.block_until_ready(fwd(packed, x))

    assert out.shape == (2, 1, 16, 16), out.shape
    assert bool(jnp.all(jnp.isfinite(out)))
    ref = _reference_forward(packed, x)
    assert bool(jnp.allclose(out, ref, rtol=1e-2, atol=1e-2)), \
        float(jnp.max(jnp.abs(out - ref)))
    print("KERNEL_OK")
</pallas_src>

<mosaic_0001>
module attributes {stable_mosaic.version = 11 : i64} {
  func.func @_fused_forward_kernel(%arg0: memref<2x1024xbf16, #tpu.memory_space<vmem>>, %arg1: memref<1024x512xbf16, #tpu.memory_space<vmem>>, %arg2: memref<512x2304xbf16, #tpu.memory_space<vmem>>, %arg3: memref<256x256xbf16, #tpu.memory_space<any>>, %arg4: memref<256x256xbf16, #tpu.memory_space<any>>, %arg5: memref<256x256xbf16, #tpu.memory_space<any>>, %arg6: memref<256x256xbf16, #tpu.memory_space<any>>, %arg7: memref<256x256xbf16, #tpu.memory_space<any>>, %arg8: memref<256x384xbf16, #tpu.memory_space<any>>, %arg9: memref<384x640xbf16, #tpu.memory_space<any>>, %arg10: memref<640x256xbf16, #tpu.memory_space<any>>, %arg11: memref<1x512xf32, #tpu.memory_space<vmem>>, %arg12: memref<1x256xf32, #tpu.memory_space<vmem>>, %arg13: memref<1x256xf32, #tpu.memory_space<vmem>>, %arg14: memref<1x256xf32, #tpu.memory_space<vmem>>, %arg15: memref<1x256xf32, #tpu.memory_space<vmem>>, %arg16: memref<1x256xf32, #tpu.memory_space<vmem>>, %arg17: memref<1x384xf32, #tpu.memory_space<vmem>>, %arg18: memref<1x640xf32, #tpu.memory_space<vmem>>, %arg19: memref<1x256xf32, #tpu.memory_space<vmem>>, %arg20: memref<2x256xf32, #tpu.memory_space<vmem>>, %arg21: memref<256x256xbf16, #tpu.memory_space<vmem>>, %arg22: memref<256x256xbf16, #tpu.memory_space<vmem>>, %arg23: memref<256x256xbf16, #tpu.memory_space<vmem>>, %arg24: memref<256x256xbf16, #tpu.memory_space<vmem>>, %arg25: memref<256x256xbf16, #tpu.memory_space<vmem>>, %arg26: memref<256x384xbf16, #tpu.memory_space<vmem>>, %arg27: memref<384x640xbf16, #tpu.memory_space<vmem>>, %arg28: memref<640x256xbf16, #tpu.memory_space<vmem>>, %arg29: memref<8x!tpu.dma_semaphore, #tpu.memory_space<semaphore_mem>>) attributes {dimension_semantics = [], scalar_prefetch = 0 : i64, scratch_operands = 9 : i64, tpu.core_type = #tpu.core_type<tc>} {
    %c0_i32 = arith.constant 0 : i32
    %0 = tpu.memref_slice %arg29[%c0_i32] : memref<8x!tpu.dma_semaphore, #tpu.memory_space<semaphore_mem>> -> memref<1x!tpu.dma_semaphore, #tpu.memory_space<semaphore_mem>>
    %1 = tpu.memref_squeeze %0 : memref<1x!tpu.dma_semaphore, #tpu.memory_space<semaphore_mem>> -> memref<!tpu.dma_semaphore, #tpu.memory_space<semaphore_mem>>
    tpu.enqueue_dma source(%arg3 : memref<256x256xbf16, #tpu.memory_space<any>>) target(%arg21 : memref<256x256xbf16, #tpu.memory_space<vmem>>) target_semaphore(%1 : memref<!tpu.dma_semaphore, #tpu.memory_space<semaphore_mem>>)
    %c1_i32 = arith.constant 1 : i32
    %2 = tpu.memref_slice %arg29[%c1_i32] : memref<8x!tpu.dma_semaphore, #tpu.memory_space<semaphore_mem>> -> memref<1x!tpu.dma_semaphore, #tpu.memory_space<semaphore_mem>>
    %3 = tpu.memref_squeeze %2 : memref<1x!tpu.dma_semaphore, #tpu.memory_space<semaphore_mem>> -> memref<!tpu.dma_semaphore, #tpu.memory_space<semaphore_mem>>
    tpu.enqueue_dma source(%arg4 : memref<256x256xbf16, #tpu.memory_space<any>>) target(%arg22 : memref<256x256xbf16, #tpu.memory_space<vmem>>) target_semaphore(%3 : memref<!tpu.dma_semaphore, #tpu.memory_space<semaphore_mem>>)
    %c2_i32 = arith.constant 2 : i32
    %4 = tpu.memref_slice %arg29[%c2_i32] : memref<8x!tpu.dma_semaphore, #tpu.memory_space<semaphore_mem>> -> memref<1x!tpu.dma_semaphore, #tpu.memory_space<semaphore_mem>>
    %5 = tpu.memref_squeeze %4 : memref<1x!tpu.dma_semaphore, #tpu.memory_space<semaphore_mem>> -> memref<!tpu.dma_semaphore, #tpu.memory_space<semaphore_mem>>
    tpu.enqueue_dma source(%arg5 : memref<256x256xbf16, #tpu.memory_space<any>>) target(%arg23 : memref<256x256xbf16, #tpu.memory_space<vmem>>) target_semaphore(%5 : memref<!tpu.dma_semaphore, #tpu.memory_space<semaphore_mem>>)
    %c3_i32 = arith.constant 3 : i32
    %6 = tpu.memref_slice %arg29[%c3_i32] : memref<8x!tpu.dma_semaphore, #tpu.memory_space<semaphore_mem>> -> memref<1x!tpu.dma_semaphore, #tpu.memory_space<semaphore_mem>>
    %7 = tpu.memref_squeeze %6 : memref<1x!tpu.dma_semaphore, #tpu.memory_space<semaphore_mem>> -> memref<!tpu.dma_semaphore, #tpu.memory_space<semaphore_mem>>
    tpu.enqueue_dma source(%arg6 : memref<256x256xbf16, #tpu.memory_space<any>>) target(%arg24 : memref<256x256xbf16, #tpu.memory_space<vmem>>) target_semaphore(%7 : memref<!tpu.dma_semaphore, #tpu.memory_space<semaphore_mem>>)
    %c4_i32 = arith.constant 4 : i32
    %8 = tpu.memref_slice %arg29[%c4_i32] : memref<8x!tpu.dma_semaphore, #tpu.memory_space<semaphore_mem>> -> memref<1x!tpu.dma_semaphore, #tpu.memory_space<semaphore_mem>>
    %9 = tpu.memref_squeeze %8 : memref<1x!tpu.dma_semaphore, #tpu.memory_space<semaphore_mem>> -> memref<!tpu.dma_semaphore, #tpu.memory_space<semaphore_mem>>
    tpu.enqueue_dma source(%arg7 : memref<256x256xbf16, #tpu.memory_space<any>>) target(%arg25 : memref<256x256xbf16, #tpu.memory_space<vmem>>) target_semaphore(%9 : memref<!tpu.dma_semaphore, #tpu.memory_space<semaphore_mem>>)
    %c5_i32 = arith.constant 5 : i32
    %10 = tpu.memref_slice %arg29[%c5_i32] : memref<8x!tpu.dma_semaphore, #tpu.memory_space<semaphore_mem>> -> memref<1x!tpu.dma_semaphore, #tpu.memory_space<semaphore_mem>>
    %11 = tpu.memref_squeeze %10 : memref<1x!tpu.dma_semaphore, #tpu.memory_space<semaphore_mem>> -> memref<!tpu.dma_semaphore, #tpu.memory_space<semaphore_mem>>
    tpu.enqueue_dma source(%arg8 : memref<256x384xbf16, #tpu.memory_space<any>>) target(%arg26 : memref<256x384xbf16, #tpu.memory_space<vmem>>) target_semaphore(%11 : memref<!tpu.dma_semaphore, #tpu.memory_space<semaphore_mem>>)
    %c6_i32 = arith.constant 6 : i32
    %12 = tpu.memref_slice %arg29[%c6_i32] : memref<8x!tpu.dma_semaphore, #tpu.memory_space<semaphore_mem>> -> memref<1x!tpu.dma_semaphore, #tpu.memory_space<semaphore_mem>>
    %13 = tpu.memref_squeeze %12 : memref<1x!tpu.dma_semaphore, #tpu.memory_space<semaphore_mem>> -> memref<!tpu.dma_semaphore, #tpu.memory_space<semaphore_mem>>
    tpu.enqueue_dma source(%arg9 : memref<384x640xbf16, #tpu.memory_space<any>>) target(%arg27 : memref<384x640xbf16, #tpu.memory_space<vmem>>) target_semaphore(%13 : memref<!tpu.dma_semaphore, #tpu.memory_space<semaphore_mem>>)
    %c7_i32 = arith.constant 7 : i32
    %14 = tpu.memref_slice %arg29[%c7_i32] : memref<8x!tpu.dma_semaphore, #tpu.memory_space<semaphore_mem>> -> memref<1x!tpu.dma_semaphore, #tpu.memory_space<semaphore_mem>>
    %15 = tpu.memref_squeeze %14 : memref<1x!tpu.dma_semaphore, #tpu.memory_space<semaphore_mem>> -> memref<!tpu.dma_semaphore, #tpu.memory_space<semaphore_mem>>
    tpu.enqueue_dma source(%arg10 : memref<640x256xbf16, #tpu.memory_space<any>>) target(%arg28 : memref<640x256xbf16, #tpu.memory_space<vmem>>) target_semaphore(%15 : memref<!tpu.dma_semaphore, #tpu.memory_space<semaphore_mem>>)
    %c0 = arith.constant 0 : index
    %c0_0 = arith.constant 0 : index
    %16 = vector.load %arg0[%c0, %c0_0] : memref<2x1024xbf16, #tpu.memory_space<vmem>>, vector<2x1024xbf16>
    %c0_1 = arith.constant 0 : index
    %c0_2 = arith.constant 0 : index
    %17 = vector.load %arg1[%c0_1, %c0_2] : memref<1024x512xbf16, #tpu.memory_space<vmem>>, vector<1024x512xbf16>
    %cst = arith.constant dense<0.000000e+00> : vector<2x512xf32>
    %18 = tpu.matmul %16, %17, %cst {dimension_numbers = #tpu.dot_dimension_numbers<[1], [0], [0], [1], [0, 0, 1, 1], [], []>} : vector<2x1024xbf16>, vector<1024x512xbf16>, vector<2x512xf32> -> vector<2x512xf32>
    %c0_3 = arith.constant 0 : index
    %c0_4 = arith.constant 0 : index
    %19 = vector.load %arg11[%c0_3, %c0_4] : memref<1x512xf32, #tpu.memory_space<vmem>>, vector<1x512xf32>
    %20 = vector.broadcast %19 : vector<1x512xf32> to vector<2x512xf32>
    %21 = arith.addf %18, %20 : vector<2x512xf32>
    %cst_5 = arith.constant 0.000000e+00 : f32
    %22 = vector.broadcast %cst_5 : f32 to vector<2x512xf32>
    %23 = arith.maximumf %21, %22 : vector<2x512xf32>
    %c0_6 = arith.constant 0 : index
    %c0_7 = arith.constant 0 : index
    %24 = vector.load %arg2[%c0_6, %c0_7] : memref<512x2304xbf16, #tpu.memory_space<vmem>>, vector<512x2304xbf16>
    %25 = arith.truncf %23 : vector<2x512xf32> to vector<2x512xbf16>
    %cst_8 = arith.constant dense<0.000000e+00> : vector<2x2304xf32>
    %26 = tpu.matmul %25, %24, %cst_8 {dimension_numbers = #tpu.dot_dimension_numbers<[1], [0], [0], [1], [0, 0, 1, 1], [], []>} : vector<2x512xbf16>, vector<512x2304xbf16>, vector<2x2304xf32> -> vector<2x2304xf32>
    %27 = vector.extract_strided_slice %26 {offsets = [0, 0], sizes = [2, 256], strides = [1, 1]} : vector<2x2304xf32> to vector<2x256xf32>
    %28 = vector.extract_strided_slice %26 {offsets = [0, 256], sizes = [2, 256], strides = [1, 1]} : vector<2x2304xf32> to vector<2x256xf32>
    %29 = arith.maximumf %27, %28 : vector<2x256xf32>
    %30 = vector.extract_strided_slice %26 {offsets = [0, 512], sizes = [2, 256], strides = [1, 1]} : vector<2x2304xf32> to vector<2x256xf32>
    %31 = arith.maximumf %29, %30 : vector<2x256xf32>
    %32 = vector.extract_strided_slice %26 {offsets = [0, 768], sizes = [2, 256], strides = [1, 1]} : vector<2x2304xf32> to vector<2x256xf32>
    %33 = arith.maximumf %31, %32 : vector<2x256xf32>
    %34 = vector.extract_strided_slice %26 {offsets = [0, 1024], sizes = [2, 256], strides = [1, 1]} : vector<2x2304xf32> to vector<2x256xf32>
    %35 = arith.maximumf %33, %34 : vector<2x256xf32>
    %36 = vector.extract_strided_slice %26 {offsets = [0, 1280], sizes = [2, 256], strides = [1, 1]} : vector<2x2304xf32> to vector<2x256xf32>
    %37 = arith.maximumf %35, %36 : vector<2x256xf32>
    %38 = vector.extract_strided_slice %26 {offsets = [0, 1536], sizes = [2, 256], strides = [1, 1]} : vector<2x2304xf32> to vector<2x256xf32>
    %39 = arith.maximumf %37, %38 : vector<2x256xf32>
    %40 = vector.extract_strided_slice %26 {offsets = [0, 1792], sizes = [2, 256], strides = [1, 1]} : vector<2x2304xf32> to vector<2x256xf32>
    %41 = arith.maximumf %39, %40 : vector<2x256xf32>
    %42 = vector.extract_strided_slice %26 {offsets = [0, 2048], sizes = [2, 256], strides = [1, 1]} : vector<2x2304xf32> to vector<2x256xf32>
    %43 = arith.maximumf %41, %42 : vector<2x256xf32>
    %c0_i32_9 = arith.constant 0 : i32
    %44 = tpu.memref_slice %arg29[%c0_i32_9] : memref<8x!tpu.dma_semaphore, #tpu.memory_space<semaphore_mem>> -> memref<1x!tpu.dma_semaphore, #tpu.memory_space<semaphore_mem>>
    %45 = tpu.memref_squeeze %44 : memref<1x!tpu.dma_semaphore, #tpu.memory_space<semaphore_mem>> -> memref<!tpu.dma_semaphore, #tpu.memory_space<semaphore_mem>>
    tpu.wait_dma2 semaphore(%45 : memref<!tpu.dma_semaphore, #tpu.memory_space<semaphore_mem>>) src(%arg3 : memref<256x256xbf16, #tpu.memory_space<any>>) dst(%arg21 : memref<256x256xbf16, #tpu.memory_space<vmem>>)
    %c1_i32_10 = arith.constant 1 : i32
    %46 = tpu.memref_slice %arg29[%c1_i32_10] : memref<8x!tpu.dma_semaphore, #tpu.memory_space<semaphore_mem>> -> memref<1x!tpu.dma_semaphore, #tpu.memory_space<semaphore_mem>>
    %47 = tpu.memref_squeeze %46 : memref<1x!tpu.dma_semaphore, #tpu.memory_space<semaphore_mem>> -> memref<!tpu.dma_semaphore, #tpu.memory_space<semaphore_mem>>
    tpu.wait_dma2 semaphore(%47 : memref<!tpu.dma_semaphore, #tpu.memory_space<semaphore_mem>>) src(%arg4 : memref<256x256xbf16, #tpu.memory_space<any>>) dst(%arg22 : memref<256x256xbf16, #tpu.memory_space<vmem>>)
    %c0_11 = arith.constant 0 : index
    %c0_12 = arith.constant 0 : index
    %48 = vector.load %arg21[%c0_11, %c0_12] : memref<256x256xbf16, #tpu.memory_space<vmem>>, vector<256x256xbf16>
    %49 = arith.truncf %43 : vector<2x256xf32> to vector<2x256xbf16>
    %cst_13 = arith.constant dense<0.000000e+00> : vector<2x256xf32>
    %50 = tpu.matmul %49, %48, %cst_13 {dimension_numbers = #tpu.dot_dimension_numbers<[1], [0], [0], [1], [0, 0, 1, 1], [], []>} : vector<2x256xbf16>, vector<256x256xbf16>, vector<2x256xf32> -> vector<2x256xf32>
    %c0_14 = arith.constant 0 : index
    %c0_15 = arith.constant 0 : index
    %51 = vector.load %arg12[%c0_14, %c0_15] : memref<1x256xf32, #tpu.memory_space<vmem>>, vector<1x256xf32>
    %52 = vector.broadcast %51 : vector<1x256xf32> to vector<2x256xf32>
    %53 = arith.addf %50, %52 : vector<2x256xf32>
    %cst_16 = arith.constant 0.000000e+00 : f32
    %54 = vector.broadcast %cst_16 : f32 to vector<2x256xf32>
    %55 = arith.maximumf %53, %54 : vector<2x256xf32>
    %c0_17 = arith.constant 0 : index
    %c0_18 = arith.constant 0 : index
    %56 = vector.load %arg22[%c0_17, %c0_18] : memref<256x256xbf16, #tpu.memory_space<vmem>>, vector<256x256xbf16>
    %57 = arith.truncf %55 : vector<2x256xf32> to vector<2x256xbf16>
    %cst_19 = arith.constant dense<0.000000e+00> : vector<2x256xf32>
    %58 = tpu.matmul %57, %56, %cst_19 {dimension_numbers = #tpu.dot_dimension_numbers<[1], [0], [0], [1], [0, 0, 1, 1], [], []>} : vector<2x256xbf16>, vector<256x256xbf16>, vector<2x256xf32> -> vector<2x256xf32>
    %c0_20 = arith.constant 0 : index
    %c0_21 = arith.constant 0 : index
    %59 = vector.load %arg13[%c0_20, %c0_21] : memref<1x256xf32, #tpu.memory_space<vmem>>, vector<1x256xf32>
    %60 = vector.broadcast %59 : vector<1x256xf32> to vector<2x256xf32>
    %61 = arith.addf %58, %60 : vector<2x256xf32>
    %62 = arith.addf %61, %43 : vector<2x256xf32>
    %cst_22 = arith.constant 0.000000e+00 : f32
    %63 = vector.broadcast %cst_22 : f32 to vector<2x256xf32>
    %64 = arith.maximumf %62, %63 : vector<2x256xf32>
    %c2_i32_23 = arith.constant 2 : i32
    %65 = tpu.memref_slice %arg29[%c2_i32_23] : memref<8x!tpu.dma_semaphore, #tpu.memory_space<semaphore_mem>> -> memref<1x!tpu.dma_semaphore, #tpu.memory_space<semaphore_mem>>
    %66 = tpu.memref_squeeze %65 : memref<1x!tpu.dma_semaphore, #tpu.memory_space<semaphore_mem>> -> memref<!tpu.dma_semaphore, #tpu.memory_space<semaphore_mem>>
    tpu.wait_dma2 semaphore(%66 : memref<!tpu.dma_semaphore, #tpu.memory_space<semaphore_mem>>) src(%arg5 : memref<256x256xbf16, #tpu.memory_space<any>>) dst(%arg23 : memref<256x256xbf16, #tpu.memory_space<vmem>>)
    %c3_i32_24 = arith.constant 3 : i32
    %67 = tpu.memref_slice %arg29[%c3_i32_24] : memref<8x!tpu.dma_semaphore, #tpu.memory_space<semaphore_mem>> -> memref<1x!tpu.dma_semaphore, #tpu.memory_space<semaphore_mem>>
    %68 = tpu.memref_squeeze %67 : memref<1x!tpu.dma_semaphore, #tpu.memory_space<semaphore_mem>> -> memref<!tpu.dma_semaphore, #tpu.memory_space<semaphore_mem>>
    tpu.wait_dma2 semaphore(%68 : memref<!tpu.dma_semaphore, #tpu.memory_space<semaphore_mem>>) src(%arg6 : memref<256x256xbf16, #tpu.memory_space<any>>) dst(%arg24 : memref<256x256xbf16, #tpu.memory_space<vmem>>)
    %c4_i32_25 = arith.constant 4 : i32
    %69 = tpu.memref_slice %arg29[%c4_i32_25] : memref<8x!tpu.dma_semaphore, #tpu.memory_space<semaphore_mem>> -> memref<1x!tpu.dma_semaphore, #tpu.memory_space<semaphore_mem>>
    %70 = tpu.memref_squeeze %69 : memref<1x!tpu.dma_semaphore, #tpu.memory_space<semaphore_mem>> -> memref<!tpu.dma_semaphore, #tpu.memory_space<semaphore_mem>>
    tpu.wait_dma2 semaphore(%70 : memref<!tpu.dma_semaphore, #tpu.memory_space<semaphore_mem>>) src(%arg7 : memref<256x256xbf16, #tpu.memory_space<any>>) dst(%arg25 : memref<256x256xbf16, #tpu.memory_space<vmem>>)
    %c0_26 = arith.constant 0 : index
    %c0_27 = arith.constant 0 : index
    %71 = vector.load %arg23[%c0_26, %c0_27] : memref<256x256xbf16, #tpu.memory_space<vmem>>, vector<256x256xbf16>
    %72 = arith.truncf %64 : vector<2x256xf32> to vector<2x256xbf16>
    %cst_28 = arith.constant dense<0.000000e+00> : vector<2x256xf32>
    %73 = tpu.matmul %72, %71, %cst_28 {dimension_numbers = #tpu.dot_dimension_numbers<[1], [0], [0], [1], [0, 0, 1, 1], [], []>} : vector<2x256xbf16>, vector<256x256xbf16>, vector<2x256xf32> -> vector<2x256xf32>
    %c0_29 = arith.constant 0 : index
    %c0_30 = arith.constant 0 : index
    %74 = vector.load %arg14[%c0_29, %c0_30] : memref<1x256xf32, #tpu.memory_space<vmem>>, vector<1x256xf32>
    %75 = vector.broadcast %74 : vector<1x256xf32> to vector<2x256xf32>
    %76 = arith.addf %73, %75 : vector<2x256xf32>
    %cst_31 = arith.constant 0.000000e+00 : f32
    %77 = vector.broadcast %cst_31 : f32 to vector<2x256xf32>
    %78 = arith.maximumf %76, %77 : vector<2x256xf32>
    %c0_32 = arith.constant 0 : index
    %c0_33 = arith.constant 0 : index
    %79 = vector.load %arg24[%c0_32, %c0_33] : memref<256x256xbf16, #tpu.memory_space<vmem>>, vector<256x256xbf16>
    %80 = arith.truncf %78 : vector<2x256xf32> to vector<2x256xbf16>
    %cst_34 = arith.constant dense<0.000000e+00> : vector<2x256xf32>
    %81 = tpu.matmul %80, %79, %cst_34 {dimension_numbers = #tpu.dot_dimension_numbers<[1], [0], [0], [1], [0, 0, 1, 1], [], []>} : vector<2x256xbf16>, vector<256x256xbf16>, vector<2x256xf32> -> vector<2x256xf32>
    %c0_35 = arith.constant 0 : index
    %c0_36 = arith.constant 0 : index
    %82 = vector.load %arg15[%c0_35, %c0_36] : memref<1x256xf32, #tpu.memory_space<vmem>>, vector<1x256xf32>
    %83 = vector.broadcast %82 : vector<1x256xf32> to vector<2x256xf32>
    %84 = arith.addf %81, %83 : vector<2x256xf32>
    %c0_37 = arith.constant 0 : index
    %c0_38 = arith.constant 0 : index
    %85 = vector.load %arg25[%c0_37, %c0_38] : memref<256x256xbf16, #tpu.memory_space<vmem>>, vector<256x256xbf16>
    %86 = arith.truncf %64 : vector<2x256xf32> to vector<2x256xbf16>
    %cst_39 = arith.constant dense<0.000000e+00> : vector<2x256xf32>
    %87 = tpu.matmul %86, %85, %cst_39 {dimension_numbers = #tpu.dot_dimension_numbers<[1], [0], [0], [1], [0, 0, 1, 1], [], []>} : vector<2x256xbf16>, vector<256x256xbf16>, vector<2x256xf32> -> vector<2x256xf32>
    %c0_40 = arith.constant 0 : index
    %c0_41 = arith.constant 0 : index
    %88 = vector.load %arg16[%c0_40, %c0_41] : memref<1x256xf32, #tpu.memory_space<vmem>>, vector<1x256xf32>
    %89 = vector.broadcast %88 : vector<1x256xf32> to vector<2x256xf32>
    %90 = arith.addf %87, %89 : vector<2x256xf32>
    %91 = arith.addf %84, %90 : vector<2x256xf32>
    %cst_42 = arith.constant 0.000000e+00 : f32
    %92 = vector.broadcast %cst_42 : f32 to vector<2x256xf32>
    %93 = arith.maximumf %91, %92 : vector<2x256xf32>
    %c5_i32_43 = arith.constant 5 : i32
    %94 = tpu.memref_slice %arg29[%c5_i32_43] : memref<8x!tpu.dma_semaphore, #tpu.memory_space<semaphore_mem>> -> memref<1x!tpu.dma_semaphore, #tpu.memory_space<semaphore_mem>>
    %95 = tpu.memref_squeeze %94 : memref<1x!tpu.dma_semaphore, #tpu.memory_space<semaphore_mem>> -> memref<!tpu.dma_semaphore, #tpu.memory_space<semaphore_mem>>
    tpu.wait_dma2 semaphore(%95 : memref<!tpu.dma_semaphore, #tpu.memory_space<semaphore_mem>>) src(%arg8 : memref<256x384xbf16, #tpu.memory_space<any>>) dst(%arg26 : memref<256x384xbf16, #tpu.memory_space<vmem>>)
    %c0_44 = arith.constant 0 : index
    %c0_45 = arith.constant 0 : index
    %96 = vector.load %arg26[%c0_44, %c0_45] : memref<256x384xbf16, #tpu.memory_space<vmem>>, vector<256x384xbf16>
    %97 = arith.truncf %93 : vector<2x256xf32> to vector<2x256xbf16>
    %cst_46 = arith.constant dense<0.000000e+00> : vector<2x384xf32>
    %98 = tpu.matmul %97, %96, %cst_46 {dimension_numbers = #tpu.dot_dimension_numbers<[1], [0], [0], [1], [0, 0, 1, 1], [], []>} : vector<2x256xbf16>, vector<256x384xbf16>, vector<2x384xf32> -> vector<2x384xf32>
    %c0_47 = arith.constant 0 : index
    %c0_48 = arith.constant 0 : index
    %99 = vector.load %arg17[%c0_47, %c0_48] : memref<1x384xf32, #tpu.memory_space<vmem>>, vector<1x384xf32>
    %100 = vector.broadcast %99 : vector<1x384xf32> to vector<2x384xf32>
    %101 = arith.addf %98, %100 : vector<2x384xf32>
    %cst_49 = arith.constant 0.000000e+00 : f32
    %102 = vector.broadcast %cst_49 : f32 to vector<2x384xf32>
    %103 = arith.maximumf %101, %102 : vector<2x384xf32>
    %c6_i32_50 = arith.constant 6 : i32
    %104 = tpu.memref_slice %arg29[%c6_i32_50] : memref<8x!tpu.dma_semaphore, #tpu.memory_space<semaphore_mem>> -> memref<1x!tpu.dma_semaphore, #tpu.memory_space<semaphore_mem>>
    %105 = tpu.memref_squeeze %104 : memref<1x!tpu.dma_semaphore, #tpu.memory_space<semaphore_mem>> -> memref<!tpu.dma_semaphore, #tpu.memory_space<semaphore_mem>>
    tpu.wait_dma2 semaphore(%105 : memref<!tpu.dma_semaphore, #tpu.memory_space<semaphore_mem>>) src(%arg9 : memref<384x640xbf16, #tpu.memory_space<any>>) dst(%arg27 : memref<384x640xbf16, #tpu.memory_space<vmem>>)
    %c0_51 = arith.constant 0 : index
    %c0_52 = arith.constant 0 : index
    %106 = vector.load %arg27[%c0_51, %c0_52] : memref<384x640xbf16, #tpu.memory_space<vmem>>, vector<384x640xbf16>
    %107 = arith.truncf %103 : vector<2x384xf32> to vector<2x384xbf16>
    %cst_53 = arith.constant dense<0.000000e+00> : vector<2x640xf32>
    %108 = tpu.matmul %107, %106, %cst_53 {dimension_numbers = #tpu.dot_dimension_numbers<[1], [0], [0], [1], [0, 0, 1, 1], [], []>} : vector<2x384xbf16>, vector<384x640xbf16>, vector<2x640xf32> -> vector<2x640xf32>
    %c0_54 = arith.constant 0 : index
    %c0_55 = arith.constant 0 : index
    %109 = vector.load %arg18[%c0_54, %c0_55] : memref<1x640xf32, #tpu.memory_space<vmem>>, vector<1x640xf32>
    %110 = vector.broadcast %109 : vector<1x640xf32> to vector<2x640xf32>
    %111 = arith.addf %108, %110 : vector<2x640xf32>
    %cst_56 = arith.constant 0.000000e+00 : f32
    %112 = vector.broadcast %cst_56 : f32 to vector<2x640xf32>
    %113 = arith.maximumf %111, %112 : vector<2x640xf32>
    %c7_i32_57 = arith.constant 7 : i32
    %114 = tpu.memref_slice %arg29[%c7_i32_57] : memref<8x!tpu.dma_semaphore, #tpu.memory_space<semaphore_mem>> -> memref<1x!tpu.dma_semaphore, #tpu.memory_space<semaphore_mem>>
    %115 = tpu.memref_squeeze %114 : memref<1x!tpu.dma_semaphore, #tpu.memory_space<semaphore_mem>> -> memref<!tpu.dma_semaphore, #tpu.memory_space<semaphore_mem>>
    tpu.wait_dma2 semaphore(%115 : memref<!tpu.dma_semaphore, #tpu.memory_space<semaphore_mem>>) src(%arg10 : memref<640x256xbf16, #tpu.memory_space<any>>) dst(%arg28 : memref<640x256xbf16, #tpu.memory_space<vmem>>)
    %c0_58 = arith.constant 0 : index
    %c0_59 = arith.constant 0 : index
    %116 = vector.load %arg28[%c0_58, %c0_59] : memref<640x256xbf16, #tpu.memory_space<vmem>>, vector<640x256xbf16>
    %117 = arith.truncf %113 : vector<2x640xf32> to vector<2x640xbf16>
    %cst_60 = arith.constant dense<0.000000e+00> : vector<2x256xf32>
    %118 = tpu.matmul %117, %116, %cst_60 {dimension_numbers = #tpu.dot_dimension_numbers<[1], [0], [0], [1], [0, 0, 1, 1], [], []>} : vector<2x640xbf16>, vector<640x256xbf16>, vector<2x256xf32> -> vector<2x256xf32>
    %c0_61 = arith.constant 0 : index
    %c0_62 = arith.constant 0 : index
    %119 = vector.load %arg19[%c0_61, %c0_62] : memref<1x256xf32, #tpu.memory_space<vmem>>, vector<1x256xf32>
    %120 = vector.broadcast %119 : vector<1x256xf32> to vector<2x256xf32>
    %121 = arith.addf %118, %120 : vector<2x256xf32>
    %c0_63 = arith.constant 0 : index
    %c0_64 = arith.constant 0 : index
    %122 = vector.load %arg20[%c0_63, %c0_64] : memref<2x256xf32, #tpu.memory_space<vmem>>, vector<2x256xf32>
    tpu.vector_store %arg20[%c0_63, %c0_64], %121 {strides = array<i32>} : memref<2x256xf32, #tpu.memory_space<vmem>>, vector<2x256xf32>,
    return
  }
}

</mosaic_0001>

<bundles_post_ra>
// kernel: resnet_deconv_shallow_forward.1
= control target key start
LH: loop header
LB: loop body
LE: loop exit
PB: predicated region body
PF: predicated region fallthrough
CT: control target
= control target key end

     0   :  { %s14006_s0 = inlined_call_operand.vmem [shape: bf16[2,1024], index: 0, kind: input, shape index: {}]   ;;  %s14007_s1 = inlined_call_operand.hbm [shape: bf16[1024,512], index: 1, kind: input, shape index: {}]   ;;  %s14008_s2 = inlined_call_operand.hbm [shape: bf16[512,2304], index: 2, kind: input, shape index: {}]   ;;  %s14009_s3 = inlined_call_operand.hbm [shape: bf16[256,256], index: 3, kind: input, shape index: {}]   ;;  %s14010_s4 = inlined_call_operand.hbm [shape: bf16[256,256], index: 4, kind: input, shape index: {}]   ;;  %s14011_s5 = inlined_call_operand.hbm [shape: bf16[256,256], index: 5, kind: input, shape index: {}]   ;;  %s14012_s6 = inlined_call_operand.hbm [shape: bf16[256,256], index: 6, kind: input, shape index: {}]   ;;  %s14013_s7 = inlined_call_operand.hbm [shape: bf16[256,256], index: 7, kind: input, shape index: {}]   ;;  %s14014_s8 = inlined_call_operand.hbm [shape: bf16[256,384], index: 8, kind: input, shape index: {}]   ;;  %s14015_s9 = inlined_call_operand.hbm [shape: bf16[384,640], index: 9, kind: input, shape index: {}]   ;;  %s14016_s10 = inlined_call_operand.hbm [shape: bf16[640,256], index: 10, kind: input, shape index: {}]   ;;  %s14017_s11 = inlined_call_operand.hbm [shape: f32[1,512], index: 11, kind: input, shape index: {}]   ;;  %s14018_s12 = inlined_call_operand.hbm [shape: f32[1,256], index: 12, kind: input, shape index: {}]   ;;  %s14019_s13 = inlined_call_operand.hbm [shape: f32[1,256], index: 13, kind: input, shape index: {}]   ;;  %s14020_s14 = inlined_call_operand.hbm [shape: f32[1,256], index: 14, kind: input, shape index: {}]   ;;  %s14021_s15 = inlined_call_operand.hbm [shape: f32[1,256], index: 15, kind: input, shape index: {}]   ;;  %s14022_s16 = inlined_call_operand.hbm [shape: f32[1,256], index: 16, kind: input, shape index: {}]   ;;  %s14023_s17 = inlined_call_operand.hbm [shape: f32[1,384], index: 17, kind: input, shape index: {}]   ;;  %s14024_s18 = inlined_call_operand.hbm [shape: f32[1,640], index: 18, kind: input, shape index: {}]   ;;  %s14025_s19 = inlined_call_operand.hbm [shape: f32[1,256], index: 19, kind: input, shape index: {}]   ;;  %s14026_s20 = inlined_call_operand.vmem [shape: f32[2,256], index: 20, kind: output, shape index: {}]  }
   0x1   :  { %14027 = sst [smem:[#allocation60_spill]] %s14006_s0 }
   0x2   :  { %14028 = sst [smem:[#allocation61_spill]] %s14007_s1 }
   0x3   :  { %14029 = sst [smem:[#allocation62_spill]] %s14008_s2 }
   0x4   :  { %14030 = sst [smem:[#allocation63_spill]] %s14009_s3 }
   0x5   :  { %14031 = sst [smem:[#allocation64_spill]] %s14010_s4 }
   0x6   :  { %25 = vsyncpa [#allocation12], 0 }
   0x7   :  { %26 = vsyncpa [#allocation14], 0 }
   0x8   :  { %27 = vsyncpa [#allocation17], 0 }
   0x9   :  { %28 = vsyncpa [#allocation20], 0 }
   0xa   :  { %29 = vsyncpa [#allocation23], 0 }
   0xb   :  { %30 = vsyncpa [#allocation26], 0  ;;  %s13472_s1 = smov [#allocation13]  }
   0xc   :  { %s50_s22 = sshll.u32 %s13472_s1, 4  ;;  %s51_s22 = int_to_ptr.vmem [resolvable:$true] %s50_s22 }
   0xd   :  { %s13072_s23 = scalar_lea.vmem %s51_s22, 73728  ;;  %p13077_p1 = scmp.lt.s32.totalorder %s51_s22, %s51_s22 }
   0xe   :  { %p13073_p0 = scmp.ne.s32.totalorder %s51_s22, %s13072_s23  ;;  %p13078_p2 = scmp.lt.s32.totalorder %s13072_s23, %s13072_s23 }
  0x10   :  { %p13079_p3 = por %p13078_p2, %p13077_p1 }
  0x12   :  { %p13080_p4 = pnand %p13079_p3, %p13073_p0 }
  0x14   :  { %13083 = shalt.err (!%p13080_p4)
}
  0x15   :  { %s13473_s24 = smov 1152   ;;  %s13474_s2 = smov 72  }
  0x16   :  { %s14032_s26 = sld [smem:[#allocation62_spill]]  ;;  %s13475_s27 = smov [#allocation16]  }
  0x17   :  { %s73_s28 = sshll.u32 %s13475_s27, 4  ;;  %s13476_s4 = smov [#allocation19]   ;;  %s74_s28 = int_to_ptr.vmem [resolvable:$true] %s73_s28 }
  0x18   :  { %s93_s29 = sshll.u32 %s13476_s4, 4  ;;  %s13092_s30 = scalar_lea.vmem %s74_s28, 32  ;;  %s94_s29 = int_to_ptr.vmem [resolvable:$true] %s93_s29 }
  0x19   :  { %p13093_p5 = scmp.ne.s32.totalorder %s74_s28, %s13092_s30  ;;  %p13097_p6 = scmp.lt.s32.totalorder %s74_s28, %s74_s28 }
  0x1a   :  { %p13098_p7 = scmp.lt.s32.totalorder %s13092_s30, %s13092_s30 }
  0x1c   :  { %56 = dma.hbm_to_vmem [thread:$0]  %s14032_s26, 73728, %s51_s22, [#allocation14], %s13473_s24, %s13473_s24, %s13474_s2  }
  0x1d   :  { %p13099_p8 = por %p13098_p7, %p13097_p6 }
  0x1f   :  { %p13100_p9 = pnand %p13099_p8, %p13093_p5 }
  0x21   :  { %13103 = shalt.err (!%p13100_p9)
}
  0x22   :  { %76 = dma.hbm_to_vmem [thread:$0]  %s14018_s12, 32, %s74_s28, [#allocation17]  }
  0x23   :  { %s13112_s1 = scalar_lea.vmem %s94_s29, 32  ;;  %p13117_p11 = scmp.lt.s32.totalorder %s94_s29, %s94_s29 }
  0x24   :  { %p13113_p10 = scmp.ne.s32.totalorder %s94_s29, %s13112_s1  ;;  %p13118_p12 = scmp.lt.s32.totalorder %s13112_s1, %s13112_s1 }
  0x26   :  { %p13119_p13 = por %p13118_p12, %p13117_p11 }
  0x28   :  { %p13120_p0 = pnand %p13119_p13, %p13113_p10 }
  0x2a   :  { %13123 = shalt.err (!%p13120_p0)
}
  0x2b   :  { %96 = dma.hbm_to_vmem [thread:$0]  %s14020_s14, 32, %s94_s29, [#allocation20]  }
  0x2c   :  { %s13477_s24 = smov [#allocation22]   ;;  %s13478_s25 = smov [#allocation25]  }
  0x2d   :  { %s113_s2 = sshll.u32 %s13477_s24, 4  ;;  %s133_s3 = sshll.u32 %s13478_s25, 4  ;;  %s114_s2 = int_to_ptr.vmem [resolvable:$true] %s113_s2  ;;  %s134_s3 = int_to_ptr.vmem [resolvable:$true] %s133_s3 }
  0x2e   :  { %s13132_s26 = scalar_lea.vmem %s114_s2, 32  ;;  %p13137_p2 = scmp.lt.s32.totalorder %s114_s2, %s114_s2 }
  0x2f   :  { %p13133_p1 = scmp.ne.s32.totalorder %s114_s2, %s13132_s26  ;;  %p13138_p3 = scmp.lt.s32.totalorder %s13132_s26, %s13132_s26 }
  0x31   :  { %p13139_p4 = por %p13138_p3, %p13137_p2 }
  0x33   :  { %p13140_p5 = pnand %p13139_p4, %p13133_p1 }
  0x35   :  { %13143 = shalt.err (!%p13140_p5)
}
  0x36   :  { %116 = dma.hbm_to_vmem [thread:$0]  %s14022_s16, 32, %s114_s2, [#allocation23]  }
  0x37   :  { %s13152_s28 = scalar_lea.vmem %s134_s3, 80  ;;  %s13156_s14 = scalar_lea.vmem %s134_s3, 96 }
  0x38   :  { %p13153_p6 = scmp.ne.s32.totalorder %s134_s3, %s13152_s28  ;;  %p13157_p7 = scmp.lt.s32.totalorder %s134_s3, %s134_s3 }
  0x39   :  { %p13158_p8 = scmp.lt.s32.totalorder %s13156_s14, %s13152_s28 }
  0x3b   :  { %p13159_p9 = por %p13158_p8, %p13157_p7 }
  0x3d   :  { %p13160_p10 = pnand %p13159_p9, %p13153_p6 }
  0x3f   :  { %13163 = shalt.err (!%p13160_p10)
}
  0x40   :  { %136 = dma.hbm_to_vmem [thread:$0]  %s14024_s18, 80, %s134_s3, [#allocation26]  }
  0x41   :  { %s13479_s30 = smov [#allocation11]  }
  0x42   :  { %s38_s0 = sshll.u32 %s13479_s30, 4  ;;  %s39_s0 = int_to_ptr.vmem [resolvable:$true] %s38_s0 }
  0x43   :  { %s13172_s21 = scalar_lea.vmem %s39_s0, 32768  ;;  %p13177_p12 = scmp.lt.s32.totalorder %s39_s0, %s39_s0 }
  0x44   :  { %p13173_p11 = scmp.ne.s32.totalorder %s39_s0, %s13172_s21  ;;  %p13178_p13 = scmp.lt.s32.totalorder %s13172_s21, %s13172_s21 }
  0x46   :  { %p13179_p0 = por %p13178_p13, %p13177_p12 }
  0x48   :  { %p13180_p1 = pnand %p13179_p0, %p13173_p11 }
  0x4a   :  { %13183 = shalt.err (!%p13180_p1)
}
  0x4b   :  { %s13480_s16 = smov 256   ;;  %s13481_s1 = smov 16  }
  0x4c   :  { %s14033_s24 = sld [smem:[#allocation61_spill]]  ;;  %s13482_s2 = smov [#allocation15]  }
  0x4d   :  { %s63_s25 = sshll.u32 %s13482_s2, 4  ;;  %s13483_s26 = smov [#allocation18]   ;;  %s64_s25 = int_to_ptr.vmem [resolvable:$true] %s63_s25 }
  0x4e   :  { %s83_s18 = sshll.u32 %s13483_s26, 4  ;;  %s13192_s3 = scalar_lea.vmem %s64_s25, 64  ;;  %s84_s18 = int_to_ptr.vmem [resolvable:$true] %s83_s18 }
  0x4f   :  { %p13193_p2 = scmp.ne.s32.totalorder %s64_s25, %s13192_s3  ;;  %p13197_p3 = scmp.lt.s32.totalorder %s64_s25, %s64_s25 }
  0x50   :  { %p13198_p4 = scmp.lt.s32.totalorder %s13192_s3, %s13192_s3 }
  0x52   :  { %44 = dma.hbm_to_vmem [thread:$0]  %s14033_s24, 32768, %s39_s0, [#allocation12], %s13480_s16, %s13480_s16, %s13481_s1  }
  0x53   :  { %p13199_p5 = por %p13198_p4, %p13197_p3 }
  0x55   :  { %p13200_p6 = pnand %p13199_p5, %p13193_p2 }
  0x57   :  { %13203 = shalt.err (!%p13200_p6)
}
  0x58   :  { %66 = dma.hbm_to_vmem [thread:$0]  %s14017_s11, 64, %s64_s25, [#allocation14]  }
  0x59   :  { %s13212_s28 = scalar_lea.vmem %s84_s18, 32  ;;  %p13217_p8 = scmp.lt.s32.totalorder %s84_s18, %s84_s18 }
  0x5a   :  { %p13213_p7 = scmp.ne.s32.totalorder %s84_s18, %s13212_s28  ;;  %p13218_p9 = scmp.lt.s32.totalorder %s13212_s28, %s13212_s28 }
  0x5c   :  { %p13219_p10 = por %p13218_p9, %p13217_p8 }
  0x5e   :  { %p13220_p11 = pnand %p13219_p10, %p13213_p7 }
  0x60   :  { %13223 = shalt.err (!%p13220_p11)
}
  0x61   :  { %86 = dma.hbm_to_vmem [thread:$0]  %s14019_s13, 32, %s84_s18, [#allocation17]  }
  0x62   :  { %s13484_s29 = smov [#allocation21]   ;;  %s13485_s0 = smov [#allocation24]  }
  0x63   :  { %s103_s30 = sshll.u32 %s13484_s29, 4  ;;  %s123_s21 = sshll.u32 %s13485_s0, 4  ;;  %s104_s30 = int_to_ptr.vmem [resolvable:$true] %s103_s30  ;;  %s124_s21 = int_to_ptr.vmem [resolvable:$true] %s123_s21 }
  0x64   :  { %s13232_s16 = scalar_lea.vmem %s104_s30, 32  ;;  %p13237_p13 = scmp.lt.s32.totalorder %s104_s30, %s104_s30 }
  0x65   :  { %p13233_p12 = scmp.ne.s32.totalorder %s104_s30, %s13232_s16  ;;  %p13238_p0 = scmp.lt.s32.totalorder %s13232_s16, %s13232_s16 }
  0x67   :  { %p13239_p1 = por %p13238_p0, %p13237_p13 }
  0x69   :  { %p13240_p2 = pnand %p13239_p1, %p13233_p12 }
  0x6b   :  { %13243 = shalt.err (!%p13240_p2)
}
  0x6c   :  { %106 = dma.hbm_to_vmem [thread:$0]  %s14021_s15, 32, %s104_s30, [#allocation20]  }
  0x6d   :  { %s13252_s22 = scalar_lea.vmem %s124_s21, 48  ;;  %s13256_s13 = scalar_lea.vmem %s124_s21, 64 }
  0x6e   :  { %p13253_p3 = scmp.ne.s32.totalorder %s124_s21, %s13252_s22  ;;  %p13257_p4 = scmp.lt.s32.totalorder %s124_s21, %s124_s21 }
  0x6f   :  { %p13258_p5 = scmp.lt.s32.totalorder %s13256_s13, %s13252_s22 }
  0x71   :  { %p13259_p6 = por %p13258_p5, %p13257_p4 }
  0x73   :  { %p13260_p7 = pnand %p13259_p6, %p13253_p3 }
  0x75   :  { %13263 = shalt.err (!%p13260_p7)
}
  0x76   :  { %126 = dma.hbm_to_vmem [thread:$0]  %s14023_s17, 48, %s124_s21, [#allocation23]  }
  0x77   :  { %s13486_s2 = smov [#allocation27]  }
  0x78   :  { %s143_s25 = sshll.u32 %s13486_s2, 4  ;;  %s144_s25 = int_to_ptr.vmem [resolvable:$true] %s143_s25 }
  0x79   :  { %s13272_s26 = scalar_lea.vmem %s144_s25, 32  ;;  %p13277_p9 = scmp.lt.s32.totalorder %s144_s25, %s144_s25 }
  0x7a   :  { %p13273_p8 = scmp.ne.s32.totalorder %s144_s25, %s13272_s26  ;;  %p13278_p10 = scmp.lt.s32.totalorder %s13272_s26, %s13272_s26 }
  0x7c   :  { %p13279_p11 = por %p13278_p10, %p13277_p9 }
  0x7e   :  { %p13280_p12 = pnand %p13279_p11, %p13273_p8 }
  0x80   :  { %13283 = shalt.err (!%p13280_p12)
}
  0x81   :  { %146 = dma.hbm_to_vmem [thread:$0]  %s14025_s19, 32, %s144_s25, [#allocation26]  }
  0x82   :  { %13444 = dma.done.wait [#allocation12], 32768  }
  0x83   :  { %13445 = vsyncadd [#allocation12], 4294934528 }
  0x84   :  { %13446 = dma.done.wait [#allocation14], 73792  }
  0x85   :  { %13447 = vsyncadd [#allocation14], 4294893504 }
  0x86   :  { %13448 = dma.done.wait [#allocation17], 64  }
  0x87   :  { %13449 = vsyncadd [#allocation17], 4294967232 }
  0x88   :  { %13450 = dma.done.wait [#allocation20], 64  }
  0x89   :  { %13451 = vsyncadd [#allocation20], 4294967232 }
  0x8a   :  { %13452 = dma.done.wait [#allocation23], 80  }
  0x8b   :  { %13453 = vsyncadd [#allocation23], 4294967216 }
  0x8c   :  { %13454 = dma.done.wait [#allocation26], 112  }
  0x8d   :  { %13455 = vsyncadd [#allocation26], 4294967184  ;;  %v11223_v0 = vld [vmem:[#allocation11 + $0xe4] ss:$16 sps:$4 sm:$0xff]   ;;  %v11227_v2 = vld [vmem:[#allocation11 + $0xe0] ss:$16 sps:$4 sm:$0xff]   ;;  %v535_v36 = vlaneseq }
  0x8e   :  { %v11225_v1 = vld [vmem:[#allocation11 + $0x2e4] ss:$16 sps:$4 sm:$0xff]   ;;  %1893 = vmatprep.subr.bf16.mxu0 %v11223_v0  ;;  %v11228_v3 = vld [vmem:[#allocation11 + $0x2e0] ss:$16 sps:$4 sm:$0xff]   ;;  %v13487_v37 = vmov 1966171168  }
  0x8f   :  { %1934 = vmatprep.subr.bf16.mxu1 %v11225_v1  ;;  %v11229_v4 = vld [vmem:[#allocation11 + $0xc4] ss:$16 sps:$4 sm:$0xff]   ;;  %1894 = vmatpush1.bf16.msra.mxu0 %v11227_v2  ;;  %v11233_v6 = vld [vmem:[#allocation11 + $0xc0] ss:$16 sps:$4 sm:$0xff]   ;;  %v558_v38 = vunpack.c.l.s4 %v13487_v37  ;;  %v13637_v42 = vshrl.u32 %v535_v36, 7  ;;  %s14034_s3 = sld [smem:[#allocation60_spill]] }
  0x90   :  { %1935 = vmatpush1.bf16.msra.mxu1 %v11228_v3  ;;  %v11231_v5 = vld [vmem:[#allocation11 + $0x2c4] ss:$16 sps:$4 sm:$0xff]   ;;  %1895 = vmatprep.subr.bf16.mxu0 %v11229_v4  ;;  %v11234_v7 = vld [vmem:[#allocation11 + $0x2c0] ss:$16 sps:$4 sm:$0xff]   ;;  %s13488_s12 = smov [#allocation2]   ;;  %s13489_s28 = smov [#allocation3]  }
  0x91   :  { %1936 = vmatprep.subr.bf16.mxu1 %v11231_v5  ;;  %v11235_v8 = vld [vmem:[#allocation11 + $0xa4] ss:$16 sps:$4 sm:$0xff]   ;;  %v11239_v10 = vld [vmem:[#allocation11 + $0xa0] ss:$16 sps:$4 sm:$0xff]   ;;  %v559_v43 = vunpack.c.0.s8 %v558_v38  ;;  %s188_s27 = sshll.u32 %s13488_s12, 4  ;;  %s200_s14 = sshll.u32 %s13489_s28, 4  ;;  %s189_s27 = int_to_ptr.vmem [resolvable:$true] %s188_s27  ;;  %s201_s14 = int_to_ptr.vmem [resolvable:$true] %s200_s14 }
  0x92   :  { %v11237_v9 = vld [vmem:[#allocation11 + $0x2a4] ss:$16 sps:$4 sm:$0xff]   ;;  %v11240_v11 = vld [vmem:[#allocation11 + $0x2a0] ss:$16 sps:$4 sm:$0xff]   ;;  %s13292_s4 = scalar_lea.vmem %s189_s27, 4096  ;;  %p13297_p0 = scmp.lt.s32.totalorder %s189_s27, %s189_s27 }
  0x93   :  { %1896 = vmatpush1.bf16.msra.mxu0 %v11233_v6  ;;  %v11241_v12 = vld [vmem:[#allocation11 + $0x84] ss:$16 sps:$4 sm:$0xff]   ;;  %v11245_v14 = vld [vmem:[#allocation11 + $0x80] ss:$16 sps:$4 sm:$0xff]   ;;  %v562_v49 = vsub.s32 %v559_v43, %v13637_v42  ;;  %p13293_p13 = scmp.ne.s32.totalorder %s189_s27, %s13292_s4  ;;  %p13298_p1 = scmp.lt.s32.totalorder %s13292_s4, %s13292_s4 }
  0x94   :  { %1937 = vmatpush1.bf16.msra.mxu1 %v11234_v7  ;;  %1897 = vmatprep.subr.bf16.mxu0 %v11235_v8  ;;  %v11243_v13 = vld [vmem:[#allocation11 + $0x284] ss:$16 sps:$4 sm:$0xff]   ;;  %v11246_v15 = vld [vmem:[#allocation11 + $0x280] ss:$16 sps:$4 sm:$0xff]  }
  0x95   :  { %1938 = vmatprep.subr.bf16.mxu1 %v11237_v9  ;;  %v11247_v16 = vld [vmem:[#allocation11 + $0x64] ss:$16 sps:$4 sm:$0xff]   ;;  %v11251_v18 = vld [vmem:[#allocation11 + $0x60] ss:$16 sps:$4 sm:$0xff]   ;;  %p13299_p2 = por %p13298_p1, %p13297_p0 }
  0x96   :  { %v11249_v17 = vld [vmem:[#allocation11 + $0x264] ss:$16 sps:$4 sm:$0xff]   ;;  %v11252_v19 = vld [vmem:[#allocation11 + $0x260] ss:$16 sps:$4 sm:$0xff]  }
  0x97   :  { %1898 = vmatpush1.bf16.msra.mxu0 %v11239_v10  ;;  %v11253_v20 = vld [vmem:[#allocation11 + $0x44] ss:$16 sps:$4 sm:$0xff]   ;;  %v11257_v22 = vld [vmem:[#allocation11 + $0x40] ss:$16 sps:$4 sm:$0xff]   ;;  %p13300_p3 = pnand %p13299_p2, %p13293_p13 }
  0x98   :  { %1939 = vmatpush1.bf16.msra.mxu1 %v11240_v11  ;;  %1899 = vmatprep.subr.bf16.mxu0 %v11241_v12  ;;  %v11255_v21 = vld [vmem:[#allocation11 + $0x244] ss:$16 sps:$4 sm:$0xff]   ;;  %v11258_v23 = vld [vmem:[#allocation11 + $0x240] ss:$16 sps:$4 sm:$0xff]  }
  0x99   :  { %1940 = vmatprep.subr.bf16.mxu1 %v11243_v13  ;;  %v11259_v24 = vld [vmem:[#allocation11 + $0x24] ss:$16 sps:$4 sm:$0xff]   ;;  %v11263_v26 = vld [vmem:[#allocation11 + $0x20] ss:$16 sps:$4 sm:$0xff]  }
  0x9a   :  { %v11261_v25 = vld [vmem:[#allocation11 + $0x224] ss:$16 sps:$4 sm:$0xff]   ;;  %v11264_v27 = vld [vmem:[#allocation11 + $0x220] ss:$16 sps:$4 sm:$0xff]  }
  0x9b   :  { %1900 = vmatpush1.bf16.msra.mxu0 %v11245_v14  ;;  %v11265_v28 = vld [vmem:[#allocation11 + $0x4] ss:$16 sps:$4 sm:$0xff]   ;;  %v11269_v30 = vld [vmem:[#allocation11] ss:$16 sps:$4 sm:$0xff]  }
  0x9c   :  { %1941 = vmatpush1.bf16.msra.mxu1 %v11246_v15  ;;  %1901 = vmatprep.subr.bf16.mxu0 %v11247_v16  ;;  %v11267_v29 = vld [vmem:[#allocation11 + $0x204] ss:$16 sps:$4 sm:$0xff]   ;;  %v11270_v31 = vld [vmem:[#allocation11 + $0x200] ss:$16 sps:$4 sm:$0xff]  }
  0x9d   :  { %1942 = vmatprep.subr.bf16.mxu1 %v11249_v17  ;;  %v11271_v32 = vld [vmem:[#allocation11 + $0x1e4] ss:$16 sps:$4 sm:$0xff]   ;;  %v11275_v34 = vld [vmem:[#allocation11 + $0x1e0] ss:$16 sps:$4 sm:$0xff]  }
  0x9e   :  { %v11273_v33 = vld [vmem:[#allocation11 + $0x3e4] ss:$16 sps:$4 sm:$0xff]   ;;  %v11276_v35 = vld [vmem:[#allocation11 + $0x3e0] ss:$16 sps:$4 sm:$0xff]  }
  0x9f   :  { %1902 = vmatpush1.bf16.msra.mxu0 %v11251_v18  ;;  %v11277_v39 = vld [vmem:[#allocation11 + $0x1c4] ss:$16 sps:$4 sm:$0xff]   ;;  %v11281_v41 = vld [vmem:[#allocation11 + $0x1c0] ss:$16 sps:$4 sm:$0xff]  }
  0xa0   :  { %1943 = vmatpush1.bf16.msra.mxu1 %v11252_v19  ;;  %1903 = vmatprep.subr.bf16.mxu0 %v11253_v20  ;;  %v11279_v40 = vld [vmem:[#allocation11 + $0x3c4] ss:$16 sps:$4 sm:$0xff]   ;;  %v11282_v44 = vld [vmem:[#allocation11 + $0x3c0] ss:$16 sps:$4 sm:$0xff]  }
  0xa1   :  { %1944 = vmatprep.subr.bf16.mxu1 %v11255_v21  ;;  %v11283_v45 = vld [vmem:[#allocation11 + $0x1a4] ss:$16 sps:$4 sm:$0xff]   ;;  %v11287_v47 = vld [vmem:[#allocation11 + $0x1a0] ss:$16 sps:$4 sm:$0xff]  }
  0xa2   :  { %v11285_v46 = vld [vmem:[#allocation11 + $0x3a4] ss:$16 sps:$4 sm:$0xff]   ;;  %v11288_v48 = vld [vmem:[#allocation11 + $0x3a0] ss:$16 sps:$4 sm:$0xff]  }
  0xa3   :  { %1904 = vmatpush1.bf16.msra.mxu0 %v11257_v22  ;;  %v11289_v50 = vld [vmem:[#allocation11 + $0x184] ss:$16 sps:$4 sm:$0xff]   ;;  %v11293_v53 = vld [vmem:[#allocation11 + $0x180] ss:$16 sps:$4 sm:$0xff]  }
  0xa4   :  { %1945 = vmatpush1.bf16.msra.mxu1 %v11258_v23  ;;  %1905 = vmatprep.subr.bf16.mxu0 %v11259_v24  ;;  %v11291_v51 = vld [vmem:[#allocation11 + $0x384] ss:$16 sps:$4 sm:$0xff]   ;;  %v11294_v56 = vld [vmem:[#allocation11 + $0x380] ss:$16 sps:$4 sm:$0xff]  }
  0xa5   :  { %1946 = vmatprep.subr.bf16.mxu1 %v11261_v25  ;;  %v276_v52 = vld [vmem:[%s14034_s3] sm:$0xff] }
  0xa6   :  { %v563_v54 = vrot.slane %v276_v52, %v562_v49  ;;  %v556_v55 = vcombine.high %v276_v52, %v276_v52  ;;  %v11295_v57 = vld [vmem:[#allocation11 + $0x164] ss:$16 sps:$4 sm:$0xff]   ;;  %v11299_v61 = vld [vmem:[#allocation11 + $0x160] ss:$16 sps:$4 sm:$0xff]  }
  0xa7   :  { %1906 = vmatpush1.bf16.msra.mxu0 %v11263_v26  ;;  %v11297_v58 = vld [vmem:[#allocation11 + $0x364] ss:$16 sps:$4 sm:$0xff]   ;;  %v11300_v0 = vld [vmem:[#allocation11 + $0x360] ss:$16 sps:$4 sm:$0xff]  }
  0xa8   :  { %1947 = vmatpush1.bf16.msra.mxu1 %v11264_v27  ;;  %1907 = vmatprep.subr.bf16.mxu0 %v11265_v28  ;;  %v571_v59 = vcombine.high %v563_v54, %v563_v54  ;;  %v570_v60 = vrot.slane %v556_v55, %v562_v49  ;;  %v11301_v1 = vld [vmem:[#allocation11 + $0x144] ss:$16 sps:$4 sm:$0xff]   ;;  %v11305_v4 = vld [vmem:[#allocation11 + $0x140] ss:$16 sps:$4 sm:$0xff]   ;;  %v13653_v14 = vrot.slane %v563_v54, %v562_v49 }
  0xa9   :  { %1948 = vmatprep.subr.bf16.mxu1 %v11267_v29  ;;  %v11303_v2 = vld [vmem:[#allocation11 + $0x344] ss:$16 sps:$4 sm:$0xff]   ;;  %v11306_v5 = vld [vmem:[#allocation11 + $0x340] ss:$16 sps:$4 sm:$0xff]  }
  0xaa   :  { %v13643_v62 = vrot.slane %v571_v59, %v562_v49  ;;  %v13645_v63 = vrot.slane %v570_v60, %v562_v49  ;;  %v11307_v6 = vld [vmem:[#allocation11 + $0x124] ss:$16 sps:$4 sm:$0xff]   ;;  %v11311_v8 = vld [vmem:[#allocation11 + $0x120] ss:$16 sps:$4 sm:$0xff]   ;;  %v572_v12 = vcombine.high %v570_v60, %v570_v60  ;;  %v13659_v19 = vcombine.high %v13653_v14, %v13653_v14 }
  0xab   :  { %1908 = vmatpush1.bf16.msra.mxu0 %v11269_v30  ;;  %v11309_v7 = vld [vmem:[#allocation11 + $0x324] ss:$16 sps:$4 sm:$0xff]   ;;  %v11312_v9 = vld [vmem:[#allocation11 + $0x320] ss:$16 sps:$4 sm:$0xff]  }
  0xac   :  { %1949 = vmatpush1.bf16.msra.mxu1 %v11270_v31  ;;  %1909 = vmatprep.subr.bf16.mxu0 %v11271_v32  ;;  %v13649_v3 = vcombine.high %v13643_v62, %v13643_v62  ;;  %v11313_v10 = vld [vmem:[#allocation11 + $0x104] ss:$16 sps:$4 sm:$0xff]   ;;  %v11317_v13 = vld [vmem:[#allocation11 + $0x100] ss:$16 sps:$4 sm:$0xff]   ;;  %v13655_v18 = vrot.slane %v572_v12, %v562_v49 }
  0xad   :  { %1950 = vmatprep.subr.bf16.mxu1 %v11273_v33  ;;  %1925 = vmatprep.mubr.bf16.mxu0 %v13643_v62  ;;  %v11315_v11 = vld [vmem:[#allocation11 + $0x304] ss:$16 sps:$4 sm:$0xff]   ;;  %v11318_v15 = vld [vmem:[#allocation11 + $0x300] ss:$16 sps:$4 sm:$0xff]  }
  0xae   :  { %1966 = vmatprep.mubr.bf16.mxu1 %v13649_v3  ;;  %v11321_v16 = vld [vmem:[#allocation11 + $0x4e4] ss:$16 sps:$4 sm:$0xff]   ;;  %v11319_v20 = vld [vmem:[#allocation11 + $0x4e0] ss:$16 sps:$4 sm:$0xff]   ;;  %v13663_v24 = vcombine.high %v13655_v18, %v13655_v18 }
  0xaf   :  { %1910 = vmatpush2.bf16.msra.mxu0 %v11275_v34  ;;  %v11324_v17 = vld [vmem:[#allocation11 + $0x6e4] ss:$16 sps:$4 sm:$0xff]   ;;  %v11322_v21 = vld [vmem:[#allocation11 + $0x6e0] ss:$16 sps:$4 sm:$0xff]  }
  0xb0   :  { %1951 = vmatpush2.bf16.msra.mxu1 %v11276_v35  ;;  %1911 = vmatprep.subr.bf16.mxu0 %v11277_v39  ;;  %v11327_v22 = vld [vmem:[#allocation11 + $0x4c4] ss:$16 sps:$4 sm:$0xff]   ;;  %v11325_v25 = vld [vmem:[#allocation11 + $0x4c0] ss:$16 sps:$4 sm:$0xff]  }
  0xb1   :  { %1952 = vmatprep.subr.bf16.mxu1 %v11279_v40  ;;  %v11330_v23 = vld [vmem:[#allocation11 + $0x6c4] ss:$16 sps:$4 sm:$0xff]   ;;  %v11328_v26 = vld [vmem:[#allocation11 + $0x6c0] ss:$16 sps:$4 sm:$0xff]  }
  0xb2   :  { %v11333_v27 = vld [vmem:[#allocation11 + $0x4a4] ss:$16 sps:$4 sm:$0xff]   ;;  %v11331_v29 = vld [vmem:[#allocation11 + $0x4a0] ss:$16 sps:$4 sm:$0xff]  }
  0xb3   :  { %1912 = vmatpush2.bf16.msra.mxu0 %v11281_v41  ;;  %v11336_v28 = vld [vmem:[#allocation11 + $0x6a4] ss:$16 sps:$4 sm:$0xff]   ;;  %v11334_v30 = vld [vmem:[#allocation11 + $0x6a0] ss:$16 sps:$4 sm:$0xff]  }
  0xb4   :  { %1953 = vmatpush2.bf16.msra.mxu1 %v11282_v44  ;;  %1913 = vmatprep.subr.bf16.mxu0 %v11283_v45  ;;  %v11339_v31 = vld [vmem:[#allocation11 + $0x484] ss:$16 sps:$4 sm:$0xff]   ;;  %v11337_v33 = vld [vmem:[#allocation11 + $0x480] ss:$16 sps:$4 sm:$0xff]  }
  0xb5   :  { %1954 = vmatprep.subr.bf16.mxu1 %v11285_v46  ;;  %v11342_v32 = vld [vmem:[#allocation11 + $0x684] ss:$16 sps:$4 sm:$0xff]   ;;  %v11340_v34 = vld [vmem:[#allocation11 + $0x680] ss:$16 sps:$4 sm:$0xff]  }
  0xb6   :  { %v11345_v35 = vld [vmem:[#allocation11 + $0x464] ss:$16 sps:$4 sm:$0xff]   ;;  %v11343_v37 = vld [vmem:[#allocation11 + $0x460] ss:$16 sps:$4 sm:$0xff]  }
  0xb7   :  { %1914 = vmatpush2.bf16.msra.mxu0 %v11287_v47  ;;  %v11348_v36 = vld [vmem:[#allocation11 + $0x664] ss:$16 sps:$4 sm:$0xff]   ;;  %v11346_v38 = vld [vmem:[#allocation11 + $0x660] ss:$16 sps:$4 sm:$0xff]  }
  0xb8   :  { %1955 = vmatpush2.bf16.msra.mxu1 %v11288_v48  ;;  %1915 = vmatprep.subr.bf16.mxu0 %v11289_v50  ;;  %v11351_v39 = vld [vmem:[#allocation11 + $0x444] ss:$16 sps:$4 sm:$0xff]   ;;  %v11349_v41 = vld [vmem:[#allocation11 + $0x440] ss:$16 sps:$4 sm:$0xff]  }
  0xb9   :  { %1956 = vmatprep.subr.bf16.mxu1 %v11291_v51  ;;  %v11354_v40 = vld [vmem:[#allocation11 + $0x644] ss:$16 sps:$4 sm:$0xff]   ;;  %v11352_v43 = vld [vmem:[#allocation11 + $0x640] ss:$16 sps:$4 sm:$0xff]  }
  0xba   :  { %v11357_v44 = vld [vmem:[#allocation11 + $0x424] ss:$16 sps:$4 sm:$0xff]   ;;  %v11355_v46 = vld [vmem:[#allocation11 + $0x420] ss:$16 sps:$4 sm:$0xff]  }
  0xbb   :  { %1916 = vmatpush2.bf16.msra.mxu0 %v11293_v53  ;;  %v11360_v45 = vld [vmem:[#allocation11 + $0x624] ss:$16 sps:$4 sm:$0xff]   ;;  %v11358_v47 = vld [vmem:[#allocation11 + $0x620] ss:$16 sps:$4 sm:$0xff]  }
  0xbc   :  { %1957 = vmatpush2.bf16.msra.mxu1 %v11294_v56  ;;  %1917 = vmatprep.subr.bf16.mxu0 %v11295_v57  ;;  %v11363_v48 = vld [vmem:[#allocation11 + $0x404] ss:$16 sps:$4 sm:$0xff]   ;;  %v11361_v50 = vld [vmem:[#allocation11 + $0x400] ss:$16 sps:$4 sm:$0xff]  }
  0xbd   :  { %1958 = vmatprep.subr.bf16.mxu1 %v11297_v58  ;;  %v11366_v49 = vld [vmem:[#allocation11 + $0x604] ss:$16 sps:$4 sm:$0xff]   ;;  %v11364_v51 = vld [vmem:[#allocation11 + $0x600] ss:$16 sps:$4 sm:$0xff]  }
  0xbe   :  { %v11369_v52 = vld [vmem:[#allocation11 + $0x5e4] ss:$16 sps:$4 sm:$0xff]   ;;  %v11367_v54 = vld [vmem:[#allocation11 + $0x5e0] ss:$16 sps:$4 sm:$0xff]  }
  0xbf   :  { %1918 = vmatpush2.bf16.msra.mxu0 %v11299_v61  ;;  %v11372_v53 = vld [vmem:[#allocation11 + $0x7e4] ss:$16 sps:$4 sm:$0xff]   ;;  %v11370_v55 = vld [vmem:[#allocation11 + $0x7e0] ss:$16 sps:$4 sm:$0xff]  }
  0xc0   :  { %1959 = vmatpush2.bf16.msra.mxu1 %v11300_v0  ;;  %1919 = vmatprep.subr.bf16.mxu0 %v11301_v1  ;;  %v11375_v56 = vld [vmem:[#allocation11 + $0x5c4] ss:$16 sps:$4 sm:$0xff]   ;;  %v11373_v58 = vld [vmem:[#allocation11 + $0x5c0] ss:$16 sps:$4 sm:$0xff]  }
  0xc1   :  { %1960 = vmatprep.subr.bf16.mxu1 %v11303_v2  ;;  %v11378_v57 = vld [vmem:[#allocation11 + $0x7c4] ss:$16 sps:$4 sm:$0xff]   ;;  %v11376_v59 = vld [vmem:[#allocation11 + $0x7c0] ss:$16 sps:$4 sm:$0xff]  }
  0xc2   :  { %v11381_v60 = vld [vmem:[#allocation11 + $0x5a4] ss:$16 sps:$4 sm:$0xff]   ;;  %v11379_v0 = vld [vmem:[#allocation11 + $0x5a0] ss:$16 sps:$4 sm:$0xff]  }
  0xc3   :  { %1920 = vmatpush2.bf16.msra.mxu0 %v11305_v4  ;;  %v11384_v61 = vld [vmem:[#allocation11 + $0x7a4] ss:$16 sps:$4 sm:$0xff]   ;;  %v11382_v1 = vld [vmem:[#allocation11 + $0x7a0] ss:$16 sps:$4 sm:$0xff]  }
  0xc4   :  { %1961 = vmatpush2.bf16.msra.mxu1 %v11306_v5  ;;  %1921 = vmatprep.subr.bf16.mxu0 %v11307_v6  ;;  %v11387_v2 = vld [vmem:[#allocation11 + $0x584] ss:$16 sps:$4 sm:$0xff]   ;;  %v11385_v5 = vld [vmem:[#allocation11 + $0x580] ss:$16 sps:$4 sm:$0xff]  }
  0xc5   :  { %1962 = vmatprep.subr.bf16.mxu1 %v11309_v7  ;;  %v11390_v4 = vld [vmem:[#allocation11 + $0x784] ss:$16 sps:$4 sm:$0xff]   ;;  %v11388_v6 = vld [vmem:[#allocation11 + $0x780] ss:$16 sps:$4 sm:$0xff]  }
  0xc6   :  { %v11393_v7 = vld [vmem:[#allocation11 + $0x564] ss:$16 sps:$4 sm:$0xff]  }
  0xc7   :  { %1922 = vmatpush2.bf16.msra.mxu0 %v11311_v8  ;;  %v11396_v8 = vld [vmem:[#allocation11 + $0x764] ss:$16 sps:$4 sm:$0xff]  }
  0xc8   :  { %1963 = vmatpush2.bf16.msra.mxu1 %v11312_v9  ;;  %1923 = vmatprep.subr.bf16.mxu0 %v11313_v10  ;;  %v11391_v9 = vld [vmem:[#allocation11 + $0x560] ss:$16 sps:$4 sm:$0xff]   ;;  %v11402_v12 = vld [vmem:[#allocation11 + $0x744] ss:$16 sps:$4 sm:$0xff]  }
  0xc9   :  { %1964 = vmatprep.subr.bf16.mxu1 %v11315_v11  ;;  %v11394_v10 = vld [vmem:[#allocation11 + $0x760] ss:$16 sps:$4 sm:$0xff]   ;;  %v11399_v11 = vld [vmem:[#allocation11 + $0x544] ss:$16 sps:$4 sm:$0xff]  }
  0xcb   :  { %1924 = vmatpush2.bf16.msra.mxu0 %v11317_v13  ;;  %v11397_v13 = vld [vmem:[#allocation11 + $0x540] ss:$16 sps:$4 sm:$0xff]  }
  0xcc   :  { %1965 = vmatpush2.bf16.msra.mxu1 %v11318_v15  ;;  %1975 = vmatprep.subr.bf16.mxu0 %v11321_v16  ;;  %v11400_v15 = vld [vmem:[#allocation11 + $0x740] ss:$16 sps:$4 sm:$0xff]   ;;  %v11405_v16 = vld [vmem:[#allocation11 + $0x524] ss:$16 sps:$4 sm:$0xff]  }
  0xcd   :  { %2016 = vmatprep.subr.bf16.mxu1 %v11324_v17  ;;  %v11408_v17 = vld [vmem:[#allocation11 + $0x724] ss:$16 sps:$4 sm:$0xff]  }
  0xce   :  { %1926 = vmatmul.mubr.bf16.vlgmr.msra.gmra.mxu0 %v13653_v14 }
  0xcf   :  { %1967 = vmatmul.mubr.bf16.vlgmr.msra.gmra.mxu1 %v13659_v19  ;;  %1976 = vmatpush1.bf16.msra.mxu0 %v11319_v20  ;;  %v11403_v20 = vld [vmem:[#allocation11 + $0x520] ss:$16 sps:$4 sm:$0xff]  }
  0xd0   :  { %2017 = vmatpush1.bf16.msra.mxu1 %v11322_v21  ;;  %1977 = vmatprep.subr.bf16.mxu0 %v11327_v22  ;;  %v11406_v21 = vld [vmem:[#allocation11 + $0x720] ss:$16 sps:$4 sm:$0xff]   ;;  %v11411_v22 = vld [vmem:[#allocation11 + $0x504] ss:$16 sps:$4 sm:$0xff]  }
  0xd1   :  { %2018 = vmatprep.subr.bf16.mxu1 %v11330_v23  ;;  %2007 = vmatprep.mubr.bf16.mxu0 %v13655_v18  ;;  %v11414_v23 = vld [vmem:[#allocation11 + $0x704] ss:$16 sps:$4 sm:$0xff]  }
  0xd2   :  { %2048 = vmatprep.mubr.bf16.mxu1 %v13663_v24 }
  0xd3   :  { %1978 = vmatpush1.bf16.msra.mxu0 %v11325_v25  ;;  %v11409_v25 = vld [vmem:[#allocation11 + $0x500] ss:$16 sps:$4 sm:$0xff]  }
  0xd4   :  { %2019 = vmatpush1.bf16.msra.mxu1 %v11328_v26  ;;  %1979 = vmatprep.subr.bf16.mxu0 %v11333_v27  ;;  %v11412_v26 = vld [vmem:[#allocation11 + $0x700] ss:$16 sps:$4 sm:$0xff]   ;;  %v11418_v27 = vld [vmem:[#allocation11 + $0xec] ss:$16 sps:$4 sm:$0xff]  }
  0xd5   :  { %2020 = vmatprep.subr.bf16.mxu1 %v11336_v28  ;;  %v11421_v28 = vld [vmem:[#allocation11 + $0x2ec] ss:$16 sps:$4 sm:$0xff]  }
  0xd7   :  { %1980 = vmatpush1.bf16.msra.mxu0 %v11331_v29  ;;  %v13671_v29 = vcombine.high %v13645_v63, %v13645_v63 }
  0xd8   :  { %2021 = vmatpush1.bf16.msra.mxu1 %v11334_v30  ;;  %1981 = vmatprep.subr.bf16.mxu0 %v11339_v31  ;;  %v11416_v30 = vld [vmem:[#allocation11 + $0xe8] ss:$16 sps:$4 sm:$0xff]  }
  0xd9   :  { %2022 = vmatprep.subr.bf16.mxu1 %v11342_v32  ;;  %v11419_v31 = vld [vmem:[#allocation11 + $0x2e8] ss:$16 sps:$4 sm:$0xff]   ;;  %v11424_v32 = vld [vmem:[#allocation11 + $0xcc] ss:$16 sps:$4 sm:$0xff]  }
  0xdb   :  { %1982 = vmatpush1.bf16.msra.mxu0 %v11337_v33  ;;  %v11427_v33 = vld [vmem:[#allocation11 + $0x2cc] ss:$16 sps:$4 sm:$0xff]  }
  0xdc   :  { %2023 = vmatpush1.bf16.msra.mxu1 %v11340_v34  ;;  %1983 = vmatprep.subr.bf16.mxu0 %v11345_v35  ;;  %v11422_v34 = vld [vmem:[#allocation11 + $0xc8] ss:$16 sps:$4 sm:$0xff]  }
  0xdd   :  { %2024 = vmatprep.subr.bf16.mxu1 %v11348_v36  ;;  %v11425_v35 = vld [vmem:[#allocation11 + $0x2c8] ss:$16 sps:$4 sm:$0xff]   ;;  %v11430_v36 = vld [vmem:[#allocation11 + $0xac] ss:$16 sps:$4 sm:$0xff]  }
  0xdf   :  { %1984 = vmatpush1.bf16.msra.mxu0 %v11343_v37  ;;  %v11433_v37 = vld [vmem:[#allocation11 + $0x2ac] ss:$16 sps:$4 sm:$0xff]  }
  0xe0   :  { %2025 = vmatpush1.bf16.msra.mxu1 %v11346_v38  ;;  %1985 = vmatprep.subr.bf16.mxu0 %v11351_v39  ;;  %v11428_v38 = vld [vmem:[#allocation11 + $0xa8] ss:$16 sps:$4 sm:$0xff]  }
  0xe1   :  { %2026 = vmatprep.subr.bf16.mxu1 %v11354_v40  ;;  %v11431_v39 = vld [vmem:[#allocation11 + $0x2a8] ss:$16 sps:$4 sm:$0xff]   ;;  %v11436_v40 = vld [vmem:[#allocation11 + $0x8c] ss:$16 sps:$4 sm:$0xff]  }
  0xe3   :  { %1986 = vmatpush1.bf16.msra.mxu0 %v11349_v41  ;;  %v11439_v41 = vld [vmem:[#allocation11 + $0x28c] ss:$16 sps:$4 sm:$0xff]  }
  0xe4   :  { %2027 = vmatpush1.bf16.msra.mxu1 %v11352_v43  ;;  %1987 = vmatprep.subr.bf16.mxu0 %v11357_v44  ;;  %v11434_v43 = vld [vmem:[#allocation11 + $0x88] ss:$16 sps:$4 sm:$0xff]  }
  0xe5   :  { %2028 = vmatprep.subr.bf16.mxu1 %v11360_v45  ;;  %v11437_v44 = vld [vmem:[#allocation11 + $0x288] ss:$16 sps:$4 sm:$0xff]   ;;  %v11442_v45 = vld [vmem:[#allocation11 + $0x6c] ss:$16 sps:$4 sm:$0xff]  }
  0xe7   :  { %1988 = vmatpush1.bf16.msra.mxu0 %v11355_v46  ;;  %v11445_v46 = vld [vmem:[#allocation11 + $0x26c] ss:$16 sps:$4 sm:$0xff]  }
  0xe8   :  { %2029 = vmatpush1.bf16.msra.mxu1 %v11358_v47  ;;  %1989 = vmatprep.subr.bf16.mxu0 %v11363_v48  ;;  %v11440_v47 = vld [vmem:[#allocation11 + $0x68] ss:$16 sps:$4 sm:$0xff]   ;;  %v11451_v48 = vld [vmem:[#allocation11 + $0x24c] ss:$16 sps:$4 sm:$0xff]  }
  0xe9   :  { %2030 = vmatprep.subr.bf16.mxu1 %v11366_v49  ;;  %v11446_v49 = vld [vmem:[#allocation11 + $0x48] ss:$16 sps:$4 sm:$0xff]  }
  0xeb   :  { %1990 = vmatpush1.bf16.msra.mxu0 %v11361_v50  ;;  %v11449_v50 = vld [vmem:[#allocation11 + $0x248] ss:$16 sps:$4 sm:$0xff]  }
  0xec   :  { %2031 = vmatpush1.bf16.msra.mxu1 %v11364_v51  ;;  %1991 = vmatprep.subr.bf16.mxu0 %v11369_v52  ;;  %v11454_v51 = vld [vmem:[#allocation11 + $0x2c] ss:$16 sps:$4 sm:$0xff]  }
  0xed   :  { %2032 = vmatprep.subr.bf16.mxu1 %v11372_v53  ;;  %v11457_v52 = vld [vmem:[#allocation11 + $0x22c] ss:$16 sps:$4 sm:$0xff]   ;;  %v11452_v53 = vld [vmem:[#allocation11 + $0x28] ss:$16 sps:$4 sm:$0xff]  }
  0xef   :  { %1992 = vmatpush2.bf16.msra.mxu0 %v11367_v54  ;;  %v11455_v54 = vld [vmem:[#allocation11 + $0x228] ss:$16 sps:$4 sm:$0xff]  }
  0xf0   :  { %2033 = vmatpush2.bf16.msra.mxu1 %v11370_v55  ;;  %1993 = vmatprep.subr.bf16.mxu0 %v11375_v56  ;;  %v11460_v55 = vld [vmem:[#allocation11 + $0xc] ss:$16 sps:$4 sm:$0xff]  }
  0xf1   :  { %2034 = vmatprep.subr.bf16.mxu1 %v11378_v57  ;;  %v11463_v56 = vld [vmem:[#allocation11 + $0x20c] ss:$16 sps:$4 sm:$0xff]   ;;  %v11458_v57 = vld [vmem:[#allocation11 + $0x8] ss:$16 sps:$4 sm:$0xff]  }
  0xf3   :  { %1994 = vmatpush2.bf16.msra.mxu0 %v11373_v58  ;;  %v11461_v58 = vld [vmem:[#allocation11 + $0x208] ss:$16 sps:$4 sm:$0xff]  }
  0xf4   :  { %2035 = vmatpush2.bf16.msra.mxu1 %v11376_v59  ;;  %1995 = vmatprep.subr.bf16.mxu0 %v11381_v60  ;;  %v11466_v59 = vld [vmem:[#allocation11 + $0x1ec] ss:$16 sps:$4 sm:$0xff]  }
  0xf5   :  { %2036 = vmatprep.subr.bf16.mxu1 %v11384_v61  ;;  %v11469_v60 = vld [vmem:[#allocation11 + $0x3ec] ss:$16 sps:$4 sm:$0xff]   ;;  %v11464_v61 = vld [vmem:[#allocation11 + $0x1e8] ss:$16 sps:$4 sm:$0xff]  }
  0xf7   :  { %1996 = vmatpush2.bf16.msra.mxu0 %v11379_v0  ;;  %v11467_v0 = vld [vmem:[#allocation11 + $0x3e8] ss:$16 sps:$4 sm:$0xff]  }
  0xf8   :  { %2037 = vmatpush2.bf16.msra.mxu1 %v11382_v1  ;;  %1997 = vmatprep.subr.bf16.mxu0 %v11387_v2  ;;  %v11472_v1 = vld [vmem:[#allocation11 + $0x1cc] ss:$16 sps:$4 sm:$0xff]  }
  0xf9   :  { %2038 = vmatprep.subr.bf16.mxu1 %v11390_v4  ;;  %v11475_v2 = vld [vmem:[#allocation11 + $0x3cc] ss:$16 sps:$4 sm:$0xff]   ;;  %v11470_v4 = vld [vmem:[#allocation11 + $0x1c8] ss:$16 sps:$4 sm:$0xff]  }
  0xfb   :  { %1998 = vmatpush2.bf16.msra.mxu0 %v11385_v5  ;;  %v11473_v5 = vld [vmem:[#allocation11 + $0x3c8] ss:$16 sps:$4 sm:$0xff]  }
  0xfc   :  { %2039 = vmatpush2.bf16.msra.mxu1 %v11388_v6  ;;  %1999 = vmatprep.subr.bf16.mxu0 %v11393_v7  ;;  %v11478_v6 = vld [vmem:[#allocation11 + $0x1ac] ss:$16 sps:$4 sm:$0xff]  }
  0xfd   :  { %2040 = vmatprep.subr.bf16.mxu1 %v11396_v8  ;;  %v11481_v7 = vld [vmem:[#allocation11 + $0x3ac] ss:$16 sps:$4 sm:$0xff]   ;;  %v11476_v8 = vld [vmem:[#allocation11 + $0x1a8] ss:$16 sps:$4 sm:$0xff]  }
  0xff   :  { %2000 = vmatpush2.bf16.msra.mxu0 %v11391_v9  ;;  %v11479_v9 = vld [vmem:[#allocation11 + $0x3a8] ss:$16 sps:$4 sm:$0xff]  }
 0x100   :  { %2041 = vmatpush2.bf16.msra.mxu1 %v11394_v10  ;;  %2001 = vmatprep.subr.bf16.mxu0 %v11399_v11  ;;  %v11484_v10 = vld [vmem:[#allocation11 + $0x18c] ss:$16 sps:$4 sm:$0xff]  }
 0x101   :  { %2042 = vmatprep.subr.bf16.mxu1 %v11402_v12  ;;  %v11487_v11 = vld [vmem:[#allocation11 + $0x38c] ss:$16 sps:$4 sm:$0xff]   ;;  %v11482_v12 = vld [vmem:[#allocation11 + $0x188] ss:$16 sps:$4 sm:$0xff]  }
 0x103   :  { %2002 = vmatpush2.bf16.msra.mxu0 %v11397_v13  ;;  %v11485_v13 = vld [vmem:[#allocation11 + $0x388] ss:$16 sps:$4 sm:$0xff]  }
 0x104   :  { %2043 = vmatpush2.bf16.msra.mxu1 %v11400_v15  ;;  %2003 = vmatprep.subr.bf16.mxu0 %v11405_v16  ;;  %v11490_v15 = vld [vmem:[#allocation11 + $0x16c] ss:$16 sps:$4 sm:$0xff]  }
 0x105   :  { %2044 = vmatprep.subr.bf16.mxu1 %v11408_v17  ;;  %v11493_v16 = vld [vmem:[#allocation11 + $0x36c] ss:$16 sps:$4 sm:$0xff]   ;;  %v11488_v17 = vld [vmem:[#allocation11 + $0x168] ss:$16 sps:$4 sm:$0xff]  }
 0x107   :  { %2004 = vmatpush2.bf16.msra.mxu0 %v11403_v20  ;;  %v11491_v20 = vld [vmem:[#allocation11 + $0x368] ss:$16 sps:$4 sm:$0xff]  }
 0x108   :  { %2045 = vmatpush2.bf16.msra.mxu1 %v11406_v21  ;;  %2005 = vmatprep.subr.bf16.mxu0 %v11411_v22  ;;  %v11496_v21 = vld [vmem:[#allocation11 + $0x14c] ss:$16 sps:$4 sm:$0xff]  }
 0x109   :  { %2046 = vmatprep.subr.bf16.mxu1 %v11414_v23  ;;  %v11499_v22 = vld [vmem:[#allocation11 + $0x34c] ss:$16 sps:$4 sm:$0xff]   ;;  %v11494_v23 = vld [vmem:[#allocation11 + $0x148] ss:$16 sps:$4 sm:$0xff]  }
 0x10b   :  { %2006 = vmatpush2.bf16.msra.mxu0 %v11409_v25  ;;  %v11497_v25 = vld [vmem:[#allocation11 + $0x348] ss:$16 sps:$4 sm:$0xff]  }
 0x10c   :  { %2047 = vmatpush2.bf16.msra.mxu1 %v11412_v26  ;;  %2057 = vmatprep.subr.bf16.mxu0 %v11418_v27  ;;  %v11502_v26 = vld [vmem:[#allocation11 + $0x12c] ss:$16 sps:$4 sm:$0xff]  }
 0x10d   :  { %2098 = vmatprep.subr.bf16.mxu1 %v11421_v28  ;;  %v11505_v27 = vld [vmem:[#allocation11 + $0x32c] ss:$16 sps:$4 sm:$0xff]   ;;  %v11500_v28 = vld [vmem:[#allocation11 + $0x128] ss:$16 sps:$4 sm:$0xff]  }
 0x10e   :  { %2008 = vmatmul.mubr.bf16.vlgmr.msra.gmra.mxu0 %v13645_v63 }
 0x10f   :  { %2049 = vmatmul.mubr.bf16.vlgmr.msra.gmra.mxu1 %v13671_v29  ;;  %2058 = vmatpush1.bf16.msra.mxu0 %v11416_v30  ;;  %v11503_v30 = vld [vmem:[#allocation11 + $0x328] ss:$16 sps:$4 sm:$0xff]  }
 0x110   :  { %2099 = vmatpush1.bf16.msra.mxu1 %v11419_v31  ;;  %2059 = vmatprep.subr.bf16.mxu0 %v11424_v32  ;;  %v11508_v31 = vld [vmem:[#allocation11 + $0x10c] ss:$16 sps:$4 sm:$0xff]  }
 0x111   :  { %2100 = vmatprep.subr.bf16.mxu1 %v11427_v33  ;;  %2089 = vmatprep.mubr.bf16.mxu0 %v13643_v62  ;;  %v11443_v62 = vld [vmem:[#allocation11 + $0x268] ss:$16 sps:$4 sm:$0xff]   ;;  %v11511_v32 = vld [vmem:[#allocation11 + $0x30c] ss:$16 sps:$4 sm:$0xff]  }
 0x112   :  { %2130 = vmatprep.mubr.bf16.mxu1 %v13649_v3  ;;  %v11448_v3 = vld [vmem:[#allocation11 + $0x4c] ss:$16 sps:$4 sm:$0xff]   ;;  %v11506_v33 = vld [vmem:[#allocation11 + $0x108] ss:$16 sps:$4 sm:$0xff]  }
 0x113   :  { %2060 = vmatpush1.bf16.msra.mxu0 %v11422_v34  ;;  %v11509_v34 = vld [vmem:[#allocation11 + $0x308] ss:$16 sps:$4 sm:$0xff]  }
 0x114   :  { %2101 = vmatpush1.bf16.msra.mxu1 %v11425_v35  ;;  %2061 = vmatprep.subr.bf16.mxu0 %v11430_v36  ;;  %v11514_v35 = vld [vmem:[#allocation11 + $0x4ec] ss:$16 sps:$4 sm:$0xff]  }
 0x115   :  { %2102 = vmatprep.subr.bf16.mxu1 %v11433_v37  ;;  %v11517_v36 = vld [vmem:[#allocation11 + $0x6ec] ss:$16 sps:$4 sm:$0xff]   ;;  %v11512_v37 = vld [vmem:[#allocation11 + $0x4e8] ss:$16 sps:$4 sm:$0xff]  }
 0x117   :  { %2062 = vmatpush1.bf16.msra.mxu0 %v11428_v38  ;;  %v11515_v38 = vld [vmem:[#allocation11 + $0x6e8] ss:$16 sps:$4 sm:$0xff]  }
 0x118   :  { %2103 = vmatpush1.bf16.msra.mxu1 %v11431_v39  ;;  %2063 = vmatprep.subr.bf16.mxu0 %v11436_v40  ;;  %v11520_v39 = vld [vmem:[#allocation11 + $0x4cc] ss:$16 sps:$4 sm:$0xff]  }
 0x119   :  { %2104 = vmatprep.subr.bf16.mxu1 %v11439_v41  ;;  %v11523_v40 = vld [vmem:[#allocation11 + $0x6cc] ss:$16 sps:$4 sm:$0xff]   ;;  %v11518_v41 = vld [vmem:[#allocation11 + $0x4c8] ss:$16 sps:$4 sm:$0xff]  }
 0x11b   :  { %2064 = vmatpush1.bf16.msra.mxu0 %v11434_v43  ;;  %v11521_v43 = vld [vmem:[#allocation11 + $0x6c8] ss:$16 sps:$4 sm:$0xff]  }
 0x11c   :  { %2105 = vmatpush1.bf16.msra.mxu1 %v11437_v44  ;;  %2065 = vmatprep.subr.bf16.mxu0 %v11442_v45  ;;  %v11526_v44 = vld [vmem:[#allocation11 + $0x4ac] ss:$16 sps:$4 sm:$0xff]  }
 0x11d   :  { %2106 = vmatprep.subr.bf16.mxu1 %v11445_v46  ;;  %v11529_v45 = vld [vmem:[#allocation11 + $0x6ac] ss:$16 sps:$4 sm:$0xff]   ;;  %v11524_v46 = vld [vmem:[#allocation11 + $0x4a8] ss:$16 sps:$4 sm:$0xff]  }
 0x11f   :  { %2066 = vmatpush1.bf16.msra.mxu0 %v11440_v47  ;;  %v11527_v47 = vld [vmem:[#allocation11 + $0x6a8] ss:$16 sps:$4 sm:$0xff]  }
 0x120   :  { %2107 = vmatpush1.bf16.msra.mxu1 %v11443_v62  ;;  %2067 = vmatprep.subr.bf16.mxu0 %v11448_v3  ;;  %v11532_v62 = vld [vmem:[#allocation11 + $0x48c] ss:$16 sps:$4 sm:$0xff]   ;;  %v11530_v3 = vld [vmem:[#allocation11 + $0x488] ss:$16 sps:$4 sm:$0xff]  }
 0x121   :  { %2108 = vmatprep.subr.bf16.mxu1 %v11451_v48  ;;  %v11538_v48 = vld [vmem:[#allocation11 + $0x46c] ss:$16 sps:$4 sm:$0xff]  }
 0x123   :  { %2068 = vmatpush1.bf16.msra.mxu0 %v11446_v49  ;;  %v11541_v49 = vld [vmem:[#allocation11 + $0x66c] ss:$16 sps:$4 sm:$0xff]  }
 0x124   :  { %2109 = vmatpush1.bf16.msra.mxu1 %v11449_v50  ;;  %2069 = vmatprep.subr.bf16.mxu0 %v11454_v51  ;;  %v11536_v50 = vld [vmem:[#allocation11 + $0x468] ss:$16 sps:$4 sm:$0xff]  }
 0x125   :  { %2110 = vmatprep.subr.bf16.mxu1 %v11457_v52  ;;  %v11539_v51 = vld [vmem:[#allocation11 + $0x668] ss:$16 sps:$4 sm:$0xff]  }
 0x126   :  { %v11542_v52 = vld [vmem:[#allocation11 + $0x448] ss:$16 sps:$4 sm:$0xff]  }
 0x127   :  { %2070 = vmatpush1.bf16.msra.mxu0 %v11452_v53  ;;  %v11545_v53 = vld [vmem:[#allocation11 + $0x648] ss:$16 sps:$4 sm:$0xff]  }
 0x128   :  { %2111 = vmatpush1.bf16.msra.mxu1 %v11455_v54  ;;  %2071 = vmatprep.subr.bf16.mxu0 %v11460_v55  ;;  %v11550_v54 = vld [vmem:[#allocation11 + $0x42c] ss:$16 sps:$4 sm:$0xff]  }
 0x129   :  { %2112 = vmatprep.subr.bf16.mxu1 %v11463_v56  ;;  %v11553_v55 = vld [vmem:[#allocation11 + $0x62c] ss:$16 sps:$4 sm:$0xff]   ;;  %v11548_v56 = vld [vmem:[#allocation11 + $0x428] ss:$16 sps:$4 sm:$0xff]  }
 0x12b   :  { %2072 = vmatpush1.bf16.msra.mxu0 %v11458_v57  ;;  %v11551_v57 = vld [vmem:[#allocation11 + $0x628] ss:$16 sps:$4 sm:$0xff]  }
 0x12c   :  { %2113 = vmatpush1.bf16.msra.mxu1 %v11461_v58  ;;  %2073 = vmatprep.subr.bf16.mxu0 %v11466_v59  ;;  %v11556_v58 = vld [vmem:[#allocation11 + $0x40c] ss:$16 sps:$4 sm:$0xff]  }
 0x12d   :  { %2114 = vmatprep.subr.bf16.mxu1 %v11469_v60  ;;  %v11559_v59 = vld [vmem:[#allocation11 + $0x60c] ss:$16 sps:$4 sm:$0xff]   ;;  %v11554_v60 = vld [vmem:[#allocation11 + $0x408] ss:$16 sps:$4 sm:$0xff]  }
 0x12f   :  { %2074 = vmatpush2.bf16.msra.mxu0 %v11464_v61  ;;  %v11557_v61 = vld [vmem:[#allocation11 + $0x608] ss:$16 sps:$4 sm:$0xff]  }
 0x130   :  { %2115 = vmatpush2.bf16.msra.mxu1 %v11467_v0  ;;  %2075 = vmatprep.subr.bf16.mxu0 %v11472_v1  ;;  %v11562_v0 = vld [vmem:[#allocation11 + $0x5ec] ss:$16 sps:$4 sm:$0xff]  }
 0x131   :  { %2116 = vmatprep.subr.bf16.mxu1 %v11475_v2  ;;  %v11565_v1 = vld [vmem:[#allocation11 + $0x7ec] ss:$16 sps:$4 sm:$0xff]   ;;  %v11560_v2 = vld [vmem:[#allocation11 + $0x5e8] ss:$16 sps:$4 sm:$0xff]  }
 0x133   :  { %2076 = vmatpush2.bf16.msra.mxu0 %v11470_v4  ;;  %v11563_v4 = vld [vmem:[#allocation11 + $0x7e8] ss:$16 sps:$4 sm:$0xff]  }
 0x134   :  { %2117 = vmatpush2.bf16.msra.mxu1 %v11473_v5  ;;  %2077 = vmatprep.subr.bf16.mxu0 %v11478_v6  ;;  %v11568_v5 = vld [vmem:[#allocation11 + $0x5cc] ss:$16 sps:$4 sm:$0xff]  }
 0x135   :  { %2118 = vmatprep.subr.bf16.mxu1 %v11481_v7  ;;  %v11571_v6 = vld [vmem:[#allocation11 + $0x7cc] ss:$16 sps:$4 sm:$0xff]   ;;  %v11566_v7 = vld [vmem:[#allocation11 + $0x5c8] ss:$16 sps:$4 sm:$0xff]  }
 0x137   :  { %2078 = vmatpush2.bf16.msra.mxu0 %v11476_v8  ;;  %v11569_v8 = vld [vmem:[#allocation11 + $0x7c8] ss:$16 sps:$4 sm:$0xff]  }
 0x138   :  { %2119 = vmatpush2.bf16.msra.mxu1 %v11479_v9  ;;  %2079 = vmatprep.subr.bf16.mxu0 %v11484_v10  ;;  %v11574_v9 = vld [vmem:[#allocation11 + $0x5ac] ss:$16 sps:$4 sm:$0xff]  }
 0x139   :  { %2120 = vmatprep.subr.bf16.mxu1 %v11487_v11  ;;  %v11577_v10 = vld [vmem:[#allocation11 + $0x7ac] ss:$16 sps:$4 sm:$0xff]   ;;  %v11572_v11 = vld [vmem:[#allocation11 + $0x5a8] ss:$16 sps:$4 sm:$0xff]  }
 0x13b   :  { %2080 = vmatpush2.bf16.msra.mxu0 %v11482_v12  ;;  %v11575_v12 = vld [vmem:[#allocation11 + $0x7a8] ss:$16 sps:$4 sm:$0xff]  }
 0x13c   :  { %2121 = vmatpush2.bf16.msra.mxu1 %v11485_v13  ;;  %2081 = vmatprep.subr.bf16.mxu0 %v11490_v15  ;;  %v11580_v13 = vld [vmem:[#allocation11 + $0x58c] ss:$16 sps:$4 sm:$0xff]  }
 0x13d   :  { %2122 = vmatprep.subr.bf16.mxu1 %v11493_v16  ;;  %v11583_v15 = vld [vmem:[#allocation11 + $0x78c] ss:$16 sps:$4 sm:$0xff]   ;;  %v11578_v16 = vld [vmem:[#allocation11 + $0x588] ss:$16 sps:$4 sm:$0xff]  }
 0x13f   :  { %2082 = vmatpush2.bf16.msra.mxu0 %v11488_v17  ;;  %v11581_v17 = vld [vmem:[#allocation11 + $0x788] ss:$16 sps:$4 sm:$0xff]  }
 0x140   :  { %2123 = vmatpush2.bf16.msra.mxu1 %v11491_v20  ;;  %2083 = vmatprep.subr.bf16.mxu0 %v11496_v21  ;;  %v11586_v20 = vld [vmem:[#allocation11 + $0x56c] ss:$16 sps:$4 sm:$0xff]  }
 0x141   :  { %2124 = vmatprep.subr.bf16.mxu1 %v11499_v22  ;;  %v11589_v21 = vld [vmem:[#allocation11 + $0x76c] ss:$16 sps:$4 sm:$0xff]   ;;  %v11584_v22 = vld [vmem:[#allocation11 + $0x568] ss:$16 sps:$4 sm:$0xff]  }
 0x143   :  { %2084 = vmatpush2.bf16.msra.mxu0 %v11494_v23  ;;  %v11587_v23 = vld [vmem:[#allocation11 + $0x768] ss:$16 sps:$4 sm:$0xff]  }
 0x144   :  { %2125 = vmatpush2.bf16.msra.mxu1 %v11497_v25  ;;  %2085 = vmatprep.subr.bf16.mxu0 %v11502_v26  ;;  %v11592_v25 = vld [vmem:[#allocation11 + $0x54c] ss:$16 sps:$4 sm:$0xff]  }
 0x145   :  { %2126 = vmatprep.subr.bf16.mxu1 %v11505_v27  ;;  %v11595_v26 = vld [vmem:[#allocation11 + $0x74c] ss:$16 sps:$4 sm:$0xff]   ;;  %v11590_v27 = vld [vmem:[#allocation11 + $0x548] ss:$16 sps:$4 sm:$0xff]  }
 0x147   :  { %2086 = vmatpush2.bf16.msra.mxu0 %v11500_v28  ;;  %v11593_v28 = vld [vmem:[#allocation11 + $0x748] ss:$16 sps:$4 sm:$0xff]  }
 0x148   :  { %2127 = vmatpush2.bf16.msra.mxu1 %v11503_v30  ;;  %2087 = vmatprep.subr.bf16.mxu0 %v11508_v31  ;;  %v11598_v30 = vld [vmem:[#allocation11 + $0x52c] ss:$16 sps:$4 sm:$0xff]  }
 0x149   :  { %2128 = vmatprep.subr.bf16.mxu1 %v11511_v32  ;;  %v11601_v31 = vld [vmem:[#allocation11 + $0x72c] ss:$16 sps:$4 sm:$0xff]   ;;  %v11596_v32 = vld [vmem:[#allocation11 + $0x528] ss:$16 sps:$4 sm:$0xff]  }
 0x14b   :  { %2088 = vmatpush2.bf16.msra.mxu0 %v11506_v33  ;;  %v11599_v33 = vld [vmem:[#allocation11 + $0x728] ss:$16 sps:$4 sm:$0xff]  }
 0x14c   :  { %2129 = vmatpush2.bf16.msra.mxu1 %v11509_v34  ;;  %2139 = vmatprep.subr.bf16.mxu0 %v11514_v35  ;;  %v11604_v34 = vld [vmem:[#allocation11 + $0x50c] ss:$16 sps:$4 sm:$0xff]  }
 0x14d   :  { %2180 = vmatprep.subr.bf16.mxu1 %v11517_v36  ;;  %v11607_v35 = vld [vmem:[#allocation11 + $0x70c] ss:$16 sps:$4 sm:$0xff]   ;;  %v11602_v36 = vld [vmem:[#allocation11 + $0x508] ss:$16 sps:$4 sm:$0xff]  }
 0x14e   :  { %2090 = vmatmul.mubr.bf16.vlgmr.msra.gmra.mxu0 %v13653_v14  ;;  %v11535_v14 = vld [vmem:[#allocation11 + $0x68c] ss:$16 sps:$4 sm:$0xff]  }
 0x14f   :  { %2131 = vmatmul.mubr.bf16.vlgmr.msra.gmra.mxu1 %v13659_v19  ;;  %2140 = vmatpush1.bf16.msra.mxu0 %v11512_v37  ;;  %v11533_v19 = vld [vmem:[#allocation11 + $0x688] ss:$16 sps:$4 sm:$0xff]  }
 0x150   :  { %2181 = vmatpush1.bf16.msra.mxu1 %v11515_v38  ;;  %2141 = vmatprep.subr.bf16.mxu0 %v11520_v39  ;;  %v11605_v37 = vld [vmem:[#allocation11 + $0x708] ss:$16 sps:$4 sm:$0xff]   ;;  %v11610_v38 = vld [vmem:[#allocation13 + $0x3f4] ss:$72 sps:$4 sm:$0xff]  }
 0x151   :  { %2182 = vmatprep.subr.bf16.mxu1 %v11523_v40  ;;  %2171 = vmatprep.mubr.bf16.mxu0 %v13655_v18  ;;  %v11544_v18 = vld [vmem:[#allocation11 + $0x44c] ss:$16 sps:$4 sm:$0xff]   ;;  %v11608_v39 = vld [vmem:[#allocation13 + $0x3f0] ss:$72 sps:$4 sm:$0xff]  }
 0x152   :  { %2212 = vmatprep.mubr.bf16.mxu1 %v13663_v24  ;;  %v11547_v24 = vld [vmem:[#allocation11 + $0x64c] ss:$16 sps:$4 sm:$0xff]  }
 0x153   :  { %2142 = vmatpush1.bf16.msra.mxu0 %v11518_v41  ;;  %v11613_v40 = vld [vmem:[#allocation13 + $0x364] ss:$72 sps:$4 sm:$0xff]   ;;  %v11611_v41 = vld [vmem:[#allocation13 + $0x360] ss:$72 sps:$4 sm:$0xff]  }
 0x154   :  { %2183 = vmatpush1.bf16.msra.mxu1 %v11521_v43  ;;  %2143 = vmatprep.subr.bf16.mxu0 %v11526_v44 }
 0x155   :  { %2184 = vmatprep.subr.bf16.mxu1 %v11529_v45 }
 0x157   :  { %2144 = vmatpush1.bf16.msra.mxu0 %v11524_v46 }
 0x158   :  { %2185 = vmatpush1.bf16.msra.mxu1 %v11527_v47  ;;  %2145 = vmatprep.subr.bf16.mxu0 %v11532_v62  ;;  %v11616_v47 = vld [vmem:[#allocation13 + $0x2d4] ss:$72 sps:$4 sm:$0xff]   ;;  %v11614_v62 = vld [vmem:[#allocation13 + $0x2d0] ss:$72 sps:$4 sm:$0xff]  }
 0x159   :  { %2186 = vmatprep.subr.bf16.mxu1 %v11535_v14 }
 0x15b   :  { %2146 = vmatpush1.bf16.msra.mxu0 %v11530_v3 }
 0x15c   :  { %2187 = vmatpush1.bf16.msra.mxu1 %v11533_v19  ;;  %2147 = vmatprep.subr.bf16.mxu0 %v11538_v48 }
 0x15d   :  { %2188 = vmatprep.subr.bf16.mxu1 %v11541_v49  ;;  %v11619_v49 = vld [vmem:[#allocation13 + $0x244] ss:$72 sps:$4 sm:$0xff]  }
 0x15f   :  { %2148 = vmatpush1.bf16.msra.mxu0 %v11536_v50  ;;  %v11617_v50 = vld [vmem:[#allocation13 + $0x240] ss:$72 sps:$4 sm:$0xff]  }
 0x160   :  { %2189 = vmatpush1.bf16.msra.mxu1 %v11539_v51  ;;  %2149 = vmatprep.subr.bf16.mxu0 %v11544_v18  ;;  %v11706_v51 = vld [vmem:[#allocation13 + $0xcf4] ss:$72 sps:$4 sm:$0xff]   ;;  %v11620_v18 = vld [vmem:[#allocation13 + $0x1b0] ss:$72 sps:$4 sm:$0xff]  }
 0x161   :  { %2190 = vmatprep.subr.bf16.mxu1 %v11547_v24  ;;  %v11710_v24 = vld [vmem:[#allocation13 + $0xc60] ss:$72 sps:$4 sm:$0xff]  }
 0x163   :  { %2150 = vmatpush1.bf16.msra.mxu0 %v11542_v52  ;;  %v11712_v52 = vld [vmem:[#allocation13 + $0xc64] ss:$72 sps:$4 sm:$0xff]  }
 0x164   :  { %2191 = vmatpush1.bf16.msra.mxu1 %v11545_v53  ;;  %2151 = vmatprep.subr.bf16.mxu0 %v11550_v54  ;;  %v11625_v53 = vld [vmem:[#allocation13 + $0x124] ss:$72 sps:$4 sm:$0xff]   ;;  %v11623_v54 = vld [vmem:[#allocation13 + $0x120] ss:$72 sps:$4 sm:$0xff]  }
 0x165   :  { %2192 = vmatprep.subr.bf16.mxu1 %v11553_v55  ;;  %v11716_v55 = vld [vmem:[#allocation13 + $0xbd0] ss:$72 sps:$4 sm:$0xff]  }
 0x167   :  { %2152 = vmatpush1.bf16.msra.mxu0 %v11548_v56  ;;  %v11718_v56 = vld [vmem:[#allocation13 + $0xbd4] ss:$72 sps:$4 sm:$0xff]  }
 0x168   :  { %2193 = vmatpush1.bf16.msra.mxu1 %v11551_v57  ;;  %2153 = vmatprep.subr.bf16.mxu0 %v11556_v58  ;;  %v11628_v57 = vld [vmem:[#allocation13 + $0x94] ss:$72 sps:$4 sm:$0xff]   ;;  %v11626_v58 = vld [vmem:[#allocation13 + $0x90] ss:$72 sps:$4 sm:$0xff]  }
 0x169   :  { %2194 = vmatprep.subr.bf16.mxu1 %v11559_v59  ;;  %v11722_v59 = vld [vmem:[#allocation13 + $0xb40] ss:$72 sps:$4 sm:$0xff]  }
 0x16b   :  { %2154 = vmatpush1.bf16.msra.mxu0 %v11554_v60  ;;  %v11724_v60 = vld [vmem:[#allocation13 + $0xb44] ss:$72 sps:$4 sm:$0xff]  }
 0x16c   :  { %2195 = vmatpush1.bf16.msra.mxu1 %v11557_v61  ;;  %2155 = vmatprep.subr.bf16.mxu0 %v11562_v0  ;;  %v11631_v61 = vld [vmem:[#allocation13 + $0x4] ss:$72 sps:$4 sm:$0xff]   ;;  %v11629_v0 = vld [vmem:[#allocation13] ss:$72 sps:$4 sm:$0xff]  }
 0x16d   :  { %2196 = vmatprep.subr.bf16.mxu1 %v11565_v1  ;;  %v11728_v1 = vld [vmem:[#allocation13 + $0xab0] ss:$72 sps:$4 sm:$0xff]  }
 0x16f   :  { %2156 = vmatpush2.bf16.msra.mxu0 %v11560_v2  ;;  %v11730_v2 = vld [vmem:[#allocation13 + $0xab4] ss:$72 sps:$4 sm:$0xff]  }
 0x170   :  { %2197 = vmatpush2.bf16.msra.mxu1 %v11563_v4  ;;  %2157 = vmatprep.subr.bf16.mxu0 %v11568_v5  ;;  %v11634_v4 = vld [vmem:[#allocation13 + $0x874] ss:$72 sps:$4 sm:$0xff]   ;;  %v11632_v5 = vld [vmem:[#allocation13 + $0x870] ss:$72 sps:$4 sm:$0xff]  }
 0x171   :  { %2198 = vmatprep.subr.bf16.mxu1 %v11571_v6  ;;  %v11734_v6 = vld [vmem:[#allocation13 + $0xa20] ss:$72 sps:$4 sm:$0xff]  }
 0x173   :  { %2158 = vmatpush2.bf16.msra.mxu0 %v11566_v7  ;;  %v11736_v7 = vld [vmem:[#allocation13 + $0xa24] ss:$72 sps:$4 sm:$0xff]  }
 0x174   :  { %2199 = vmatpush2.bf16.msra.mxu1 %v11569_v8  ;;  %2159 = vmatprep.subr.bf16.mxu0 %v11574_v9  ;;  %v11637_v8 = vld [vmem:[#allocation13 + $0x7e4] ss:$72 sps:$4 sm:$0xff]   ;;  %v11635_v9 = vld [vmem:[#allocation13 + $0x7e0] ss:$72 sps:$4 sm:$0xff]  }
 0x175   :  { %2200 = vmatprep.subr.bf16.mxu1 %v11577_v10  ;;  %v11740_v10 = vld [vmem:[#allocation13 + $0x990] ss:$72 sps:$4 sm:$0xff]  }
 0x177   :  { %2160 = vmatpush2.bf16.msra.mxu0 %v11572_v11  ;;  %v11742_v11 = vld [vmem:[#allocation13 + $0x994] ss:$72 sps:$4 sm:$0xff]  }
 0x178   :  { %2201 = vmatpush2.bf16.msra.mxu1 %v11575_v12  ;;  %2161 = vmatprep.subr.bf16.mxu0 %v11580_v13  ;;  %v11640_v12 = vld [vmem:[#allocation13 + $0x754] ss:$72 sps:$4 sm:$0xff]   ;;  %v11638_v13 = vld [vmem:[#allocation13 + $0x750] ss:$72 sps:$4 sm:$0xff]  }
 0x179   :  { %2202 = vmatprep.subr.bf16.mxu1 %v11583_v15  ;;  %v11746_v15 = vld [vmem:[#allocation13 + $0x900] ss:$72 sps:$4 sm:$0xff]  }
 0x17b   :  { %2162 = vmatpush2.bf16.msra.mxu0 %v11578_v16  ;;  %v11748_v16 = vld [vmem:[#allocation13 + $0x904] ss:$72 sps:$4 sm:$0xff]  }
 0x17c   :  { %2203 = vmatpush2.bf16.msra.mxu1 %v11581_v17  ;;  %2163 = vmatprep.subr.bf16.mxu0 %v11586_v20  ;;  %v11643_v17 = vld [vmem:[#allocation13 + $0x6c4] ss:$72 sps:$4 sm:$0xff]   ;;  %v11641_v20 = vld [vmem:[#allocation13 + $0x6c0] ss:$72 sps:$4 sm:$0xff]  }
 0x17d   :  { %2204 = vmatprep.subr.bf16.mxu1 %v11589_v21  ;;  %v11752_v21 = vld [vmem:[#allocation13 + $0x1170] ss:$72 sps:$4 sm:$0xff]  }
 0x17f   :  { %2164 = vmatpush2.bf16.msra.mxu0 %v11584_v22  ;;  %v11754_v22 = vld [vmem:[#allocation13 + $0x1174] ss:$72 sps:$4 sm:$0xff]  }
 0x180   :  { %2205 = vmatpush2.bf16.msra.mxu1 %v11587_v23  ;;  %2165 = vmatprep.subr.bf16.mxu0 %v11592_v25  ;;  %v11646_v23 = vld [vmem:[#allocation13 + $0x634] ss:$72 sps:$4 sm:$0xff]   ;;  %v11644_v25 = vld [vmem:[#allocation13 + $0x630] ss:$72 sps:$4 sm:$0xff]  }
 0x181   :  { %2206 = vmatprep.subr.bf16.mxu1 %v11595_v26  ;;  %v11758_v26 = vld [vmem:[#allocation13 + $0x10e0] ss:$72 sps:$4 sm:$0xff]  }
 0x183   :  { %2166 = vmatpush2.bf16.msra.mxu0 %v11590_v27  ;;  %v11760_v27 = vld [vmem:[#allocation13 + $0x10e4] ss:$72 sps:$4 sm:$0xff]  }
 0x184   :  { %2207 = vmatpush2.bf16.msra.mxu1 %v11593_v28  ;;  %2167 = vmatprep.subr.bf16.mxu0 %v11598_v30  ;;  %v11649_v28 = vld [vmem:[#allocation13 + $0x5a4] ss:$72 sps:$4 sm:$0xff]   ;;  %v11647_v30 = vld [vmem:[#allocation13 + $0x5a0] ss:$72 sps:$4 sm:$0xff]  }
 0x185   :  { %2208 = vmatprep.subr.bf16.mxu1 %v11601_v31  ;;  %v11764_v31 = vld [vmem:[#allocation13 + $0x1050] ss:$72 sps:$4 sm:$0xff]  }
 0x187   :  { %2168 = vmatpush2.bf16.msra.mxu0 %v11596_v32  ;;  %v11766_v32 = vld [vmem:[#allocation13 + $0x1054] ss:$72 sps:$4 sm:$0xff]  }
 0x188   :  { %2209 = vmatpush2.bf16.msra.mxu1 %v11599_v33  ;;  %2169 = vmatprep.subr.bf16.mxu0 %v11604_v34  ;;  %v13691_v33 = vld [vmem:[#allocation15] sm:$0xf]  ;;  %v11652_v34 = vld [vmem:[#allocation13 + $0x514] ss:$72 sps:$4 sm:$0xff]  }
 0x189   :  { %2210 = vmatprep.subr.bf16.mxu1 %v11607_v35  ;;  %v13694_v35 = vsub.s32 0, %v13637_v42 }
 0x18b   :  { %2170 = vmatpush2.bf16.msra.mxu0 %v11602_v36  ;;  %v13697_v36 = vsub.s32 1, %v13637_v42 }
 0x18c   :  { %2211 = vmatpush2.bf16.msra.mxu1 %v11605_v37  ;;  %5685 = vmatprep.subr.bf16.mxu0 %v11610_v38  ;;  %v11650_v37 = vld [vmem:[#allocation13 + $0x510] ss:$72 sps:$4 sm:$0xff]   ;;  %v11770_v38 = vld [vmem:[#allocation13 + $0xfc0] ss:$72 sps:$4 sm:$0xff]  }
 0x18d   :  { %5726 = vmatprep.subr.bf16.mxu1 %v11706_v51 }
 0x18e   :  { %v13681_v43 = vpop.f32.mrf.mxu0  ;;  %2172 = vmatmul.mubr.bf16.vlgmr.msra.gmra.mxu0 %v13645_v63  ;;  %v11704_v63 = vld [vmem:[#allocation13 + $0xcf0] ss:$72 sps:$4 sm:$0xff]  }
 0x18f   :  { %v13683_v44 = vpop.f32.mrf.mxu1  ;;  %2213 = vmatmul.mubr.bf16.vlgmr.msra.gmra.mxu1 %v13671_v29  ;;  %5686 = vmatpush1.bf16.msra.mxu0 %v11608_v39  ;;  %v11622_v29 = vld [vmem:[#allocation13 + $0x1b4] ss:$72 sps:$4 sm:$0xff]   ;;  %v11772_v39 = vld [vmem:[#allocation13 + $0xfc4] ss:$72 sps:$4 sm:$0xff]  }
 0x190   :  { %v13687_v45 = vpop.f32.mrf.mxu0  ;;  %5687 = vmatprep.subr.bf16.mxu0 %v11613_v40  ;;  %5727 = vmatpush1.bf16.msra.mxu1 %v11704_v63  ;;  %v11655_v40 = vld [vmem:[#allocation13 + $0x484] ss:$72 sps:$4 sm:$0xff]  }
 0x191   :  { %v13689_v46 = vpop.f32.mrf.mxu1  ;;  %5728 = vmatprep.subr.bf16.mxu1 %v11712_v52  ;;  %v11784_v63 = vld [vmem:[#allocation13 + $0xea4] ss:$72 sps:$4 sm:$0xff]  }
 0x192   :  { %v1931_v14 = vpop.f32.mrf.mxu0 }
 0x193   :  { %v1972_v3 = vpop.f32.mrf.mxu1  ;;  %5688 = vmatpush1.bf16.msra.mxu0 %v11611_v41  ;;  %v538_v41 = vrot.slane %v13691_v33, %v13694_v35  ;;  %v11776_v14 = vld [vmem:[#allocation13 + $0xf30] ss:$72 sps:$4 sm:$0xff]  }
 0x194   :  { %v1932_v19 = vpop.f32.mrf.mxu0  ;;  %5689 = vmatprep.subr.bf16.mxu0 %v11616_v47  ;;  %5729 = vmatpush1.bf16.msra.mxu1 %v11710_v24  ;;  %v542_v47 = vrot.slane %v13691_v33, %v13697_v36  ;;  %v11778_v3 = vld [vmem:[#allocation13 + $0xf34] ss:$72 sps:$4 sm:$0xff]  }
 0x195   :  { %v1973_v48 = vpop.f32.mrf.mxu1  ;;  %5730 = vmatprep.subr.bf16.mxu1 %v11718_v56  ;;  %v11658_v19 = vld [vmem:[#allocation13 + $0x3fc] ss:$72 sps:$4 sm:$0xff]  }
 0x196   :  { %v1928_v48 = vadd.f32 %v13681_v43, %v538_v41  ;;  %v11790_v43 = vld [vmem:[#allocation13 + $0xe14] ss:$72 sps:$4 sm:$0xff]  }
 0x197   :  { %5690 = vmatpush1.bf16.msra.mxu0 %v11614_v62  ;;  %v11653_v62 = vld [vmem:[#allocation13 + $0x480] ss:$72 sps:$4 sm:$0xff]   ;;  %v11700_v41 = vld [vmem:[#allocation13 + $0x51c] ss:$72 sps:$4 sm:$0xff]  }
 0x198   :  { %5691 = vmatprep.subr.bf16.mxu0 %v11619_v49  ;;  %5731 = vmatpush1.bf16.msra.mxu1 %v11716_v55  ;;  %v1930_v49 = vadd.f32 %v13687_v45, %v542_v47  ;;  %v1969_v51 = vadd.f32 %v13683_v44, %v1928_v48  ;;  %v11703_v48 = vld [vmem:[#allocation13 + $0x48c] ss:$72 sps:$4 sm:$0xff]  }
 0x199   :  { %5732 = vmatprep.subr.bf16.mxu1 %v11724_v60 }
 0x19a   :  { %v1971_v24 = vadd.f32 %v13689_v46, %v1930_v49 }
 0x19b   :  { %5692 = vmatpush1.bf16.msra.mxu0 %v11617_v50  ;;  %v11782_v50 = vld [vmem:[#allocation13 + $0xea0] ss:$72 sps:$4 sm:$0xff]  }
 0x19c   :  { %5693 = vmatprep.subr.bf16.mxu0 %v11622_v29  ;;  %5733 = vmatpush1.bf16.msra.mxu1 %v11722_v59 }
 0x19d   :  { %5734 = vmatprep.subr.bf16.mxu1 %v11730_v2  ;;  %v11656_v2 = vld [vmem:[#allocation13 + $0x3f8] ss:$72 sps:$4 sm:$0xff]  }
 0x19f   :  { %5694 = vmatpush1.bf16.msra.mxu0 %v11620_v18 }
 0x1a0   :  { %5695 = vmatprep.subr.bf16.mxu0 %v11625_v53  ;;  %5735 = vmatpush1.bf16.msra.mxu1 %v11728_v1 }
 0x1a1   :  { %5736 = vmatprep.subr.bf16.mxu1 %v11736_v7  ;;  %v11802_v7 = vld [vmem:[#allocation13 + $0xcfc] ss:$72 sps:$4 sm:$0xff]  }
 0x1a3   :  { %5696 = vmatpush1.bf16.msra.mxu0 %v11623_v54 }
 0x1a4   :  { %5697 = vmatprep.subr.bf16.mxu0 %v11628_v57  ;;  %5737 = vmatpush1.bf16.msra.mxu1 %v11734_v6  ;;  %v11788_v57 = vld [vmem:[#allocation13 + $0xe10] ss:$72 sps:$4 sm:$0xff]   ;;  %v11661_v6 = vld [vmem:[#allocation13 + $0x36c] ss:$72 sps:$4 sm:$0xff]  }
 0x1a5   :  { %5738 = vmatprep.subr.bf16.mxu1 %v11742_v11  ;;  %v11667_v11 = vld [vmem:[#allocation13 + $0x24c] ss:$72 sps:$4 sm:$0xff]  }
 0x1a7   :  { %5698 = vmatpush1.bf16.msra.mxu0 %v11626_v58 }
 0x1a8   :  { %5699 = vmatprep.subr.bf16.mxu0 %v11631_v61  ;;  %5739 = vmatpush1.bf16.msra.mxu1 %v11740_v10  ;;  %v11662_v10 = vld [vmem:[#allocation13 + $0x2d8] ss:$72 sps:$4 sm:$0xff]  }
 0x1a9   :  { %5740 = vmatprep.subr.bf16.mxu1 %v11748_v16  ;;  %v11673_v16 = vld [vmem:[#allocation13 + $0x12c] ss:$72 sps:$4 sm:$0xff]  }
 0x1ab   :  { %5700 = vmatpush1.bf16.msra.mxu0 %v11629_v0  ;;  %v11796_v0 = vld [vmem:[#allocation13 + $0xd84] ss:$72 sps:$4 sm:$0xff]  }
 0x1ac   :  { %5701 = vmatprep.subr.bf16.mxu0 %v11634_v4  ;;  %5741 = vmatpush1.bf16.msra.mxu1 %v11746_v15  ;;  %v11794_v4 = vld [vmem:[#allocation13 + $0xd80] ss:$72 sps:$4 sm:$0xff]  }
 0x1ad   :  { %5742 = vmatprep.subr.bf16.mxu1 %v11754_v22  ;;  %v11668_v15 = vld [vmem:[#allocation13 + $0x1b8] ss:$72 sps:$4 sm:$0xff]   ;;  %v11679_v22 = vld [vmem:[#allocation13 + $0xc] ss:$72 sps:$4 sm:$0xff]  }
 0x1af   :  { %5702 = vmatpush2.bf16.msra.mxu0 %v11632_v5 }
 0x1b0   :  { %5703 = vmatprep.subr.bf16.mxu0 %v11637_v8  ;;  %5743 = vmatpush2.bf16.msra.mxu1 %v11752_v21  ;;  %v11659_v8 = vld [vmem:[#allocation13 + $0x368] ss:$72 sps:$4 sm:$0xff]   ;;  %v11674_v21 = vld [vmem:[#allocation13 + $0x98] ss:$72 sps:$4 sm:$0xff]  }
 0x1b1   :  { %5744 = vmatprep.subr.bf16.mxu1 %v11760_v27  ;;  %v11685_v27 = vld [vmem:[#allocation13 + $0x7ec] ss:$72 sps:$4 sm:$0xff]  }
 0x1b3   :  { %5704 = vmatpush2.bf16.msra.mxu0 %v11635_v9  ;;  %v11664_v9 = vld [vmem:[#allocation13 + $0x2dc] ss:$72 sps:$4 sm:$0xff]  }
 0x1b4   :  { %5705 = vmatprep.subr.bf16.mxu0 %v11640_v12  ;;  %5745 = vmatpush2.bf16.msra.mxu1 %v11758_v26  ;;  %v11665_v12 = vld [vmem:[#allocation13 + $0x248] ss:$72 sps:$4 sm:$0xff]   ;;  %v11680_v26 = vld [vmem:[#allocation13 + $0x878] ss:$72 sps:$4 sm:$0xff]  }
 0x1b5   :  { %5746 = vmatprep.subr.bf16.mxu1 %v11766_v32  ;;  %v11691_v32 = vld [vmem:[#allocation13 + $0x6cc] ss:$72 sps:$4 sm:$0xff]  }
 0x1b7   :  { %5706 = vmatpush2.bf16.msra.mxu0 %v11638_v13  ;;  %v11670_v13 = vld [vmem:[#allocation13 + $0x1bc] ss:$72 sps:$4 sm:$0xff]  }
 0x1b8   :  { %5707 = vmatprep.subr.bf16.mxu0 %v11643_v17  ;;  %5747 = vmatpush2.bf16.msra.mxu1 %v11764_v31  ;;  %v11671_v17 = vld [vmem:[#allocation13 + $0x128] ss:$72 sps:$4 sm:$0xff]   ;;  %v11686_v31 = vld [vmem:[#allocation13 + $0x758] ss:$72 sps:$4 sm:$0xff]  }
 0x1b9   :  { %5748 = vmatprep.subr.bf16.mxu1 %v11772_v39  ;;  %v11697_v39 = vld [vmem:[#allocation13 + $0x5ac] ss:$72 sps:$4 sm:$0xff]  }
 0x1bb   :  { %5708 = vmatpush2.bf16.msra.mxu0 %v11641_v20  ;;  %v11676_v20 = vld [vmem:[#allocation13 + $0x9c] ss:$72 sps:$4 sm:$0xff]  }
 0x1bc   :  { %5709 = vmatprep.subr.bf16.mxu0 %v11646_v23  ;;  %5749 = vmatpush2.bf16.msra.mxu1 %v11770_v38  ;;  %v11677_v23 = vld [vmem:[#allocation13 + $0x8] ss:$72 sps:$4 sm:$0xff]   ;;  %v11692_v38 = vld [vmem:[#allocation13 + $0x638] ss:$72 sps:$4 sm:$0xff]  }
 0x1bd   :  { %5750 = vmatprep.subr.bf16.mxu1 %v11778_v3 }
 0x1bf   :  { %5710 = vmatpush2.bf16.msra.mxu0 %v11644_v25  ;;  %v11682_v25 = vld [vmem:[#allocation13 + $0x87c] ss:$72 sps:$4 sm:$0xff]  }
 0x1c0   :  { %5711 = vmatprep.subr.bf16.mxu0 %v11649_v28  ;;  %5751 = vmatpush2.bf16.msra.mxu1 %v11776_v14  ;;  %v11683_v28 = vld [vmem:[#allocation13 + $0x7e8] ss:$72 sps:$4 sm:$0xff]   ;;  %v11698_v14 = vld [vmem:[#allocation13 + $0x518] ss:$72 sps:$4 sm:$0xff]  }
 0x1c1   :  { %5752 = vmatprep.subr.bf16.mxu1 %v11784_v63  ;;  %v11701_v63 = vld [vmem:[#allocation13 + $0x488] ss:$72 sps:$4 sm:$0xff]  }
 0x1c3   :  { %5712 = vmatpush2.bf16.msra.mxu0 %v11647_v30  ;;  %v11688_v30 = vld [vmem:[#allocation13 + $0x75c] ss:$72 sps:$4 sm:$0xff]  }
 0x1c4   :  { %5713 = vmatprep.subr.bf16.mxu0 %v11652_v34  ;;  %5753 = vmatpush2.bf16.msra.mxu1 %v11782_v50  ;;  %v11689_v34 = vld [vmem:[#allocation13 + $0x6c8] ss:$72 sps:$4 sm:$0xff]  }
 0x1c5   :  { %5754 = vmatprep.subr.bf16.mxu1 %v11790_v43  ;;  %v11719_v43 = vld [vmem:[#allocation13 + $0x2e0] ss:$72 sps:$4 sm:$0xff]  }
 0x1c7   :  { %5714 = vmatpush2.bf16.msra.mxu0 %v11650_v37  ;;  %v11694_v37 = vld [vmem:[#allocation13 + $0x63c] ss:$72 sps:$4 sm:$0xff]  }
 0x1c8   :  { %5715 = vmatprep.subr.bf16.mxu0 %v11655_v40  ;;  %5755 = vmatpush2.bf16.msra.mxu1 %v11788_v57  ;;  %v11695_v40 = vld [vmem:[#allocation13 + $0x5a8] ss:$72 sps:$4 sm:$0xff]   ;;  %v11733_v57 = vld [vmem:[#allocation13 + $0x1c4] ss:$72 sps:$4 sm:$0xff]  }
 0x1c9   :  { %5756 = vmatprep.subr.bf16.mxu1 %v11796_v0  ;;  %v11749_v0 = vld [vmem:[#allocation13 + $0x10] ss:$72 sps:$4 sm:$0xff]  }
 0x1cb   :  { %5716 = vmatpush2.bf16.msra.mxu0 %v11653_v62 }
 0x1cc   :  { %5767 = vmatprep.subr.bf16.mxu0 %v11658_v19  ;;  %5757 = vmatpush2.bf16.msra.mxu1 %v11794_v4  ;;  %v11763_v4 = vld [vmem:[#allocation13 + $0x7f4] ss:$72 sps:$4 sm:$0xff]  }
 0x1cd   :  { %5808 = vmatprep.subr.bf16.mxu1 %v11802_v7  ;;  %v11769_v7 = vld [vmem:[#allocation13 + $0x764] ss:$72 sps:$4 sm:$0xff]  }
 0x1ce   :  { %v2009_v29 = vpop.f32.mrf.mxu0 }
 0x1cf   :  { %v2050_v18 = vpop.f32.mrf.mxu1  ;;  %v2010_v52 = vadd.f32 %v2009_v29, %v1969_v51 }
 0x1d0   :  { %v2011_v53 = vpop.f32.mrf.mxu0 }
 0x1d1   :  { %v2052_v54 = vpop.f32.mrf.mxu1  ;;  %v2051_v55 = vadd.f32 %v2050_v18, %v2010_v52  ;;  %v2012_v56 = vadd.f32 %v2011_v53, %v1971_v24  ;;  %v11709_v18 = vld [vmem:[#allocation13 + $0x404] ss:$72 sps:$4 sm:$0xff]   ;;  %v11707_v24 = vld [vmem:[#allocation13 + $0x400] ss:$72 sps:$4 sm:$0xff]   ;;  %v11715_v52 = vld [vmem:[#allocation13 + $0x374] ss:$72 sps:$4 sm:$0xff]  }
 0x1d2   :  { %v2013_v45 = vpop.f32.mrf.mxu0  ;;  %v11713_v53 = vld [vmem:[#allocation13 + $0x370] ss:$72 sps:$4 sm:$0xff]  }
 0x1d3   :  { %v2054_v58 = vpop.f32.mrf.mxu1  ;;  %v2053_v59 = vadd.f32 %v2052_v54, %v2012_v56  ;;  %v2221_v60 = vmax.f32 %v2051_v55, 0.0  ;;  %v11721_v54 = vld [vmem:[#allocation13 + $0x2e4] ss:$72 sps:$4 sm:$0xff]   ;;  %v11727_v55 = vld [vmem:[#allocation13 + $0x254] ss:$72 sps:$4 sm:$0xff]  }
 0x1d4   :  { %v2014_v44 = vpop.f32.mrf.mxu0  ;;  %v11725_v56 = vld [vmem:[#allocation13 + $0x250] ss:$72 sps:$4 sm:$0xff]   ;;  %v11731_v45 = vld [vmem:[#allocation13 + $0x1c0] ss:$72 sps:$4 sm:$0xff]   ;;  %v11739_v58 = vld [vmem:[#allocation13 + $0x134] ss:$72 sps:$4 sm:$0xff]  }
 0x1d5   :  { %v2055_v61 = vpop.f32.mrf.mxu1  ;;  %v2222_v1 = vmax.f32 %v2053_v59, 0.0  ;;  %v13709_v5 = vpack.c.bf16 %v2221_v60, %v2221_v60  ;;  %v11737_v59 = vld [vmem:[#allocation13 + $0x130] ss:$72 sps:$4 sm:$0xff]   ;;  %v11745_v60 = vld [vmem:[#allocation13 + $0xa4] ss:$72 sps:$4 sm:$0xff]  }
 0x1d6   :  { %v11743_v44 = vld [vmem:[#allocation13 + $0xa0] ss:$72 sps:$4 sm:$0xff]   ;;  %v11751_v61 = vld [vmem:[#allocation13 + $0x14] ss:$72 sps:$4 sm:$0xff]  }
 0x1d7   :  { %v13707_v46 = vpack.c.bf16 %v2222_v1, %v2222_v1  ;;  %v11757_v1 = vld [vmem:[#allocation13 + $0x884] ss:$72 sps:$4 sm:$0xff]  }
 0x1d9   :  { %5717 = vmatprep.mubr.bf16.mxu0 %v13707_v46 }
 0x1da   :  { %5718 = vmatmul.mubr.bf16.vlgmr.msra.gmra.mxu0 %v13709_v5 }
 0x1db   :  { %5768 = vmatpush1.bf16.msra.mxu0 %v11656_v2  ;;  %5799 = vmatprep.mubr.bf16.mxu0 %v13707_v46  ;;  %v11755_v2 = vld [vmem:[#allocation13 + $0x880] ss:$72 sps:$4 sm:$0xff]  }
 0x1dc   :  { %5769 = vmatprep.subr.bf16.mxu0 %v11661_v6  ;;  %v11761_v6 = vld [vmem:[#allocation13 + $0x7f0] ss:$72 sps:$4 sm:$0xff]  }
 0x1df   :  { %5770 = vmatpush1.bf16.msra.mxu0 %v11659_v8  ;;  %v11767_v8 = vld [vmem:[#allocation13 + $0x760] ss:$72 sps:$4 sm:$0xff]  }
 0x1e0   :  { %5771 = vmatprep.subr.bf16.mxu0 %v11664_v9  ;;  %v11775_v9 = vld [vmem:[#allocation13 + $0x6d4] ss:$72 sps:$4 sm:$0xff]  }
 0x1e3   :  { %5772 = vmatpush1.bf16.msra.mxu0 %v11662_v10  ;;  %v13725_v10 = vsub.s32 2, %v13637_v42 }
 0x1e4   :  { %5773 = vmatprep.subr.bf16.mxu0 %v11667_v11  ;;  %v11773_v11 = vld [vmem:[#allocation13 + $0x6d0] ss:$72 sps:$4 sm:$0xff]  }
 0x1e7   :  { %5774 = vmatpush1.bf16.msra.mxu0 %v11665_v12  ;;  %v549_v12 = vsub.s32 3, %v13637_v42 }
 0x1e8   :  { %5775 = vmatprep.subr.bf16.mxu0 %v11670_v13  ;;  %v11781_v13 = vld [vmem:[#allocation13 + $0x644] ss:$72 sps:$4 sm:$0xff]  }
 0x1eb   :  { %5776 = vmatpush1.bf16.msra.mxu0 %v11668_v15  ;;  %v546_v15 = vrot.slane %v13691_v33, %v13725_v10 }
 0x1ec   :  { %5777 = vmatprep.subr.bf16.mxu0 %v11673_v16  ;;  %v550_v16 = vrot.slane %v13691_v33, %v549_v12  ;;  %v11791_v33 = vld [vmem:[#allocation13 + $0x520] ss:$72 sps:$4 sm:$0xff]  }
 0x1ef   :  { %5778 = vmatpush1.bf16.msra.mxu0 %v11671_v17  ;;  %v11779_v17 = vld [vmem:[#allocation13 + $0x640] ss:$72 sps:$4 sm:$0xff]  }
 0x1f0   :  { %5779 = vmatprep.subr.bf16.mxu0 %v11676_v20  ;;  %v11787_v20 = vld [vmem:[#allocation13 + $0x5b4] ss:$72 sps:$4 sm:$0xff]  }
 0x1f3   :  { %5780 = vmatpush1.bf16.msra.mxu0 %v11674_v21 }
 0x1f4   :  { %5781 = vmatprep.subr.bf16.mxu0 %v11679_v22 }
 0x1f7   :  { %5782 = vmatpush1.bf16.msra.mxu0 %v11677_v23  ;;  %v11785_v23 = vld [vmem:[#allocation13 + $0x5b0] ss:$72 sps:$4 sm:$0xff]  }
 0x1f8   :  { %5783 = vmatprep.subr.bf16.mxu0 %v11682_v25  ;;  %v11793_v25 = vld [vmem:[#allocation13 + $0x524] ss:$72 sps:$4 sm:$0xff]  }
 0x1fb   :  { %5784 = vmatpush2.bf16.msra.mxu0 %v11680_v26 }
 0x1fc   :  { %5785 = vmatprep.subr.bf16.mxu0 %v11685_v27 }
 0x1ff   :  { %5786 = vmatpush2.bf16.msra.mxu0 %v11683_v28 }
 0x200   :  { %5787 = vmatprep.subr.bf16.mxu0 %v11688_v30 }
 0x203   :  { %5788 = vmatpush2.bf16.msra.mxu0 %v11686_v31 }
 0x204   :  { %5789 = vmatprep.subr.bf16.mxu0 %v11691_v32 }
 0x207   :  { %5790 = vmatpush2.bf16.msra.mxu0 %v11689_v34 }
 0x208   :  { %5791 = vmatprep.subr.bf16.mxu0 %v11694_v37  ;;  %v11799_v37 = vld [vmem:[#allocation13 + $0x494] ss:$72 sps:$4 sm:$0xff]  }
 0x20b   :  { %5792 = vmatpush2.bf16.msra.mxu0 %v11692_v38 }
 0x20c   :  { %5793 = vmatprep.subr.bf16.mxu0 %v11697_v39 }
 0x20e   :  { %v13714_v47 = vpop.f32.mrf.mxu0 }
 0x20f   :  { %v13716_v62 = vpop.f32.mrf.mxu1  ;;  %5794 = vmatpush2.bf16.msra.mxu0 %v11695_v40  ;;  %v2092_v21 = vadd.f32 %v13714_v47, %v546_v15  ;;  %v11847_v15 = vld [vmem:[#allocation13 + $0x1c] ss:$72 sps:$4 sm:$0xff]  }
 0x210   :  { %v13718_v3 = vpop.f32.mrf.mxu0  ;;  %5795 = vmatprep.subr.bf16.mxu0 %v11700_v41 }
 0x211   :  { %v13720_v19 = vpop.f32.mrf.mxu1  ;;  %v2094_v22 = vadd.f32 %v13718_v3, %v550_v16  ;;  %v2133_v26 = vadd.f32 %v13716_v62, %v2092_v21  ;;  %v11842_v16 = vld [vmem:[#allocation13 + $0x908] ss:$72 sps:$4 sm:$0xff]   ;;  %v11853_v21 = vld [vmem:[#allocation13 + $0x88c] ss:$72 sps:$4 sm:$0xff]  }
 0x212   :  { %v2095_v49 = vpop.f32.mrf.mxu0 }
 0x213   :  { %v2136_v50 = vpop.f32.mrf.mxu1  ;;  %5796 = vmatpush2.bf16.msra.mxu0 %v11698_v14  ;;  %v2135_v30 = vadd.f32 %v13720_v19, %v2094_v22  ;;  %v11797_v14 = vld [vmem:[#allocation13 + $0x490] ss:$72 sps:$4 sm:$0xff]   ;;  %v11805_v49 = vld [vmem:[#allocation13 + $0x40c] ss:$72 sps:$4 sm:$0xff]  }
 0x214   :  { %v2096_v51 = vpop.f32.mrf.mxu0  ;;  %5797 = vmatprep.subr.bf16.mxu0 %v11703_v48  ;;  %v11848_v22 = vld [vmem:[#allocation13 + $0x1178] ss:$72 sps:$4 sm:$0xff]  }
 0x215   :  { %v2137_v29 = vpop.f32.mrf.mxu1  ;;  %v11803_v51 = vld [vmem:[#allocation13 + $0x408] ss:$72 sps:$4 sm:$0xff]  }
 0x217   :  { %5798 = vmatpush2.bf16.msra.mxu0 %v11701_v63  ;;  %v11800_v63 = vld [vmem:[#allocation13 + $0xcf8] ss:$72 sps:$4 sm:$0xff]  }
 0x218   :  { %5849 = vmatprep.subr.bf16.mxu0 %v11709_v18  ;;  %v11808_v18 = vld [vmem:[#allocation13 + $0xc6c] ss:$72 sps:$4 sm:$0xff]  }
 0x21a   :  { %5800 = vmatmul.mubr.bf16.vlgmr.msra.gmra.mxu0 %v13709_v5 }
 0x21b   :  { %5850 = vmatpush1.bf16.msra.mxu0 %v11707_v24  ;;  %5881 = vmatprep.mubr.bf16.mxu0 %v13707_v46  ;;  %v11811_v24 = vld [vmem:[#allocation13 + $0x37c] ss:$72 sps:$4 sm:$0xff]  }
 0x21c   :  { %5851 = vmatprep.subr.bf16.mxu0 %v11715_v52  ;;  %v11806_v52 = vld [vmem:[#allocation13 + $0xc68] ss:$72 sps:$4 sm:$0xff]  }
 0x21f   :  { %5852 = vmatpush1.bf16.msra.mxu0 %v11713_v53  ;;  %v11809_v53 = vld [vmem:[#allocation13 + $0x378] ss:$72 sps:$4 sm:$0xff]  }
 0x220   :  { %5853 = vmatprep.subr.bf16.mxu0 %v11721_v54  ;;  %v11814_v54 = vld [vmem:[#allocation13 + $0xbdc] ss:$72 sps:$4 sm:$0xff]  }
 0x223   :  { %5854 = vmatpush1.bf16.msra.mxu0 %v11719_v43  ;;  %v11817_v43 = vld [vmem:[#allocation13 + $0x2ec] ss:$72 sps:$4 sm:$0xff]  }
 0x224   :  { %5855 = vmatprep.subr.bf16.mxu0 %v11727_v55  ;;  %v11812_v55 = vld [vmem:[#allocation13 + $0xbd8] ss:$72 sps:$4 sm:$0xff]  }
 0x227   :  { %5856 = vmatpush1.bf16.msra.mxu0 %v11725_v56  ;;  %v11815_v56 = vld [vmem:[#allocation13 + $0x2e8] ss:$72 sps:$4 sm:$0xff]  }
 0x228   :  { %5857 = vmatprep.subr.bf16.mxu0 %v11733_v57  ;;  %v11820_v57 = vld [vmem:[#allocation13 + $0xb4c] ss:$72 sps:$4 sm:$0xff]  }
 0x22b   :  { %5858 = vmatpush1.bf16.msra.mxu0 %v11731_v45  ;;  %v11823_v45 = vld [vmem:[#allocation13 + $0x25c] ss:$72 sps:$4 sm:$0xff]  }
 0x22c   :  { %5859 = vmatprep.subr.bf16.mxu0 %v11739_v58  ;;  %v11818_v58 = vld [vmem:[#allocation13 + $0xb48] ss:$72 sps:$4 sm:$0xff]  }
 0x22f   :  { %5860 = vmatpush1.bf16.msra.mxu0 %v11737_v59  ;;  %v11821_v59 = vld [vmem:[#allocation13 + $0x258] ss:$72 sps:$4 sm:$0xff]  }
 0x230   :  { %5861 = vmatprep.subr.bf16.mxu0 %v11745_v60  ;;  %v11826_v60 = vld [vmem:[#allocation13 + $0xabc] ss:$72 sps:$4 sm:$0xff]  }
 0x233   :  { %5862 = vmatpush1.bf16.msra.mxu0 %v11743_v44  ;;  %v11829_v44 = vld [vmem:[#allocation13 + $0x1cc] ss:$72 sps:$4 sm:$0xff]  }
 0x234   :  { %5863 = vmatprep.subr.bf16.mxu0 %v11751_v61  ;;  %v11824_v61 = vld [vmem:[#allocation13 + $0xab8] ss:$72 sps:$4 sm:$0xff]  }
 0x237   :  { %5864 = vmatpush1.bf16.msra.mxu0 %v11749_v0  ;;  %v11827_v0 = vld [vmem:[#allocation13 + $0x1c8] ss:$72 sps:$4 sm:$0xff]  }
 0x238   :  { %5865 = vmatprep.subr.bf16.mxu0 %v11757_v1  ;;  %v11832_v1 = vld [vmem:[#allocation13 + $0xa2c] ss:$72 sps:$4 sm:$0xff]  }
 0x23b   :  { %5866 = vmatpush2.bf16.msra.mxu0 %v11755_v2  ;;  %v11835_v2 = vld [vmem:[#allocation13 + $0x13c] ss:$72 sps:$4 sm:$0xff]  }
 0x23c   :  { %5867 = vmatprep.subr.bf16.mxu0 %v11763_v4  ;;  %v11830_v4 = vld [vmem:[#allocation13 + $0xa28] ss:$72 sps:$4 sm:$0xff]  }
 0x23f   :  { %5868 = vmatpush2.bf16.msra.mxu0 %v11761_v6  ;;  %v11833_v6 = vld [vmem:[#allocation13 + $0x138] ss:$72 sps:$4 sm:$0xff]  }
 0x240   :  { %5869 = vmatprep.subr.bf16.mxu0 %v11769_v7  ;;  %v11838_v7 = vld [vmem:[#allocation13 + $0x99c] ss:$72 sps:$4 sm:$0xff]  }
 0x243   :  { %5870 = vmatpush2.bf16.msra.mxu0 %v11767_v8  ;;  %v11841_v8 = vld [vmem:[#allocation13 + $0xac] ss:$72 sps:$4 sm:$0xff]  }
 0x244   :  { %5871 = vmatprep.subr.bf16.mxu0 %v11775_v9  ;;  %v11836_v9 = vld [vmem:[#allocation13 + $0x998] ss:$72 sps:$4 sm:$0xff]  }
 0x247   :  { %5872 = vmatpush2.bf16.msra.mxu0 %v11773_v11  ;;  %v11839_v11 = vld [vmem:[#allocation13 + $0xa8] ss:$72 sps:$4 sm:$0xff]  }
 0x248   :  { %5873 = vmatprep.subr.bf16.mxu0 %v11781_v13  ;;  %v11844_v13 = vld [vmem:[#allocation13 + $0x90c] ss:$72 sps:$4 sm:$0xff]  }
 0x24b   :  { %5874 = vmatpush2.bf16.msra.mxu0 %v11779_v17  ;;  %v11845_v17 = vld [vmem:[#allocation13 + $0x18] ss:$72 sps:$4 sm:$0xff]  }
 0x24c   :  { %5875 = vmatprep.subr.bf16.mxu0 %v11787_v20  ;;  %v11850_v20 = vld [vmem:[#allocation13 + $0x117c] ss:$72 sps:$4 sm:$0xff]  }
 0x24e   :  { %v2173_v27 = vpop.f32.mrf.mxu0 }
 0x24f   :  { %v2214_v28 = vpop.f32.mrf.mxu1  ;;  %v2174_v31 = vadd.f32 %v2173_v27, %v2133_v26  ;;  %5876 = vmatpush2.bf16.msra.mxu0 %v11785_v23  ;;  %v11851_v23 = vld [vmem:[#allocation13 + $0x888] ss:$72 sps:$4 sm:$0xff]   ;;  %v11859_v26 = vld [vmem:[#allocation13 + $0x7fc] ss:$72 sps:$4 sm:$0xff]  }
 0x250   :  { %v2175_v32 = vpop.f32.mrf.mxu0  ;;  %5877 = vmatprep.subr.bf16.mxu0 %v11793_v25  ;;  %v11856_v25 = vld [vmem:[#allocation13 + $0x10ec] ss:$72 sps:$4 sm:$0xff]   ;;  %v11854_v27 = vld [vmem:[#allocation13 + $0x10e8] ss:$72 sps:$4 sm:$0xff]  }
 0x251   :  { %v2216_v34 = vpop.f32.mrf.mxu1  ;;  %v2215_v38 = vadd.f32 %v2214_v28, %v2174_v31  ;;  %v2176_v39 = vadd.f32 %v2175_v32, %v2135_v30  ;;  %v11857_v28 = vld [vmem:[#allocation13 + $0x7f8] ss:$72 sps:$4 sm:$0xff]   ;;  %v11862_v30 = vld [vmem:[#allocation13 + $0x105c] ss:$72 sps:$4 sm:$0xff]   ;;  %v11865_v31 = vld [vmem:[#allocation13 + $0x76c] ss:$72 sps:$4 sm:$0xff]  }
 0x252   :  { %v2177_v40 = vpop.f32.mrf.mxu0  ;;  %v11863_v32 = vld [vmem:[#allocation13 + $0x768] ss:$72 sps:$4 sm:$0xff]  }
 0x253   :  { %v2218_v41 = vpop.f32.mrf.mxu1  ;;  %v2217_v47 = vadd.f32 %v2216_v34, %v2176_v39  ;;  %5878 = vmatpush2.bf16.msra.mxu0 %v11791_v33  ;;  %v2223_v3 = vmax.f32 %v2215_v38, 0.0  ;;  %v11860_v33 = vld [vmem:[#allocation13 + $0x1058] ss:$72 sps:$4 sm:$0xff]   ;;  %v11868_v34 = vld [vmem:[#allocation13 + $0xfcc] ss:$72 sps:$4 sm:$0xff]  }
 0x254   :  { %v2178_v62 = vpop.f32.mrf.mxu0  ;;  %5879 = vmatprep.subr.bf16.mxu0 %v11799_v37  ;;  %v11871_v37 = vld [vmem:[#allocation13 + $0x6dc] ss:$72 sps:$4 sm:$0xff]   ;;  %v11866_v38 = vld [vmem:[#allocation13 + $0xfc8] ss:$72 sps:$4 sm:$0xff]   ;;  %v11869_v39 = vld [vmem:[#allocation13 + $0x6d8] ss:$72 sps:$4 sm:$0xff]  }
 0x255   :  { %v2219_v48 = vpop.f32.mrf.mxu1  ;;  %v2224_v19 = vmax.f32 %v2217_v47, 0.0  ;;  %v13739_v29 = vpack.c.bf16 %v2223_v3, %v2223_v3  ;;  %v11874_v40 = vld [vmem:[#allocation13 + $0xf3c] ss:$72 sps:$4 sm:$0xff]   ;;  %v11877_v41 = vld [vmem:[#allocation13 + $0x64c] ss:$72 sps:$4 sm:$0xff]  }
 0x256   :  { %v11872_v47 = vld [vmem:[#allocation13 + $0xf38] ss:$72 sps:$4 sm:$0xff]   ;;  %v11880_v3 = vld [vmem:[#allocation13 + $0xeac] ss:$72 sps:$4 sm:$0xff]   ;;  %v11883_v62 = vld [vmem:[#allocation13 + $0x5bc] ss:$72 sps:$4 sm:$0xff]  }
 0x257   :  { %v13737_v50 = vpack.c.bf16 %v2224_v19, %v2224_v19  ;;  %5880 = vmatpush2.bf16.msra.mxu0 %v11797_v14  ;;  %v11875_v14 = vld [vmem:[#allocation13 + $0x648] ss:$72 sps:$4 sm:$0xff]   ;;  %v11886_v19 = vld [vmem:[#allocation13 + $0xe1c] ss:$72 sps:$4 sm:$0xff]  }
 0x258   :  { %5931 = vmatprep.subr.bf16.mxu0 %v11805_v49  ;;  %v11878_v48 = vld [vmem:[#allocation13 + $0xea8] ss:$72 sps:$4 sm:$0xff]   ;;  %v11881_v49 = vld [vmem:[#allocation13 + $0x5b8] ss:$72 sps:$4 sm:$0xff]  }
 0x259   :  { %5758 = vmatprep.mubr.bf16.mxu1 %v13737_v50 }
 0x25a   :  { %5882 = vmatmul.mubr.bf16.vlgmr.msra.gmra.mxu0 %v13709_v5  ;;  %5759 = vmatmul.mubr.bf16.vlgmr.msra.gmra.mxu1 %v13739_v29 }
 0x25b   :  { %5809 = vmatpush1.bf16.msra.mxu1 %v11800_v63  ;;  %5932 = vmatpush1.bf16.msra.mxu0 %v11803_v51  ;;  %v11889_v63 = vld [vmem:[#allocation13 + $0x52c] ss:$72 sps:$4 sm:$0xff]   ;;  %v11884_v51 = vld [vmem:[#allocation13 + $0xe18] ss:$72 sps:$4 sm:$0xff]  }
 0x25c   :  { %5963 = vmatprep.mubr.bf16.mxu0 %v13707_v46  ;;  %5840 = vmatprep.mubr.bf16.mxu1 %v13737_v50 }
 0x25d   :  { %5810 = vmatprep.subr.bf16.mxu1 %v11808_v18  ;;  %5933 = vmatprep.subr.bf16.mxu0 %v11811_v24  ;;  %v11887_v18 = vld [vmem:[#allocation13 + $0x528] ss:$72 sps:$4 sm:$0xff]   ;;  %v11892_v24 = vld [vmem:[#allocation13 + $0xd8c] ss:$72 sps:$4 sm:$0xff]  }
 0x25f   :  { %5811 = vmatpush1.bf16.msra.mxu1 %v11806_v52  ;;  %5934 = vmatpush1.bf16.msra.mxu0 %v11809_v53  ;;  %v11895_v52 = vld [vmem:[#allocation13 + $0x49c] ss:$72 sps:$4 sm:$0xff]   ;;  %v11890_v53 = vld [vmem:[#allocation13 + $0xd88] ss:$72 sps:$4 sm:$0xff]  }
 0x260   :  { %5812 = vmatprep.subr.bf16.mxu1 %v11814_v54  ;;  %5935 = vmatprep.subr.bf16.mxu0 %v11817_v43  ;;  %v11893_v54 = vld [vmem:[#allocation13 + $0x498] ss:$72 sps:$4 sm:$0xff]   ;;  %v11898_v43 = vld [vmem:[#allocation13 + $0xd04] ss:$72 sps:$4 sm:$0xff]  }
 0x263   :  { %5813 = vmatpush1.bf16.msra.mxu1 %v11812_v55  ;;  %5936 = vmatpush1.bf16.msra.mxu0 %v11815_v56  ;;  %v11901_v55 = vld [vmem:[#allocation13 + $0x414] ss:$72 sps:$4 sm:$0xff]   ;;  %v11896_v56 = vld [vmem:[#allocation13 + $0xd00] ss:$72 sps:$4 sm:$0xff]  }
 0x264   :  { %5814 = vmatprep.subr.bf16.mxu1 %v11820_v57  ;;  %5937 = vmatprep.subr.bf16.mxu0 %v11823_v45  ;;  %v11899_v57 = vld [vmem:[#allocation13 + $0x410] ss:$72 sps:$4 sm:$0xff]   ;;  %v11904_v45 = vld [vmem:[#allocation13 + $0xc74] ss:$72 sps:$4 sm:$0xff]  }
 0x267   :  { %5815 = vmatpush1.bf16.msra.mxu1 %v11818_v58  ;;  %5938 = vmatpush1.bf16.msra.mxu0 %v11821_v59  ;;  %v11907_v58 = vld [vmem:[#allocation13 + $0x384] ss:$72 sps:$4 sm:$0xff]  }
 0x268   :  { %5816 = vmatprep.subr.bf16.mxu1 %v11826_v60  ;;  %5939 = vmatprep.subr.bf16.mxu0 %v11829_v44  ;;  %v11902_v60 = vld [vmem:[#allocation13 + $0xc70] ss:$72 sps:$4 sm:$0xff]  }
 0x26b   :  { %5817 = vmatpush1.bf16.msra.mxu1 %v11824_v61  ;;  %5940 = vmatpush1.bf16.msra.mxu0 %v11827_v0  ;;  %v11905_v61 = vld [vmem:[#allocation13 + $0x380] ss:$72 sps:$4 sm:$0xff]   ;;  %v11910_v0 = vld [vmem:[#allocation13 + $0xbe4] ss:$72 sps:$4 sm:$0xff]  }
 0x26c   :  { %5818 = vmatprep.subr.bf16.mxu1 %v11832_v1  ;;  %5941 = vmatprep.subr.bf16.mxu0 %v11835_v2  ;;  %v11913_v1 = vld [vmem:[#allocation13 + $0x2f4] ss:$72 sps:$4 sm:$0xff]  }
 0x26f   :  { %5819 = vmatpush1.bf16.msra.mxu1 %v11830_v4  ;;  %5942 = vmatpush1.bf16.msra.mxu0 %v11833_v6  ;;  %v11908_v4 = vld [vmem:[#allocation13 + $0xbe0] ss:$72 sps:$4 sm:$0xff]  }
 0x270   :  { %5820 = vmatprep.subr.bf16.mxu1 %v11838_v7  ;;  %5943 = vmatprep.subr.bf16.mxu0 %v11841_v8  ;;  %v11911_v7 = vld [vmem:[#allocation13 + $0x2f0] ss:$72 sps:$4 sm:$0xff]   ;;  %v11916_v8 = vld [vmem:[#allocation13 + $0xb54] ss:$72 sps:$4 sm:$0xff]  }
 0x273   :  { %5821 = vmatpush1.bf16.msra.mxu1 %v11836_v9  ;;  %5944 = vmatpush1.bf16.msra.mxu0 %v11839_v11  ;;  %v11919_v9 = vld [vmem:[#allocation13 + $0x264] ss:$72 sps:$4 sm:$0xff]   ;;  %v11914_v11 = vld [vmem:[#allocation13 + $0xb50] ss:$72 sps:$4 sm:$0xff]  }
 0x274   :  { %5822 = vmatprep.subr.bf16.mxu1 %v11844_v13  ;;  %5945 = vmatprep.subr.bf16.mxu0 %v11847_v15  ;;  %v11917_v13 = vld [vmem:[#allocation13 + $0x260] ss:$72 sps:$4 sm:$0xff]   ;;  %v11922_v15 = vld [vmem:[#allocation13 + $0xac4] ss:$72 sps:$4 sm:$0xff]  }
 0x277   :  { %5823 = vmatpush1.bf16.msra.mxu1 %v11842_v16  ;;  %5946 = vmatpush1.bf16.msra.mxu0 %v11845_v17  ;;  %v11925_v16 = vld [vmem:[#allocation13 + $0x1d4] ss:$72 sps:$4 sm:$0xff]   ;;  %v11920_v17 = vld [vmem:[#allocation13 + $0xac0] ss:$72 sps:$4 sm:$0xff]  }
 0x278   :  { %5824 = vmatprep.subr.bf16.mxu1 %v11850_v20  ;;  %5947 = vmatprep.subr.bf16.mxu0 %v11853_v21  ;;  %v11923_v20 = vld [vmem:[#allocation13 + $0x1d0] ss:$72 sps:$4 sm:$0xff]   ;;  %v11928_v21 = vld [vmem:[#allocation13 + $0xa34] ss:$72 sps:$4 sm:$0xff]  }
 0x27b   :  { %5825 = vmatpush2.bf16.msra.mxu1 %v11848_v22  ;;  %5948 = vmatpush2.bf16.msra.mxu0 %v11851_v23  ;;  %v11931_v22 = vld [vmem:[#allocation13 + $0x144] ss:$72 sps:$4 sm:$0xff]   ;;  %v11926_v23 = vld [vmem:[#allocation13 + $0xa30] ss:$72 sps:$4 sm:$0xff]  }
 0x27c   :  { %5826 = vmatprep.subr.bf16.mxu1 %v11856_v25  ;;  %5949 = vmatprep.subr.bf16.mxu0 %v11859_v26  ;;  %v11929_v25 = vld [vmem:[#allocation13 + $0x140] ss:$72 sps:$4 sm:$0xff]   ;;  %v11934_v26 = vld [vmem:[#allocation13 + $0x9a4] ss:$72 sps:$4 sm:$0xff]  }
 0x27f   :  { %5827 = vmatpush2.bf16.msra.mxu1 %v11854_v27  ;;  %5950 = vmatpush2.bf16.msra.mxu0 %v11857_v28  ;;  %v11937_v27 = vld [vmem:[#allocation13 + $0xb4] ss:$72 sps:$4 sm:$0xff]   ;;  %v11932_v28 = vld [vmem:[#allocation13 + $0x9a0] ss:$72 sps:$4 sm:$0xff]  }
 0x280   :  { %5828 = vmatprep.subr.bf16.mxu1 %v11862_v30  ;;  %5951 = vmatprep.subr.bf16.mxu0 %v11865_v31  ;;  %v11935_v30 = vld [vmem:[#allocation13 + $0xb0] ss:$72 sps:$4 sm:$0xff]   ;;  %v11940_v31 = vld [vmem:[#allocation13 + $0x914] ss:$72 sps:$4 sm:$0xff]  }
 0x283   :  { %5829 = vmatpush2.bf16.msra.mxu1 %v11860_v33  ;;  %5952 = vmatpush2.bf16.msra.mxu0 %v11863_v32  ;;  %v11943_v33 = vld [vmem:[#allocation13 + $0x24] ss:$72 sps:$4 sm:$0xff]   ;;  %v11938_v32 = vld [vmem:[#allocation13 + $0x910] ss:$72 sps:$4 sm:$0xff]  }
 0x284   :  { %5830 = vmatprep.subr.bf16.mxu1 %v11868_v34  ;;  %5953 = vmatprep.subr.bf16.mxu0 %v11871_v37  ;;  %v11941_v34 = vld [vmem:[#allocation13 + $0x20] ss:$72 sps:$4 sm:$0xff]   ;;  %v11946_v37 = vld [vmem:[#allocation13 + $0x1184] ss:$72 sps:$4 sm:$0xff]  }
 0x287   :  { %5831 = vmatpush2.bf16.msra.mxu1 %v11866_v38  ;;  %5954 = vmatpush2.bf16.msra.mxu0 %v11869_v39  ;;  %v11949_v38 = vld [vmem:[#allocation13 + $0x894] ss:$72 sps:$4 sm:$0xff]   ;;  %v11944_v39 = vld [vmem:[#allocation13 + $0x1180] ss:$72 sps:$4 sm:$0xff]  }
 0x288   :  { %5832 = vmatprep.subr.bf16.mxu1 %v11874_v40  ;;  %5955 = vmatprep.subr.bf16.mxu0 %v11877_v41  ;;  %v11947_v40 = vld [vmem:[#allocation13 + $0x890] ss:$72 sps:$4 sm:$0xff]   ;;  %v11952_v41 = vld [vmem:[#allocation13 + $0x10f4] ss:$72 sps:$4 sm:$0xff]  }
 0x28b   :  { %5833 = vmatpush2.bf16.msra.mxu1 %v11872_v47  ;;  %5956 = vmatpush2.bf16.msra.mxu0 %v11875_v14  ;;  %v11955_v47 = vld [vmem:[#allocation13 + $0x804] ss:$72 sps:$4 sm:$0xff]   ;;  %v11950_v14 = vld [vmem:[#allocation13 + $0x10f0] ss:$72 sps:$4 sm:$0xff]  }
 0x28c   :  { %5834 = vmatprep.subr.bf16.mxu1 %v11880_v3  ;;  %5957 = vmatprep.subr.bf16.mxu0 %v11883_v62  ;;  %v11953_v3 = vld [vmem:[#allocation13 + $0x800] ss:$72 sps:$4 sm:$0xff]   ;;  %v11958_v62 = vld [vmem:[#allocation13 + $0x1064] ss:$72 sps:$4 sm:$0xff]  }
 0x28f   :  { %5835 = vmatpush2.bf16.msra.mxu1 %v11878_v48  ;;  %5958 = vmatpush2.bf16.msra.mxu0 %v11881_v49  ;;  %v11961_v48 = vld [vmem:[#allocation13 + $0x774] ss:$72 sps:$4 sm:$0xff]   ;;  %v11956_v49 = vld [vmem:[#allocation13 + $0x1060] ss:$72 sps:$4 sm:$0xff]  }
 0x290   :  { %5836 = vmatprep.subr.bf16.mxu1 %v11886_v19  ;;  %5959 = vmatprep.subr.bf16.mxu0 %v11889_v63  ;;  %v11959_v19 = vld [vmem:[#allocation13 + $0x770] ss:$72 sps:$4 sm:$0xff]   ;;  %v11964_v63 = vld [vmem:[#allocation13 + $0xfd4] ss:$72 sps:$4 sm:$0xff]  }
 0x293   :  { %5837 = vmatpush2.bf16.msra.mxu1 %v11884_v51  ;;  %5960 = vmatpush2.bf16.msra.mxu0 %v11887_v18  ;;  %v11967_v51 = vld [vmem:[#allocation13 + $0x6e4] ss:$72 sps:$4 sm:$0xff]   ;;  %v11962_v18 = vld [vmem:[#allocation13 + $0xfd0] ss:$72 sps:$4 sm:$0xff]  }
 0x294   :  { %5838 = vmatprep.subr.bf16.mxu1 %v11892_v24  ;;  %5961 = vmatprep.subr.bf16.mxu0 %v11895_v52  ;;  %v11965_v24 = vld [vmem:[#allocation13 + $0x6e0] ss:$72 sps:$4 sm:$0xff]   ;;  %v11970_v52 = vld [vmem:[#allocation13 + $0xf44] ss:$72 sps:$4 sm:$0xff]  }
 0x297   :  { %5839 = vmatpush2.bf16.msra.mxu1 %v11890_v53  ;;  %5962 = vmatpush2.bf16.msra.mxu0 %v11893_v54  ;;  %v11973_v53 = vld [vmem:[#allocation13 + $0x654] ss:$72 sps:$4 sm:$0xff]   ;;  %v11968_v54 = vld [vmem:[#allocation13 + $0xf40] ss:$72 sps:$4 sm:$0xff]  }
 0x298   :  { %5890 = vmatprep.subr.bf16.mxu1 %v11898_v43  ;;  %6013 = vmatprep.subr.bf16.mxu0 %v11901_v55  ;;  %v11971_v43 = vld [vmem:[#allocation13 + $0x650] ss:$72 sps:$4 sm:$0xff]   ;;  %v11976_v55 = vld [vmem:[#allocation13 + $0xeb4] ss:$72 sps:$4 sm:$0xff]  }
 0x29a   :  { %5841 = vmatmul.mubr.bf16.vlgmr.msra.gmra.mxu1 %v13739_v29  ;;  %5964 = vmatmul.mubr.bf16.vlgmr.msra.gmra.mxu0 %v13709_v5  ;;  %v13748_v59 = vpop.f32.mrf.mxu0 }
 0x29b   :  { %5891 = vmatpush1.bf16.msra.mxu1 %v11896_v56  ;;  %5922 = vmatprep.mubr.bf16.mxu1 %v13737_v50  ;;  %v11979_v56 = vld [vmem:[#allocation13 + $0x5c4] ss:$72 sps:$4 sm:$0xff]  }
 0x29c   :  { %6014 = vmatpush1.bf16.msra.mxu0 %v11899_v57  ;;  %6045 = vmatprep.mubr.bf16.mxu0 %v13707_v46  ;;  %v13752_v44 = vpop.f32.mrf.mxu0  ;;  %v11974_v57 = vld [vmem:[#allocation13 + $0xeb0] ss:$72 sps:$4 sm:$0xff]  }
 0x29d   :  { %5892 = vmatprep.subr.bf16.mxu1 %v11904_v45  ;;  %6015 = vmatprep.subr.bf16.mxu0 %v11907_v58  ;;  %v11977_v45 = vld [vmem:[#allocation13 + $0x5c0] ss:$72 sps:$4 sm:$0xff]   ;;  %v11982_v58 = vld [vmem:[#allocation13 + $0xe24] ss:$72 sps:$4 sm:$0xff]  }
 0x29e   :  { %v5723_v2 = vpop.f32.mrf.mxu0 }
 0x29f   :  { %5893 = vmatpush1.bf16.msra.mxu1 %v11902_v60  ;;  %v11985_v60 = vld [vmem:[#allocation13 + $0x534] ss:$72 sps:$4 sm:$0xff]   ;;  %v11991_v2 = vld [vmem:[#allocation13 + $0x4a4] ss:$72 sps:$4 sm:$0xff]  }
 0x2a0   :  { %6016 = vmatpush1.bf16.msra.mxu0 %v11905_v61  ;;  %v5724_v6 = vpop.f32.mrf.mxu0  ;;  %5894 = vmatprep.subr.bf16.mxu1 %v11910_v0  ;;  %v11980_v61 = vld [vmem:[#allocation13 + $0xe20] ss:$72 sps:$4 sm:$0xff]   ;;  %v11983_v0 = vld [vmem:[#allocation13 + $0x530] ss:$72 sps:$4 sm:$0xff]  }
 0x2a1   :  { %6017 = vmatprep.subr.bf16.mxu0 %v11913_v1  ;;  %v11988_v1 = vld [vmem:[#allocation13 + $0xd94] ss:$72 sps:$4 sm:$0xff]   ;;  %v11989_v6 = vld [vmem:[#allocation13 + $0x4a0] ss:$72 sps:$4 sm:$0xff]  }
 0x2a3   :  { %5895 = vmatpush1.bf16.msra.mxu1 %v11908_v4  ;;  %v11986_v4 = vld [vmem:[#allocation13 + $0xd90] ss:$72 sps:$4 sm:$0xff]  }
 0x2a4   :  { %6018 = vmatpush1.bf16.msra.mxu0 %v11911_v7  ;;  %5896 = vmatprep.subr.bf16.mxu1 %v11916_v8  ;;  %v11994_v7 = vld [vmem:[#allocation13 + $0xd0c] ss:$72 sps:$4 sm:$0xff]   ;;  %v11997_v8 = vld [vmem:[#allocation13 + $0x41c] ss:$72 sps:$4 sm:$0xff]  }
 0x2a5   :  { %6019 = vmatprep.subr.bf16.mxu0 %v11919_v9  ;;  %v11992_v9 = vld [vmem:[#allocation13 + $0xd08] ss:$72 sps:$4 sm:$0xff]  }
 0x2a7   :  { %5897 = vmatpush1.bf16.msra.mxu1 %v11914_v11  ;;  %v11995_v11 = vld [vmem:[#allocation13 + $0x418] ss:$72 sps:$4 sm:$0xff]  }
 0x2a8   :  { %6020 = vmatpush1.bf16.msra.mxu0 %v11917_v13  ;;  %5898 = vmatprep.subr.bf16.mxu1 %v11922_v15  ;;  %v12000_v13 = vld [vmem:[#allocation13 + $0xc7c] ss:$72 sps:$4 sm:$0xff]  }
 0x2a9   :  { %6021 = vmatprep.subr.bf16.mxu0 %v11925_v16  ;;  %v12003_v16 = vld [vmem:[#allocation13 + $0x38c] ss:$72 sps:$4 sm:$0xff]  }
 0x2ab   :  { %5899 = vmatpush1.bf16.msra.mxu1 %v11920_v17  ;;  %v11998_v17 = vld [vmem:[#allocation13 + $0xc78] ss:$72 sps:$4 sm:$0xff]  }
 0x2ac   :  { %6022 = vmatpush1.bf16.msra.mxu0 %v11923_v20  ;;  %5900 = vmatprep.subr.bf16.mxu1 %v11928_v21  ;;  %v12001_v21 = vld [vmem:[#allocation13 + $0x388] ss:$72 sps:$4 sm:$0xff]  }
 0x2ad   :  { %6023 = vmatprep.subr.bf16.mxu0 %v11931_v22  ;;  %v12006_v22 = vld [vmem:[#allocation13 + $0xbec] ss:$72 sps:$4 sm:$0xff]  }
 0x2af   :  { %5901 = vmatpush1.bf16.msra.mxu1 %v11926_v23  ;;  %v12009_v23 = vld [vmem:[#allocation13 + $0x2fc] ss:$72 sps:$4 sm:$0xff]  }
 0x2b0   :  { %6024 = vmatpush1.bf16.msra.mxu0 %v11929_v25  ;;  %5902 = vmatprep.subr.bf16.mxu1 %v11934_v26  ;;  %v12004_v26 = vld [vmem:[#allocation13 + $0xbe8] ss:$72 sps:$4 sm:$0xff]  }
 0x2b1   :  { %6025 = vmatprep.subr.bf16.mxu0 %v11937_v27 }
 0x2b3   :  { %5903 = vmatpush1.bf16.msra.mxu1 %v11932_v28  ;;  %v12007_v28 = vld [vmem:[#allocation13 + $0x2f8] ss:$72 sps:$4 sm:$0xff]  }
 0x2b4   :  { %6026 = vmatpush1.bf16.msra.mxu0 %v11935_v30  ;;  %5904 = vmatprep.subr.bf16.mxu1 %v11940_v31  ;;  %v12012_v30 = vld [vmem:[#allocation13 + $0xb5c] ss:$72 sps:$4 sm:$0xff]   ;;  %v12015_v31 = vld [vmem:[#allocation13 + $0x26c] ss:$72 sps:$4 sm:$0xff]  }
 0x2b5   :  { %6027 = vmatprep.subr.bf16.mxu0 %v11943_v33  ;;  %v12010_v33 = vld [vmem:[#allocation13 + $0xb58] ss:$72 sps:$4 sm:$0xff]  }
 0x2b7   :  { %5905 = vmatpush1.bf16.msra.mxu1 %v11938_v32  ;;  %v12013_v32 = vld [vmem:[#allocation13 + $0x268] ss:$72 sps:$4 sm:$0xff]  }
 0x2b8   :  { %6028 = vmatpush1.bf16.msra.mxu0 %v11941_v34  ;;  %5906 = vmatprep.subr.bf16.mxu1 %v11946_v37  ;;  %v12018_v34 = vld [vmem:[#allocation13 + $0xacc] ss:$72 sps:$4 sm:$0xff]   ;;  %v12021_v37 = vld [vmem:[#allocation13 + $0x1dc] ss:$72 sps:$4 sm:$0xff]  }
 0x2b9   :  { %6029 = vmatprep.subr.bf16.mxu0 %v11949_v38  ;;  %v12016_v38 = vld [vmem:[#allocation13 + $0xac8] ss:$72 sps:$4 sm:$0xff]  }
 0x2bb   :  { %5907 = vmatpush2.bf16.msra.mxu1 %v11944_v39  ;;  %v12019_v39 = vld [vmem:[#allocation13 + $0x1d8] ss:$72 sps:$4 sm:$0xff]  }
 0x2bc   :  { %6030 = vmatpush2.bf16.msra.mxu0 %v11947_v40  ;;  %5908 = vmatprep.subr.bf16.mxu1 %v11952_v41  ;;  %v12024_v40 = vld [vmem:[#allocation13 + $0xa3c] ss:$72 sps:$4 sm:$0xff]   ;;  %v12027_v41 = vld [vmem:[#allocation13 + $0x14c] ss:$72 sps:$4 sm:$0xff]  }
 0x2bd   :  { %6031 = vmatprep.subr.bf16.mxu0 %v11955_v47  ;;  %v12022_v47 = vld [vmem:[#allocation13 + $0xa38] ss:$72 sps:$4 sm:$0xff]  }
 0x2bf   :  { %5909 = vmatpush2.bf16.msra.mxu1 %v11950_v14  ;;  %v12025_v14 = vld [vmem:[#allocation13 + $0x148] ss:$72 sps:$4 sm:$0xff]  }
 0x2c0   :  { %6032 = vmatpush2.bf16.msra.mxu0 %v11953_v3  ;;  %5910 = vmatprep.subr.bf16.mxu1 %v11958_v62  ;;  %v12030_v3 = vld [vmem:[#allocation13 + $0x9ac] ss:$72 sps:$4 sm:$0xff]   ;;  %v12033_v62 = vld [vmem:[#allocation13 + $0xbc] ss:$72 sps:$4 sm:$0xff]  }
 0x2c1   :  { %6033 = vmatprep.subr.bf16.mxu0 %v11961_v48  ;;  %v12028_v48 = vld [vmem:[#allocation13 + $0x9a8] ss:$72 sps:$4 sm:$0xff]  }
 0x2c3   :  { %5911 = vmatpush2.bf16.msra.mxu1 %v11956_v49  ;;  %v12031_v49 = vld [vmem:[#allocation13 + $0xb8] ss:$72 sps:$4 sm:$0xff]  }
 0x2c4   :  { %6034 = vmatpush2.bf16.msra.mxu0 %v11959_v19  ;;  %5912 = vmatprep.subr.bf16.mxu1 %v11964_v63  ;;  %v12036_v19 = vld [vmem:[#allocation13 + $0x91c] ss:$72 sps:$4 sm:$0xff]   ;;  %v12039_v63 = vld [vmem:[#allocation13 + $0x2c] ss:$72 sps:$4 sm:$0xff]  }
 0x2c5   :  { %6035 = vmatprep.subr.bf16.mxu0 %v11967_v51  ;;  %v12034_v51 = vld [vmem:[#allocation13 + $0x918] ss:$72 sps:$4 sm:$0xff]  }
 0x2c7   :  { %5913 = vmatpush2.bf16.msra.mxu1 %v11962_v18  ;;  %v12037_v18 = vld [vmem:[#allocation13 + $0x28] ss:$72 sps:$4 sm:$0xff]  }
 0x2c8   :  { %6036 = vmatpush2.bf16.msra.mxu0 %v11965_v24  ;;  %5914 = vmatprep.subr.bf16.mxu1 %v11970_v52  ;;  %v12042_v24 = vld [vmem:[#allocation13 + $0x118c] ss:$72 sps:$4 sm:$0xff]   ;;  %v12045_v52 = vld [vmem:[#allocation13 + $0x89c] ss:$72 sps:$4 sm:$0xff]  }
 0x2c9   :  { %6037 = vmatprep.subr.bf16.mxu0 %v11973_v53  ;;  %v12040_v53 = vld [vmem:[#allocation13 + $0x1188] ss:$72 sps:$4 sm:$0xff]  }
 0x2cb   :  { %5915 = vmatpush2.bf16.msra.mxu1 %v11968_v54  ;;  %v12043_v54 = vld [vmem:[#allocation13 + $0x898] ss:$72 sps:$4 sm:$0xff]  }
 0x2cc   :  { %6038 = vmatpush2.bf16.msra.mxu0 %v11971_v43  ;;  %5916 = vmatprep.subr.bf16.mxu1 %v11976_v55  ;;  %v12048_v43 = vld [vmem:[#allocation13 + $0x10fc] ss:$72 sps:$4 sm:$0xff]   ;;  %v12051_v55 = vld [vmem:[#allocation13 + $0x80c] ss:$72 sps:$4 sm:$0xff]  }
 0x2cd   :  { %6039 = vmatprep.subr.bf16.mxu0 %v11979_v56  ;;  %v12046_v56 = vld [vmem:[#allocation13 + $0x10f8] ss:$72 sps:$4 sm:$0xff]  }
 0x2cf   :  { %5917 = vmatpush2.bf16.msra.mxu1 %v11974_v57  ;;  %v12049_v57 = vld [vmem:[#allocation13 + $0x808] ss:$72 sps:$4 sm:$0xff]  }
 0x2d0   :  { %6040 = vmatpush2.bf16.msra.mxu0 %v11977_v45  ;;  %5918 = vmatprep.subr.bf16.mxu1 %v11982_v58  ;;  %v12054_v45 = vld [vmem:[#allocation13 + $0x106c] ss:$72 sps:$4 sm:$0xff]   ;;  %v12057_v58 = vld [vmem:[#allocation13 + $0x77c] ss:$72 sps:$4 sm:$0xff]  }
 0x2d1   :  { %6041 = vmatprep.subr.bf16.mxu0 %v11985_v60  ;;  %v12052_v60 = vld [vmem:[#allocation13 + $0x1068] ss:$72 sps:$4 sm:$0xff]  }
 0x2d3   :  { %5919 = vmatpush2.bf16.msra.mxu1 %v11980_v61  ;;  %v12055_v61 = vld [vmem:[#allocation13 + $0x778] ss:$72 sps:$4 sm:$0xff]  }
 0x2d4   :  { %6042 = vmatpush2.bf16.msra.mxu0 %v11983_v0  ;;  %5920 = vmatprep.subr.bf16.mxu1 %v11988_v1  ;;  %v12060_v0 = vld [vmem:[#allocation13 + $0xfdc] ss:$72 sps:$4 sm:$0xff]   ;;  %v12063_v1 = vld [vmem:[#allocation13 + $0x6ec] ss:$72 sps:$4 sm:$0xff]  }
 0x2d5   :  { %6043 = vmatprep.subr.bf16.mxu0 %v11991_v2  ;;  %v12058_v2 = vld [vmem:[#allocation13 + $0xfd8] ss:$72 sps:$4 sm:$0xff]  }
 0x2d7   :  { %5921 = vmatpush2.bf16.msra.mxu1 %v11986_v4  ;;  %v12061_v4 = vld [vmem:[#allocation13 + $0x6e8] ss:$72 sps:$4 sm:$0xff]  }
 0x2d8   :  { %6044 = vmatpush2.bf16.msra.mxu0 %v11989_v6  ;;  %5972 = vmatprep.subr.bf16.mxu1 %v11994_v7  ;;  %v12066_v6 = vld [vmem:[#allocation13 + $0xf4c] ss:$72 sps:$4 sm:$0xff]   ;;  %v12069_v7 = vld [vmem:[#allocation13 + $0x65c] ss:$72 sps:$4 sm:$0xff]  }
 0x2d9   :  { %6095 = vmatprep.subr.bf16.mxu0 %v11997_v8  ;;  %v12064_v8 = vld [vmem:[#allocation13 + $0xf48] ss:$72 sps:$4 sm:$0xff]  }
 0x2da   :  { %v13754_v15 = vpop.f32.mrf.mxu0  ;;  %5923 = vmatmul.mubr.bf16.vlgmr.msra.gmra.mxu1 %v13739_v29 }
 0x2db   :  { %6046 = vmatmul.mubr.bf16.vlgmr.msra.gmra.mxu0 %v13709_v5  ;;  %5973 = vmatpush1.bf16.msra.mxu1 %v11992_v9  ;;  %v12067_v9 = vld [vmem:[#allocation13 + $0x658] ss:$72 sps:$4 sm:$0xff]  }
 0x2dc   :  { %6004 = vmatprep.mubr.bf16.mxu1 %v13737_v50  ;;  %6096 = vmatpush1.bf16.msra.mxu0 %v11995_v11  ;;  %v13759_v20 = vpop.f32.mrf.mxu0  ;;  %v12072_v11 = vld [vmem:[#allocation13 + $0xebc] ss:$72 sps:$4 sm:$0xff]  }
 0x2dd   :  { %6127 = vmatprep.mubr.bf16.mxu0 %v13707_v46  ;;  %5974 = vmatprep.subr.bf16.mxu1 %v12000_v13  ;;  %v12075_v13 = vld [vmem:[#allocation13 + $0x5cc] ss:$72 sps:$4 sm:$0xff]  }
 0x2de   :  { %v5805_v25 = vpop.f32.mrf.mxu0  ;;  %6097 = vmatprep.subr.bf16.mxu0 %v12003_v16  ;;  %v12070_v16 = vld [vmem:[#allocation13 + $0xeb8] ss:$72 sps:$4 sm:$0xff]  }
 0x2df   :  { %5975 = vmatpush1.bf16.msra.mxu1 %v11998_v17  ;;  %v12073_v17 = vld [vmem:[#allocation13 + $0x5c8] ss:$72 sps:$4 sm:$0xff]   ;;  %v12079_v25 = vld [vmem:[#allocation13 + $0x538] ss:$72 sps:$4 sm:$0xff]  }
 0x2e0   :  { %6098 = vmatpush1.bf16.msra.mxu0 %v12001_v21  ;;  %v5806_v27 = vpop.f32.mrf.mxu0  ;;  %5976 = vmatprep.subr.bf16.mxu1 %v12006_v22  ;;  %v12078_v21 = vld [vmem:[#allocation13 + $0xe2c] ss:$72 sps:$4 sm:$0xff]   ;;  %v12081_v22 = vld [vmem:[#allocation13 + $0x53c] ss:$72 sps:$4 sm:$0xff]  }
 0x2e1   :  { %6099 = vmatprep.subr.bf16.mxu0 %v12009_v23  ;;  %v12076_v23 = vld [vmem:[#allocation13 + $0xe28] ss:$72 sps:$4 sm:$0xff]   ;;  %v12087_v27 = vld [vmem:[#allocation13 + $0x4ac] ss:$72 sps:$4 sm:$0xff]  }
 0x2e3   :  { %5977 = vmatpush1.bf16.msra.mxu1 %v12004_v26  ;;  %v12084_v26 = vld [vmem:[#allocation13 + $0xd9c] ss:$72 sps:$4 sm:$0xff]  }
 0x2e4   :  { %6100 = vmatpush1.bf16.msra.mxu0 %v12007_v28  ;;  %5978 = vmatprep.subr.bf16.mxu1 %v12012_v30  ;;  %v12082_v28 = vld [vmem:[#allocation13 + $0xd98] ss:$72 sps:$4 sm:$0xff]   ;;  %v12085_v30 = vld [vmem:[#allocation13 + $0x4a8] ss:$72 sps:$4 sm:$0xff]  }
 0x2e5   :  { %6101 = vmatprep.subr.bf16.mxu0 %v12015_v31  ;;  %v12090_v31 = vld [vmem:[#allocation13 + $0xd14] ss:$72 sps:$4 sm:$0xff]  }
 0x2e7   :  { %5979 = vmatpush1.bf16.msra.mxu1 %v12010_v33  ;;  %v12093_v33 = vld [vmem:[#allocation13 + $0x424] ss:$72 sps:$4 sm:$0xff]  }
 0x2e8   :  { %6102 = vmatpush1.bf16.msra.mxu0 %v12013_v32  ;;  %5980 = vmatprep.subr.bf16.mxu1 %v12018_v34  ;;  %v12088_v32 = vld [vmem:[#allocation13 + $0xd10] ss:$72 sps:$4 sm:$0xff]   ;;  %v12091_v34 = vld [vmem:[#allocation13 + $0x420] ss:$72 sps:$4 sm:$0xff]  }
 0x2e9   :  { %6103 = vmatprep.subr.bf16.mxu0 %v12021_v37  ;;  %v12096_v37 = vld [vmem:[#allocation13 + $0xc84] ss:$72 sps:$4 sm:$0xff]  }
 0x2eb   :  { %5981 = vmatpush1.bf16.msra.mxu1 %v12016_v38 }
 0x2ec   :  { %6104 = vmatpush1.bf16.msra.mxu0 %v12019_v39  ;;  %5982 = vmatprep.subr.bf16.mxu1 %v12024_v40  ;;  %v12099_v40 = vld [vmem:[#allocation13 + $0x394] ss:$72 sps:$4 sm:$0xff]  }
 0x2ed   :  { %6105 = vmatprep.subr.bf16.mxu0 %v12027_v41  ;;  %v12094_v41 = vld [vmem:[#allocation13 + $0xc80] ss:$72 sps:$4 sm:$0xff]  }
 0x2ef   :  { %5983 = vmatpush1.bf16.msra.mxu1 %v12022_v47 }
 0x2f0   :  { %6106 = vmatpush1.bf16.msra.mxu0 %v12025_v14  ;;  %5984 = vmatprep.subr.bf16.mxu1 %v12030_v3  ;;  %v12097_v3 = vld [vmem:[#allocation13 + $0x390] ss:$72 sps:$4 sm:$0xff]  }
 0x2f1   :  { %6107 = vmatprep.subr.bf16.mxu0 %v12033_v62  ;;  %v12102_v62 = vld [vmem:[#allocation13 + $0xbf4] ss:$72 sps:$4 sm:$0xff]  }
 0x2f3   :  { %5985 = vmatpush1.bf16.msra.mxu1 %v12028_v48  ;;  %v12105_v48 = vld [vmem:[#allocation13 + $0x304] ss:$72 sps:$4 sm:$0xff]  }
 0x2f4   :  { %6108 = vmatpush1.bf16.msra.mxu0 %v12031_v49  ;;  %5986 = vmatprep.subr.bf16.mxu1 %v12036_v19 }
 0x2f5   :  { %6109 = vmatprep.subr.bf16.mxu0 %v12039_v63  ;;  %v12100_v63 = vld [vmem:[#allocation13 + $0xbf0] ss:$72 sps:$4 sm:$0xff]  }
 0x2f7   :  { %5987 = vmatpush1.bf16.msra.mxu1 %v12034_v51 }
 0x2f8   :  { %6110 = vmatpush1.bf16.msra.mxu0 %v12037_v18  ;;  %5988 = vmatprep.subr.bf16.mxu1 %v12042_v24  ;;  %v12103_v24 = vld [vmem:[#allocation13 + $0x300] ss:$72 sps:$4 sm:$0xff]  }
 0x2f9   :  { %6111 = vmatprep.subr.bf16.mxu0 %v12045_v52  ;;  %v12108_v52 = vld [vmem:[#allocation13 + $0xb64] ss:$72 sps:$4 sm:$0xff]  }
 0x2fb   :  { %5989 = vmatpush2.bf16.msra.mxu1 %v12040_v53  ;;  %v12111_v53 = vld [vmem:[#allocation13 + $0x274] ss:$72 sps:$4 sm:$0xff]  }
 0x2fc   :  { %6112 = vmatpush2.bf16.msra.mxu0 %v12043_v54  ;;  %5990 = vmatprep.subr.bf16.mxu1 %v12048_v43  ;;  %v12106_v54 = vld [vmem:[#allocation13 + $0xb60] ss:$72 sps:$4 sm:$0xff]   ;;  %v12109_v43 = vld [vmem:[#allocation13 + $0x270] ss:$72 sps:$4 sm:$0xff]  }
 0x2fd   :  { %6113 = vmatprep.subr.bf16.mxu0 %v12051_v55  ;;  %v12114_v55 = vld [vmem:[#allocation13 + $0xad4] ss:$72 sps:$4 sm:$0xff]  }
 0x2ff   :  { %5991 = vmatpush2.bf16.msra.mxu1 %v12046_v56  ;;  %v12117_v56 = vld [vmem:[#allocation13 + $0x1e4] ss:$72 sps:$4 sm:$0xff]  }
 0x300   :  { %6114 = vmatpush2.bf16.msra.mxu0 %v12049_v57  ;;  %5992 = vmatprep.subr.bf16.mxu1 %v12054_v45  ;;  %v12112_v57 = vld [vmem:[#allocation13 + $0xad0] ss:$72 sps:$4 sm:$0xff]   ;;  %v12115_v45 = vld [vmem:[#allocation13 + $0x1e0] ss:$72 sps:$4 sm:$0xff]  }
 0x301   :  { %6115 = vmatprep.subr.bf16.mxu0 %v12057_v58  ;;  %v12120_v58 = vld [vmem:[#allocation13 + $0xa44] ss:$72 sps:$4 sm:$0xff]  }
 0x303   :  { %5993 = vmatpush2.bf16.msra.mxu1 %v12052_v60  ;;  %v12123_v60 = vld [vmem:[#allocation13 + $0x154] ss:$72 sps:$4 sm:$0xff]  }
 0x304   :  { %6116 = vmatpush2.bf16.msra.mxu0 %v12055_v61  ;;  %5994 = vmatprep.subr.bf16.mxu1 %v12060_v0  ;;  %v12118_v61 = vld [vmem:[#allocation13 + $0xa40] ss:$72 sps:$4 sm:$0xff]   ;;  %v12121_v0 = vld [vmem:[#allocation13 + $0x150] ss:$72 sps:$4 sm:$0xff]  }
 0x305   :  { %6117 = vmatprep.subr.bf16.mxu0 %v12063_v1  ;;  %v12126_v1 = vld [vmem:[#allocation13 + $0x9b4] ss:$72 sps:$4 sm:$0xff]  }
 0x307   :  { %5995 = vmatpush2.bf16.msra.mxu1 %v12058_v2  ;;  %v12129_v2 = vld [vmem:[#allocation13 + $0xc4] ss:$72 sps:$4 sm:$0xff]  }
 0x308   :  { %6118 = vmatpush2.bf16.msra.mxu0 %v12061_v4  ;;  %5996 = vmatprep.subr.bf16.mxu1 %v12066_v6  ;;  %v12124_v4 = vld [vmem:[#allocation13 + $0x9b0] ss:$72 sps:$4 sm:$0xff]   ;;  %v12127_v6 = vld [vmem:[#allocation13 + $0xc0] ss:$72 sps:$4 sm:$0xff]  }
 0x309   :  { %6119 = vmatprep.subr.bf16.mxu0 %v12069_v7  ;;  %v12132_v7 = vld [vmem:[#allocation13 + $0x924] ss:$72 sps:$4 sm:$0xff]  }
 0x30b   :  { %5997 = vmatpush2.bf16.msra.mxu1 %v12064_v8  ;;  %v12135_v8 = vld [vmem:[#allocation13 + $0x34] ss:$72 sps:$4 sm:$0xff]  }
 0x30c   :  { %6120 = vmatpush2.bf16.msra.mxu0 %v12067_v9  ;;  %5998 = vmatprep.subr.bf16.mxu1 %v12072_v11  ;;  %v12130_v9 = vld [vmem:[#allocation13 + $0x920] ss:$72 sps:$4 sm:$0xff]   ;;  %v12133_v11 = vld [vmem:[#allocation13 + $0x30] ss:$72 sps:$4 sm:$0xff]  }
 0x30d   :  { %6121 = vmatprep.subr.bf16.mxu0 %v12075_v13  ;;  %v12138_v13 = vld [vmem:[#allocation13 + $0x1194] ss:$72 sps:$4 sm:$0xff]  }
 0x30f   :  { %5999 = vmatpush2.bf16.msra.mxu1 %v12070_v16  ;;  %v12141_v16 = vld [vmem:[#allocation13 + $0x8a4] ss:$72 sps:$4 sm:$0xff]  }
 0x310   :  { %6122 = vmatpush2.bf16.msra.mxu0 %v12073_v17  ;;  %6000 = vmatprep.subr.bf16.mxu1 %v12078_v21  ;;  %v12136_v17 = vld [vmem:[#allocation13 + $0x1190] ss:$72 sps:$4 sm:$0xff]   ;;  %v12139_v21 = vld [vmem:[#allocation13 + $0x8a0] ss:$72 sps:$4 sm:$0xff]  }
 0x311   :  { %6123 = vmatprep.subr.bf16.mxu0 %v12081_v22  ;;  %v12144_v22 = vld [vmem:[#allocation13 + $0x1104] ss:$72 sps:$4 sm:$0xff]  }
 0x313   :  { %6001 = vmatpush2.bf16.msra.mxu1 %v12076_v23  ;;  %v12147_v23 = vld [vmem:[#allocation13 + $0x814] ss:$72 sps:$4 sm:$0xff]  }
 0x314   :  { %6124 = vmatpush2.bf16.msra.mxu0 %v12079_v25  ;;  %6002 = vmatprep.subr.bf16.mxu1 %v12084_v26  ;;  %v12142_v25 = vld [vmem:[#allocation13 + $0x1100] ss:$72 sps:$4 sm:$0xff]   ;;  %v12145_v26 = vld [vmem:[#allocation13 + $0x810] ss:$72 sps:$4 sm:$0xff]  }
 0x315   :  { %6125 = vmatprep.subr.bf16.mxu0 %v12087_v27  ;;  %v12150_v27 = vld [vmem:[#allocation13 + $0x1074] ss:$72 sps:$4 sm:$0xff]  }
 0x317   :  { %6003 = vmatpush2.bf16.msra.mxu1 %v12082_v28  ;;  %v12153_v28 = vld [vmem:[#allocation13 + $0x784] ss:$72 sps:$4 sm:$0xff]  }
 0x318   :  { %6126 = vmatpush2.bf16.msra.mxu0 %v12085_v30  ;;  %6054 = vmatprep.subr.bf16.mxu1 %v12090_v31  ;;  %v12148_v30 = vld [vmem:[#allocation13 + $0x1070] ss:$72 sps:$4 sm:$0xff]   ;;  %v12151_v31 = vld [vmem:[#allocation13 + $0x780] ss:$72 sps:$4 sm:$0xff]  }
 0x319   :  { %6177 = vmatprep.subr.bf16.mxu0 %v12093_v33  ;;  %v12156_v33 = vld [vmem:[#allocation13 + $0xfe4] ss:$72 sps:$4 sm:$0xff]  }
 0x31a   :  { %v13762_v38 = vpop.f32.mrf.mxu0  ;;  %6005 = vmatmul.mubr.bf16.vlgmr.msra.gmra.mxu1 %v13739_v29  ;;  %v13765_v39 = vpop.f32.mrf.mxu1 }
 0x31b   :  { %6128 = vmatmul.mubr.bf16.vlgmr.msra.gmra.mxu0 %v13709_v5  ;;  %6055 = vmatpush1.bf16.msra.mxu1 %v12088_v32  ;;  %v12159_v32 = vld [vmem:[#allocation13 + $0x6f4] ss:$72 sps:$4 sm:$0xff]  }
 0x31c   :  { %6086 = vmatprep.mubr.bf16.mxu1 %v13737_v50  ;;  %6178 = vmatpush1.bf16.msra.mxu0 %v12091_v34  ;;  %v13769_v47 = vpop.f32.mrf.mxu0  ;;  %v13771_v14 = vpop.f32.mrf.mxu1  ;;  %v12154_v34 = vld [vmem:[#allocation13 + $0xfe0] ss:$72 sps:$4 sm:$0xff]  }
 0x31d   :  { %6209 = vmatprep.mubr.bf16.mxu0 %v13707_v46  ;;  %6056 = vmatprep.subr.bf16.mxu1 %v12096_v37  ;;  %v12157_v37 = vld [vmem:[#allocation13 + $0x6f0] ss:$72 sps:$4 sm:$0xff]  }
 0x31e   :  { %v5887_v49 = vpop.f32.mrf.mxu0  ;;  %6179 = vmatprep.subr.bf16.mxu0 %v12099_v40  ;;  %v5764_v19 = vpop.f32.mrf.mxu1  ;;  %v12162_v40 = vld [vmem:[#allocation13 + $0xf54] ss:$72 sps:$4 sm:$0xff]  }
 0x31f   :  { %6057 = vmatpush1.bf16.msra.mxu1 %v12094_v41  ;;  %v12165_v41 = vld [vmem:[#allocation13 + $0x664] ss:$72 sps:$4 sm:$0xff]   ;;  %v12171_v49 = vld [vmem:[#allocation13 + $0x5d4] ss:$72 sps:$4 sm:$0xff]   ;;  %v12166_v19 = vld [vmem:[#allocation13 + $0xec0] ss:$72 sps:$4 sm:$0xff]  }
 0x320   :  { %6180 = vmatpush1.bf16.msra.mxu0 %v12097_v3  ;;  %v5888_v51 = vpop.f32.mrf.mxu0  ;;  %v5765_v18 = vpop.f32.mrf.mxu1  ;;  %6058 = vmatprep.subr.bf16.mxu1 %v12102_v62  ;;  %v12160_v3 = vld [vmem:[#allocation13 + $0xf50] ss:$72 sps:$4 sm:$0xff]   ;;  %v12163_v62 = vld [vmem:[#allocation13 + $0x660] ss:$72 sps:$4 sm:$0xff]  }
 0x321   :  { %6181 = vmatprep.subr.bf16.mxu0 %v12105_v48  ;;  %v12168_v48 = vld [vmem:[#allocation13 + $0xec4] ss:$72 sps:$4 sm:$0xff]   ;;  %v12174_v51 = vld [vmem:[#allocation13 + $0xe34] ss:$72 sps:$4 sm:$0xff]  }
 0x322   :  { %v12177_v18 = vld [vmem:[#allocation13 + $0x544] ss:$72 sps:$4 sm:$0xff]  }
 0x323   :  { %6059 = vmatpush1.bf16.msra.mxu1 %v12100_v63  ;;  %v12169_v63 = vld [vmem:[#allocation13 + $0x5d0] ss:$72 sps:$4 sm:$0xff]  }
 0x324   :  { %6182 = vmatpush1.bf16.msra.mxu0 %v12103_v24  ;;  %6060 = vmatprep.subr.bf16.mxu1 %v12108_v52  ;;  %v12172_v24 = vld [vmem:[#allocation13 + $0xe30] ss:$72 sps:$4 sm:$0xff]   ;;  %v12175_v52 = vld [vmem:[#allocation13 + $0x540] ss:$72 sps:$4 sm:$0xff]  }
 0x325   :  { %6183 = vmatprep.subr.bf16.mxu0 %v12111_v53  ;;  %v12180_v53 = vld [vmem:[#allocation13 + $0xda4] ss:$72 sps:$4 sm:$0xff]  }
 0x327   :  { %6061 = vmatpush1.bf16.msra.mxu1 %v12106_v54  ;;  %v12183_v54 = vld [vmem:[#allocation13 + $0x4b4] ss:$72 sps:$4 sm:$0xff]  }
 0x328   :  { %6184 = vmatpush1.bf16.msra.mxu0 %v12109_v43  ;;  %6062 = vmatprep.subr.bf16.mxu1 %v12114_v55  ;;  %v12178_v43 = vld [vmem:[#allocation13 + $0xda0] ss:$72 sps:$4 sm:$0xff]   ;;  %v12181_v55 = vld [vmem:[#allocation13 + $0x4b0] ss:$72 sps:$4 sm:$0xff]  }
 0x329   :  { %6185 = vmatprep.subr.bf16.mxu0 %v12117_v56  ;;  %v12186_v56 = vld [vmem:[#allocation13 + $0xd1c] ss:$72 sps:$4 sm:$0xff]  }
 0x32b   :  { %6063 = vmatpush1.bf16.msra.mxu1 %v12112_v57  ;;  %v12189_v57 = vld [vmem:[#allocation13 + $0x42c] ss:$72 sps:$4 sm:$0xff]  }
 0x32c   :  { %6186 = vmatpush1.bf16.msra.mxu0 %v12115_v45  ;;  %6064 = vmatprep.subr.bf16.mxu1 %v12120_v58  ;;  %v12184_v45 = vld [vmem:[#allocation13 + $0xd18] ss:$72 sps:$4 sm:$0xff]   ;;  %v12187_v58 = vld [vmem:[#allocation13 + $0x428] ss:$72 sps:$4 sm:$0xff]  }
 0x32d   :  { %6187 = vmatprep.subr.bf16.mxu0 %v12123_v60  ;;  %v12192_v60 = vld [vmem:[#allocation13 + $0xc8c] ss:$72 sps:$4 sm:$0xff]  }
 0x32f   :  { %6065 = vmatpush1.bf16.msra.mxu1 %v12118_v61 }
 0x330   :  { %6188 = vmatpush1.bf16.msra.mxu0 %v12121_v0  ;;  %6066 = vmatprep.subr.bf16.mxu1 %v12126_v1  ;;  %v12195_v1 = vld [vmem:[#allocation13 + $0x39c] ss:$72 sps:$4 sm:$0xff]  }
 0x331   :  { %6189 = vmatprep.subr.bf16.mxu0 %v12129_v2  ;;  %v13779_v2 = vadd.f32 %v13765_v39, %v13748_v59  ;;  %v12201_v39 = vld [vmem:[#allocation13 + $0x30c] ss:$72 sps:$4 sm:$0xff]  }
 0x333   :  { %6067 = vmatpush1.bf16.msra.mxu1 %v12124_v4 }
 0x334   :  { %6190 = vmatpush1.bf16.msra.mxu0 %v12127_v6  ;;  %6068 = vmatprep.subr.bf16.mxu1 %v12132_v7  ;;  %v12190_v6 = vld [vmem:[#allocation13 + $0xc88] ss:$72 sps:$4 sm:$0xff]  }
 0x335   :  { %6191 = vmatprep.subr.bf16.mxu0 %v12135_v8 }
 0x337   :  { %6069 = vmatpush1.bf16.msra.mxu1 %v12130_v9  ;;  %v12193_v9 = vld [vmem:[#allocation13 + $0x398] ss:$72 sps:$4 sm:$0xff]  }
 0x338   :  { %6192 = vmatpush1.bf16.msra.mxu0 %v12133_v11  ;;  %6070 = vmatprep.subr.bf16.mxu1 %v12138_v13  ;;  %v12198_v11 = vld [vmem:[#allocation13 + $0xbfc] ss:$72 sps:$4 sm:$0xff]   ;;  %v13790_v13 = vadd.f32 %v13771_v14, %v13752_v44 }
 0x339   :  { %6193 = vmatprep.subr.bf16.mxu0 %v12141_v16 }
 0x33b   :  { %6071 = vmatpush2.bf16.msra.mxu1 %v12136_v17 }
 0x33c   :  { %6194 = vmatpush2.bf16.msra.mxu0 %v12139_v21  ;;  %6072 = vmatprep.subr.bf16.mxu1 %v12144_v22  ;;  %v12196_v22 = vld [vmem:[#allocation13 + $0xbf8] ss:$72 sps:$4 sm:$0xff]  }
 0x33d   :  { %6195 = vmatprep.subr.bf16.mxu0 %v12147_v23  ;;  %v12199_v23 = vld [vmem:[#allocation13 + $0x308] ss:$72 sps:$4 sm:$0xff]  }
 0x33f   :  { %6073 = vmatpush2.bf16.msra.mxu1 %v12142_v25  ;;  %v12204_v25 = vld [vmem:[#allocation13 + $0xb6c] ss:$72 sps:$4 sm:$0xff]  }
 0x340   :  { %6196 = vmatpush2.bf16.msra.mxu0 %v12145_v26  ;;  %6074 = vmatprep.subr.bf16.mxu1 %v12150_v27  ;;  %v12207_v26 = vld [vmem:[#allocation13 + $0x27c] ss:$72 sps:$4 sm:$0xff]   ;;  %v12205_v27 = vld [vmem:[#allocation13 + $0x278] ss:$72 sps:$4 sm:$0xff]  }
 0x341   :  { %6197 = vmatprep.subr.bf16.mxu0 %v12153_v28  ;;  %v12210_v28 = vld [vmem:[#allocation13 + $0xadc] ss:$72 sps:$4 sm:$0xff]  }
 0x343   :  { %6075 = vmatpush2.bf16.msra.mxu1 %v12148_v30  ;;  %v12213_v30 = vld [vmem:[#allocation13 + $0x1ec] ss:$72 sps:$4 sm:$0xff]  }
 0x344   :  { %6198 = vmatpush2.bf16.msra.mxu0 %v12151_v31  ;;  %6076 = vmatprep.subr.bf16.mxu1 %v12156_v33  ;;  %v12208_v31 = vld [vmem:[#allocation13 + $0xad8] ss:$72 sps:$4 sm:$0xff]   ;;  %v12211_v33 = vld [vmem:[#allocation13 + $0x1e8] ss:$72 sps:$4 sm:$0xff]  }
 0x345   :  { %6199 = vmatprep.subr.bf16.mxu0 %v12159_v32  ;;  %v12216_v32 = vld [vmem:[#allocation13 + $0xa4c] ss:$72 sps:$4 sm:$0xff]  }
 0x347   :  { %6077 = vmatpush2.bf16.msra.mxu1 %v12154_v34  ;;  %v12219_v34 = vld [vmem:[#allocation13 + $0x15c] ss:$72 sps:$4 sm:$0xff]  }
 0x348   :  { %6200 = vmatpush2.bf16.msra.mxu0 %v12157_v37  ;;  %6078 = vmatprep.subr.bf16.mxu1 %v12162_v40  ;;  %v12214_v37 = vld [vmem:[#allocation13 + $0xa48] ss:$72 sps:$4 sm:$0xff]   ;;  %v12217_v40 = vld [vmem:[#allocation13 + $0x158] ss:$72 sps:$4 sm:$0xff]  }
 0x349   :  { %6201 = vmatprep.subr.bf16.mxu0 %v12165_v41  ;;  %v12222_v41 = vld [vmem:[#allocation13 + $0x9bc] ss:$72 sps:$4 sm:$0xff]  }
 0x34b   :  { %6079 = vmatpush2.bf16.msra.mxu1 %v12160_v3  ;;  %v12225_v3 = vld [vmem:[#allocation13 + $0xcc] ss:$72 sps:$4 sm:$0xff]  }
 0x34c   :  { %6202 = vmatpush2.bf16.msra.mxu0 %v12163_v62  ;;  %6080 = vmatprep.subr.bf16.mxu1 %v12168_v48  ;;  %v12220_v62 = vld [vmem:[#allocation13 + $0x9b8] ss:$72 sps:$4 sm:$0xff]   ;;  %v12223_v48 = vld [vmem:[#allocation13 + $0xc8] ss:$72 sps:$4 sm:$0xff]  }
 0x34d   :  { %6203 = vmatprep.subr.bf16.mxu0 %v12171_v49  ;;  %v12228_v49 = vld [vmem:[#allocation13 + $0x92c] ss:$72 sps:$4 sm:$0xff]  }
 0x34f   :  { %6081 = vmatpush2.bf16.msra.mxu1 %v12166_v19  ;;  %v12231_v19 = vld [vmem:[#allocation13 + $0x3c] ss:$72 sps:$4 sm:$0xff]  }
 0x350   :  { %6204 = vmatpush2.bf16.msra.mxu0 %v12169_v63  ;;  %6082 = vmatprep.subr.bf16.mxu1 %v12174_v51  ;;  %v12226_v63 = vld [vmem:[#allocation13 + $0x928] ss:$72 sps:$4 sm:$0xff]   ;;  %v12229_v51 = vld [vmem:[#allocation13 + $0x38] ss:$72 sps:$4 sm:$0xff]  }
 0x351   :  { %6205 = vmatprep.subr.bf16.mxu0 %v12177_v18  ;;  %v12234_v18 = vld [vmem:[#allocation13 + $0x119c] ss:$72 sps:$4 sm:$0xff]  }
 0x353   :  { %6083 = vmatpush2.bf16.msra.mxu1 %v12172_v24  ;;  %v12237_v24 = vld [vmem:[#allocation13 + $0x8ac] ss:$72 sps:$4 sm:$0xff]  }
 0x354   :  { %6206 = vmatpush2.bf16.msra.mxu0 %v12175_v52  ;;  %6084 = vmatprep.subr.bf16.mxu1 %v12180_v53  ;;  %v12232_v52 = vld [vmem:[#allocation13 + $0x1198] ss:$72 sps:$4 sm:$0xff]   ;;  %v12235_v53 = vld [vmem:[#allocation13 + $0x8a8] ss:$72 sps:$4 sm:$0xff]  }
 0x355   :  { %6207 = vmatprep.subr.bf16.mxu0 %v12183_v54  ;;  %v12240_v54 = vld [vmem:[#allocation13 + $0x110c] ss:$72 sps:$4 sm:$0xff]  }
 0x357   :  { %6085 = vmatpush2.bf16.msra.mxu1 %v12178_v43  ;;  %v12243_v43 = vld [vmem:[#allocation13 + $0x81c] ss:$72 sps:$4 sm:$0xff]  }
 0x358   :  { %6208 = vmatpush2.bf16.msra.mxu0 %v12181_v55  ;;  %6136 = vmatprep.subr.bf16.mxu1 %v12186_v56  ;;  %v12238_v55 = vld [vmem:[#allocation13 + $0x1108] ss:$72 sps:$4 sm:$0xff]   ;;  %v12241_v56 = vld [vmem:[#allocation13 + $0x818] ss:$72 sps:$4 sm:$0xff]  }
 0x359   :  { %6259 = vmatprep.subr.bf16.mxu0 %v12189_v57  ;;  %v12246_v57 = vld [vmem:[#allocation13 + $0x107c] ss:$72 sps:$4 sm:$0xff]  }
 0x35a   :  { %v5842_v61 = vpop.f32.mrf.mxu1  ;;  %v13774_v0 = vpop.f32.mrf.mxu0  ;;  %6087 = vmatmul.mubr.bf16.vlgmr.msra.gmra.mxu1 %v13739_v29 }
 0x35b   :  { %v13782_v4 = vadd.f32 %v5842_v61, %v13754_v15  ;;  %6210 = vmatmul.mubr.bf16.vlgmr.msra.gmra.mxu0 %v13709_v5  ;;  %6137 = vmatpush1.bf16.msra.mxu1 %v12184_v45  ;;  %v12249_v45 = vld [vmem:[#allocation13 + $0x78c] ss:$72 sps:$4 sm:$0xff]  }
 0x35c   :  { %6168 = vmatprep.mubr.bf16.mxu1 %v13737_v50  ;;  %6260 = vmatpush1.bf16.msra.mxu0 %v12187_v58  ;;  %v5844_v7 = vpop.f32.mrf.mxu1  ;;  %v13786_v8 = vpop.f32.mrf.mxu0  ;;  %v12244_v58 = vld [vmem:[#allocation13 + $0x1078] ss:$72 sps:$4 sm:$0xff]   ;;  %v12252_v61 = vld [vmem:[#allocation13 + $0xfec] ss:$72 sps:$4 sm:$0xff]  }
 0x35d   :  { %v6423_v59 = vmax.f32 %v13779_v2, %v13782_v4  ;;  %6291 = vmatprep.mubr.bf16.mxu0 %v13707_v46  ;;  %v13796_v15 = vadd.f32 %v5844_v7, %v13759_v20  ;;  %6138 = vmatprep.subr.bf16.mxu1 %v12192_v60  ;;  %v12202_v20 = vld [vmem:[#allocation13 + $0xb68] ss:$72 sps:$4 sm:$0xff]   ;;  %v12253_v7 = vld [vmem:[#allocation13 + $0x6f8] ss:$72 sps:$4 sm:$0xff]  }
 0x35e   :  { %v5846_v16 = vpop.f32.mrf.mxu1  ;;  %v5969_v17 = vpop.f32.mrf.mxu0  ;;  %6261 = vmatprep.subr.bf16.mxu0 %v12195_v1  ;;  %v12247_v60 = vld [vmem:[#allocation13 + $0x788] ss:$72 sps:$4 sm:$0xff]   ;;  %v12255_v1 = vld [vmem:[#allocation13 + $0x6fc] ss:$72 sps:$4 sm:$0xff]  }
 0x35f   :  { %v6424_v21 = vmax.f32 %v13790_v13, %v13796_v15  ;;  %6139 = vmatpush1.bf16.msra.mxu1 %v12190_v6  ;;  %v12250_v6 = vld [vmem:[#allocation13 + $0xfe8] ss:$72 sps:$4 sm:$0xff]   ;;  %v12264_v17 = vld [vmem:[#allocation13 + $0xecc] ss:$72 sps:$4 sm:$0xff]  }
 0x360   :  { %6262 = vmatpush1.bf16.msra.mxu0 %v12193_v9  ;;  %v5847_v44 = vpop.f32.mrf.mxu1  ;;  %v5970_v14 = vpop.f32.mrf.mxu0  ;;  %6140 = vmatprep.subr.bf16.mxu1 %v12198_v11  ;;  %v12258_v9 = vld [vmem:[#allocation13 + $0xf5c] ss:$72 sps:$4 sm:$0xff]   ;;  %v12261_v11 = vld [vmem:[#allocation13 + $0x66c] ss:$72 sps:$4 sm:$0xff]   ;;  %v12259_v16 = vld [vmem:[#allocation13 + $0x668] ss:$72 sps:$4 sm:$0xff]  }
 0x361   :  { %6263 = vmatprep.subr.bf16.mxu0 %v12201_v39  ;;  %v12256_v39 = vld [vmem:[#allocation13 + $0xf58] ss:$72 sps:$4 sm:$0xff]   ;;  %v12262_v44 = vld [vmem:[#allocation13 + $0xec8] ss:$72 sps:$4 sm:$0xff]   ;;  %v12309_v13 = vld [vmem:[#allocation13 + $0x1f4] ss:$72 sps:$4 sm:$0xff]  }
 0x362   :  { %v12265_v14 = vld [vmem:[#allocation13 + $0x5d8] ss:$72 sps:$4 sm:$0xff]  }
 0x363   :  { %6141 = vmatpush1.bf16.msra.mxu1 %v12196_v22  ;;  %v12267_v22 = vld [vmem:[#allocation13 + $0x5dc] ss:$72 sps:$4 sm:$0xff]   ;;  %v12292_v2 = vld [vmem:[#allocation13 + $0xc00] ss:$72 sps:$4 sm:$0xff]  }
 0x364   :  { %6264 = vmatpush1.bf16.msra.mxu0 %v12199_v23  ;;  %6142 = vmatprep.subr.bf16.mxu1 %v12204_v25  ;;  %v12270_v23 = vld [vmem:[#allocation13 + $0xe3c] ss:$72 sps:$4 sm:$0xff]   ;;  %v12273_v25 = vld [vmem:[#allocation13 + $0x54c] ss:$72 sps:$4 sm:$0xff]   ;;  %v12304_v15 = vld [vmem:[#allocation13 + $0xae0] ss:$72 sps:$4 sm:$0xff]  }
 0x365   :  { %6265 = vmatprep.subr.bf16.mxu0 %v12207_v26  ;;  %v12268_v26 = vld [vmem:[#allocation13 + $0xe38] ss:$72 sps:$4 sm:$0xff]  }
 0x367   :  { %6143 = vmatpush1.bf16.msra.mxu1 %v12202_v20  ;;  %v12271_v20 = vld [vmem:[#allocation13 + $0x548] ss:$72 sps:$4 sm:$0xff]  }
 0x368   :  { %6266 = vmatpush1.bf16.msra.mxu0 %v12205_v27  ;;  %6144 = vmatprep.subr.bf16.mxu1 %v12210_v28  ;;  %v12276_v27 = vld [vmem:[#allocation13 + $0xdac] ss:$72 sps:$4 sm:$0xff]   ;;  %v12279_v28 = vld [vmem:[#allocation13 + $0x4bc] ss:$72 sps:$4 sm:$0xff]  }
 0x369   :  { %6267 = vmatprep.subr.bf16.mxu0 %v12213_v30  ;;  %v12274_v30 = vld [vmem:[#allocation13 + $0xda8] ss:$72 sps:$4 sm:$0xff]  }
 0x36b   :  { %6145 = vmatpush1.bf16.msra.mxu1 %v12208_v31  ;;  %v12277_v31 = vld [vmem:[#allocation13 + $0x4b8] ss:$72 sps:$4 sm:$0xff]  }
 0x36c   :  { %6268 = vmatpush1.bf16.msra.mxu0 %v12211_v33  ;;  %6146 = vmatprep.subr.bf16.mxu1 %v12216_v32  ;;  %v12282_v33 = vld [vmem:[#allocation13 + $0xd24] ss:$72 sps:$4 sm:$0xff]   ;;  %v12285_v32 = vld [vmem:[#allocation13 + $0x434] ss:$72 sps:$4 sm:$0xff]  }
 0x36d   :  { %6269 = vmatprep.subr.bf16.mxu0 %v12219_v34  ;;  %v12280_v34 = vld [vmem:[#allocation13 + $0xd20] ss:$72 sps:$4 sm:$0xff]  }
 0x36f   :  { %6147 = vmatpush1.bf16.msra.mxu1 %v12214_v37  ;;  %v12283_v37 = vld [vmem:[#allocation13 + $0x430] ss:$72 sps:$4 sm:$0xff]  }
 0x370   :  { %6270 = vmatpush1.bf16.msra.mxu0 %v12217_v40  ;;  %6148 = vmatprep.subr.bf16.mxu1 %v12222_v41  ;;  %v12288_v40 = vld [vmem:[#allocation13 + $0xc94] ss:$72 sps:$4 sm:$0xff]  }
 0x371   :  { %6271 = vmatprep.subr.bf16.mxu0 %v12225_v3  ;;  %v12291_v3 = vld [vmem:[#allocation13 + $0x3a4] ss:$72 sps:$4 sm:$0xff]  }
 0x373   :  { %6149 = vmatpush1.bf16.msra.mxu1 %v12220_v62 }
 0x374   :  { %6272 = vmatpush1.bf16.msra.mxu0 %v12223_v48  ;;  %6150 = vmatprep.subr.bf16.mxu1 %v12228_v49  ;;  %v12286_v49 = vld [vmem:[#allocation13 + $0xc90] ss:$72 sps:$4 sm:$0xff]  }
 0x375   :  { %6273 = vmatprep.subr.bf16.mxu0 %v12231_v19 }
 0x377   :  { %6151 = vmatpush1.bf16.msra.mxu1 %v12226_v63  ;;  %v12289_v63 = vld [vmem:[#allocation13 + $0x3a0] ss:$72 sps:$4 sm:$0xff]  }
 0x378   :  { %6274 = vmatpush1.bf16.msra.mxu0 %v12229_v51  ;;  %6152 = vmatprep.subr.bf16.mxu1 %v12234_v18  ;;  %v12294_v51 = vld [vmem:[#allocation13 + $0xc04] ss:$72 sps:$4 sm:$0xff]  }
 0x379   :  { %6275 = vmatprep.subr.bf16.mxu0 %v12237_v24 }
 0x37b   :  { %6153 = vmatpush2.bf16.msra.mxu1 %v12232_v52  ;;  %v12297_v52 = vld [vmem:[#allocation13 + $0x314] ss:$72 sps:$4 sm:$0xff]  }
 0x37c   :  { %6276 = vmatpush2.bf16.msra.mxu0 %v12235_v53  ;;  %6154 = vmatprep.subr.bf16.mxu1 %v12240_v54 }
 0x37d   :  { %6277 = vmatprep.subr.bf16.mxu0 %v12243_v43 }
 0x37f   :  { %6155 = vmatpush2.bf16.msra.mxu1 %v12238_v55  ;;  %v12303_v55 = vld [vmem:[#allocation13 + $0x284] ss:$72 sps:$4 sm:$0xff]  }
 0x380   :  { %6278 = vmatpush2.bf16.msra.mxu0 %v12241_v56  ;;  %6156 = vmatprep.subr.bf16.mxu1 %v12246_v57  ;;  %v12298_v56 = vld [vmem:[#allocation13 + $0xb70] ss:$72 sps:$4 sm:$0xff]   ;;  %v12301_v57 = vld [vmem:[#allocation13 + $0x280] ss:$72 sps:$4 sm:$0xff]  }
 0x381   :  { %6279 = vmatprep.subr.bf16.mxu0 %v12249_v45  ;;  %v12306_v45 = vld [vmem:[#allocation13 + $0xae4] ss:$72 sps:$4 sm:$0xff]  }
 0x383   :  { %6157 = vmatpush2.bf16.msra.mxu1 %v12244_v58  ;;  %v12312_v58 = vld [vmem:[#allocation13 + $0xa54] ss:$72 sps:$4 sm:$0xff]  }
 0x384   :  { %6280 = vmatpush2.bf16.msra.mxu0 %v12247_v60  ;;  %6158 = vmatprep.subr.bf16.mxu1 %v12252_v61  ;;  %v12315_v60 = vld [vmem:[#allocation13 + $0x164] ss:$72 sps:$4 sm:$0xff]   ;;  %v12310_v61 = vld [vmem:[#allocation13 + $0xa50] ss:$72 sps:$4 sm:$0xff]  }
 0x385   :  { %6281 = vmatprep.subr.bf16.mxu0 %v12255_v1  ;;  %v12313_v1 = vld [vmem:[#allocation13 + $0x160] ss:$72 sps:$4 sm:$0xff]  }
 0x387   :  { %6159 = vmatpush2.bf16.msra.mxu1 %v12250_v6  ;;  %v12318_v6 = vld [vmem:[#allocation13 + $0x9c4] ss:$72 sps:$4 sm:$0xff]  }
 0x388   :  { %6282 = vmatpush2.bf16.msra.mxu0 %v12253_v7  ;;  %6160 = vmatprep.subr.bf16.mxu1 %v12258_v9  ;;  %v12321_v7 = vld [vmem:[#allocation13 + $0xd4] ss:$72 sps:$4 sm:$0xff]   ;;  %v12316_v9 = vld [vmem:[#allocation13 + $0x9c0] ss:$72 sps:$4 sm:$0xff]  }
 0x389   :  { %6283 = vmatprep.subr.bf16.mxu0 %v12261_v11  ;;  %v12319_v11 = vld [vmem:[#allocation13 + $0xd0] ss:$72 sps:$4 sm:$0xff]  }
 0x38b   :  { %6161 = vmatpush2.bf16.msra.mxu1 %v12256_v39  ;;  %v12324_v39 = vld [vmem:[#allocation13 + $0x934] ss:$72 sps:$4 sm:$0xff]  }
 0x38c   :  { %6284 = vmatpush2.bf16.msra.mxu0 %v12259_v16  ;;  %6162 = vmatprep.subr.bf16.mxu1 %v12264_v17  ;;  %v12327_v16 = vld [vmem:[#allocation13 + $0x44] ss:$72 sps:$4 sm:$0xff]   ;;  %v12322_v17 = vld [vmem:[#allocation13 + $0x930] ss:$72 sps:$4 sm:$0xff]  }
 0x38d   :  { %6285 = vmatprep.subr.bf16.mxu0 %v12267_v22  ;;  %v12325_v22 = vld [vmem:[#allocation13 + $0x40] ss:$72 sps:$4 sm:$0xff]  }
 0x38f   :  { %6163 = vmatpush2.bf16.msra.mxu1 %v12262_v44  ;;  %v12330_v44 = vld [vmem:[#allocation13 + $0x11a4] ss:$72 sps:$4 sm:$0xff]  }
 0x390   :  { %6286 = vmatpush2.bf16.msra.mxu0 %v12265_v14  ;;  %6164 = vmatprep.subr.bf16.mxu1 %v12270_v23  ;;  %v12333_v14 = vld [vmem:[#allocation13 + $0x8b4] ss:$72 sps:$4 sm:$0xff]   ;;  %v12328_v23 = vld [vmem:[#allocation13 + $0x11a0] ss:$72 sps:$4 sm:$0xff]  }
 0x391   :  { %6287 = vmatprep.subr.bf16.mxu0 %v12273_v25  ;;  %v12331_v25 = vld [vmem:[#allocation13 + $0x8b0] ss:$72 sps:$4 sm:$0xff]  }
 0x393   :  { %6165 = vmatpush2.bf16.msra.mxu1 %v12268_v26  ;;  %v12336_v26 = vld [vmem:[#allocation13 + $0x1114] ss:$72 sps:$4 sm:$0xff]  }
 0x394   :  { %6288 = vmatpush2.bf16.msra.mxu0 %v12271_v20  ;;  %6166 = vmatprep.subr.bf16.mxu1 %v12276_v27  ;;  %v12339_v20 = vld [vmem:[#allocation13 + $0x824] ss:$72 sps:$4 sm:$0xff]   ;;  %v12334_v27 = vld [vmem:[#allocation13 + $0x1110] ss:$72 sps:$4 sm:$0xff]  }
 0x395   :  { %6289 = vmatprep.subr.bf16.mxu0 %v12279_v28  ;;  %v12337_v28 = vld [vmem:[#allocation13 + $0x820] ss:$72 sps:$4 sm:$0xff]  }
 0x397   :  { %6167 = vmatpush2.bf16.msra.mxu1 %v12274_v30  ;;  %v12342_v30 = vld [vmem:[#allocation13 + $0x1084] ss:$72 sps:$4 sm:$0xff]  }
 0x398   :  { %6290 = vmatpush2.bf16.msra.mxu0 %v12277_v31  ;;  %6218 = vmatprep.subr.bf16.mxu1 %v12282_v33  ;;  %v12345_v31 = vld [vmem:[#allocation13 + $0x794] ss:$72 sps:$4 sm:$0xff]   ;;  %v12340_v33 = vld [vmem:[#allocation13 + $0x1080] ss:$72 sps:$4 sm:$0xff]  }
 0x399   :  { %6341 = vmatprep.subr.bf16.mxu0 %v12285_v32  ;;  %v12343_v32 = vld [vmem:[#allocation13 + $0x790] ss:$72 sps:$4 sm:$0xff]  }
 0x39a   :  { %v5924_v41 = vpop.f32.mrf.mxu1  ;;  %6169 = vmatmul.mubr.bf16.vlgmr.msra.gmra.mxu1 %v13739_v29 }
 0x39b   :  { %v5925_v62 = vadd.f32 %v5924_v41, %v13762_v38  ;;  %v13802_v48 = vpop.f32.mrf.mxu0  ;;  %6292 = vmatmul.mubr.bf16.vlgmr.msra.gmra.mxu0 %v13709_v5  ;;  %6219 = vmatpush1.bf16.msra.mxu1 %v12280_v34  ;;  %v12348_v34 = vld [vmem:[#allocation13 + $0xff4] ss:$72 sps:$4 sm:$0xff]   ;;  %v12349_v41 = vld [vmem:[#allocation13 + $0x700] ss:$72 sps:$4 sm:$0xff]  }
 0x39c   :  { %6250 = vmatprep.mubr.bf16.mxu1 %v13737_v50  ;;  %6342 = vmatpush1.bf16.msra.mxu0 %v12283_v37  ;;  %v5926_v19 = vpop.f32.mrf.mxu1  ;;  %v12351_v37 = vld [vmem:[#allocation13 + $0x704] ss:$72 sps:$4 sm:$0xff]  }
 0x39d   :  { %v13809_v18 = vmax.f32 %v6423_v59, %v5925_v62  ;;  %6373 = vmatprep.mubr.bf16.mxu0 %v13707_v46  ;;  %v5927_v38 = vadd.f32 %v5926_v19, %v13769_v47  ;;  %v13813_v24 = vpop.f32.mrf.mxu0  ;;  %6220 = vmatprep.subr.bf16.mxu1 %v12288_v40  ;;  %v12295_v46 = vld [vmem:[#allocation13 + $0x310] ss:$72 sps:$4 sm:$0xff]   ;;  %v12300_v59 = vld [vmem:[#allocation13 + $0xb74] ss:$72 sps:$4 sm:$0xff]  }
 0x39e   :  { %v5928_v53 = vpop.f32.mrf.mxu1  ;;  %6343 = vmatprep.subr.bf16.mxu0 %v12291_v3  ;;  %v12346_v40 = vld [vmem:[#allocation13 + $0xff0] ss:$72 sps:$4 sm:$0xff]   ;;  %v12354_v3 = vld [vmem:[#allocation13 + $0xf64] ss:$72 sps:$4 sm:$0xff]   ;;  %v12357_v62 = vld [vmem:[#allocation13 + $0x674] ss:$72 sps:$4 sm:$0xff]  }
 0x39f   :  { %v13818_v54 = vmax.f32 %v6424_v21, %v5927_v38  ;;  %v6051_v43 = vpop.f32.mrf.mxu0  ;;  %6221 = vmatpush1.bf16.msra.mxu1 %v12286_v49  ;;  %v12307_v21 = vld [vmem:[#allocation13 + $0x1f0] ss:$72 sps:$4 sm:$0xff]   ;;  %v12352_v49 = vld [vmem:[#allocation13 + $0xf60] ss:$72 sps:$4 sm:$0xff]   ;;  %v12366_v53 = vld [vmem:[#allocation13 + $0xe44] ss:$72 sps:$4 sm:$0xff]  }
 0x3a0   :  { %6344 = vmatpush1.bf16.msra.mxu0 %v12289_v63  ;;  %v5929_v4 = vpop.f32.mrf.mxu1  ;;  %6222 = vmatprep.subr.bf16.mxu1 %v12294_v51  ;;  %v12355_v19 = vld [vmem:[#allocation13 + $0x670] ss:$72 sps:$4 sm:$0xff]   ;;  %v12360_v63 = vld [vmem:[#allocation13 + $0xed4] ss:$72 sps:$4 sm:$0xff]   ;;  %v12363_v51 = vld [vmem:[#allocation13 + $0x5e4] ss:$72 sps:$4 sm:$0xff]  }
 0x3a1   :  { %v6052_v47 = vpop.f32.mrf.mxu0  ;;  %6345 = vmatprep.subr.bf16.mxu0 %v12297_v52  ;;  %v12358_v38 = vld [vmem:[#allocation13 + $0xed0] ss:$72 sps:$4 sm:$0xff]   ;;  %v12361_v52 = vld [vmem:[#allocation13 + $0x5e0] ss:$72 sps:$4 sm:$0xff]   ;;  %v12369_v43 = vld [vmem:[#allocation13 + $0x554] ss:$72 sps:$4 sm:$0xff]  }
 0x3a2   :  { %v12367_v4 = vld [vmem:[#allocation13 + $0x550] ss:$72 sps:$4 sm:$0xff]  }
 0x3a3   :  { %6223 = vmatpush1.bf16.msra.mxu1 %v12292_v2  ;;  %v12364_v2 = vld [vmem:[#allocation13 + $0xe40] ss:$72 sps:$4 sm:$0xff]   ;;  %v12370_v47 = vld [vmem:[#allocation13 + $0xdb0] ss:$72 sps:$4 sm:$0xff]  }
 0x3a4   :  { %6346 = vmatpush1.bf16.msra.mxu0 %v12295_v46  ;;  %6224 = vmatprep.subr.bf16.mxu1 %v12300_v59  ;;  %v12372_v46 = vld [vmem:[#allocation13 + $0xdb4] ss:$72 sps:$4 sm:$0xff]   ;;  %v12375_v59 = vld [vmem:[#allocation13 + $0x4c4] ss:$72 sps:$4 sm:$0xff]  }
 0x3a5   :  { %6347 = vmatprep.subr.bf16.mxu0 %v12303_v55  ;;  %v12373_v55 = vld [vmem:[#allocation13 + $0x4c0] ss:$72 sps:$4 sm:$0xff]  }
 0x3a7   :  { %6225 = vmatpush1.bf16.msra.mxu1 %v12298_v56  ;;  %v12378_v56 = vld [vmem:[#allocation13 + $0xd2c] ss:$72 sps:$4 sm:$0xff]  }
 0x3a8   :  { %6348 = vmatpush1.bf16.msra.mxu0 %v12301_v57  ;;  %6226 = vmatprep.subr.bf16.mxu1 %v12306_v45  ;;  %v12376_v57 = vld [vmem:[#allocation13 + $0xd28] ss:$72 sps:$4 sm:$0xff]   ;;  %v12381_v45 = vld [vmem:[#allocation13 + $0xc9c] ss:$72 sps:$4 sm:$0xff]  }
 0x3a9   :  { %6349 = vmatprep.subr.bf16.mxu0 %v12309_v13 }
 0x3ab   :  { %6227 = vmatpush1.bf16.msra.mxu1 %v12304_v15 }
 0x3ac   :  { %6350 = vmatpush1.bf16.msra.mxu0 %v12307_v21  ;;  %6228 = vmatprep.subr.bf16.mxu1 %v12312_v58  ;;  %v12379_v58 = vld [vmem:[#allocation13 + $0xc98] ss:$72 sps:$4 sm:$0xff]  }
 0x3ad   :  { %6351 = vmatprep.subr.bf16.mxu0 %v12315_v60 }
 0x3af   :  { %6229 = vmatpush1.bf16.msra.mxu1 %v12310_v61  ;;  %v12384_v61 = vld [vmem:[#allocation13 + $0xc0c] ss:$72 sps:$4 sm:$0xff]  }
 0x3b0   :  { %6352 = vmatpush1.bf16.msra.mxu0 %v12313_v1  ;;  %6230 = vmatprep.subr.bf16.mxu1 %v12318_v6 }
 0x3b1   :  { %6353 = vmatprep.subr.bf16.mxu0 %v12321_v7 }
 0x3b3   :  { %6231 = vmatpush1.bf16.msra.mxu1 %v12316_v9 }
 0x3b4   :  { %6354 = vmatpush1.bf16.msra.mxu0 %v12319_v11  ;;  %6232 = vmatprep.subr.bf16.mxu1 %v12324_v39  ;;  %v12382_v11 = vld [vmem:[#allocation13 + $0xc08] ss:$72 sps:$4 sm:$0xff]  }
 0x3b5   :  { %6355 = vmatprep.subr.bf16.mxu0 %v12327_v16  ;;  %v12387_v16 = vld [vmem:[#allocation13 + $0xb7c] ss:$72 sps:$4 sm:$0xff]  }
 0x3b7   :  { %6233 = vmatpush1.bf16.msra.mxu1 %v12322_v17 }
 0x3b8   :  { %6356 = vmatpush1.bf16.msra.mxu0 %v12325_v22  ;;  %6234 = vmatprep.subr.bf16.mxu1 %v12330_v44  ;;  %v12385_v22 = vld [vmem:[#allocation13 + $0xb78] ss:$72 sps:$4 sm:$0xff]   ;;  %v12390_v44 = vld [vmem:[#allocation13 + $0xaec] ss:$72 sps:$4 sm:$0xff]  }
 0x3b9   :  { %6357 = vmatprep.subr.bf16.mxu0 %v12333_v14  ;;  %v12393_v14 = vld [vmem:[#allocation13 + $0xa5c] ss:$72 sps:$4 sm:$0xff]  }
 0x3bb   :  { %6235 = vmatpush2.bf16.msra.mxu1 %v12328_v23  ;;  %v12391_v23 = vld [vmem:[#allocation13 + $0xa58] ss:$72 sps:$4 sm:$0xff]  }
 0x3bc   :  { %6358 = vmatpush2.bf16.msra.mxu0 %v12331_v25  ;;  %6236 = vmatprep.subr.bf16.mxu1 %v12336_v26  ;;  %v12396_v25 = vld [vmem:[#allocation13 + $0x9cc] ss:$72 sps:$4 sm:$0xff]   ;;  %v12394_v26 = vld [vmem:[#allocation13 + $0x9c8] ss:$72 sps:$4 sm:$0xff]  }
 0x3bd   :  { %6359 = vmatprep.subr.bf16.mxu0 %v12339_v20  ;;  %v12399_v20 = vld [vmem:[#allocation13 + $0x93c] ss:$72 sps:$4 sm:$0xff]  }
 0x3bf   :  { %6237 = vmatpush2.bf16.msra.mxu1 %v12334_v27  ;;  %v12397_v27 = vld [vmem:[#allocation13 + $0x938] ss:$72 sps:$4 sm:$0xff]  }
 0x3c0   :  { %6360 = vmatpush2.bf16.msra.mxu0 %v12337_v28  ;;  %6238 = vmatprep.subr.bf16.mxu1 %v12342_v30  ;;  %v12402_v28 = vld [vmem:[#allocation13 + $0x11ac] ss:$72 sps:$4 sm:$0xff]   ;;  %v12400_v30 = vld [vmem:[#allocation13 + $0x11a8] ss:$72 sps:$4 sm:$0xff]  }
 0x3c1   :  { %6361 = vmatprep.subr.bf16.mxu0 %v12345_v31  ;;  %v12405_v31 = vld [vmem:[#allocation13 + $0x111c] ss:$72 sps:$4 sm:$0xff]  }
 0x3c3   :  { %6239 = vmatpush2.bf16.msra.mxu1 %v12340_v33  ;;  %v12403_v33 = vld [vmem:[#allocation13 + $0x1118] ss:$72 sps:$4 sm:$0xff]  }
 0x3c4   :  { %6362 = vmatpush2.bf16.msra.mxu0 %v12343_v32  ;;  %6240 = vmatprep.subr.bf16.mxu1 %v12348_v34  ;;  %v12408_v32 = vld [vmem:[#allocation13 + $0x108c] ss:$72 sps:$4 sm:$0xff]   ;;  %v12406_v34 = vld [vmem:[#allocation13 + $0x1088] ss:$72 sps:$4 sm:$0xff]  }
 0x3c5   :  { %6363 = vmatprep.subr.bf16.mxu0 %v12351_v37  ;;  %v12411_v37 = vld [vmem:[#allocation13 + $0xffc] ss:$72 sps:$4 sm:$0xff]  }
 0x3c7   :  { %6241 = vmatpush2.bf16.msra.mxu1 %v12346_v40  ;;  %v12409_v40 = vld [vmem:[#allocation13 + $0xff8] ss:$72 sps:$4 sm:$0xff]  }
 0x3c8   :  { %6364 = vmatpush2.bf16.msra.mxu0 %v12349_v41  ;;  %6242 = vmatprep.subr.bf16.mxu1 %v12354_v3  ;;  %v12414_v41 = vld [vmem:[#allocation13 + $0xf6c] ss:$72 sps:$4 sm:$0xff]   ;;  %v12412_v3 = vld [vmem:[#allocation13 + $0xf68] ss:$72 sps:$4 sm:$0xff]  }
 0x3c9   :  { %6365 = vmatprep.subr.bf16.mxu0 %v12357_v62  ;;  %v12417_v62 = vld [vmem:[#allocation13 + $0xedc] ss:$72 sps:$4 sm:$0xff]  }
 0x3cb   :  { %6243 = vmatpush2.bf16.msra.mxu1 %v12352_v49  ;;  %v12415_v49 = vld [vmem:[#allocation13 + $0xed8] ss:$72 sps:$4 sm:$0xff]  }
 0x3cc   :  { %6366 = vmatpush2.bf16.msra.mxu0 %v12355_v19  ;;  %6244 = vmatprep.subr.bf16.mxu1 %v12360_v63  ;;  %v12420_v19 = vld [vmem:[#allocation13 + $0xe4c] ss:$72 sps:$4 sm:$0xff]   ;;  %v12418_v63 = vld [vmem:[#allocation13 + $0xe48] ss:$72 sps:$4 sm:$0xff]  }
 0x3cd   :  { %6367 = vmatprep.subr.bf16.mxu0 %v12363_v51  ;;  %v12423_v51 = vld [vmem:[#allocation13 + $0xdbc] ss:$72 sps:$4 sm:$0xff]  }
 0x3cf   :  { %6245 = vmatpush2.bf16.msra.mxu1 %v12358_v38  ;;  %v12421_v38 = vld [vmem:[#allocation13 + $0xdb8] ss:$72 sps:$4 sm:$0xff]  }
 0x3d0   :  { %6368 = vmatpush2.bf16.msra.mxu0 %v12361_v52  ;;  %6246 = vmatprep.subr.bf16.mxu1 %v12366_v53  ;;  %v12426_v52 = vld [vmem:[#allocation13 + $0xd34] ss:$72 sps:$4 sm:$0xff]   ;;  %v12424_v53 = vld [vmem:[#allocation13 + $0xd30] ss:$72 sps:$4 sm:$0xff]  }
 0x3d1   :  { %6369 = vmatprep.subr.bf16.mxu0 %v12369_v43  ;;  %v12429_v43 = vld [vmem:[#allocation13 + $0xca4] ss:$72 sps:$4 sm:$0xff]  }
 0x3d3   :  { %6247 = vmatpush2.bf16.msra.mxu1 %v12364_v2 }
 0x3d4   :  { %6370 = vmatpush2.bf16.msra.mxu0 %v12367_v4  ;;  %6248 = vmatprep.subr.bf16.mxu1 %v12372_v46 }
 0x3d5   :  { %6371 = vmatprep.subr.bf16.mxu0 %v12375_v59  ;;  %v12427_v59 = vld [vmem:[#allocation13 + $0xca0] ss:$72 sps:$4 sm:$0xff]  }
 0x3d7   :  { %6249 = vmatpush2.bf16.msra.mxu1 %v12370_v47 }
 0x3d8   :  { %6372 = vmatpush2.bf16.msra.mxu0 %v12373_v55  ;;  %6300 = vmatprep.subr.bf16.mxu1 %v12378_v56  ;;  %v12432_v55 = vld [vmem:[#allocation13 + $0xc14] ss:$72 sps:$4 sm:$0xff]  }
 0x3da   :  { %v6006_v13 = vpop.f32.mrf.mxu1  ;;  %6251 = vmatmul.mubr.bf16.vlgmr.msra.gmra.mxu1 %v13739_v29 }
 0x3db   :  { %v13822_v15 = vadd.f32 %v6006_v13, %v13774_v0  ;;  %v13824_v21 = vpop.f32.mrf.mxu0  ;;  %6374 = vmatmul.mubr.bf16.vlgmr.msra.gmra.mxu0 %v13709_v5  ;;  %6301 = vmatpush1.bf16.msra.mxu1 %v12376_v57 }
 0x3dc   :  { %6332 = vmatprep.mubr.bf16.mxu1 %v13737_v50  ;;  %v6008_v60 = vpop.f32.mrf.mxu1  ;;  %6302 = vmatprep.subr.bf16.mxu1 %v12381_v45 }
 0x3dd   :  { %v6427_v1 = vmax.f32 %v13809_v18, %v13822_v15  ;;  %v13831_v6 = vadd.f32 %v6008_v60, %v13786_v8  ;;  %v13833_v7 = vpop.f32.mrf.mxu0  ;;  %v12388_v8 = vld [vmem:[#allocation13 + $0xae8] ss:$72 sps:$4 sm:$0xff]   ;;  %v12438_v15 = vld [vmem:[#allocation13 + $0xaf4] ss:$72 sps:$4 sm:$0xff]  }
 0x3de   :  { %v6010_v0 = vpop.f32.mrf.mxu1  ;;  %v12433_v18 = vld [vmem:[#allocation13 + $0xb80] ss:$72 sps:$4 sm:$0xff]  }
 0x3df   :  { %v6428_v9 = vmax.f32 %v13818_v54, %v13831_v6  ;;  %v6133_v5 = vpop.f32.mrf.mxu0  ;;  %6303 = vmatpush1.bf16.msra.mxu1 %v12379_v58  ;;  %v12430_v58 = vld [vmem:[#allocation13 + $0xc10] ss:$72 sps:$4 sm:$0xff]   ;;  %v12444_v54 = vld [vmem:[#allocation13 + $0x9d4] ss:$72 sps:$4 sm:$0xff]  }
 0x3e0   :  { %v6011_v39 = vpop.f32.mrf.mxu1  ;;  %6304 = vmatprep.subr.bf16.mxu1 %v12384_v61  ;;  %v12435_v61 = vld [vmem:[#allocation13 + $0xb84] ss:$72 sps:$4 sm:$0xff]   ;;  %v12439_v5 = vld [vmem:[#allocation13 + $0xa60] ss:$72 sps:$4 sm:$0xff]   ;;  %v12442_v6 = vld [vmem:[#allocation13 + $0x9d0] ss:$72 sps:$4 sm:$0xff]  }
 0x3e1   :  { %v6134_v17 = vpop.f32.mrf.mxu0  ;;  %v12450_v39 = vld [vmem:[#allocation13 + $0x11b4] ss:$72 sps:$4 sm:$0xff]  }
 0x3e2   :  { %v12453_v17 = vld [vmem:[#allocation13 + $0x1124] ss:$72 sps:$4 sm:$0xff]  }
 0x3e3   :  { %6305 = vmatpush1.bf16.msra.mxu1 %v12382_v11  ;;  %v12445_v11 = vld [vmem:[#allocation13 + $0x940] ss:$72 sps:$4 sm:$0xff]  }
 0x3e4   :  { %6306 = vmatprep.subr.bf16.mxu1 %v12387_v16  ;;  %v12448_v16 = vld [vmem:[#allocation13 + $0x11b0] ss:$72 sps:$4 sm:$0xff]  }
 0x3e7   :  { %6307 = vmatpush1.bf16.msra.mxu1 %v12385_v22  ;;  %v12451_v22 = vld [vmem:[#allocation13 + $0x1120] ss:$72 sps:$4 sm:$0xff]  }
 0x3e8   :  { %6308 = vmatprep.subr.bf16.mxu1 %v12390_v44  ;;  %v12456_v44 = vld [vmem:[#allocation13 + $0x1094] ss:$72 sps:$4 sm:$0xff]  }
 0x3eb   :  { %6309 = vmatpush1.bf16.msra.mxu1 %v12388_v8  ;;  %v12454_v8 = vld [vmem:[#allocation13 + $0x1090] ss:$72 sps:$4 sm:$0xff]  }
 0x3ec   :  { %6310 = vmatprep.subr.bf16.mxu1 %v12393_v14  ;;  %v12459_v14 = vld [vmem:[#allocation13 + $0x1004] ss:$72 sps:$4 sm:$0xff]  }
 0x3ef   :  { %6311 = vmatpush1.bf16.msra.mxu1 %v12391_v23  ;;  %v12457_v23 = vld [vmem:[#allocation13 + $0x1000] ss:$72 sps:$4 sm:$0xff]  }
 0x3f0   :  { %6312 = vmatprep.subr.bf16.mxu1 %v12396_v25  ;;  %v12462_v25 = vld [vmem:[#allocation13 + $0xf74] ss:$72 sps:$4 sm:$0xff]  }
 0x3f3   :  { %6313 = vmatpush1.bf16.msra.mxu1 %v12394_v26  ;;  %v12460_v26 = vld [vmem:[#allocation13 + $0xf70] ss:$72 sps:$4 sm:$0xff]  }
 0x3f4   :  { %6314 = vmatprep.subr.bf16.mxu1 %v12399_v20  ;;  %v12465_v20 = vld [vmem:[#allocation13 + $0xee4] ss:$72 sps:$4 sm:$0xff]  }
 0x3f7   :  { %6315 = vmatpush1.bf16.msra.mxu1 %v12397_v27  ;;  %v12463_v27 = vld [vmem:[#allocation13 + $0xee0] ss:$72 sps:$4 sm:$0xff]  }
 0x3f8   :  { %6316 = vmatprep.subr.bf16.mxu1 %v12402_v28  ;;  %v12468_v28 = vld [vmem:[#allocation13 + $0xe54] ss:$72 sps:$4 sm:$0xff]  }
 0x3fb   :  { %6317 = vmatpush2.bf16.msra.mxu1 %v12400_v30  ;;  %v12466_v30 = vld [vmem:[#allocation13 + $0xe50] ss:$72 sps:$4 sm:$0xff]  }
 0x3fc   :  { %6318 = vmatprep.subr.bf16.mxu1 %v12405_v31  ;;  %v12471_v31 = vld [vmem:[#allocation13 + $0xdc4] ss:$72 sps:$4 sm:$0xff]  }
 0x3ff   :  { %6319 = vmatpush2.bf16.msra.mxu1 %v12403_v33  ;;  %v12469_v33 = vld [vmem:[#allocation13 + $0xdc0] ss:$72 sps:$4 sm:$0xff]  }
 0x400   :  { %6320 = vmatprep.subr.bf16.mxu1 %v12408_v32 }
 0x403   :  { %6321 = vmatpush2.bf16.msra.mxu1 %v12406_v34 }
 0x404   :  { %6322 = vmatprep.subr.bf16.mxu1 %v12411_v37 }
 0x407   :  { %6323 = vmatpush2.bf16.msra.mxu1 %v12409_v40 }
 0x408   :  { %6324 = vmatprep.subr.bf16.mxu1 %v12414_v41 }
 0x40b   :  { %6325 = vmatpush2.bf16.msra.mxu1 %v12412_v3 }
 0x40c   :  { %6326 = vmatprep.subr.bf16.mxu1 %v12417_v62 }
 0x40f   :  { %6327 = vmatpush2.bf16.msra.mxu1 %v12415_v49 }
 0x410   :  { %6328 = vmatprep.subr.bf16.mxu1 %v12420_v19 }
 0x413   :  { %6329 = vmatpush2.bf16.msra.mxu1 %v12418_v63 }
 0x414   :  { %6330 = vmatprep.subr.bf16.mxu1 %v12423_v51 }
 0x417   :  { %6331 = vmatpush2.bf16.msra.mxu1 %v12421_v38 }
 0x418   :  { %6382 = vmatprep.subr.bf16.mxu1 %v12426_v52 }
 0x41a   :  { %v6088_v2 = vpop.f32.mrf.mxu1  ;;  %6333 = vmatmul.mubr.bf16.vlgmr.msra.gmra.mxu1 %v13739_v29 }
 0x41b   :  { %v6089_v4 = vadd.f32 %v6088_v2, %v13802_v48  ;;  %v13839_v46 = vpop.f32.mrf.mxu0  ;;  %6383 = vmatpush1.bf16.msra.mxu1 %v12424_v53  ;;  %6414 = vmatprep.mubr.bf16.mxu1 %v13737_v50 }
 0x41c   :  { %v6090_v47 = vpop.f32.mrf.mxu1  ;;  %6384 = vmatprep.subr.bf16.mxu1 %v12429_v43 }
 0x41d   :  { %v13845_v56 = vmax.f32 %v6427_v1, %v6089_v4  ;;  %v6091_v57 = vadd.f32 %v6090_v47, %v13813_v24  ;;  %v13848_v45 = vpop.f32.mrf.mxu0  ;;  %v12436_v24 = vld [vmem:[#allocation13 + $0xaf0] ss:$72 sps:$4 sm:$0xff]   ;;  %v12441_v1 = vld [vmem:[#allocation13 + $0xa64] ss:$72 sps:$4 sm:$0xff]  }
 0x41e   :  { %v6092_v13 = vpop.f32.mrf.mxu1 }
 0x41f   :  { %v13853_v48 = vmax.f32 %v6428_v9, %v6091_v57  ;;  %v6215_v50 = vpop.f32.mrf.mxu0  ;;  %6385 = vmatpush1.bf16.msra.mxu1 %v12427_v59  ;;  %v12447_v9 = vld [vmem:[#allocation13 + $0x944] ss:$72 sps:$4 sm:$0xff]  }
 0x420   :  { %v6093_v60 = vpop.f32.mrf.mxu1  ;;  %6386 = vmatprep.subr.bf16.mxu1 %v12432_v55 }
 0x421   :  { %v6216_v0 = vpop.f32.mrf.mxu0 }
 0x423   :  { %6387 = vmatpush1.bf16.msra.mxu1 %v12430_v58 }
 0x424   :  { %6388 = vmatprep.subr.bf16.mxu1 %v12435_v61 }
 0x427   :  { %6389 = vmatpush1.bf16.msra.mxu1 %v12433_v18 }
 0x428   :  { %6390 = vmatprep.subr.bf16.mxu1 %v12438_v15 }
 0x42b   :  { %6391 = vmatpush1.bf16.msra.mxu1 %v12436_v24 }
 0x42c   :  { %6392 = vmatprep.subr.bf16.mxu1 %v12441_v1 }
 0x42f   :  { %6393 = vmatpush1.bf16.msra.mxu1 %v12439_v5 }
 0x430   :  { %6394 = vmatprep.subr.bf16.mxu1 %v12444_v54 }
 0x433   :  { %6395 = vmatpush1.bf16.msra.mxu1 %v12442_v6 }
 0x434   :  { %6396 = vmatprep.subr.bf16.mxu1 %v12447_v9 }
 0x437   :  { %6397 = vmatpush1.bf16.msra.mxu1 %v12445_v11 }
 0x438   :  { %6398 = vmatprep.subr.bf16.mxu1 %v12450_v39 }
 0x43b   :  { %6399 = vmatpush2.bf16.msra.mxu1 %v12448_v16 }
 0x43c   :  { %6400 = vmatprep.subr.bf16.mxu1 %v12453_v17 }
 0x43f   :  { %6401 = vmatpush2.bf16.msra.mxu1 %v12451_v22 }
 0x440   :  { %6402 = vmatprep.subr.bf16.mxu1 %v12456_v44 }
 0x443   :  { %6403 = vmatpush2.bf16.msra.mxu1 %v12454_v8 }
 0x444   :  { %6404 = vmatprep.subr.bf16.mxu1 %v12459_v14 }
 0x447   :  { %6405 = vmatpush2.bf16.msra.mxu1 %v12457_v23 }
 0x448   :  { %6406 = vmatprep.subr.bf16.mxu1 %v12462_v25 }
 0x44b   :  { %6407 = vmatpush2.bf16.msra.mxu1 %v12460_v26 }
 0x44c   :  { %6408 = vmatprep.subr.bf16.mxu1 %v12465_v20 }
 0x44f   :  { %6409 = vmatpush2.bf16.msra.mxu1 %v12463_v27 }
 0x450   :  { %6410 = vmatprep.subr.bf16.mxu1 %v12468_v28 }
 0x453   :  { %6411 = vmatpush2.bf16.msra.mxu1 %v12466_v30 }
 0x454   :  { %6412 = vmatprep.subr.bf16.mxu1 %v12471_v31 }
 0x457   :  { %6413 = vmatpush2.bf16.msra.mxu1 %v12469_v33 }
 0x45a   :  { %v6170_v32 = vpop.f32.mrf.mxu1  ;;  %6415 = vmatmul.mubr.bf16.vlgmr.msra.gmra.mxu1 %v13739_v29 }
 0x45b   :  { %v6171_v34 = vadd.f32 %v6170_v32, %v13824_v21  ;;  %v13857_v37 = vpop.f32.mrf.mxu0 }
 0x45c   :  { %v6172_v40 = vpop.f32.mrf.mxu1 }
 0x45d   :  { %v6431_v41 = vmax.f32 %v13845_v56, %v6171_v34  ;;  %v6173_v3 = vadd.f32 %v6172_v40, %v13833_v7  ;;  %v13861_v62 = vpop.f32.mrf.mxu0 }
 0x45e   :  { %v6174_v49 = vpop.f32.mrf.mxu1 }
 0x45f   :  { %v6432_v19 = vmax.f32 %v13853_v48, %v6173_v3  ;;  %v6297_v63 = vpop.f32.mrf.mxu0 }
 0x460   :  { %v6175_v51 = vpop.f32.mrf.mxu1 }
 0x461   :  { %v6298_v38 = vpop.f32.mrf.mxu0 }
 0x462   :  { %13303 = shalt.err (!%p13300_p3)  }
 0x463   :  { %s14035_s0 = sld [smem:[#allocation63_spill]]  ;;  %s13312_s21 = scalar_lea.vmem %s201_s14, 4096 }
 0x464   :  { %p13313_p4 = scmp.ne.s32.totalorder %s201_s14, %s13312_s21  ;;  %p13317_p5 = scmp.lt.s32.totalorder %s201_s14, %s201_s14 }
 0x465   :  { %p13318_p6 = scmp.lt.s32.totalorder %s13312_s21, %s13312_s21 }
 0x467   :  { %p13319_p7 = por %p13318_p6, %p13317_p5 }
 0x469   :  { %191 = dma.hbm_to_vmem [thread:$0]  %s14035_s0, 4096, %s189_s27, [#allocation10] }
 0x46a   :  { %p13320_p8 = pnand %p13319_p7, %p13313_p4 }
 0x46c   :  { %13323 = shalt.err (!%p13320_p8)  }
 0x46d   :  { %s14036_s1 = sld [smem:[#allocation64_spill]]  ;;  %s13490_s22 = smov [#allocation4]  }
 0x46e   :  { %s212_s13 = sshll.u32 %s13490_s22, 4  ;;  %s13491_s23 = smov [#allocation5]   ;;  %s213_s13 = int_to_ptr.vmem [resolvable:$true] %s212_s13 }
 0x46f   :  { %s224_s24 = sshll.u32 %s13491_s23, 4  ;;  %s13332_s2 = scalar_lea.vmem %s213_s13, 4096  ;;  %s225_s24 = int_to_ptr.vmem [resolvable:$true] %s224_s24 }
 0x470   :  { %p13333_p9 = scmp.ne.s32.totalorder %s213_s13, %s13332_s2  ;;  %p13337_p10 = scmp.lt.s32.totalorder %s213_s13, %s213_s13 }
 0x471   :  { %p13338_p11 = scmp.lt.s32.totalorder %s13332_s2, %s13332_s2 }
 0x473   :  { %203 = dma.hbm_to_vmem [thread:$0]  %s14036_s1, 4096, %s201_s14, [#allocation10 + $0x1] }
 0x474   :  { %p13339_p12 = por %p13338_p11, %p13337_p10 }
 0x476   :  { %p13340_p13 = pnand %p13339_p12, %p13333_p9 }
 0x49a   :  { %v6252_v29 = vpop.f32.mrf.mxu1 }
 0x49b   :  { %v6253_v21 = vadd.f32 %v6252_v29, %v13839_v46  ;;  %v13871_v7 = vpop.f32.mrf.mxu0 }
 0x49c   :  { %v6254_v52 = vpop.f32.mrf.mxu1 }
 0x49d   :  { %v13873_v53 = vmax.f32 %v6431_v41, %v6253_v21  ;;  %v6255_v43 = vadd.f32 %v6254_v52, %v13848_v45  ;;  %v13876_v2 = vpop.f32.mrf.mxu0 }
 0x49e   :  { %13343 = shalt.err (!%p13340_p13)  }
 0x49f   :  { %215 = dma.hbm_to_vmem [thread:$0]  %s14011_s5, 4096, %s213_s13, [#allocation10 + $0x2]  ;;  %v6256_v4 = vpop.f32.mrf.mxu1  ;;  %v13881_v46 = vmax.f32 %v6432_v19, %v6255_v43  ;;  %v6379_v59 = vpop.f32.mrf.mxu0 }
 0x4a0   :  { %s13352_s15 = scalar_lea.vmem %s225_s24, 4096  ;;  %p13357_p1 = scmp.lt.s32.totalorder %s225_s24, %s225_s24 }
 0x4a1   :  { %p13353_p0 = scmp.ne.s32.totalorder %s225_s24, %s13352_s15  ;;  %p13358_p2 = scmp.lt.s32.totalorder %s13352_s15, %s13352_s15 }
 0x4a3   :  { %p13359_p3 = por %p13358_p2, %p13357_p1 }
 0x4a5   :  { %p13360_p4 = pnand %p13359_p3, %p13353_p0 }
 0x4a7   :  { %13363 = shalt.err (!%p13360_p4)  }
 0x4a8   :  { %227 = dma.hbm_to_vmem [thread:$0]  %s14012_s6, 4096, %s225_s24, [#allocation10 + $0x3]  ;;  %v6257_v47 = vpop.f32.mrf.mxu1  ;;  %v6380_v55 = vpop.f32.mrf.mxu0 }
 0x4a9   :  { %s13492_s19 = smov [#allocation6]   ;;  %s13493_s5 = smov [#allocation7]  }
 0x4aa   :  { %s236_s3 = sshll.u32 %s13492_s19, 4  ;;  %s248_s12 = sshll.u32 %s13493_s5, 4  ;;  %s237_s3 = int_to_ptr.vmem [resolvable:$true] %s236_s3  ;;  %s249_s12 = int_to_ptr.vmem [resolvable:$true] %s248_s12 }
 0x4ab   :  { %s13372_s27 = scalar_lea.vmem %s237_s3, 4096  ;;  %p13377_p6 = scmp.lt.s32.totalorder %s237_s3, %s237_s3 }
 0x4ac   :  { %p13373_p5 = scmp.ne.s32.totalorder %s237_s3, %s13372_s27  ;;  %p13378_p7 = scmp.lt.s32.totalorder %s13372_s27, %s13372_s27 }
 0x4ae   :  { %p13379_p8 = por %p13378_p7, %p13377_p6 }
 0x4b0   :  { %p13380_p9 = pnand %p13379_p8, %p13373_p5 }
 0x4b2   :  { %13383 = shalt.err (!%p13380_p9)  }
 0x4b3   :  { %239 = dma.hbm_to_vmem [thread:$0]  %s14013_s7, 4096, %s237_s3, [#allocation10 + $0x4] }
 0x4b4   :  { %s13392_s6 = scalar_lea.vmem %s249_s12, 6144  ;;  %p13397_p11 = scmp.lt.s32.totalorder %s249_s12, %s249_s12 }
 0x4b5   :  { %p13393_p10 = scmp.ne.s32.totalorder %s249_s12, %s13392_s6  ;;  %p13398_p12 = scmp.lt.s32.totalorder %s13392_s6, %s13392_s6 }
 0x4b7   :  { %p13399_p13 = por %p13398_p12, %p13397_p11 }
 0x4b9   :  { %p13400_p0 = pnand %p13399_p13, %p13393_p10 }
 0x4bb   :  { %13403 = shalt.err (!%p13400_p0)  }
 0x4bc   :  { %251 = dma.hbm_to_vmem [thread:$0]  %s14014_s8, 6144, %s249_s12, [#allocation10 + $0x5] }
 0x4bd   :  { %s13494_s30 = smov [#allocation8]   ;;  %s13495_s21 = smov [#allocation9]  }
 0x4be   :  { %s260_s0 = sshll.u32 %s13494_s30, 4  ;;  %s272_s16 = sshll.u32 %s13495_s21, 4  ;;  %s261_s0 = int_to_ptr.vmem [resolvable:$true] %s260_s0  ;;  %s273_s16 = int_to_ptr.vmem [resolvable:$true] %s272_s16 }
 0x4bf   :  { %s13412_s11 = scalar_lea.vmem %s261_s0, 15360  ;;  %p13417_p2 = scmp.lt.s32.totalorder %s261_s0, %s261_s0 }
 0x4c0   :  { %p13413_p1 = scmp.ne.s32.totalorder %s261_s0, %s13412_s11  ;;  %p13418_p3 = scmp.lt.s32.totalorder %s13412_s11, %s13412_s11 }
 0x4c2   :  { %p13419_p4 = por %p13418_p3, %p13417_p2 }
 0x4c4   :  { %p13420_p5 = pnand %p13419_p4, %p13413_p1 }
 0x4c6   :  { %13423 = shalt.err (!%p13420_p5)  }
 0x4c7   :  { %263 = dma.hbm_to_vmem [thread:$0]  %s14015_s9, 15360, %s261_s0, [#allocation10 + $0x6] }
 0x4c8   :  { %s13432_s22 = scalar_lea.vmem %s273_s16, 10240  ;;  %p13437_p7 = scmp.lt.s32.totalorder %s273_s16, %s273_s16 }
 0x4c9   :  { %p13433_p6 = scmp.ne.s32.totalorder %s273_s16, %s13432_s22  ;;  %p13438_p8 = scmp.lt.s32.totalorder %s13432_s22, %s13432_s22 }
 0x4cb   :  { %p13439_p9 = por %p13438_p8, %p13437_p7 }
 0x4cd   :  { %p13440_p10 = pnand %p13439_p9, %p13433_p6 }
 0x4cf   :  { %13443 = shalt.err (!%p13440_p10)  }
 0x4d0   :  { %275 = dma.hbm_to_vmem [thread:$0]  %s14016_s10, 10240, %s273_s16, [#allocation10 + $0x7] }
 0x4da   :  { %v6334_v56 = vpop.f32.mrf.mxu1 }
 0x4db   :  { %v6335_v57 = vadd.f32 %v6334_v56, %v13857_v37 }
 0x4dc   :  { %v6336_v45 = vpop.f32.mrf.mxu1 }
 0x4dd   :  { %v6435_v13 = vmax.f32 %v13873_v53, %v6335_v57  ;;  %v6337_v58 = vadd.f32 %v6336_v45, %v13861_v62 }
 0x4de   :  { %v6338_v48 = vpop.f32.mrf.mxu1 }
 0x4df   :  { %v6436_v18 = vmax.f32 %v13881_v46, %v6337_v58 }
 0x4e0   :  { %v6339_v50 = vpop.f32.mrf.mxu1 }
 0x51a   :  { %v6416_v60 = vpop.f32.mrf.mxu1 }
 0x51b   :  { %v6417_v61 = vadd.f32 %v6416_v60, %v13871_v7 }
 0x51c   :  { %v6418_v0 = vpop.f32.mrf.mxu1 }
 0x51d   :  { %v13903_v15 = vmax.f32 %v6435_v13, %v6417_v61  ;;  %v6419_v24 = vadd.f32 %v6418_v0, %v13876_v2 }
 0x51e   :  { %v6420_v1 = vpop.f32.mrf.mxu1 }
 0x51f   :  { %v13906_v5 = vmax.f32 %v6436_v18, %v6419_v24 }
 0x520   :  { %v6421_v54 = vpop.f32.mrf.mxu1 }
 0x521   :  { %13456 = dma.done.wait [#allocation10], 4096 }
 0x522   :  { %13457 = vsyncadd [#allocation10], 4294963200 }
 0x523   :  { %13458 = dma.done.wait [#allocation10 + $0x1], 4096 }
 0x524   :  { %13459 = vsyncadd [#allocation10 + $0x1], 4294963200  ;;  %v6478_v6 = vpack.c.bf16 %v13906_v5, %v13906_v5  ;;  %v12472_v9 = vld [vmem:[#allocation2 + $0x74] ss:$8 sps:$4 sm:$0xff]   ;;  %v12474_v11 = vld [vmem:[#allocation2 + $0x70] ss:$8 sps:$4 sm:$0xff]   ;;  %v6477_v1 = vpack.c.bf16 %v13903_v15, %v13903_v15 }
 0x525   :  { %6651 = vmatprep.subr.bf16.mxu0 %v12472_v9  ;;  %v12475_v39 = vld [vmem:[#allocation2 + $0x64] ss:$8 sps:$4 sm:$0xff]   ;;  %v12477_v16 = vld [vmem:[#allocation2 + $0x60] ss:$8 sps:$4 sm:$0xff]   ;;  %v12478_v17 = vld [vmem:[#allocation2 + $0x54] ss:$8 sps:$4 sm:$0xff]  }
 0x526   :  { %6683 = vmatprep.mubr.bf16.mxu0 %v6478_v6  ;;  %6652 = vmatpush1.bf16.msra.mxu0 %v12474_v11  ;;  %v12480_v22 = vld [vmem:[#allocation2 + $0x50] ss:$8 sps:$4 sm:$0xff]   ;;  %v12481_v44 = vld [vmem:[#allocation2 + $0x44] ss:$8 sps:$4 sm:$0xff]   ;;  %v12483_v8 = vld [vmem:[#allocation2 + $0x40] ss:$8 sps:$4 sm:$0xff]  }
 0x527   :  { %6653 = vmatprep.subr.bf16.mxu0 %v12475_v39  ;;  %v12484_v14 = vld [vmem:[#allocation2 + $0x34] ss:$8 sps:$4 sm:$0xff]   ;;  %v12486_v23 = vld [vmem:[#allocation2 + $0x30] ss:$8 sps:$4 sm:$0xff]   ;;  %v12487_v25 = vld [vmem:[#allocation2 + $0x24] ss:$8 sps:$4 sm:$0xff]  }
 0x528   :  { %v12489_v26 = vld [vmem:[#allocation2 + $0x20] ss:$8 sps:$4 sm:$0xff]   ;;  %v12490_v20 = vld [vmem:[#allocation2 + $0x14] ss:$8 sps:$4 sm:$0xff]   ;;  %v12522_v28 = vld [vmem:[#allocation3 + $0x70] ss:$8 sps:$4 sm:$0xff]  }
 0x529   :  { %v12520_v27 = vld [vmem:[#allocation3 + $0x74] ss:$8 sps:$4 sm:$0xff]   ;;  %v12492_v30 = vld [vmem:[#allocation2 + $0x10] ss:$8 sps:$4 sm:$0xff]   ;;  %v12523_v31 = vld [vmem:[#allocation3 + $0x64] ss:$8 sps:$4 sm:$0xff]  }
 0x52a   :  { %6654 = vmatpush1.bf16.msra.mxu0 %v12477_v16  ;;  %v12493_v33 = vld [vmem:[#allocation2 + $0x4] ss:$8 sps:$4 sm:$0xff]   ;;  %6900 = vmatprep.subr.bf16.mxu1 %v12520_v27  ;;  %v12525_v32 = vld [vmem:[#allocation3 + $0x60] ss:$8 sps:$4 sm:$0xff]   ;;  %v12526_v34 = vld [vmem:[#allocation3 + $0x54] ss:$8 sps:$4 sm:$0xff]  }
 0x52b   :  { %6655 = vmatprep.subr.bf16.mxu0 %v12478_v17  ;;  %6901 = vmatpush1.bf16.msra.mxu1 %v12522_v28  ;;  %v12495_v37 = vld [vmem:[#allocation2] ss:$8 sps:$4 sm:$0xff]   ;;  %v12496_v40 = vld [vmem:[#allocation2 + $0xf4] ss:$8 sps:$4 sm:$0xff]   ;;  %v12528_v41 = vld [vmem:[#allocation3 + $0x50] ss:$8 sps:$4 sm:$0xff]  }
 0x52c   :  { %6902 = vmatprep.subr.bf16.mxu1 %v12523_v31  ;;  %v12529_v3 = vld [vmem:[#allocation3 + $0x44] ss:$8 sps:$4 sm:$0xff]   ;;  %v12498_v62 = vld [vmem:[#allocation2 + $0xf0] ss:$8 sps:$4 sm:$0xff]   ;;  %v12531_v19 = vld [vmem:[#allocation3 + $0x40] ss:$8 sps:$4 sm:$0xff]  }
 0x52d   :  { %v12499_v49 = vld [vmem:[#allocation2 + $0xe4] ss:$8 sps:$4 sm:$0xff]   ;;  %v12532_v63 = vld [vmem:[#allocation3 + $0x34] ss:$8 sps:$4 sm:$0xff]   ;;  %v12501_v51 = vld [vmem:[#allocation2 + $0xe0] ss:$8 sps:$4 sm:$0xff]  }
 0x52e   :  { %6656 = vmatpush1.bf16.msra.mxu0 %v12480_v22  ;;  %v12502_v38 = vld [vmem:[#allocation2 + $0xd4] ss:$8 sps:$4 sm:$0xff]   ;;  %v12534_v29 = vld [vmem:[#allocation3 + $0x30] ss:$8 sps:$4 sm:$0xff]   ;;  %v12535_v21 = vld [vmem:[#allocation3 + $0x24] ss:$8 sps:$4 sm:$0xff]  }
 0x52f   :  { %6657 = vmatprep.subr.bf16.mxu0 %v12481_v44  ;;  %6903 = vmatpush1.bf16.msra.mxu1 %v12525_v32  ;;  %v12504_v7 = vld [vmem:[#allocation2 + $0xd0] ss:$8 sps:$4 sm:$0xff]   ;;  %v12505_v52 = vld [vmem:[#allocation2 + $0xc4] ss:$8 sps:$4 sm:$0xff]   ;;  %v12537_v53 = vld [vmem:[#allocation3 + $0x20] ss:$8 sps:$4 sm:$0xff]  }
 0x530   :  { %6904 = vmatprep.subr.bf16.mxu1 %v12526_v34  ;;  %v12538_v43 = vld [vmem:[#allocation3 + $0x14] ss:$8 sps:$4 sm:$0xff]   ;;  %v12507_v2 = vld [vmem:[#allocation2 + $0xc0] ss:$8 sps:$4 sm:$0xff]   ;;  %v12540_v46 = vld [vmem:[#allocation3 + $0x10] ss:$8 sps:$4 sm:$0xff]  }
 0x531   :  { %v12508_v4 = vld [vmem:[#allocation2 + $0xb4] ss:$8 sps:$4 sm:$0xff]   ;;  %v12541_v59 = vld [vmem:[#allocation3 + $0x4] ss:$8 sps:$4 sm:$0xff]   ;;  %v12510_v47 = vld [vmem:[#allocation2 + $0xb0] ss:$8 sps:$4 sm:$0xff]  }
 0x532   :  { %6658 = vmatpush1.bf16.msra.mxu0 %v12483_v8  ;;  %v12511_v55 = vld [vmem:[#allocation2 + $0xa4] ss:$8 sps:$4 sm:$0xff]   ;;  %v12543_v56 = vld [vmem:[#allocation3] ss:$8 sps:$4 sm:$0xff]   ;;  %v12544_v57 = vld [vmem:[#allocation3 + $0xf4] ss:$8 sps:$4 sm:$0xff]  }
 0x533   :  { %6659 = vmatprep.subr.bf16.mxu0 %v12484_v14  ;;  %6905 = vmatpush1.bf16.msra.mxu1 %v12528_v41  ;;  %v12513_v45 = vld [vmem:[#allocation2 + $0xa0] ss:$8 sps:$4 sm:$0xff]   ;;  %v12514_v13 = vld [vmem:[#allocation2 + $0x94] ss:$8 sps:$4 sm:$0xff]   ;;  %v12546_v48 = vld [vmem:[#allocation3 + $0xf0] ss:$8 sps:$4 sm:$0xff]  }
 0x534   :  { %6906 = vmatprep.subr.bf16.mxu1 %v12529_v3  ;;  %v12547_v50 = vld [vmem:[#allocation3 + $0xe4] ss:$8 sps:$4 sm:$0xff]   ;;  %v12516_v58 = vld [vmem:[#allocation2 + $0x90] ss:$8 sps:$4 sm:$0xff]   ;;  %v12549_v61 = vld [vmem:[#allocation3 + $0xe0] ss:$8 sps:$4 sm:$0xff]  }
 0x535   :  { %v12517_v60 = vld [vmem:[#allocation2 + $0x84] ss:$8 sps:$4 sm:$0xff]   ;;  %v12550_v0 = vld [vmem:[#allocation3 + $0xd4] ss:$8 sps:$4 sm:$0xff]   ;;  %v12519_v18 = vld [vmem:[#allocation2 + $0x80] ss:$8 sps:$4 sm:$0xff]  }
 0x536   :  { %6660 = vmatpush1.bf16.msra.mxu0 %v12486_v23  ;;  %v12552_v24 = vld [vmem:[#allocation3 + $0xd0] ss:$8 sps:$4 sm:$0xff]   ;;  %v12553_v54 = vld [vmem:[#allocation3 + $0xc4] ss:$8 sps:$4 sm:$0xff]   ;;  %v12555_v6 = vld [vmem:[#allocation3 + $0xc0] ss:$8 sps:$4 sm:$0xff]  }
 0x537   :  { %6661 = vmatprep.subr.bf16.mxu0 %v12487_v25  ;;  %6907 = vmatpush1.bf16.msra.mxu1 %v12531_v19  ;;  %v12556_v9 = vld [vmem:[#allocation3 + $0xb4] ss:$8 sps:$4 sm:$0xff]   ;;  %v12558_v11 = vld [vmem:[#allocation3 + $0xb0] ss:$8 sps:$4 sm:$0xff]   ;;  %v12559_v39 = vld [vmem:[#allocation3 + $0xa4] ss:$8 sps:$4 sm:$0xff]  }
 0x538   :  { %6908 = vmatprep.subr.bf16.mxu1 %v12532_v63  ;;  %v12561_v16 = vld [vmem:[#allocation3 + $0xa0] ss:$8 sps:$4 sm:$0xff]   ;;  %v12562_v17 = vld [vmem:[#allocation3 + $0x94] ss:$8 sps:$4 sm:$0xff]   ;;  %v12564_v22 = vld [vmem:[#allocation3 + $0x90] ss:$8 sps:$4 sm:$0xff]  }
 0x539   :  { %v12565_v44 = vld [vmem:[#allocation3 + $0x84] ss:$8 sps:$4 sm:$0xff]   ;;  %v12567_v8 = vld [vmem:[#allocation3 + $0x80] ss:$8 sps:$4 sm:$0xff]  }
 0x53a   :  { %6662 = vmatpush1.bf16.msra.mxu0 %v12489_v26  ;;  %v6479_v14 = vld [vmem:[#allocation16] sm:$0x3] }
 0x53b   :  { %6663 = vmatprep.subr.bf16.mxu0 %v12490_v20  ;;  %6909 = vmatpush1.bf16.msra.mxu1 %v12534_v29  ;;  %v6484_v23 = vrot.slane %v6479_v14, %v13694_v35  ;;  %v6488_v25 = vrot.slane %v6479_v14, %v13697_v36 }
 0x53c   :  { %6910 = vmatprep.subr.bf16.mxu1 %v12535_v21 }
 0x53e   :  { %6664 = vmatpush1.bf16.msra.mxu0 %v12492_v30 }
 0x53f   :  { %6665 = vmatprep.subr.bf16.mxu0 %v12493_v33  ;;  %6911 = vmatpush1.bf16.msra.mxu1 %v12537_v53 }
 0x540   :  { %6912 = vmatprep.subr.bf16.mxu1 %v12538_v43 }
 0x542   :  { %6666 = vmatpush1.bf16.msra.mxu0 %v12495_v37 }
 0x543   :  { %6667 = vmatprep.subr.bf16.mxu0 %v12496_v40  ;;  %6913 = vmatpush1.bf16.msra.mxu1 %v12540_v46  ;;  %v6728_v40 = vld [vmem:[#allocation18] sm:$0x3] }
 0x544   :  { %6914 = vmatprep.subr.bf16.mxu1 %v12541_v59  ;;  %v6733_v41 = vrot.slane %v6728_v40, %v13694_v35  ;;  %v6737_v3 = vrot.slane %v6728_v40, %v13697_v36 }
 0x546   :  { %6668 = vmatpush2.bf16.msra.mxu0 %v12498_v62 }
 0x547   :  { %6669 = vmatprep.subr.bf16.mxu0 %v12499_v49  ;;  %6915 = vmatpush1.bf16.msra.mxu1 %v12543_v56 }
 0x548   :  { %6916 = vmatprep.subr.bf16.mxu1 %v12544_v57 }
 0x54a   :  { %6670 = vmatpush2.bf16.msra.mxu0 %v12501_v51 }
 0x54b   :  { %6671 = vmatprep.subr.bf16.mxu0 %v12502_v38  ;;  %6917 = vmatpush2.bf16.msra.mxu1 %v12546_v48 }
 0x54c   :  { %6918 = vmatprep.subr.bf16.mxu1 %v12547_v50 }
 0x54e   :  { %6672 = vmatpush2.bf16.msra.mxu0 %v12504_v7 }
 0x54f   :  { %6673 = vmatprep.subr.bf16.mxu0 %v12505_v52  ;;  %6919 = vmatpush2.bf16.msra.mxu1 %v12549_v61 }
 0x550   :  { %6920 = vmatprep.subr.bf16.mxu1 %v12550_v0 }
 0x552   :  { %6674 = vmatpush2.bf16.msra.mxu0 %v12507_v2 }
 0x553   :  { %6675 = vmatprep.subr.bf16.mxu0 %v12508_v4  ;;  %6921 = vmatpush2.bf16.msra.mxu1 %v12552_v24 }
 0x554   :  { %6922 = vmatprep.subr.bf16.mxu1 %v12553_v54 }
 0x556   :  { %6676 = vmatpush2.bf16.msra.mxu0 %v12510_v47 }
 0x557   :  { %6677 = vmatprep.subr.bf16.mxu0 %v12511_v55  ;;  %6923 = vmatpush2.bf16.msra.mxu1 %v12555_v6 }
 0x558   :  { %6924 = vmatprep.subr.bf16.mxu1 %v12556_v9 }
 0x55a   :  { %6678 = vmatpush2.bf16.msra.mxu0 %v12513_v45 }
 0x55b   :  { %6679 = vmatprep.subr.bf16.mxu0 %v12514_v13  ;;  %6925 = vmatpush2.bf16.msra.mxu1 %v12558_v11 }
 0x55c   :  { %6926 = vmatprep.subr.bf16.mxu1 %v12559_v39 }
 0x55e   :  { %6680 = vmatpush2.bf16.msra.mxu0 %v12516_v58 }
 0x55f   :  { %6681 = vmatprep.subr.bf16.mxu0 %v12517_v60  ;;  %6927 = vmatpush2.bf16.msra.mxu1 %v12561_v16 }
 0x560   :  { %6928 = vmatprep.subr.bf16.mxu1 %v12562_v17 }
 0x562   :  { %6682 = vmatpush2.bf16.msra.mxu0 %v12519_v18 }
 0x563   :  { %6929 = vmatpush2.bf16.msra.mxu1 %v12564_v22 }
 0x564   :  { %6930 = vmatprep.subr.bf16.mxu1 %v12565_v44 }
 0x565   :  { %6684 = vmatmul.mubr.bf16.vlgmr.msra.gmra.mxu0 %v6477_v1 }
 0x567   :  { %6931 = vmatpush2.bf16.msra.mxu1 %v12567_v8 }
 0x625   :  { %v6685_v26 = vpop.f32.mrf.mxu0 }
 0x626   :  { %v6686_v20 = vadd.f32 %v6685_v26, %v6484_v23 }
 0x627   :  { %v6687_v27 = vpop.f32.mrf.mxu0 }
 0x628   :  { %v6688_v28 = vadd.f32 %v6687_v27, %v6488_v25  ;;  %v6692_v30 = vmax.f32 %v6686_v20, 0.0 }
 0x629   :  { %v6689_v31 = vpop.f32.mrf.mxu0 }
 0x62a   :  { %v6693_v33 = vmax.f32 %v6688_v28, 0.0  ;;  %v6726_v37 = vpack.c.bf16 %v6692_v30, %v6692_v30 }
 0x62b   :  { %v6690_v32 = vpop.f32.mrf.mxu0 }
 0x62c   :  { %v6727_v34 = vpack.c.bf16 %v6693_v33, %v6693_v33 }
 0x62e   :  { %6932 = vmatprep.mubr.bf16.mxu1 %v6727_v34 }
 0x62f   :  { %6933 = vmatmul.mubr.bf16.vlgmr.msra.gmra.mxu1 %v6726_v37 }
 0x6ef   :  { %v6934_v62 = vpop.f32.mrf.mxu1 }
 0x6f0   :  { %v6935_v49 = vadd.f32 %v6934_v62, %v6733_v41 }
 0x6f1   :  { %v6936_v19 = vpop.f32.mrf.mxu1 }
 0x6f2   :  { %v13917_v63 = vadd.f32 %v6935_v49, %v13903_v15  ;;  %v6937_v51 = vadd.f32 %v6936_v19, %v6737_v3 }
 0x6f3   :  { %v6938_v38 = vpop.f32.mrf.mxu1 }
 0x6f4   :  { %v6943_v29 = vmax.f32 %v13917_v63, 0.0  ;;  %v6942_v21 = vadd.f32 %v6937_v51, %v13906_v5 }
 0x6f5   :  { %v6939_v7 = vpop.f32.mrf.mxu1 }
 0x6f6   :  { %v6944_v52 = vmax.f32 %v6942_v21, 0.0 }
 0x6f7   :  { %13460 = dma.done.wait [#allocation10 + $0x2], 4096 }
 0x6f8   :  { %13461 = vsyncadd [#allocation10 + $0x2], 4294963200 }
 0x6f9   :  { %13462 = dma.done.wait [#allocation10 + $0x3], 4096 }
 0x6fa   :  { %13463 = vsyncadd [#allocation10 + $0x3], 4294963200 }
 0x6fb   :  { %13464 = dma.done.wait [#allocation10 + $0x4], 4096 }
 0x6fc   :  { %13465 = vsyncadd [#allocation10 + $0x4], 4294963200  ;;  %v13921_v53 = vpack.c.bf16 %v6944_v52, %v6944_v52  ;;  %v12568_v15 = vld [vmem:[#allocation4 + $0x74] ss:$8 sps:$4 sm:$0xff]   ;;  %v12570_v43 = vld [vmem:[#allocation4 + $0x70] ss:$8 sps:$4 sm:$0xff]   ;;  %v13927_v7 = vpack.c.bf16 %v6943_v29, %v6943_v29 }
 0x6fd   :  { %7157 = vmatprep.subr.bf16.mxu0 %v12568_v15  ;;  %v12571_v2 = vld [vmem:[#allocation4 + $0x64] ss:$8 sps:$4 sm:$0xff]   ;;  %v12573_v4 = vld [vmem:[#allocation4 + $0x60] ss:$8 sps:$4 sm:$0xff]   ;;  %v12574_v5 = vld [vmem:[#allocation4 + $0x54] ss:$8 sps:$4 sm:$0xff]  }
 0x6fe   :  { %7189 = vmatprep.mubr.bf16.mxu0 %v13921_v53  ;;  %7158 = vmatpush1.bf16.msra.mxu0 %v12570_v43  ;;  %v12576_v46 = vld [vmem:[#allocation4 + $0x50] ss:$8 sps:$4 sm:$0xff]   ;;  %v12577_v59 = vld [vmem:[#allocation4 + $0x44] ss:$8 sps:$4 sm:$0xff]   ;;  %v12579_v47 = vld [vmem:[#allocation4 + $0x40] ss:$8 sps:$4 sm:$0xff]  }
 0x6ff   :  { %7159 = vmatprep.subr.bf16.mxu0 %v12571_v2  ;;  %v12580_v55 = vld [vmem:[#allocation4 + $0x34] ss:$8 sps:$4 sm:$0xff]   ;;  %v12582_v56 = vld [vmem:[#allocation4 + $0x30] ss:$8 sps:$4 sm:$0xff]   ;;  %v12583_v57 = vld [vmem:[#allocation4 + $0x24] ss:$8 sps:$4 sm:$0xff]  }
 0x700   :  { %v12585_v45 = vld [vmem:[#allocation4 + $0x20] ss:$8 sps:$4 sm:$0xff]   ;;  %v12586_v13 = vld [vmem:[#allocation4 + $0x14] ss:$8 sps:$4 sm:$0xff]   ;;  %v12588_v48 = vld [vmem:[#allocation4 + $0x10] ss:$8 sps:$4 sm:$0xff]  }
 0x701   :  { %v12589_v50 = vld [vmem:[#allocation4 + $0x4] ss:$8 sps:$4 sm:$0xff]   ;;  %v12622_v58 = vld [vmem:[#allocation5 + $0x74] ss:$8 sps:$4 sm:$0xff]   ;;  %v12624_v60 = vld [vmem:[#allocation5 + $0x70] ss:$8 sps:$4 sm:$0xff]  }
 0x702   :  { %7160 = vmatpush1.bf16.msra.mxu0 %v12573_v4  ;;  %v12591_v61 = vld [vmem:[#allocation4] ss:$8 sps:$4 sm:$0xff]   ;;  %7406 = vmatprep.subr.bf16.mxu1 %v12622_v58  ;;  %v12628_v0 = vld [vmem:[#allocation5 + $0x64] ss:$8 sps:$4 sm:$0xff]   ;;  %v12592_v24 = vld [vmem:[#allocation4 + $0xf4] ss:$8 sps:$4 sm:$0xff]  }
 0x703   :  { %7161 = vmatprep.subr.bf16.mxu0 %v12574_v5  ;;  %7407 = vmatpush1.bf16.msra.mxu1 %v12624_v60  ;;  %v12630_v18 = vld [vmem:[#allocation5 + $0x60] ss:$8 sps:$4 sm:$0xff]   ;;  %v12594_v1 = vld [vmem:[#allocation4 + $0xf0] ss:$8 sps:$4 sm:$0xff]   ;;  %v12634_v54 = vld [vmem:[#allocation5 + $0x54] ss:$8 sps:$4 sm:$0xff]  }
 0x704   :  { %7408 = vmatprep.subr.bf16.mxu1 %v12628_v0  ;;  %v12595_v6 = vld [vmem:[#allocation4 + $0xe4] ss:$8 sps:$4 sm:$0xff]   ;;  %v12636_v9 = vld [vmem:[#allocation5 + $0x50] ss:$8 sps:$4 sm:$0xff]   ;;  %v12597_v39 = vld [vmem:[#allocation4 + $0xe0] ss:$8 sps:$4 sm:$0xff]  }
 0x705   :  { %v12640_v11 = vld [vmem:[#allocation5 + $0x44] ss:$8 sps:$4 sm:$0xff]   ;;  %v12598_v16 = vld [vmem:[#allocation4 + $0xd4] ss:$8 sps:$4 sm:$0xff]   ;;  %v12642_v17 = vld [vmem:[#allocation5 + $0x40] ss:$8 sps:$4 sm:$0xff]  }
 0x706   :  { %7162 = vmatpush1.bf16.msra.mxu0 %v12576_v46  ;;  %v12646_v22 = vld [vmem:[#allocation5 + $0x34] ss:$8 sps:$4 sm:$0xff]   ;;  %v12600_v44 = vld [vmem:[#allocation4 + $0xd0] ss:$8 sps:$4 sm:$0xff]   ;;  %v12601_v8 = vld [vmem:[#allocation4 + $0xc4] ss:$8 sps:$4 sm:$0xff]  }
 0x707   :  { %7163 = vmatprep.subr.bf16.mxu0 %v12577_v59  ;;  %7409 = vmatpush1.bf16.msra.mxu1 %v12630_v18  ;;  %v12648_v14 = vld [vmem:[#allocation5 + $0x30] ss:$8 sps:$4 sm:$0xff]   ;;  %v12652_v23 = vld [vmem:[#allocation5 + $0x24] ss:$8 sps:$4 sm:$0xff]   ;;  %v12603_v25 = vld [vmem:[#allocation4 + $0xc0] ss:$8 sps:$4 sm:$0xff]  }
 0x708   :  { %7410 = vmatprep.subr.bf16.mxu1 %v12634_v54  ;;  %v12604_v26 = vld [vmem:[#allocation4 + $0xb4] ss:$8 sps:$4 sm:$0xff]   ;;  %v12654_v20 = vld [vmem:[#allocation5 + $0x20] ss:$8 sps:$4 sm:$0xff]   ;;  %v12606_v28 = vld [vmem:[#allocation4 + $0xb0] ss:$8 sps:$4 sm:$0xff]  }
 0x709   :  { %v12658_v27 = vld [vmem:[#allocation5 + $0x14] ss:$8 sps:$4 sm:$0xff]   ;;  %v12607_v30 = vld [vmem:[#allocation4 + $0xa4] ss:$8 sps:$4 sm:$0xff]   ;;  %v12660_v31 = vld [vmem:[#allocation5 + $0x10] ss:$8 sps:$4 sm:$0xff]  }
 0x70a   :  { %7164 = vmatpush1.bf16.msra.mxu0 %v12579_v47  ;;  %v12664_v33 = vld [vmem:[#allocation5 + $0x4] ss:$8 sps:$4 sm:$0xff]   ;;  %v12609_v32 = vld [vmem:[#allocation4 + $0xa0] ss:$8 sps:$4 sm:$0xff]   ;;  %v12610_v34 = vld [vmem:[#allocation4 + $0x94] ss:$8 sps:$4 sm:$0xff]  }
 0x70b   :  { %7165 = vmatprep.subr.bf16.mxu0 %v12580_v55  ;;  %7411 = vmatpush1.bf16.msra.mxu1 %v12636_v9  ;;  %v12666_v37 = vld [vmem:[#allocation5] ss:$8 sps:$4 sm:$0xff]   ;;  %v12670_v40 = vld [vmem:[#allocation5 + $0xf4] ss:$8 sps:$4 sm:$0xff]   ;;  %v12612_v41 = vld [vmem:[#allocation4 + $0x90] ss:$8 sps:$4 sm:$0xff]  }
 0x70c   :  { %7412 = vmatprep.subr.bf16.mxu1 %v12640_v11  ;;  %v12613_v3 = vld [vmem:[#allocation4 + $0x84] ss:$8 sps:$4 sm:$0xff]   ;;  %v12672_v62 = vld [vmem:[#allocation5 + $0xf0] ss:$8 sps:$4 sm:$0xff]   ;;  %v12615_v19 = vld [vmem:[#allocation4 + $0x80] ss:$8 sps:$4 sm:$0xff]  }
 0x70d   :  { %v12676_v49 = vld [vmem:[#allocation5 + $0xe4] ss:$8 sps:$4 sm:$0xff]   ;;  %v12618_v51 = vld [vmem:[#allocation6 + $0x74] ss:$8 sps:$4 sm:$0xff]   ;;  %v12678_v38 = vld [vmem:[#allocation5 + $0xe0] ss:$8 sps:$4 sm:$0xff]  }
 0x70e   :  { %7166 = vmatpush1.bf16.msra.mxu0 %v12582_v56  ;;  %v12682_v21 = vld [vmem:[#allocation5 + $0xd4] ss:$8 sps:$4 sm:$0xff]   ;;  %v12616_v52 = vld [vmem:[#allocation6 + $0x70] ss:$8 sps:$4 sm:$0xff]   ;;  %v12621_v43 = vld [vmem:[#allocation6 + $0x64] ss:$8 sps:$4 sm:$0xff]  }
 0x70f   :  { %7167 = vmatprep.subr.bf16.mxu0 %v12583_v57  ;;  %7413 = vmatpush1.bf16.msra.mxu1 %v12642_v17  ;;  %v12684_v15 = vld [vmem:[#allocation5 + $0xd0] ss:$8 sps:$4 sm:$0xff]   ;;  %v12688_v2 = vld [vmem:[#allocation5 + $0xc4] ss:$8 sps:$4 sm:$0xff]   ;;  %v12619_v4 = vld [vmem:[#allocation6 + $0x60] ss:$8 sps:$4 sm:$0xff]  }
 0x710   :  { %7414 = vmatprep.subr.bf16.mxu1 %v12646_v22  ;;  %v12690_v5 = vld [vmem:[#allocation5 + $0xc0] ss:$8 sps:$4 sm:$0xff]   ;;  %v12627_v46 = vld [vmem:[#allocation6 + $0x54] ss:$8 sps:$4 sm:$0xff]   ;;  %v12625_v29 = vld [vmem:[#allocation6 + $0x50] ss:$8 sps:$4 sm:$0xff]  }
 0x711   :  { %v12694_v63 = vld [vmem:[#allocation5 + $0xb4] ss:$8 sps:$4 sm:$0xff]   ;;  %v12696_v59 = vld [vmem:[#allocation5 + $0xb0] ss:$8 sps:$4 sm:$0xff]   ;;  %v12633_v47 = vld [vmem:[#allocation6 + $0x44] ss:$8 sps:$4 sm:$0xff]  }
 0x712   :  { %7168 = vmatpush1.bf16.msra.mxu0 %v12585_v45  ;;  %v12700_v55 = vld [vmem:[#allocation5 + $0xa4] ss:$8 sps:$4 sm:$0xff]   ;;  %v12631_v56 = vld [vmem:[#allocation6 + $0x40] ss:$8 sps:$4 sm:$0xff]   ;;  %v12639_v45 = vld [vmem:[#allocation6 + $0x34] ss:$8 sps:$4 sm:$0xff]  }
 0x713   :  { %7169 = vmatprep.subr.bf16.mxu0 %v12586_v13  ;;  %7415 = vmatpush1.bf16.msra.mxu1 %v12648_v14  ;;  %v12702_v57 = vld [vmem:[#allocation5 + $0xa0] ss:$8 sps:$4 sm:$0xff]   ;;  %v12637_v13 = vld [vmem:[#allocation6 + $0x30] ss:$8 sps:$4 sm:$0xff]   ;;  %v12657_v60 = vld [vmem:[#allocation6 + $0x4] ss:$8 sps:$4 sm:$0xff]  }
 0x714   :  { %7416 = vmatprep.subr.bf16.mxu1 %v12652_v23  ;;  %v12649_v58 = vld [vmem:[#allocation6 + $0x10] ss:$8 sps:$4 sm:$0xff]   ;;  %v12663_v0 = vld [vmem:[#allocation6 + $0xf4] ss:$8 sps:$4 sm:$0xff]   ;;  %v12681_v9 = vld [vmem:[#allocation6 + $0xc4] ss:$8 sps:$4 sm:$0xff]  }
 0x715   :  { %v12661_v18 = vld [vmem:[#allocation6 + $0xf0] ss:$8 sps:$4 sm:$0xff]   ;;  %v12675_v54 = vld [vmem:[#allocation6 + $0xd4] ss:$8 sps:$4 sm:$0xff]   ;;  %v12679_v11 = vld [vmem:[#allocation6 + $0xc0] ss:$8 sps:$4 sm:$0xff]  }
 0x716   :  { %7170 = vmatpush1.bf16.msra.mxu0 %v12588_v48  ;;  %v12643_v48 = vld [vmem:[#allocation6 + $0x20] ss:$8 sps:$4 sm:$0xff]   ;;  %v12693_v17 = vld [vmem:[#allocation6 + $0xa4] ss:$8 sps:$4 sm:$0xff]  }
 0x717   :  { %7171 = vmatprep.subr.bf16.mxu0 %v12589_v50  ;;  %7417 = vmatpush1.bf16.msra.mxu1 %v12654_v20  ;;  %v12651_v50 = vld [vmem:[#allocation6 + $0x14] ss:$8 sps:$4 sm:$0xff]   ;;  %v12691_v22 = vld [vmem:[#allocation6 + $0xa0] ss:$8 sps:$4 sm:$0xff]   ;;  %v12705_v14 = vld [vmem:[#allocation6 + $0x84] ss:$8 sps:$4 sm:$0xff]  }
 0x718   :  { %7418 = vmatprep.subr.bf16.mxu1 %v12658_v27  ;;  %v12703_v23 = vld [vmem:[#allocation6 + $0x80] ss:$8 sps:$4 sm:$0xff]   ;;  %v12709_v20 = vld [vmem:[#allocation5 + $0x84] ss:$8 sps:$4 sm:$0xff]  }
 0x719   :  { %v12711_v27 = vld [vmem:[#allocation5 + $0x80] ss:$8 sps:$4 sm:$0xff]  }
 0x71a   :  { %7172 = vmatpush1.bf16.msra.mxu0 %v12591_v61  ;;  %v12655_v61 = vld [vmem:[#allocation6] ss:$8 sps:$4 sm:$0xff]  }
 0x71b   :  { %7173 = vmatprep.subr.bf16.mxu0 %v12592_v24  ;;  %7419 = vmatpush1.bf16.msra.mxu1 %v12660_v31  ;;  %v12669_v24 = vld [vmem:[#allocation6 + $0xe4] ss:$8 sps:$4 sm:$0xff]  }
 0x71c   :  { %7420 = vmatprep.subr.bf16.mxu1 %v12664_v33 }
 0x71e   :  { %7174 = vmatpush2.bf16.msra.mxu0 %v12594_v1  ;;  %v12667_v1 = vld [vmem:[#allocation6 + $0xe0] ss:$8 sps:$4 sm:$0xff]  }
 0x71f   :  { %7175 = vmatprep.subr.bf16.mxu0 %v12595_v6  ;;  %7421 = vmatpush1.bf16.msra.mxu1 %v12666_v37  ;;  %v12673_v6 = vld [vmem:[#allocation6 + $0xd0] ss:$8 sps:$4 sm:$0xff]  }
 0x720   :  { %7422 = vmatprep.subr.bf16.mxu1 %v12670_v40 }
 0x722   :  { %7176 = vmatpush2.bf16.msra.mxu0 %v12597_v39  ;;  %v12687_v39 = vld [vmem:[#allocation6 + $0xb4] ss:$8 sps:$4 sm:$0xff]  }
 0x723   :  { %7177 = vmatprep.subr.bf16.mxu0 %v12598_v16  ;;  %7423 = vmatpush2.bf16.msra.mxu1 %v12672_v62  ;;  %v12685_v16 = vld [vmem:[#allocation6 + $0xb0] ss:$8 sps:$4 sm:$0xff]  }
 0x724   :  { %7424 = vmatprep.subr.bf16.mxu1 %v12676_v49 }
 0x726   :  { %7178 = vmatpush2.bf16.msra.mxu0 %v12600_v44  ;;  %v12699_v44 = vld [vmem:[#allocation6 + $0x94] ss:$8 sps:$4 sm:$0xff]  }
 0x727   :  { %7179 = vmatprep.subr.bf16.mxu0 %v12601_v8  ;;  %7425 = vmatpush2.bf16.msra.mxu1 %v12678_v38  ;;  %v12697_v8 = vld [vmem:[#allocation6 + $0x90] ss:$8 sps:$4 sm:$0xff]  }
 0x728   :  { %7426 = vmatprep.subr.bf16.mxu1 %v12682_v21 }
 0x72a   :  { %7180 = vmatpush2.bf16.msra.mxu0 %v12603_v25  ;;  %v12706_v25 = vld [vmem:[#allocation5 + $0x94] ss:$8 sps:$4 sm:$0xff]  }
 0x72b   :  { %7181 = vmatprep.subr.bf16.mxu0 %v12604_v26  ;;  %7427 = vmatpush2.bf16.msra.mxu1 %v12684_v15  ;;  %v12708_v26 = vld [vmem:[#allocation5 + $0x90] ss:$8 sps:$4 sm:$0xff]   ;;  %v7234_v15 = vld [vmem:[#allocation21] sm:$0x3] }
 0x72c   :  { %7428 = vmatprep.subr.bf16.mxu1 %v12688_v2  ;;  %v7239_v2 = vrot.slane %v7234_v15, %v13694_v35 }
 0x72e   :  { %7182 = vmatpush2.bf16.msra.mxu0 %v12606_v28  ;;  %v6985_v28 = vld [vmem:[#allocation19] sm:$0x3] }
 0x72f   :  { %7183 = vmatprep.subr.bf16.mxu0 %v12607_v30  ;;  %7429 = vmatpush2.bf16.msra.mxu1 %v12690_v5  ;;  %v6990_v30 = vrot.slane %v6985_v28, %v13694_v35  ;;  %v6994_v31 = vrot.slane %v6985_v28, %v13697_v36 }
 0x730   :  { %7430 = vmatprep.subr.bf16.mxu1 %v12694_v63 }
 0x732   :  { %7184 = vmatpush2.bf16.msra.mxu0 %v12609_v32 }
 0x733   :  { %7185 = vmatprep.subr.bf16.mxu0 %v12610_v34  ;;  %7431 = vmatpush2.bf16.msra.mxu1 %v12696_v59 }
 0x734   :  { %7432 = vmatprep.subr.bf16.mxu1 %v12700_v55 }
 0x736   :  { %7186 = vmatpush2.bf16.msra.mxu0 %v12612_v41 }
 0x737   :  { %7187 = vmatprep.subr.bf16.mxu0 %v12613_v3  ;;  %7433 = vmatpush2.bf16.msra.mxu1 %v12702_v57 }
 0x738   :  { %7434 = vmatprep.subr.bf16.mxu1 %v12706_v25 }
 0x73a   :  { %7188 = vmatpush2.bf16.msra.mxu0 %v12615_v19 }
 0x73b   :  { %7651 = vmatprep.subr.bf16.mxu0 %v12618_v51  ;;  %7435 = vmatpush2.bf16.msra.mxu1 %v12708_v26 }
 0x73c   :  { %7436 = vmatprep.subr.bf16.mxu1 %v12709_v20 }
 0x73d   :  { %7190 = vmatmul.mubr.bf16.vlgmr.msra.gmra.mxu0 %v13927_v7 }
 0x73e   :  { %7652 = vmatpush1.bf16.msra.mxu0 %v12616_v52  ;;  %7683 = vmatprep.mubr.bf16.mxu0 %v13921_v53  ;;  %v12645_v53 = vld [vmem:[#allocation6 + $0x24] ss:$8 sps:$4 sm:$0xff]  }
 0x73f   :  { %7653 = vmatprep.subr.bf16.mxu0 %v12621_v43  ;;  %7437 = vmatpush2.bf16.msra.mxu1 %v12711_v27  ;;  %v7479_v52 = vld [vmem:[#allocation22] sm:$0x3] }
 0x740   :  { %v7484_v43 = vrot.slane %v7479_v52, %v13694_v35  ;;  %v7488_v5 = vrot.slane %v7479_v52, %v13697_v36 }
 0x742   :  { %7654 = vmatpush1.bf16.msra.mxu0 %v12619_v4 }
 0x743   :  { %7655 = vmatprep.subr.bf16.mxu0 %v12627_v46  ;;  %v7243_v46 = vrot.slane %v7234_v15, %v13697_v36 }
 0x746   :  { %7656 = vmatpush1.bf16.msra.mxu0 %v12625_v29 }
 0x747   :  { %7657 = vmatprep.subr.bf16.mxu0 %v12633_v47 }
 0x74a   :  { %7658 = vmatpush1.bf16.msra.mxu0 %v12631_v56 }
 0x74b   :  { %7659 = vmatprep.subr.bf16.mxu0 %v12639_v45 }
 0x74e   :  { %7660 = vmatpush1.bf16.msra.mxu0 %v12637_v13 }
 0x74f   :  { %7661 = vmatprep.subr.bf16.mxu0 %v12645_v53 }
 0x752   :  { %7662 = vmatpush1.bf16.msra.mxu0 %v12643_v48 }
 0x753   :  { %7663 = vmatprep.subr.bf16.mxu0 %v12651_v50 }
 0x756   :  { %7664 = vmatpush1.bf16.msra.mxu0 %v12649_v58 }
 0x757   :  { %7665 = vmatprep.subr.bf16.mxu0 %v12657_v60 }
 0x75a   :  { %7666 = vmatpush1.bf16.msra.mxu0 %v12655_v61 }
 0x75b   :  { %7667 = vmatprep.subr.bf16.mxu0 %v12663_v0 }
 0x75e   :  { %7668 = vmatpush2.bf16.msra.mxu0 %v12661_v18 }
 0x75f   :  { %7669 = vmatprep.subr.bf16.mxu0 %v12669_v24 }
 0x762   :  { %7670 = vmatpush2.bf16.msra.mxu0 %v12667_v1 }
 0x763   :  { %7671 = vmatprep.subr.bf16.mxu0 %v12675_v54 }
 0x766   :  { %7672 = vmatpush2.bf16.msra.mxu0 %v12673_v6 }
 0x767   :  { %7673 = vmatprep.subr.bf16.mxu0 %v12681_v9 }
 0x76a   :  { %7674 = vmatpush2.bf16.msra.mxu0 %v12679_v11 }
 0x76b   :  { %7675 = vmatprep.subr.bf16.mxu0 %v12687_v39 }
 0x76e   :  { %7676 = vmatpush2.bf16.msra.mxu0 %v12685_v16 }
 0x76f   :  { %7677 = vmatprep.subr.bf16.mxu0 %v12693_v17 }
 0x772   :  { %7678 = vmatpush2.bf16.msra.mxu0 %v12691_v22 }
 0x773   :  { %7679 = vmatprep.subr.bf16.mxu0 %v12699_v44 }
 0x776   :  { %7680 = vmatpush2.bf16.msra.mxu0 %v12697_v8 }
 0x777   :  { %7681 = vmatprep.subr.bf16.mxu0 %v12705_v14 }
 0x77a   :  { %7682 = vmatpush2.bf16.msra.mxu0 %v12703_v23 }
 0x77d   :  { %7684 = vmatmul.mubr.bf16.vlgmr.msra.gmra.mxu0 %v13927_v7 }
 0x7fd   :  { %v7191_v33 = vpop.f32.mrf.mxu0 }
 0x7fe   :  { %v7192_v32 = vadd.f32 %v7191_v33, %v6990_v30 }
 0x7ff   :  { %v7193_v34 = vpop.f32.mrf.mxu0 }
 0x800   :  { %v7194_v37 = vadd.f32 %v7193_v34, %v6994_v31  ;;  %v7198_v40 = vmax.f32 %v7192_v32, 0.0 }
 0x801   :  { %v7195_v41 = vpop.f32.mrf.mxu0 }
 0x802   :  { %v7199_v3 = vmax.f32 %v7194_v37, 0.0  ;;  %v7232_v19 = vpack.c.bf16 %v7198_v40, %v7198_v40 }
 0x803   :  { %v7196_v62 = vpop.f32.mrf.mxu0 }
 0x804   :  { %v7233_v49 = vpack.c.bf16 %v7199_v3, %v7199_v3 }
 0x806   :  { %7438 = vmatprep.mubr.bf16.mxu1 %v7233_v49 }
 0x807   :  { %7439 = vmatmul.mubr.bf16.vlgmr.msra.gmra.mxu1 %v7232_v19 }
 0x83d   :  { %v7685_v51 = vpop.f32.mrf.mxu0 }
 0x83e   :  { %v7686_v4 = vadd.f32 %v7685_v51, %v7484_v43 }
 0x83f   :  { %v7687_v38 = vpop.f32.mrf.mxu0 }
 0x840   :  { %v7688_v47 = vadd.f32 %v7687_v38, %v7488_v5 }
 0x841   :  { %v7689_v21 = vpop.f32.mrf.mxu0 }
 0x843   :  { %v7690_v7 = vpop.f32.mrf.mxu0 }
 0x8c7   :  { %v7440_v63 = vpop.f32.mrf.mxu1 }
 0x8c8   :  { %v7441_v29 = vadd.f32 %v7440_v63, %v7239_v2 }
 0x8c9   :  { %v7442_v59 = vpop.f32.mrf.mxu1 }
 0x8ca   :  { %v13938_v55 = vadd.f32 %v7686_v4, %v7441_v29  ;;  %v7443_v56 = vadd.f32 %v7442_v59, %v7243_v46 }
 0x8cb   :  { %v7444_v57 = vpop.f32.mrf.mxu1 }
 0x8cc   :  { %v7694_v45 = vmax.f32 %v13938_v55, 0.0  ;;  %v7693_v13 = vadd.f32 %v7688_v47, %v7443_v56 }
 0x8cd   :  { %v7445_v53 = vpop.f32.mrf.mxu1 }
 0x8ce   :  { %v7695_v48 = vmax.f32 %v7693_v13, 0.0 }
 0x8cf   :  { %13466 = dma.done.wait [#allocation10 + $0x5], 6144 }
 0x8d0   :  { %13467 = vsyncadd [#allocation10 + $0x5], 4294961152  ;;  %v7764_v50 = vpack.c.bf16 %v7695_v48, %v7695_v48  ;;  %v12712_v58 = vld [vmem:[#allocation7 + $0xac] ss:$12 sps:$4 sm:$0xff]   ;;  %v12714_v60 = vld [vmem:[#allocation7 + $0xa8] ss:$12 sps:$4 sm:$0xff]   ;;  %v7763_v7 = vpack.c.bf16 %v7694_v45, %v7694_v45 }
 0x8d1   :  { %8038 = vmatprep.subr.bf16.mxu1 %v12712_v58  ;;  %v12715_v61 = vld [vmem:[#allocation7 + $0x94] ss:$12 sps:$4 sm:$0xff]   ;;  %v12717_v0 = vld [vmem:[#allocation7 + $0x90] ss:$12 sps:$4 sm:$0xff]   ;;  %v12720_v24 = vld [vmem:[#allocation7 + $0x78] ss:$12 sps:$4 sm:$0xff]  }
 0x8d2   :  { %8111 = vmatprep.mubr.bf16.mxu0 %v7764_v50  ;;  %8070 = vmatprep.mubr.bf16.mxu1 %v7764_v50  ;;  %v12718_v18 = vld [vmem:[#allocation7 + $0x7c] ss:$12 sps:$4 sm:$0xff]   ;;  %v12721_v1 = vld [vmem:[#allocation7 + $0x64] ss:$12 sps:$4 sm:$0xff]   ;;  %v12723_v54 = vld [vmem:[#allocation7 + $0x60] ss:$12 sps:$4 sm:$0xff]  }
 0x8d3   :  { %8039 = vmatpush1.bf16.msra.mxu1 %v12714_v60  ;;  %v12733_v6 = vld [vmem:[#allocation7 + $0x170] ss:$12 sps:$4 sm:$0xff]   ;;  %v12724_v11 = vld [vmem:[#allocation7 + $0x4c] ss:$12 sps:$4 sm:$0xff]   ;;  %v12726_v17 = vld [vmem:[#allocation7 + $0x48] ss:$12 sps:$4 sm:$0xff]  }
 0x8d4   :  { %8040 = vmatprep.subr.bf16.mxu1 %v12715_v61  ;;  %v12734_v9 = vld [vmem:[#allocation7 + $0xb0] ss:$12 sps:$4 sm:$0xff]   ;;  %11123 = vmatprep.subr.bf16.mxu0 %v12733_v6  ;;  %v12738_v39 = vld [vmem:[#allocation7 + $0x158] ss:$12 sps:$4 sm:$0xff]   ;;  %v12727_v22 = vld [vmem:[#allocation7 + $0x34] ss:$12 sps:$4 sm:$0xff]  }
 0x8d5   :  { %11124 = vmatpush3.bf16.msra.mxu0 %v12734_v9  ;;  %v12739_v16 = vld [vmem:[#allocation7 + $0x98] ss:$12 sps:$4 sm:$0xff]   ;;  %v12743_v44 = vld [vmem:[#allocation7 + $0x140] ss:$12 sps:$4 sm:$0xff]   ;;  %v12729_v14 = vld [vmem:[#allocation7 + $0x30] ss:$12 sps:$4 sm:$0xff]  }
 0x8d6   :  { %11125 = vmatprep.subr.bf16.mxu0 %v12738_v39  ;;  %v12744_v8 = vld [vmem:[#allocation7 + $0x80] ss:$12 sps:$4 sm:$0xff]   ;;  %v12730_v23 = vld [vmem:[#allocation7 + $0x1c] ss:$12 sps:$4 sm:$0xff]   ;;  %v12732_v20 = vld [vmem:[#allocation7 + $0x18] ss:$12 sps:$4 sm:$0xff]  }
 0x8d7   :  { %8041 = vmatpush1.bf16.msra.mxu1 %v12717_v0  ;;  %v12748_v25 = vld [vmem:[#allocation7 + $0x128] ss:$12 sps:$4 sm:$0xff]   ;;  %v12753_v27 = vld [vmem:[#allocation7 + $0x110] ss:$12 sps:$4 sm:$0xff]   ;;  %v12758_v31 = vld [vmem:[#allocation7 + $0xf8] ss:$12 sps:$4 sm:$0xff]  }
 0x8d8   :  { %8042 = vmatprep.subr.bf16.mxu1 %v12718_v18  ;;  %v12749_v26 = vld [vmem:[#allocation7 + $0x68] ss:$12 sps:$4 sm:$0xff]   ;;  %v12735_v28 = vld [vmem:[#allocation7 + $0x4] ss:$12 sps:$4 sm:$0xff]   ;;  %v12737_v33 = vld [vmem:[#allocation7] ss:$12 sps:$4 sm:$0xff]  }
 0x8d9   :  { %11126 = vmatpush3.bf16.msra.mxu0 %v12739_v16  ;;  %v12754_v30 = vld [vmem:[#allocation7 + $0x50] ss:$12 sps:$4 sm:$0xff]   ;;  %v12740_v32 = vld [vmem:[#allocation7 + $0x16c] ss:$12 sps:$4 sm:$0xff]   ;;  %v12742_v40 = vld [vmem:[#allocation7 + $0x168] ss:$12 sps:$4 sm:$0xff]  }
 0x8da   :  { %11127 = vmatprep.subr.bf16.mxu0 %v12743_v44  ;;  %v12759_v34 = vld [vmem:[#allocation7 + $0x38] ss:$12 sps:$4 sm:$0xff]   ;;  %v12763_v37 = vld [vmem:[#allocation7 + $0xe0] ss:$12 sps:$4 sm:$0xff]   ;;  %v12768_v62 = vld [vmem:[#allocation7 + $0xc8] ss:$12 sps:$4 sm:$0xff]  }
 0x8db   :  { %8043 = vmatpush1.bf16.msra.mxu1 %v12720_v24  ;;  %v12745_v41 = vld [vmem:[#allocation7 + $0x154] ss:$12 sps:$4 sm:$0xff]   ;;  %v12747_v49 = vld [vmem:[#allocation7 + $0x150] ss:$12 sps:$4 sm:$0xff]   ;;  %v12752_v38 = vld [vmem:[#allocation7 + $0x138] ss:$12 sps:$4 sm:$0xff]  }
 0x8dc   :  { %8044 = vmatprep.subr.bf16.mxu1 %v12721_v1  ;;  %v12764_v3 = vld [vmem:[#allocation7 + $0x20] ss:$12 sps:$4 sm:$0xff]   ;;  %v12750_v19 = vld [vmem:[#allocation7 + $0x13c] ss:$12 sps:$4 sm:$0xff]   ;;  %v12755_v21 = vld [vmem:[#allocation7 + $0x124] ss:$12 sps:$4 sm:$0xff]  }
 0x8dd   :  { %11128 = vmatpush3.bf16.msra.mxu0 %v12744_v8  ;;  %v12769_v51 = vld [vmem:[#allocation7 + $0x8] ss:$12 sps:$4 sm:$0xff]   ;;  %v12757_v52 = vld [vmem:[#allocation7 + $0x120] ss:$12 sps:$4 sm:$0xff]   ;;  %v12767_v4 = vld [vmem:[#allocation7 + $0xf0] ss:$12 sps:$4 sm:$0xff]  }
 0x8de   :  { %11129 = vmatprep.subr.bf16.mxu0 %v12748_v25  ;;  %v12760_v15 = vld [vmem:[#allocation7 + $0x10c] ss:$12 sps:$4 sm:$0xff]   ;;  %v12762_v43 = vld [vmem:[#allocation7 + $0x108] ss:$12 sps:$4 sm:$0xff]   ;;  %v12773_v63 = vld [vmem:[#allocation7 + $0xc4] ss:$12 sps:$4 sm:$0xff]  }
 0x8df   :  { %8045 = vmatpush1.bf16.msra.mxu1 %v12723_v54  ;;  %v12765_v2 = vld [vmem:[#allocation7 + $0xf4] ss:$12 sps:$4 sm:$0xff]   ;;  %v12770_v5 = vld [vmem:[#allocation7 + $0xdc] ss:$12 sps:$4 sm:$0xff]   ;;  %v12772_v46 = vld [vmem:[#allocation7 + $0xd8] ss:$12 sps:$4 sm:$0xff]  }
 0x8e0   :  { %8046 = vmatprep.subr.bf16.mxu1 %v12724_v11  ;;  %v12775_v29 = vld [vmem:[#allocation7 + $0xc0] ss:$12 sps:$4 sm:$0xff]  }
 0x8e1   :  { %11130 = vmatpush3.bf16.msra.mxu0 %v12749_v26  ;;  %v7765_v59 = vld [vmem:[#allocation24] sm:$0x7] }
 0x8e2   :  { %11131 = vmatprep.subr.bf16.mxu0 %v12753_v27  ;;  %v7778_v55 = vrot.slane %v7765_v59, %v13725_v10  ;;  %v7770_v50 = vrot.slane %v7765_v59, %v13694_v35  ;;  %v7774_v58 = vrot.slane %v7765_v59, %v13697_v36 }
 0x8e3   :  { %8047 = vmatpush1.bf16.msra.mxu1 %v12726_v17 }
 0x8e4   :  { %8048 = vmatprep.subr.bf16.mxu1 %v12727_v22 }
 0x8e5   :  { %11132 = vmatpush3.bf16.msra.mxu0 %v12754_v30 }
 0x8e6   :  { %11133 = vmatprep.subr.bf16.mxu0 %v12758_v31 }
 0x8e7   :  { %8049 = vmatpush1.bf16.msra.mxu1 %v12729_v14 }
 0x8e8   :  { %8050 = vmatprep.subr.bf16.mxu1 %v12730_v23 }
 0x8e9   :  { %11134 = vmatpush3.bf16.msra.mxu0 %v12759_v34 }
 0x8ea   :  { %11135 = vmatprep.subr.bf16.mxu0 %v12763_v37 }
 0x8eb   :  { %8051 = vmatpush1.bf16.msra.mxu1 %v12732_v20 }
 0x8ec   :  { %8052 = vmatprep.subr.bf16.mxu1 %v12735_v28 }
 0x8ed   :  { %11136 = vmatpush3.bf16.msra.mxu0 %v12764_v3 }
 0x8ee   :  { %11137 = vmatprep.subr.bf16.mxu0 %v12768_v62 }
 0x8ef   :  { %8053 = vmatpush1.bf16.msra.mxu1 %v12737_v33 }
 0x8f0   :  { %8054 = vmatprep.subr.bf16.mxu1 %v12740_v32 }
 0x8f1   :  { %11138 = vmatpush3.bf16.msra.mxu0 %v12769_v51 }
 0x8f3   :  { %8055 = vmatpush2.bf16.msra.mxu1 %v12742_v40 }
 0x8f4   :  { %8056 = vmatprep.subr.bf16.mxu1 %v12745_v41  ;;  %8112 = vmatmul.mubr.bf16.vlgmr.msra.gmra.mxu0 %v7763_v7 }
 0x8f7   :  { %8057 = vmatpush2.bf16.msra.mxu1 %v12747_v49 }
 0x8f8   :  { %8058 = vmatprep.subr.bf16.mxu1 %v12750_v19 }
 0x8fb   :  { %8059 = vmatpush2.bf16.msra.mxu1 %v12752_v38 }
 0x8fc   :  { %8060 = vmatprep.subr.bf16.mxu1 %v12755_v21 }
 0x8ff   :  { %8061 = vmatpush2.bf16.msra.mxu1 %v12757_v52 }
 0x900   :  { %8062 = vmatprep.subr.bf16.mxu1 %v12760_v15 }
 0x903   :  { %8063 = vmatpush2.bf16.msra.mxu1 %v12762_v43 }
 0x904   :  { %8064 = vmatprep.subr.bf16.mxu1 %v12765_v2 }
 0x907   :  { %8065 = vmatpush2.bf16.msra.mxu1 %v12767_v4 }
 0x908   :  { %8066 = vmatprep.subr.bf16.mxu1 %v12770_v5 }
 0x90b   :  { %8067 = vmatpush2.bf16.msra.mxu1 %v12772_v46 }
 0x90c   :  { %8068 = vmatprep.subr.bf16.mxu1 %v12773_v63 }
 0x90f   :  { %8069 = vmatpush2.bf16.msra.mxu1 %v12775_v29 }
 0x912   :  { %8071 = vmatmul.mubr.bf16.vlgmr.msra.gmra.mxu1 %v7763_v7 }
 0x9b4   :  { %v11139_v47 = vpop.f32.mrf.mxu0 }
 0x9b6   :  { %v11140_v56 = vpop.f32.mrf.mxu0 }
 0x9b7   :  { %v11141_v57 = vadd.f32 %v11140_v56, %v11139_v47 }
 0x9b8   :  { %v11142_v45 = vpop.f32.mrf.mxu0 }
 0x9b9   :  { %v13945_v13 = vadd.f32 %v11141_v57, %v7778_v55 }
 0x9ba   :  { %v11143_v53 = vpop.f32.mrf.mxu0 }
 0x9bb   :  { %v8121_v48 = vmax.f32 %v13945_v13, 0.0 }
 0x9d2   :  { %v8072_v60 = vpop.f32.mrf.mxu1 }
 0x9d3   :  { %v13950_v61 = vadd.f32 %v8072_v60, %v7770_v50 }
 0x9d4   :  { %v8074_v0 = vpop.f32.mrf.mxu1 }
 0x9d5   :  { %v8119_v18 = vmax.f32 %v13950_v61, 0.0  ;;  %v8075_v24 = vadd.f32 %v8074_v0, %v7774_v58 }
 0x9d6   :  { %v8076_v1 = vpop.f32.mrf.mxu1 }
 0x9d7   :  { %v8120_v54 = vmax.f32 %v8075_v24, 0.0 }
 0x9d8   :  { %v8077_v6 = vpop.f32.mrf.mxu1 }
 0x9d9   :  { %13468 = dma.done.wait [#allocation10 + $0x6], 15360 }
 0x9da   :  { %13469 = vsyncadd [#allocation10 + $0x6], 4294951936  ;;  %v13953_v9 = vpack.c.bf16 %v8120_v54, %v8120_v54  ;;  %v13496_v11 = vmov 0   ;;  %v12776_v39 = vld [vmem:[#allocation8 + $0x11c] ss:$20 sps:$4 sm:$0xff]   ;;  %v13960_v5 = vpack.c.bf16 %v8121_v48, %v8121_v48  ;;  %vm13498_vm0 = vmmov 0  }
 0x9db   :  { %8997 = vmatprep.mubr.bf16.mxu0 %v13496_v11  ;;  %v12778_v16 = vld [vmem:[#allocation8 + $0x39c] ss:$20 sps:$4 sm:$0xff]   ;;  %8924 = vmatprep.subr.bf16.mxu1 %v12776_v39  ;;  %v12780_v17 = vld [vmem:[#allocation8 + $0x118] ss:$20 sps:$4 sm:$0xff]   ;;  %v12782_v44 = vld [vmem:[#allocation8 + $0xf4] ss:$20 sps:$4 sm:$0xff]  }
 0x9dc   :  { %8956 = vmatprep.mubr.bf16.mxu1 %v13953_v9  ;;  %v12781_v22 = vld [vmem:[#allocation8 + $0x398] ss:$20 sps:$4 sm:$0xff]   ;;  %8965 = vmatprep.subr.bf16.mxu0 %v12778_v16  ;;  %v12784_v8 = vld [vmem:[#allocation8 + $0x374] ss:$20 sps:$4 sm:$0xff]   ;;  %v12786_v14 = vld [vmem:[#allocation8 + $0xf0] ss:$20 sps:$4 sm:$0xff]  }
 0x9dd   :  { %8925 = vmatpush1.bf16.msra.mxu1 %v12780_v17  ;;  %8966 = vmatpush1.bf16.msra.mxu0 %v12781_v22  ;;  %v12787_v23 = vld [vmem:[#allocation8 + $0x370] ss:$20 sps:$4 sm:$0xff]   ;;  %v12788_v25 = vld [vmem:[#allocation8 + $0xcc] ss:$20 sps:$4 sm:$0xff]   ;;  %v12792_v20 = vld [vmem:[#allocation8 + $0xc8] ss:$20 sps:$4 sm:$0xff]  }
 0x9de   :  { %8926 = vmatprep.subr.bf16.mxu1 %v12782_v44  ;;  %8967 = vmatprep.subr.bf16.mxu0 %v12784_v8  ;;  %v12790_v26 = vld [vmem:[#allocation8 + $0x34c] ss:$20 sps:$4 sm:$0xff]   ;;  %v12793_v27 = vld [vmem:[#allocation8 + $0x348] ss:$20 sps:$4 sm:$0xff]   ;;  %v12794_v28 = vld [vmem:[#allocation8 + $0xa4] ss:$20 sps:$4 sm:$0xff]  }
 0x9df   :  { %v12796_v30 = vld [vmem:[#allocation8 + $0x324] ss:$20 sps:$4 sm:$0xff]   ;;  %v12798_v31 = vld [vmem:[#allocation8 + $0xa0] ss:$20 sps:$4 sm:$0xff]   ;;  %v12800_v32 = vld [vmem:[#allocation8 + $0x7c] ss:$20 sps:$4 sm:$0xff]  }
 0x9e0   :  { %v12799_v33 = vld [vmem:[#allocation8 + $0x320] ss:$20 sps:$4 sm:$0xff]   ;;  %v12802_v34 = vld [vmem:[#allocation8 + $0x2fc] ss:$20 sps:$4 sm:$0xff]   ;;  %v12804_v37 = vld [vmem:[#allocation8 + $0x78] ss:$20 sps:$4 sm:$0xff]  }
 0x9e1   :  { %8927 = vmatpush1.bf16.msra.mxu1 %v12786_v14  ;;  %8968 = vmatpush1.bf16.msra.mxu0 %v12787_v23  ;;  %v12805_v40 = vld [vmem:[#allocation8 + $0x2f8] ss:$20 sps:$4 sm:$0xff]   ;;  %v12806_v41 = vld [vmem:[#allocation8 + $0x54] ss:$20 sps:$4 sm:$0xff]   ;;  %v12810_v62 = vld [vmem:[#allocation8 + $0x50] ss:$20 sps:$4 sm:$0xff]  }
 0x9e2   :  { %8928 = vmatprep.subr.bf16.mxu1 %v12788_v25  ;;  %8969 = vmatprep.subr.bf16.mxu0 %v12790_v26  ;;  %v12808_v3 = vld [vmem:[#allocation8 + $0x2d4] ss:$20 sps:$4 sm:$0xff]   ;;  %v12811_v49 = vld [vmem:[#allocation8 + $0x2d0] ss:$20 sps:$4 sm:$0xff]   ;;  %v12812_v19 = vld [vmem:[#allocation8 + $0x2c] ss:$20 sps:$4 sm:$0xff]  }
 0x9e3   :  { %v12814_v51 = vld [vmem:[#allocation8 + $0x2ac] ss:$20 sps:$4 sm:$0xff]   ;;  %v12816_v38 = vld [vmem:[#allocation8 + $0x28] ss:$20 sps:$4 sm:$0xff]   ;;  %v12818_v7 = vld [vmem:[#allocation8 + $0x4] ss:$20 sps:$4 sm:$0xff]  }
 0x9e4   :  { %v12817_v21 = vld [vmem:[#allocation8 + $0x2a8] ss:$20 sps:$4 sm:$0xff]   ;;  %v12820_v52 = vld [vmem:[#allocation8 + $0x284] ss:$20 sps:$4 sm:$0xff]   ;;  %v12822_v15 = vld [vmem:[#allocation8] ss:$20 sps:$4 sm:$0xff]  }
 0x9e5   :  { %8929 = vmatpush1.bf16.msra.mxu1 %v12792_v20  ;;  %8970 = vmatpush1.bf16.msra.mxu0 %v12793_v27  ;;  %v12823_v43 = vld [vmem:[#allocation8 + $0x280] ss:$20 sps:$4 sm:$0xff]   ;;  %v12824_v2 = vld [vmem:[#allocation8 + $0x25c] ss:$20 sps:$4 sm:$0xff]   ;;  %v12828_v4 = vld [vmem:[#allocation8 + $0x124] ss:$20 sps:$4 sm:$0xff]  }
 0x9e6   :  { %8930 = vmatprep.subr.bf16.mxu1 %v12794_v28  ;;  %8971 = vmatprep.subr.bf16.mxu0 %v12796_v30  ;;  %v12826_v46 = vld [vmem:[#allocation8 + $0x120] ss:$20 sps:$4 sm:$0xff]   ;;  %v12829_v63 = vld [vmem:[#allocation8 + $0x258] ss:$20 sps:$4 sm:$0xff]   ;;  %v12834_v59 = vld [vmem:[#allocation8 + $0xfc] ss:$20 sps:$4 sm:$0xff]   ;;  %v13967_v28 = vpack.c.bf16 %v8119_v18, %v8119_v18 }
 0x9e7   :  { %v12830_v29 = vld [vmem:[#allocation8 + $0x234] ss:$20 sps:$4 sm:$0xff]   ;;  %v12832_v47 = vld [vmem:[#allocation8 + $0xf8] ss:$20 sps:$4 sm:$0xff]   ;;  %v12835_v55 = vld [vmem:[#allocation8 + $0x230] ss:$20 sps:$4 sm:$0xff]  }
 0x9e8   :  { %v12836_v56 = vld [vmem:[#allocation8 + $0x20c] ss:$20 sps:$4 sm:$0xff]   ;;  %v12840_v57 = vld [vmem:[#allocation8 + $0xd4] ss:$20 sps:$4 sm:$0xff]   ;;  %v12838_v45 = vld [vmem:[#allocation8 + $0xd0] ss:$20 sps:$4 sm:$0xff]  }
 0x9e9   :  { %8931 = vmatpush1.bf16.msra.mxu1 %v12798_v31  ;;  %8972 = vmatpush1.bf16.msra.mxu0 %v12799_v33  ;;  %v12841_v13 = vld [vmem:[#allocation8 + $0x208] ss:$20 sps:$4 sm:$0xff]   ;;  %v12842_v53 = vld [vmem:[#allocation8 + $0x1e4] ss:$20 sps:$4 sm:$0xff]   ;;  %v12846_v48 = vld [vmem:[#allocation8 + $0xac] ss:$20 sps:$4 sm:$0xff]  }
 0x9ea   :  { %8932 = vmatprep.subr.bf16.mxu1 %v12800_v32  ;;  %8973 = vmatprep.subr.bf16.mxu0 %v12802_v34  ;;  %v12844_v50 = vld [vmem:[#allocation8 + $0xa8] ss:$20 sps:$4 sm:$0xff]   ;;  %v12847_v58 = vld [vmem:[#allocation8 + $0x1e0] ss:$20 sps:$4 sm:$0xff]   ;;  %v12852_v0 = vld [vmem:[#allocation8 + $0x84] ss:$20 sps:$4 sm:$0xff]  }
 0x9eb   :  { %v12848_v60 = vld [vmem:[#allocation8 + $0x1bc] ss:$20 sps:$4 sm:$0xff]   ;;  %v12850_v24 = vld [vmem:[#allocation8 + $0x80] ss:$20 sps:$4 sm:$0xff]   ;;  %v12853_v1 = vld [vmem:[#allocation8 + $0x1b8] ss:$20 sps:$4 sm:$0xff]  }
 0x9ec   :  { %v12854_v54 = vld [vmem:[#allocation8 + $0x194] ss:$20 sps:$4 sm:$0xff]   ;;  %v12858_v6 = vld [vmem:[#allocation8 + $0x5c] ss:$20 sps:$4 sm:$0xff]   ;;  %v12856_v39 = vld [vmem:[#allocation8 + $0x58] ss:$20 sps:$4 sm:$0xff]  }
 0x9ed   :  { %8933 = vmatpush1.bf16.msra.mxu1 %v12804_v37  ;;  %8974 = vmatpush1.bf16.msra.mxu0 %v12805_v40  ;;  %v12859_v16 = vld [vmem:[#allocation8 + $0x190] ss:$20 sps:$4 sm:$0xff]   ;;  %v12860_v17 = vld [vmem:[#allocation8 + $0x16c] ss:$20 sps:$4 sm:$0xff]   ;;  %v12864_v22 = vld [vmem:[#allocation8 + $0x34] ss:$20 sps:$4 sm:$0xff]  }
 0x9ee   :  { %8934 = vmatprep.subr.bf16.mxu1 %v12806_v41  ;;  %8975 = vmatprep.subr.bf16.mxu0 %v12808_v3  ;;  %v12862_v44 = vld [vmem:[#allocation8 + $0x30] ss:$20 sps:$4 sm:$0xff]   ;;  %v12865_v8 = vld [vmem:[#allocation8 + $0x168] ss:$20 sps:$4 sm:$0xff]   ;;  %v12870_v23 = vld [vmem:[#allocation8 + $0xc] ss:$20 sps:$4 sm:$0xff]  }
 0x9ef   :  { %v12866_v14 = vld [vmem:[#allocation8 + $0x144] ss:$20 sps:$4 sm:$0xff]   ;;  %v12868_v25 = vld [vmem:[#allocation8 + $0x8] ss:$20 sps:$4 sm:$0xff]   ;;  %v12871_v26 = vld [vmem:[#allocation8 + $0x140] ss:$20 sps:$4 sm:$0xff]  }
 0x9f0   :  { %v12874_v20 = vld [vmem:[#allocation8 + $0x264] ss:$20 sps:$4 sm:$0xff]   ;;  %v12872_v30 = vld [vmem:[#allocation8 + $0x260] ss:$20 sps:$4 sm:$0xff]   ;;  %v12880_v33 = vld [vmem:[#allocation8 + $0x23c] ss:$20 sps:$4 sm:$0xff]  }
 0x9f1   :  { %8935 = vmatpush1.bf16.msra.mxu1 %v12810_v62  ;;  %8976 = vmatpush1.bf16.msra.mxu0 %v12811_v49  ;;  %v12877_v27 = vld [vmem:[#allocation8 + $0x3a4] ss:$20 sps:$4 sm:$0xff]   ;;  %v12875_v31 = vld [vmem:[#allocation8 + $0x3a0] ss:$20 sps:$4 sm:$0xff]   ;;  %v12883_v32 = vld [vmem:[#allocation8 + $0x37c] ss:$20 sps:$4 sm:$0xff]  }
 0x9f2   :  { %8936 = vmatprep.subr.bf16.mxu1 %v12812_v19  ;;  %8977 = vmatprep.subr.bf16.mxu0 %v12814_v51  ;;  %v12878_v34 = vld [vmem:[#allocation8 + $0x238] ss:$20 sps:$4 sm:$0xff]   ;;  %v12886_v40 = vld [vmem:[#allocation8 + $0x214] ss:$20 sps:$4 sm:$0xff]   ;;  %v12884_v18 = vld [vmem:[#allocation8 + $0x210] ss:$20 sps:$4 sm:$0xff]  }
 0x9f3   :  { %v12881_v37 = vld [vmem:[#allocation8 + $0x378] ss:$20 sps:$4 sm:$0xff]   ;;  %v12889_v61 = vld [vmem:[#allocation8 + $0x354] ss:$20 sps:$4 sm:$0xff]   ;;  %v12887_v41 = vld [vmem:[#allocation8 + $0x350] ss:$20 sps:$4 sm:$0xff]  }
 0x9f4   :  { %v12892_v3 = vld [vmem:[#allocation8 + $0x1ec] ss:$20 sps:$4 sm:$0xff]   ;;  %v12890_v49 = vld [vmem:[#allocation8 + $0x1e8] ss:$20 sps:$4 sm:$0xff]   ;;  %v12898_v51 = vld [vmem:[#allocation8 + $0x1c4] ss:$20 sps:$4 sm:$0xff]  }
 0x9f5   :  { %8937 = vmatpush1.bf16.msra.mxu1 %v12816_v38  ;;  %8978 = vmatpush1.bf16.msra.mxu0 %v12817_v21  ;;  %v12895_v62 = vld [vmem:[#allocation8 + $0x32c] ss:$20 sps:$4 sm:$0xff]   ;;  %v12893_v19 = vld [vmem:[#allocation8 + $0x328] ss:$20 sps:$4 sm:$0xff]   ;;  %v12901_v38 = vld [vmem:[#allocation8 + $0x304] ss:$20 sps:$4 sm:$0xff]  }
 0x9f6   :  { %8938 = vmatprep.subr.bf16.mxu1 %v12818_v7  ;;  %8979 = vmatprep.subr.bf16.mxu0 %v12820_v52  ;;  %v12896_v21 = vld [vmem:[#allocation8 + $0x1c0] ss:$20 sps:$4 sm:$0xff]   ;;  %v12904_v52 = vld [vmem:[#allocation8 + $0x19c] ss:$20 sps:$4 sm:$0xff]  }
 0x9f7   :  { %v12899_v7 = vld [vmem:[#allocation8 + $0x300] ss:$20 sps:$4 sm:$0xff]  }
 0x9f9   :  { %8939 = vmatpush1.bf16.msra.mxu1 %v12822_v15  ;;  %8980 = vmatpush1.bf16.msra.mxu0 %v12823_v43  ;;  %v12907_v15 = vld [vmem:[#allocation8 + $0x2dc] ss:$20 sps:$4 sm:$0xff]   ;;  %v12902_v43 = vld [vmem:[#allocation8 + $0x198] ss:$20 sps:$4 sm:$0xff]  }
 0x9fa   :  { %8940 = vmatprep.subr.bf16.mxu1 %v12824_v2  ;;  %9006 = vmatprep.subr.bf16.mxu0 %v12828_v4  ;;  %v12905_v2 = vld [vmem:[#allocation8 + $0x2d8] ss:$20 sps:$4 sm:$0xff]   ;;  %v12910_v4 = vld [vmem:[#allocation8 + $0x174] ss:$20 sps:$4 sm:$0xff]  }
 0x9fc   :  { %8998 = vmatmul.mubr.bf16.vlgmr.msra.gmra.mxu0 %v13960_v5 }
 0x9fd   :  { %8941 = vmatpush2.bf16.msra.mxu1 %v12829_v63  ;;  %9007 = vmatpush1.bf16.msra.mxu0 %v12826_v46  ;;  %v12913_v46 = vld [vmem:[#allocation8 + $0x2b4] ss:$20 sps:$4 sm:$0xff]   ;;  %v12908_v63 = vld [vmem:[#allocation8 + $0x170] ss:$20 sps:$4 sm:$0xff]  }
 0x9fe   :  { %8942 = vmatprep.subr.bf16.mxu1 %v12830_v29  ;;  %9008 = vmatprep.subr.bf16.mxu0 %v12834_v59  ;;  %v12911_v29 = vld [vmem:[#allocation8 + $0x2b0] ss:$20 sps:$4 sm:$0xff]   ;;  %v12916_v59 = vld [vmem:[#allocation8 + $0x14c] ss:$20 sps:$4 sm:$0xff]  }
 0x9ff   :  { %9038 = vmatprep.mubr.bf16.mxu0 %v13953_v9 }
 0xa01   :  { %8943 = vmatpush2.bf16.msra.mxu1 %v12835_v55  ;;  %9009 = vmatpush1.bf16.msra.mxu0 %v12832_v47  ;;  %v12919_v47 = vld [vmem:[#allocation8 + $0x28c] ss:$20 sps:$4 sm:$0xff]   ;;  %v12914_v55 = vld [vmem:[#allocation8 + $0x148] ss:$20 sps:$4 sm:$0xff]  }
 0xa02   :  { %8944 = vmatprep.subr.bf16.mxu1 %v12836_v56  ;;  %9010 = vmatprep.subr.bf16.mxu0 %v12840_v57  ;;  %v12917_v56 = vld [vmem:[#allocation8 + $0x288] ss:$20 sps:$4 sm:$0xff]  }
 0xa03   :  { %v12920_v57 = vld [vmem:[#allocation8 + $0x268] ss:$20 sps:$4 sm:$0xff]  }
 0xa05   :  { %8945 = vmatpush2.bf16.msra.mxu1 %v12841_v13  ;;  %9011 = vmatpush1.bf16.msra.mxu0 %v12838_v45  ;;  %v12921_v45 = vld [vmem:[#allocation8 + $0x128] ss:$20 sps:$4 sm:$0xff]  }
 0xa06   :  { %8946 = vmatprep.subr.bf16.mxu1 %v12842_v53  ;;  %9012 = vmatprep.subr.bf16.mxu0 %v12846_v48  ;;  %v12922_v13 = vld [vmem:[#allocation8 + $0x3a8] ss:$20 sps:$4 sm:$0xff]   ;;  %v13497_v53 = vmov 0.0   ;;  %v12923_v48 = vld [vmem:[#allocation8 + $0x240] ss:$20 sps:$4 sm:$0xff]  }
 0xa09   :  { %8947 = vmatpush2.bf16.msra.mxu1 %v12847_v58  ;;  %9013 = vmatpush1.bf16.msra.mxu0 %v12844_v50  ;;  %v12924_v50 = vld [vmem:[#allocation8 + $0x100] ss:$20 sps:$4 sm:$0xff]  }
 0xa0a   :  { %8948 = vmatprep.subr.bf16.mxu1 %v12848_v60  ;;  %9014 = vmatprep.subr.bf16.mxu0 %v12852_v0  ;;  %v12925_v58 = vld [vmem:[#allocation8 + $0x380] ss:$20 sps:$4 sm:$0xff]   ;;  %v12926_v60 = vld [vmem:[#allocation8 + $0x218] ss:$20 sps:$4 sm:$0xff]  }
 0xa0b   :  { %v12927_v0 = vld [vmem:[#allocation8 + $0xd8] ss:$20 sps:$4 sm:$0xff]  }
 0xa0d   :  { %8949 = vmatpush2.bf16.msra.mxu1 %v12853_v1  ;;  %9015 = vmatpush1.bf16.msra.mxu0 %v12850_v24  ;;  %v12928_v24 = vld [vmem:[#allocation8 + $0x358] ss:$20 sps:$4 sm:$0xff]   ;;  %v12929_v1 = vld [vmem:[#allocation8 + $0x1f0] ss:$20 sps:$4 sm:$0xff]  }
 0xa0e   :  { %8950 = vmatprep.subr.bf16.mxu1 %v12854_v54  ;;  %9016 = vmatprep.subr.bf16.mxu0 %v12858_v6  ;;  %v12930_v54 = vld [vmem:[#allocation8 + $0xb0] ss:$20 sps:$4 sm:$0xff]  }
 0xa0f   :  { %v12931_v6 = vld [vmem:[#allocation8 + $0x330] ss:$20 sps:$4 sm:$0xff]  }
 0xa11   :  { %8951 = vmatpush2.bf16.msra.mxu1 %v12859_v16  ;;  %9017 = vmatpush1.bf16.msra.mxu0 %v12856_v39  ;;  %v12932_v39 = vld [vmem:[#allocation8 + $0x1c8] ss:$20 sps:$4 sm:$0xff]  }
 0xa12   :  { %8952 = vmatprep.subr.bf16.mxu1 %v12860_v17  ;;  %9018 = vmatprep.subr.bf16.mxu0 %v12864_v22  ;;  %v12933_v16 = vld [vmem:[#allocation8 + $0x88] ss:$20 sps:$4 sm:$0xff]   ;;  %v12935_v17 = vld [vmem:[#allocation8 + $0x1a0] ss:$20 sps:$4 sm:$0xff]  }
 0xa13   :  { %v12936_v22 = vld [vmem:[#allocation8 + $0x60] ss:$20 sps:$4 sm:$0xff]  }
 0xa15   :  { %8953 = vmatpush2.bf16.msra.mxu1 %v12865_v8  ;;  %9019 = vmatpush1.bf16.msra.mxu0 %v12862_v44  ;;  %v12937_v44 = vld [vmem:[#allocation8 + $0x2e0] ss:$20 sps:$4 sm:$0xff]   ;;  %v12938_v8 = vld [vmem:[#allocation8 + $0x178] ss:$20 sps:$4 sm:$0xff]  }
 0xa16   :  { %8954 = vmatprep.subr.bf16.mxu1 %v12866_v14  ;;  %9020 = vmatprep.subr.bf16.mxu0 %v12870_v23  ;;  %v12939_v14 = vld [vmem:[#allocation8 + $0x38] ss:$20 sps:$4 sm:$0xff]  }
 0xa17   :  { %v12940_v23 = vld [vmem:[#allocation8 + $0x2b8] ss:$20 sps:$4 sm:$0xff]  }
 0xa19   :  { %8955 = vmatpush2.bf16.msra.mxu1 %v12871_v26  ;;  %9021 = vmatpush1.bf16.msra.mxu0 %v12868_v25  ;;  %v12941_v25 = vld [vmem:[#allocation8 + $0x150] ss:$20 sps:$4 sm:$0xff]  }
 0xa1a   :  { %9022 = vmatprep.subr.bf16.mxu0 %v12874_v20  ;;  %9047 = vmatprep.subr.bf16.mxu1 %v12877_v27  ;;  %v12942_v26 = vld [vmem:[#allocation8 + $0x10] ss:$20 sps:$4 sm:$0xff]  }
 0xa1b   :  { %v12943_v20 = vld [vmem:[#allocation8 + $0x290] ss:$20 sps:$4 sm:$0xff]  }
 0xa1c   :  { %8957 = vmatmul.mubr.bf16.vlgmr.msra.gmra.mxu1 %v13967_v28 }
 0xa1d   :  { %9023 = vmatpush2.bf16.msra.mxu0 %v12872_v30  ;;  %9048 = vmatpush1.bf16.msra.mxu1 %v12875_v31 }
 0xa1e   :  { %9024 = vmatprep.subr.bf16.mxu0 %v12880_v33  ;;  %9049 = vmatprep.subr.bf16.mxu1 %v12883_v32  ;;  %v8273_v32 = vld [vmem:[#allocation25] sm:$0x1f] }
 0xa1f   :  { %9079 = vmatprep.mubr.bf16.mxu1 %v13496_v11 }
 0xa21   :  { %9025 = vmatpush2.bf16.msra.mxu0 %v12878_v34  ;;  %9050 = vmatpush1.bf16.msra.mxu1 %v12881_v37  ;;  %v8278_v34 = vrot.slane %v8273_v32, %v13694_v35  ;;  %v8282_v37 = vrot.slane %v8273_v32, %v13697_v36 }
 0xa22   :  { %9026 = vmatprep.subr.bf16.mxu0 %v12886_v40  ;;  %9051 = vmatprep.subr.bf16.mxu1 %v12889_v61 }
 0xa25   :  { %9027 = vmatpush2.bf16.msra.mxu0 %v12884_v18  ;;  %9052 = vmatpush1.bf16.msra.mxu1 %v12887_v41 }
 0xa26   :  { %9028 = vmatprep.subr.bf16.mxu0 %v12892_v3  ;;  %9053 = vmatprep.subr.bf16.mxu1 %v12895_v62 }
 0xa29   :  { %9029 = vmatpush2.bf16.msra.mxu0 %v12890_v49  ;;  %9054 = vmatpush1.bf16.msra.mxu1 %v12893_v19 }
 0xa2a   :  { %9030 = vmatprep.subr.bf16.mxu0 %v12898_v51  ;;  %9055 = vmatprep.subr.bf16.mxu1 %v12901_v38  ;;  %v8286_v51 = vrot.slane %v8273_v32, %v13725_v10  ;;  %v8290_v38 = vrot.slane %v8273_v32, %v549_v12  ;;  %v8293_v10 = vsub.s32 4, %v13637_v42 }
 0xa2d   :  { %9031 = vmatpush2.bf16.msra.mxu0 %v12896_v21  ;;  %9056 = vmatpush1.bf16.msra.mxu1 %v12899_v7 }
 0xa2e   :  { %9032 = vmatprep.subr.bf16.mxu0 %v12904_v52  ;;  %9057 = vmatprep.subr.bf16.mxu1 %v12907_v15 }
 0xa31   :  { %9033 = vmatpush2.bf16.msra.mxu0 %v12902_v43  ;;  %9058 = vmatpush1.bf16.msra.mxu1 %v12905_v2 }
 0xa32   :  { %9034 = vmatprep.subr.bf16.mxu0 %v12910_v4  ;;  %9059 = vmatprep.subr.bf16.mxu1 %v12913_v46 }
 0xa35   :  { %9035 = vmatpush2.bf16.msra.mxu0 %v12908_v63  ;;  %9060 = vmatpush1.bf16.msra.mxu1 %v12911_v29 }
 0xa36   :  { %9036 = vmatprep.subr.bf16.mxu0 %v12916_v59  ;;  %9061 = vmatprep.subr.bf16.mxu1 %v12919_v47 }
 0xa39   :  { %9037 = vmatpush2.bf16.msra.mxu0 %v12914_v55  ;;  %9062 = vmatpush1.bf16.msra.mxu1 %v12917_v56 }
 0xa3a   :  { %11145 = vmatprep.subr.bf16.mxu1 %v12920_v57  ;;  %11176 = vmatprep.subr.bf16.mxu0 %v13497_v53 }
 0xa3c   :  { %9039 = vmatmul.mubr.bf16.vlgmr.msra.gmra.mxu0 %v13967_v28  ;;  %9080 = vmatmul.mubr.bf16.vlgmr.msra.gmra.mxu1 %v13960_v5 }
 0xa3d   :  { %11146 = vmatpush3.bf16.msra.mxu1 %v12921_v45  ;;  %11177 = vmatpush3.bf16.msra.mxu0 %v12922_v13  ;;  %v8294_v45 = vrot.slane %v8273_v32, %v8293_v10 }
 0xa3e   :  { %11147 = vmatprep.subr.bf16.mxu1 %v12923_v48  ;;  %11178 = vmatprep.subr.bf16.mxu0 %v13497_v53 }
 0xa3f   :  { %9120 = vmatprep.mubr.bf16.mxu1 %v13953_v9  ;;  %11192 = vmatprep.mubr.msk.bf16.mxu0 %vm13498_vm0, %v13497_v53  ;;  %v12934_v9 = vld [vmem:[#allocation8 + $0x308] ss:$20 sps:$4 sm:$0xff]  }
 0xa41   :  { %11148 = vmatpush3.bf16.msra.mxu1 %v12924_v50  ;;  %11179 = vmatpush3.bf16.msra.mxu0 %v12925_v58 }
 0xa42   :  { %11149 = vmatprep.subr.bf16.mxu1 %v12926_v60  ;;  %11180 = vmatprep.subr.bf16.mxu0 %v13497_v53 }
 0xa45   :  { %11150 = vmatpush3.bf16.msra.mxu1 %v12927_v0  ;;  %11181 = vmatpush3.bf16.msra.mxu0 %v12928_v24 }
 0xa46   :  { %11151 = vmatprep.subr.bf16.mxu1 %v12929_v1  ;;  %11182 = vmatprep.subr.bf16.mxu0 %v13497_v53 }
 0xa49   :  { %11152 = vmatpush3.bf16.msra.mxu1 %v12930_v54  ;;  %11183 = vmatpush3.bf16.msra.mxu0 %v12931_v6 }
 0xa4a   :  { %11153 = vmatprep.subr.bf16.mxu1 %v12932_v39  ;;  %11184 = vmatprep.subr.bf16.mxu0 %v13497_v53 }
 0xa4d   :  { %11154 = vmatpush3.bf16.msra.mxu1 %v12933_v16  ;;  %11185 = vmatpush3.bf16.msra.mxu0 %v12934_v9 }
 0xa4e   :  { %11155 = vmatprep.subr.bf16.mxu1 %v12935_v17  ;;  %11186 = vmatprep.subr.bf16.mxu0 %v13497_v53 }
 0xa51   :  { %11156 = vmatpush3.bf16.msra.mxu1 %v12936_v22  ;;  %11187 = vmatpush3.bf16.msra.mxu0 %v12937_v44 }
 0xa52   :  { %11157 = vmatprep.subr.bf16.mxu1 %v12938_v8  ;;  %11188 = vmatprep.subr.bf16.mxu0 %v13497_v53 }
 0xa55   :  { %11158 = vmatpush3.bf16.msra.mxu1 %v12939_v14  ;;  %11189 = vmatpush3.bf16.msra.mxu0 %v12940_v23 }
 0xa56   :  { %11159 = vmatprep.subr.bf16.mxu1 %v12941_v25  ;;  %11190 = vmatprep.subr.bf16.mxu0 %v13497_v53 }
 0xa59   :  { %11160 = vmatpush3.bf16.msra.mxu1 %v12942_v26  ;;  %11191 = vmatpush3.bf16.msra.mxu0 %v12943_v20 }
 0xa5c   :  { %9121 = vmatmul.mubr.bf16.vlgmr.msra.gmra.mxu1 %v13967_v28  ;;  %11193 = vmatmul.mubr.bf16.vlgmr.msra.gmra.mxu0 %v13960_v5 }
 0xabc   :  { %v8999_v27 = vpop.f32.mrf.mxu0 }
 0xabe   :  { %v9001_v30 = vpop.f32.mrf.mxu0 }
 0xac0   :  { %v9003_v31 = vpop.f32.mrf.mxu0 }
 0xac2   :  { %v9004_v33 = vpop.f32.mrf.mxu0 }
 0xadc   :  { %v8958_v40 = vpop.f32.mrf.mxu1 }
 0xadd   :  { %v8959_v61 = vadd.f32 %v8958_v40, %v8278_v34 }
 0xade   :  { %v8960_v18 = vpop.f32.mrf.mxu1 }
 0xadf   :  { %v13978_v41 = vadd.f32 %v8999_v27, %v8959_v61  ;;  %v8961_v3 = vadd.f32 %v8960_v18, %v8282_v37 }
 0xae0   :  { %v8962_v62 = vpop.f32.mrf.mxu1 }
 0xae1   :  { %v9168_v28 = vmax.f32 %v13978_v41, 0.0  ;;  %v9002_v49 = vadd.f32 %v9001_v30, %v8961_v3 }
 0xae2   :  { %v8963_v5 = vpop.f32.mrf.mxu1 }
 0xae3   :  { %v9169_v19 = vmax.f32 %v9002_v49, 0.0 }
 0xafc   :  { %v9040_v21 = vpop.f32.mrf.mxu0  ;;  %v9081_v7 = vpop.f32.mrf.mxu1 }
 0xafd   :  { %v9041_v52 = vadd.f32 %v9040_v21, %v8286_v51 }
 0xafe   :  { %v9042_v15 = vpop.f32.mrf.mxu0  ;;  %v9083_v43 = vpop.f32.mrf.mxu1 }
 0xaff   :  { %v13984_v2 = vadd.f32 %v9081_v7, %v9041_v52  ;;  %v9043_v4 = vadd.f32 %v9042_v15, %v8290_v38 }
 0xb00   :  { %v9044_v46 = vpop.f32.mrf.mxu0  ;;  %v9085_v63 = vpop.f32.mrf.mxu1 }
 0xb01   :  { %v9170_v29 = vmax.f32 %v13984_v2, 0.0  ;;  %v9084_v59 = vadd.f32 %v9083_v43, %v9043_v4 }
 0xb02   :  { %v9045_v47 = vpop.f32.mrf.mxu0  ;;  %v9086_v55 = vpop.f32.mrf.mxu1 }
 0xb03   :  { %v9171_v56 = vmax.f32 %v9084_v59, 0.0 }
 0xb1c   :  { %v11161_v57 = vpop.f32.mrf.mxu1  ;;  %v9162_v12 = vpop.f32.mrf.mxu0 }
 0xb1e   :  { %v11162_v13 = vpop.f32.mrf.mxu1  ;;  %v11194_v53 = vpop.f32.mrf.mxu0 }
 0xb1f   :  { %v11163_v48 = vadd.f32 %v11162_v13, %v11161_v57 }
 0xb20   :  { %v11164_v50 = vpop.f32.mrf.mxu1  ;;  %v9165_v58 = vpop.f32.mrf.mxu0 }
 0xb21   :  { %v9123_v60 = vadd.f32 %v11163_v48, %v8294_v45 }
 0xb22   :  { %v11165_v0 = vpop.f32.mrf.mxu1  ;;  %v11195_v24 = vpop.f32.mrf.mxu0 }
 0xb23   :  { %v13988_v1 = vadd.f32 %v9162_v12, %v9123_v60 }
 0xb25   :  { %v9172_v54 = vmax.f32 %v13988_v1, 0.0 }
 0xb26   :  { %13470 = dma.done.wait [#allocation10 + $0x7], 10240 }
 0xb27   :  { %13471 = vsyncadd [#allocation10 + $0x7], 4294957056  ;;  %v9258_v6 = vpack.c.bf16 %v9169_v19, %v9169_v19  ;;  %v9260_v39 = vpack.c.bf16 %v9171_v56, %v9171_v56  ;;  %v12944_v42 = vld [vmem:[#allocation9 + $0x74] ss:$8 sps:$4 sm:$0xff]   ;;  %v12946_v16 = vld [vmem:[#allocation9 + $0x70] ss:$8 sps:$4 sm:$0xff]  }
 0xb28   :  { %9674 = vmatprep.subr.bf16.mxu1 %v12944_v42  ;;  %v12947_v9 = vld [vmem:[#allocation9 + $0x174] ss:$8 sps:$4 sm:$0xff]   ;;  %v12949_v17 = vld [vmem:[#allocation9 + $0x170] ss:$8 sps:$4 sm:$0xff]   ;;  %v12950_v22 = vld [vmem:[#allocation9 + $0x64] ss:$8 sps:$4 sm:$0xff]  }
 0xb29   :  { %9706 = vmatprep.mubr.bf16.mxu1 %v9258_v6  ;;  %9747 = vmatprep.mubr.bf16.mxu0 %v9260_v39  ;;  %v12952_v44 = vld [vmem:[#allocation9 + $0x60] ss:$8 sps:$4 sm:$0xff]   ;;  %v12953_v8 = vld [vmem:[#allocation9 + $0x164] ss:$8 sps:$4 sm:$0xff]   ;;  %v12956_v23 = vld [vmem:[#allocation9 + $0x54] ss:$8 sps:$4 sm:$0xff]  }
 0xb2a   :  { %9675 = vmatpush1.bf16.msra.mxu1 %v12946_v16  ;;  %9715 = vmatprep.subr.bf16.mxu0 %v12947_v9  ;;  %v12955_v14 = vld [vmem:[#allocation9 + $0x160] ss:$8 sps:$4 sm:$0xff]   ;;  %v12958_v25 = vld [vmem:[#allocation9 + $0x50] ss:$8 sps:$4 sm:$0xff]   ;;  %v12959_v26 = vld [vmem:[#allocation9 + $0x154] ss:$8 sps:$4 sm:$0xff]  }
 0xb2b   :  { %9716 = vmatpush1.bf16.msra.mxu0 %v12949_v17  ;;  %9676 = vmatprep.subr.bf16.mxu1 %v12950_v22  ;;  %v12962_v20 = vld [vmem:[#allocation9 + $0x44] ss:$8 sps:$4 sm:$0xff]   ;;  %v12961_v27 = vld [vmem:[#allocation9 + $0x150] ss:$8 sps:$4 sm:$0xff]   ;;  %v12964_v31 = vld [vmem:[#allocation9 + $0x40] ss:$8 sps:$4 sm:$0xff]  }
 0xb2c   :  { %9717 = vmatprep.subr.bf16.mxu0 %v12953_v8  ;;  %v12965_v30 = vld [vmem:[#allocation9 + $0x144] ss:$8 sps:$4 sm:$0xff]   ;;  %v12968_v33 = vld [vmem:[#allocation9 + $0x34] ss:$8 sps:$4 sm:$0xff]   ;;  %v12967_v32 = vld [vmem:[#allocation9 + $0x140] ss:$8 sps:$4 sm:$0xff]  }
 0xb2d   :  { %v12971_v34 = vld [vmem:[#allocation9 + $0x134] ss:$8 sps:$4 sm:$0xff]   ;;  %v12970_v37 = vld [vmem:[#allocation9 + $0x30] ss:$8 sps:$4 sm:$0xff]   ;;  %v12974_v40 = vld [vmem:[#allocation9 + $0x24] ss:$8 sps:$4 sm:$0xff]  }
 0xb2e   :  { %9677 = vmatpush1.bf16.msra.mxu1 %v12952_v44  ;;  %v12973_v61 = vld [vmem:[#allocation9 + $0x130] ss:$8 sps:$4 sm:$0xff]   ;;  %v12977_v18 = vld [vmem:[#allocation9 + $0x124] ss:$8 sps:$4 sm:$0xff]   ;;  %v12976_v3 = vld [vmem:[#allocation9 + $0x20] ss:$8 sps:$4 sm:$0xff]  }
 0xb2f   :  { %9678 = vmatprep.subr.bf16.mxu1 %v12956_v23  ;;  %9718 = vmatpush1.bf16.msra.mxu0 %v12955_v14  ;;  %v12980_v62 = vld [vmem:[#allocation9 + $0x14] ss:$8 sps:$4 sm:$0xff]   ;;  %v12979_v49 = vld [vmem:[#allocation9 + $0x120] ss:$8 sps:$4 sm:$0xff]   ;;  %v12982_v19 = vld [vmem:[#allocation9 + $0x10] ss:$8 sps:$4 sm:$0xff]  }
 0xb30   :  { %9719 = vmatprep.subr.bf16.mxu0 %v12959_v26  ;;  %v12983_v5 = vld [vmem:[#allocation9 + $0x114] ss:$8 sps:$4 sm:$0xff]   ;;  %v12986_v51 = vld [vmem:[#allocation9 + $0x4] ss:$8 sps:$4 sm:$0xff]   ;;  %v12985_v38 = vld [vmem:[#allocation9 + $0x110] ss:$8 sps:$4 sm:$0xff]   ;;  %v9257_v26 = vpack.c.bf16 %v9168_v28, %v9168_v28 }
 0xb31   :  { %v12989_v21 = vld [vmem:[#allocation9 + $0x104] ss:$8 sps:$4 sm:$0xff]   ;;  %v12988_v7 = vld [vmem:[#allocation9] ss:$8 sps:$4 sm:$0xff]   ;;  %v12992_v52 = vld [vmem:[#allocation9 + $0xf4] ss:$8 sps:$4 sm:$0xff]  }
 0xb32   :  { %9679 = vmatpush1.bf16.msra.mxu1 %v12958_v25  ;;  %v12991_v15 = vld [vmem:[#allocation9 + $0x100] ss:$8 sps:$4 sm:$0xff]   ;;  %v12995_v43 = vld [vmem:[#allocation9 + $0x1f4] ss:$8 sps:$4 sm:$0xff]   ;;  %v12994_v4 = vld [vmem:[#allocation9 + $0xf0] ss:$8 sps:$4 sm:$0xff]  }
 0xb33   :  { %9680 = vmatprep.subr.bf16.mxu1 %v12962_v20  ;;  %9720 = vmatpush1.bf16.msra.mxu0 %v12961_v27  ;;  %v12998_v46 = vld [vmem:[#allocation9 + $0xe4] ss:$8 sps:$4 sm:$0xff]   ;;  %v12997_v63 = vld [vmem:[#allocation9 + $0x1f0] ss:$8 sps:$4 sm:$0xff]   ;;  %v13000_v47 = vld [vmem:[#allocation9 + $0xe0] ss:$8 sps:$4 sm:$0xff]   ;;  %v9259_v27 = vpack.c.bf16 %v9170_v29, %v9170_v29 }
 0xb34   :  { %9721 = vmatprep.subr.bf16.mxu0 %v12965_v30  ;;  %v13001_v59 = vld [vmem:[#allocation9 + $0x1e4] ss:$8 sps:$4 sm:$0xff]   ;;  %v13004_v55 = vld [vmem:[#allocation9 + $0xd4] ss:$8 sps:$4 sm:$0xff]   ;;  %v13003_v56 = vld [vmem:[#allocation9 + $0x1e0] ss:$8 sps:$4 sm:$0xff]  }
 0xb35   :  { %v13007_v10 = vld [vmem:[#allocation9 + $0x1d4] ss:$8 sps:$4 sm:$0xff]   ;;  %v13006_v57 = vld [vmem:[#allocation9 + $0xd0] ss:$8 sps:$4 sm:$0xff]   ;;  %v13010_v12 = vld [vmem:[#allocation9 + $0xc4] ss:$8 sps:$4 sm:$0xff]  }
 0xb36   :  { %9681 = vmatpush1.bf16.msra.mxu1 %v12964_v31  ;;  %v13009_v45 = vld [vmem:[#allocation9 + $0x1d0] ss:$8 sps:$4 sm:$0xff]   ;;  %v13013_v13 = vld [vmem:[#allocation9 + $0x1c4] ss:$8 sps:$4 sm:$0xff]   ;;  %v13012_v53 = vld [vmem:[#allocation9 + $0xc0] ss:$8 sps:$4 sm:$0xff]  }
 0xb37   :  { %9682 = vmatprep.subr.bf16.mxu1 %v12968_v33  ;;  %9722 = vmatpush1.bf16.msra.mxu0 %v12967_v32  ;;  %v13016_v48 = vld [vmem:[#allocation9 + $0xb4] ss:$8 sps:$4 sm:$0xff]   ;;  %v13015_v50 = vld [vmem:[#allocation9 + $0x1c0] ss:$8 sps:$4 sm:$0xff]   ;;  %v13018_v60 = vld [vmem:[#allocation9 + $0xb0] ss:$8 sps:$4 sm:$0xff]  }
 0xb38   :  { %9723 = vmatprep.subr.bf16.mxu0 %v12971_v34  ;;  %v13019_v58 = vld [vmem:[#allocation9 + $0x1b4] ss:$8 sps:$4 sm:$0xff]   ;;  %v13022_v0 = vld [vmem:[#allocation9 + $0xa4] ss:$8 sps:$4 sm:$0xff]   ;;  %v13021_v24 = vld [vmem:[#allocation9 + $0x1b0] ss:$8 sps:$4 sm:$0xff]  }
 0xb39   :  { %v13025_v6 = vld [vmem:[#allocation9 + $0x1a4] ss:$8 sps:$4 sm:$0xff]   ;;  %v13024_v39 = vld [vmem:[#allocation9 + $0xa0] ss:$8 sps:$4 sm:$0xff]   ;;  %v13028_v42 = vld [vmem:[#allocation9 + $0x94] ss:$8 sps:$4 sm:$0xff]  }
 0xb3a   :  { %9683 = vmatpush1.bf16.msra.mxu1 %v12970_v37  ;;  %v13027_v16 = vld [vmem:[#allocation9 + $0x1a0] ss:$8 sps:$4 sm:$0xff]   ;;  %v13031_v9 = vld [vmem:[#allocation9 + $0x194] ss:$8 sps:$4 sm:$0xff]   ;;  %v13030_v17 = vld [vmem:[#allocation9 + $0x90] ss:$8 sps:$4 sm:$0xff]  }
 0xb3b   :  { %9684 = vmatprep.subr.bf16.mxu1 %v12974_v40  ;;  %9724 = vmatpush1.bf16.msra.mxu0 %v12973_v61  ;;  %v13034_v22 = vld [vmem:[#allocation9 + $0x84] ss:$8 sps:$4 sm:$0xff]   ;;  %v13033_v44 = vld [vmem:[#allocation9 + $0x190] ss:$8 sps:$4 sm:$0xff]   ;;  %v13036_v14 = vld [vmem:[#allocation9 + $0x80] ss:$8 sps:$4 sm:$0xff]  }
 0xb3c   :  { %9725 = vmatprep.subr.bf16.mxu0 %v12977_v18  ;;  %v13037_v8 = vld [vmem:[#allocation9 + $0x184] ss:$8 sps:$4 sm:$0xff]   ;;  %v13042_v23 = vld [vmem:[#allocation9 + $0x274] ss:$8 sps:$4 sm:$0xff]   ;;  %v13039_v25 = vld [vmem:[#allocation9 + $0x180] ss:$8 sps:$4 sm:$0xff]  }
 0xb3d   :  { %v13040_v20 = vld [vmem:[#allocation9 + $0x270] ss:$8 sps:$4 sm:$0xff]   ;;  %v13045_v30 = vld [vmem:[#allocation9 + $0x264] ss:$8 sps:$4 sm:$0xff]   ;;  %v13043_v31 = vld [vmem:[#allocation9 + $0x260] ss:$8 sps:$4 sm:$0xff]  }
 0xb3e   :  { %9685 = vmatpush1.bf16.msra.mxu1 %v12976_v3  ;;  %v13048_v33 = vld [vmem:[#allocation9 + $0x254] ss:$8 sps:$4 sm:$0xff]   ;;  %v13046_v41 = vld [vmem:[#allocation9 + $0x250] ss:$8 sps:$4 sm:$0xff]   ;;  %v13051_v28 = vld [vmem:[#allocation9 + $0x244] ss:$8 sps:$4 sm:$0xff]   ;;  %v9261_v3 = vpack.c.bf16 %v9172_v54, %v9172_v54 }
 0xb3f   :  { %9686 = vmatprep.subr.bf16.mxu1 %v12980_v62  ;;  %9726 = vmatpush1.bf16.msra.mxu0 %v12979_v49  ;;  %v13049_v32 = vld [vmem:[#allocation9 + $0x240] ss:$8 sps:$4 sm:$0xff]   ;;  %v13054_v2 = vld [vmem:[#allocation9 + $0x234] ss:$8 sps:$4 sm:$0xff]   ;;  %v13052_v29 = vld [vmem:[#allocation9 + $0x230] ss:$8 sps:$4 sm:$0xff]  }
 0xb40   :  { %9727 = vmatprep.subr.bf16.mxu0 %v12983_v5  ;;  %v13057_v34 = vld [vmem:[#allocation9 + $0x224] ss:$8 sps:$4 sm:$0xff]   ;;  %v13055_v37 = vld [vmem:[#allocation9 + $0x220] ss:$8 sps:$4 sm:$0xff]   ;;  %v13060_v40 = vld [vmem:[#allocation9 + $0x214] ss:$8 sps:$4 sm:$0xff]  }
 0xb41   :  { %v13063_v61 = vld [vmem:[#allocation9 + $0x204] ss:$8 sps:$4 sm:$0xff]   ;;  %v13061_v18 = vld [vmem:[#allocation9 + $0x200] ss:$8 sps:$4 sm:$0xff]  }
 0xb42   :  { %9687 = vmatpush1.bf16.msra.mxu1 %v12982_v19 }
 0xb43   :  { %9688 = vmatprep.subr.bf16.mxu1 %v12986_v51  ;;  %9728 = vmatpush1.bf16.msra.mxu0 %v12985_v38 }
 0xb44   :  { %9729 = vmatprep.subr.bf16.mxu0 %v12989_v21 }
 0xb46   :  { %9689 = vmatpush1.bf16.msra.mxu1 %v12988_v7 }
 0xb47   :  { %9690 = vmatprep.subr.bf16.mxu1 %v12992_v52  ;;  %9730 = vmatpush1.bf16.msra.mxu0 %v12991_v15  ;;  %v9262_v52 = vld [vmem:[#allocation27] sm:$0x3] }
 0xb48   :  { %9731 = vmatprep.subr.bf16.mxu0 %v12995_v43  ;;  %v9267_v15 = vrot.slane %v9262_v52, %v13694_v35  ;;  %v9271_v43 = vrot.slane %v9262_v52, %v13697_v36 }
 0xb4a   :  { %9691 = vmatpush2.bf16.msra.mxu1 %v12994_v4 }
 0xb4b   :  { %9692 = vmatprep.subr.bf16.mxu1 %v12998_v46  ;;  %9732 = vmatpush2.bf16.msra.mxu0 %v12997_v63 }
 0xb4c   :  { %9733 = vmatprep.subr.bf16.mxu0 %v13001_v59 }
 0xb4e   :  { %9693 = vmatpush2.bf16.msra.mxu1 %v13000_v47 }
 0xb4f   :  { %9694 = vmatprep.subr.bf16.mxu1 %v13004_v55  ;;  %9734 = vmatpush2.bf16.msra.mxu0 %v13003_v56 }
 0xb50   :  { %9735 = vmatprep.subr.bf16.mxu0 %v13007_v10 }
 0xb52   :  { %9695 = vmatpush2.bf16.msra.mxu1 %v13006_v57 }
 0xb53   :  { %9696 = vmatprep.subr.bf16.mxu1 %v13010_v12  ;;  %9736 = vmatpush2.bf16.msra.mxu0 %v13009_v45 }
 0xb54   :  { %9737 = vmatprep.subr.bf16.mxu0 %v13013_v13 }
 0xb56   :  { %9697 = vmatpush2.bf16.msra.mxu1 %v13012_v53 }
 0xb57   :  { %9698 = vmatprep.subr.bf16.mxu1 %v13016_v48  ;;  %9738 = vmatpush2.bf16.msra.mxu0 %v13015_v50 }
 0xb58   :  { %9739 = vmatprep.subr.bf16.mxu0 %v13019_v58 }
 0xb5a   :  { %9699 = vmatpush2.bf16.msra.mxu1 %v13018_v60 }
 0xb5b   :  { %9700 = vmatprep.subr.bf16.mxu1 %v13022_v0  ;;  %9740 = vmatpush2.bf16.msra.mxu0 %v13021_v24 }
 0xb5c   :  { %9741 = vmatprep.subr.bf16.mxu0 %v13025_v6 }
 0xb5e   :  { %9701 = vmatpush2.bf16.msra.mxu1 %v13024_v39 }
 0xb5f   :  { %9702 = vmatprep.subr.bf16.mxu1 %v13028_v42  ;;  %9742 = vmatpush2.bf16.msra.mxu0 %v13027_v16 }
 0xb60   :  { %9743 = vmatprep.subr.bf16.mxu0 %v13031_v9 }
 0xb62   :  { %9703 = vmatpush2.bf16.msra.mxu1 %v13030_v17 }
 0xb63   :  { %9704 = vmatprep.subr.bf16.mxu1 %v13034_v22  ;;  %9744 = vmatpush2.bf16.msra.mxu0 %v13033_v44 }
 0xb64   :  { %9745 = vmatprep.subr.bf16.mxu0 %v13037_v8 }
 0xb66   :  { %9705 = vmatpush2.bf16.msra.mxu1 %v13036_v14 }
 0xb67   :  { %9756 = vmatprep.subr.bf16.mxu1 %v13042_v23  ;;  %9746 = vmatpush2.bf16.msra.mxu0 %v13039_v25 }
 0xb69   :  { %9707 = vmatmul.mubr.bf16.vlgmr.msra.gmra.mxu1 %v9257_v26 }
 0xb6a   :  { %9757 = vmatpush1.bf16.msra.mxu1 %v13040_v20  ;;  %9788 = vmatprep.mubr.bf16.mxu1 %v13496_v11  ;;  %v13058_v11 = vld [vmem:[#allocation9 + $0x210] ss:$8 sps:$4 sm:$0xff]  }
 0xb6b   :  { %9748 = vmatmul.mubr.bf16.vlgmr.msra.gmra.mxu0 %v9259_v27  ;;  %9758 = vmatprep.subr.bf16.mxu1 %v13045_v30 }
 0xb6e   :  { %9759 = vmatpush1.bf16.msra.mxu1 %v13043_v31 }
 0xb6f   :  { %9760 = vmatprep.subr.bf16.mxu1 %v13048_v33 }
 0xb72   :  { %9761 = vmatpush1.bf16.msra.mxu1 %v13046_v41 }
 0xb73   :  { %9762 = vmatprep.subr.bf16.mxu1 %v13051_v28 }
 0xb76   :  { %9763 = vmatpush1.bf16.msra.mxu1 %v13049_v32 }
 0xb77   :  { %9764 = vmatprep.subr.bf16.mxu1 %v13054_v2 }
 0xb7a   :  { %9765 = vmatpush1.bf16.msra.mxu1 %v13052_v29 }
 0xb7b   :  { %9766 = vmatprep.subr.bf16.mxu1 %v13057_v34 }
 0xb7e   :  { %9767 = vmatpush1.bf16.msra.mxu1 %v13055_v37 }
 0xb7f   :  { %9768 = vmatprep.subr.bf16.mxu1 %v13060_v40 }
 0xb82   :  { %9769 = vmatpush1.bf16.msra.mxu1 %v13058_v11 }
 0xb83   :  { %9770 = vmatprep.subr.bf16.mxu1 %v13063_v61 }
 0xb86   :  { %9771 = vmatpush1.bf16.msra.mxu1 %v13061_v18 }
 0xb89   :  { %9789 = vmatmul.mubr.bf16.vlgmr.msra.gmra.mxu1 %v9261_v3 }
 0xc29   :  { %v9708_v62 = vpop.f32.mrf.mxu1 }
 0xc2a   :  { %v9709_v4 = vadd.f32 %v9708_v62, %v9267_v15 }
 0xc2b   :  { %v9710_v49 = vpop.f32.mrf.mxu1  ;;  %v9749_v5 = vpop.f32.mrf.mxu0 }
 0xc2c   :  { %v9711_v46 = vadd.f32 %v9710_v49, %v9271_v43  ;;  %v9750_v63 = vadd.f32 %v9749_v5, %v9709_v4 }
 0xc2d   :  { %v9712_v19 = vpop.f32.mrf.mxu1  ;;  %v9751_v51 = vpop.f32.mrf.mxu0 }
 0xc2e   :  { %v9752_v54 = vadd.f32 %v9751_v51, %v9711_v46 }
 0xc2f   :  { %v9713_v38 = vpop.f32.mrf.mxu1  ;;  %v9753_v21 = vpop.f32.mrf.mxu0 }
 0xc31   :  { %v9754_v7 = vpop.f32.mrf.mxu0 }
 0xc49   :  { %v9790_v1 = vpop.f32.mrf.mxu1 }
 0xc4a   :  { %v9791_v47 = vadd.f32 %v9790_v1, %v9750_v63 }
 0xc4b   :  { %v9792_v59 = vpop.f32.mrf.mxu1 }
 0xc4c   :  { %v9793_v55 = vadd.f32 %v9792_v59, %v9752_v54 }
 0xc4d   :  { %v9794_v56 = vpop.f32.mrf.mxu1 }
 0xc4e   :  { %v9799_v10 = vcombine.low %v9791_v47, %v9793_v55 }
 0xc4f   :  { %v9795_v57 = vpop.f32.mrf.mxu1 }
 0xc50   :  { %11114 = vst.sshfl [vmem:[%s14026_s20] sm:$0x33 pattern:$0x76325410] %v9799_v10 }
 0xc51   :  { %9813 = vsyncpa [#allocation12], 1 }
 0xc52   :  { %9814 = vsyncpa [#allocation14], 1 }
 0xc53   :  { %9815 = vsyncpa [#allocation17], 1 }
 0xc54   :  { %9816 = vsyncpa [#allocation20], 1 }
 0xc55   :  { %9817 = vsyncpa [#allocation23], 1 }
 0xc56   :  { %9818 = vsyncpa [#allocation26], 1 }
 0xc57   :  { %9819 = vsyncmov [#allocation10] }
 0xc5a   :  { %s9820_s23 = vpop.sfrf %9819 }
 0xc5b   :  { %p11115_p11 = scmp.ne.s32.totalorder %s9820_s23, 0 }
 0xc5d   :  { %9824 = shalt.err (%p11115_p11)  }
 0xc5e   :  { %9826 = vsyncmov [#allocation10 + $0x1] }
 0xc61   :  { %s9827_s24 = vpop.sfrf %9826 }
 0xc62   :  { %p11116_p12 = scmp.ne.s32.totalorder %s9827_s24, 0 }
 0xc64   :  { %9831 = shalt.err (%p11116_p12)  }
 0xc65   :  { %9833 = vsyncmov [#allocation10 + $0x2] }
 0xc68   :  { %s9834_s2 = vpop.sfrf %9833 }
 0xc69   :  { %p11117_p13 = scmp.ne.s32.totalorder %s9834_s2, 0 }
 0xc6b   :  { %9838 = shalt.err (%p11117_p13)  }
 0xc6c   :  { %9840 = vsyncmov [#allocation10 + $0x3] }
 0xc6f   :  { %s9841_s20 = vpop.sfrf %9840 }
 0xc70   :  { %p11118_p0 = scmp.ne.s32.totalorder %s9841_s20, 0 }
 0xc72   :  { %9845 = shalt.err (%p11118_p0)  }
 0xc73   :  { %9847 = vsyncmov [#allocation10 + $0x4] }
 0xc76   :  { %s9848_s25 = vpop.sfrf %9847 }
 0xc77   :  { %p11119_p1 = scmp.ne.s32.totalorder %s9848_s25, 0 }
 0xc79   :  { %9852 = shalt.err (%p11119_p1)  }
 0xc7a   :  { %9854 = vsyncmov [#allocation10 + $0x5] }
 0xc7d   :  { %s9855_s26 = vpop.sfrf %9854 }
 0xc7e   :  { %p11120_p2 = scmp.ne.s32.totalorder %s9855_s26, 0 }
 0xc80   :  { %9859 = shalt.err (%p11120_p2)  }
 0xc81   :  { %9861 = vsyncmov [#allocation10 + $0x6] }
 0xc84   :  { %s9862_s15 = vpop.sfrf %9861 }
 0xc85   :  { %p11121_p3 = scmp.ne.s32.totalorder %s9862_s15, 0 }
 0xc87   :  { %9866 = shalt.err (%p11121_p3)  }
 0xc88   :  { %9868 = vsyncmov [#allocation10 + $0x7] }
 0xc8b   :  { %s9869_s18 = vpop.sfrf %9868 }
 0xc8c   :  { %p11122_p4 = scmp.ne.s32.totalorder %s9869_s18, 0 }
 0xc8e   :  { %9873 = shalt.err (%p11122_p4)  }

</bundles_post_ra>
